<compile_context>
chip_gen: v7x
topology: tpu7x:2x2x1
jax: 0.10.0
libtpu: 0.0.40
codegen_flags: <defaults>
</compile_context>

<pallas_src>
import functools

import jax
import jax.numpy as jnp
from jax import lax
from jax.experimental import pallas as pl
from jax.experimental.pallas import tpu as pltpu


# --------------------------------------------------------------------------
# Fused conv3x3(pad=1) + folded-BN bias + ReLU + optional maxpool2x2 kernel.
# One (image, row-strip) per grid step.  All refs are (pixels, channels) 2-D
# views of flattened NHWC data.
# --------------------------------------------------------------------------
def _conv_bn_relu_pool_kernel(top_ref, mid_ref, bot_ref, w_ref, b_ref, o_ref,
                              *scratch, TH, W, pool, merge_ky):
    # top_ref: (1, W, Cin)        halo row above the strip (masked at s==0)
    # mid_ref: (1, TH*W, Cin)     the strip's TH rows, row-major
    # bot_ref: (1, W, Cin)        halo row below the strip (masked on last)
    # w_ref:   (3, 3*Cin, Cout)   or (1, 9*Cin, Cout) when merge_ky (layer 1)
    # b_ref:   (1, Cout)          folded BN bias (f32)
    # o_ref:   (1, TH*W, Cout)    or (1, (TH//2)*(W//2), Cout) when pool
    # scratch: [(TH//2)*W, Cout]  f32 VMEM buffer (only when pool)
    s = pl.program_id(1)
    ns = pl.num_programs(1)
    cin = mid_ref.shape[-1]
    cout = w_ref.shape[-1]
    dtype = mid_ref.dtype
    THW = TH * W
    CORE = (TH + 2) * W

    # ---- assemble strip + 1-row halo in registers (no jnp.pad / HBM copy) --
    # One zero guard row on each side keeps the +-1 column shifts in range;
    # the wrongly-wrapped elements are zero-masked below anyway.
    top = top_ref[0] * (s > 0).astype(dtype)           # image-top pad at s==0
    bot = bot_ref[0] * (s < ns - 1).astype(dtype)      # image-bottom pad
    zrow = jnp.zeros((W, cin), dtype)
    body = jnp.concatenate([zrow, top, mid_ref[0], bot, zrow], axis=0)

    # ---- hoisted +-1 column shifts + masks (built once per step) ----------
    # The unaligned (off-by-one) row slices are done on a 32-bit copy so that
    # only tile-aligned slices/concats touch the packed bf16 data.
    core0 = body[W:W + CORE, :]                        # aligned slice
    body32 = body.astype(jnp.float32)
    col = lax.broadcasted_iota(jnp.int32, (CORE, 1), 0) % W
    coreL = jnp.where(col == 0, 0.0,
                      body32[W - 1:W - 1 + CORE, :]).astype(dtype)
    coreR = jnp.where(col == W - 1, 0.0,
                      body32[W + 1:W + 1 + CORE, :]).astype(dtype)
    # wide[q] = [x(row,col-1) | x(row,col) | x(row,col+1)]  -> K merge over kx
    wide = jnp.concatenate([coreL, core0, coreR], axis=-1)   # (CORE, 3*Cin)

    # ---- MXU matmuls: 3 dots of K=3*Cin, or 1 dot of K=9*Cin (im2col) ------
    if merge_ky:
        lhs = jnp.concatenate([wide[0:THW, :],
                               wide[W:W + THW, :],
                               wide[2 * W:2 * W + THW, :]], axis=-1)
        acc = jnp.dot(lhs, w_ref[0], preferred_element_type=jnp.float32)
    else:
        acc = jnp.dot(wide[0:THW, :], w_ref[0],
                      preferred_element_type=jnp.float32)
        acc = acc + jnp.dot(wide[W:W + THW, :], w_ref[1],
                            preferred_element_type=jnp.float32)
        acc = acc + jnp.dot(wide[2 * W:2 * W + THW, :], w_ref[2],
                            preferred_element_type=jnp.float32)

    y = jnp.maximum(acc + b_ref[...], 0.0)             # f32 bias (BN folded), ReLU

    if pool:
        # Fused 2x2 / stride-2 maxpool epilogue: un-pooled activation never
        # touches HBM; output HBM write shrinks 4x.
        tho, wo = TH // 2, W // 2
        z = y.reshape(tho, 2 * W, cout)                # rows 2t / 2t+1 are W apart
        m = jnp.maximum(z[:, :W, :], z[:, W:, :])      # vertical max (tho, W, cout)
        mbuf = scratch[0]
        mbuf[...] = m.reshape(tho * W, cout)
        even = mbuf[pl.ds(0, tho * wo, 2), :]          # even output columns
        odd = mbuf[pl.ds(1, tho * wo, 2), :]           # odd output columns
        o_ref[0] = jnp.maximum(even, odd).astype(o_ref.dtype)
    else:
        o_ref[0] = y.astype(o_ref.dtype)


def _pick_strip_rows(H, W, *, pool, max_rows, out_quant):
    """Largest divisor of H that keeps blocks sublane-aligned and <= max_rows."""
    max_rows = max(int(max_rows), 2 if pool else 1)
    cands = []
    for d in range(1, H + 1):
        if H % d:
            continue
        if pool and d % 2:
            continue
        blk = (d // 2) * (W // 2) if pool else d * W
        if blk % out_quant and d != H:   # d == H -> block equals full array, exempt
            continue
        cands.append(d)
    small = [d for d in cands if d <= max_rows]
    return max(small) if small else min(cands)


def conv3x3_bn_relu_pool(x_nhwc, w_k, bias, *, pool, merge_ky,
                         max_strip_rows=None):
    """Fused 3x3 'same' conv + (folded-BN) bias + ReLU + optional 2x2 maxpool.

    w_k is pre-reshaped: (3, 3*Cin, Cout), or (1, 9*Cin, Cout) when merge_ky.
    """
    N, H, W, Cin = x_nhwc.shape
    KY, K, Cout = w_k.shape
    in_b = x_nhwc.dtype.itemsize
    quant = 16 if in_b == 2 else 8            # bf16 packs 2 rows / sublane word
    assert W % quant == 0, (W, quant)         # TODO(synk): general W support
    assert K == (9 if merge_ky else 3) * Cin
    assert KY == (1 if merge_ky else 3)
    if pool:
        assert H % 2 == 0 and W % 2 == 0

    if max_strip_rows is None:
        # target roughly <= 2 MiB of input strip per pipeline buffer (v7x-safe)
        max_strip_rows = max(8, (2 * 1024 * 1024) // max(1, W * Cin * in_b))
    TH = _pick_strip_rows(H, W, pool=pool, max_rows=max_strip_rows,
                          out_quant=quant)
    n_strips = H // TH

    out_h, out_w = (H // 2, W // 2) if pool else (H, W)
    blk_rows = (TH // 2) * out_w if pool else TH * W

    x2 = x_nhwc.reshape(N, H * W, Cin)                 # free metadata reshape
    b2 = bias.reshape(1, Cout).astype(jnp.float32)

    kernel = functools.partial(_conv_bn_relu_pool_kernel, TH=TH, W=W,
                               pool=pool, merge_ky=merge_ky)
    scratch = [pltpu.VMEM(((TH // 2) * W, Cout), jnp.float32)] if pool else []

    # The same input array is bound three times: strip + one halo row each side.
    top_idx = lambda n, s: (n, jnp.maximum(s * TH - 1, 0), 0)
    mid_idx = lambda n, s: (n, s, 0)
    bot_idx = lambda n, s: (n, jnp.minimum((s + 1) * TH, H - 1), 0)

    # Honest VMEM accounting: pipelined blocks (double-buffered) + the large
    # in-kernel temporaries (body/body32/wide/acc/...).
    CORE = (TH + 2) * W
    pipe = 2 * (CORE * Cin * in_b                       # top + mid + bot blocks
                + KY * K * Cout * w_k.dtype.itemsize + Cout * 4
                + blk_rows * Cout * in_b)
    tmp = ((TH + 4) * W * Cin * (in_b + 4)              # body + body32
           + CORE * 3 * Cin * in_b * 2                  # coreL/0/R + wide
           + (TH * W * 9 * Cin * in_b if merge_ky else 0)
           + TH * W * Cout * 8)                         # acc + y (f32)
    if pool:
        tmp += (TH // 2) * W * Cout * 8                 # vertical max + scratch
    vmem_limit = int(min(max(2 * (pipe + tmp), 32 * 1024 * 1024),
                         48 * 1024 * 1024))             # v7x-safe ceiling

    out2 = pl.pallas_call(
        kernel,
        out_shape=jax.ShapeDtypeStruct((N, out_h * out_w, Cout), x_nhwc.dtype),
        grid_spec=pltpu.PrefetchScalarGridSpec(
            num_scalar_prefetch=0,
            grid=(N, n_strips),
            in_specs=[
                pl.BlockSpec((1, W, Cin), top_idx),
                pl.BlockSpec((1, TH * W, Cin), mid_idx),
                pl.BlockSpec((1, W, Cin), bot_idx),
                pl.BlockSpec((KY, K, Cout), lambda n, s: (0, 0, 0)),
                pl.BlockSpec((1, Cout), lambda n, s: (0, 0)),
            ],
            out_specs=pl.BlockSpec((1, blk_rows, Cout), lambda n, s: (n, s, 0)),
            scratch_shapes=scratch,
        ),
        compiler_params=pltpu.CompilerParams(
            dimension_semantics=("parallel", "parallel"),
            vmem_limit_bytes=vmem_limit,
        ),
    )(x2, x2, x2, w_k, b2)
    return out2.reshape(N, out_h, out_w, Cout)


# --------------------------------------------------------------------------
# Parameter init (deterministic, synthetic), one-time prep, and forward pass.
# --------------------------------------------------------------------------
def init_params(key):
    eps = 1e-5
    layer_channels = [(3, 64), (64, 64), (64, 128), (128, 128)]
    params = []
    for i, (cin, cout) in enumerate(layer_channels):
        kw, kg, kb = jax.random.split(jax.random.fold_in(key, i), 3)
        fan_in = cin * 9
        w = jax.random.normal(kw, (3, 3, cin, cout), jnp.float32) * (2.0 / fan_in) ** 0.5
        gamma = 1.0 + 0.1 * jax.random.normal(kg, (cout,), jnp.float32)
        beta = 0.1 * jax.random.normal(kb, (cout,), jnp.float32)
        running_mean = jnp.zeros((cout,), jnp.float32)
        running_var = jnp.ones((cout,), jnp.float32)
        scale = gamma / jnp.sqrt(running_var + eps)
        bias = beta - running_mean * scale
        params.append((w, scale, bias))
    return params


def prepare_params(params, act_dtype=jnp.bfloat16):
    """Fold BN scale into weights ONCE, reshape for K-merged matmuls, cast."""
    prepared = []
    for (w, scale, bias) in params:
        cin, cout = w.shape[2], w.shape[3]
        w_f = w * scale.reshape(1, 1, 1, -1)            # eval-mode BN fold (f32)
        if cin <= 8:                                     # layer-1 im2col path
            w_k = w_f.reshape(9 * cin, cout)[None]       # (1, 9*Cin, Cout)
        else:
            w_k = w_f.reshape(3, 3 * cin, cout)          # (3, 3*Cin, Cout)
        prepared.append((w_k.astype(act_dtype),
                         bias.reshape(1, cout).astype(jnp.float32)))
    return prepared


def feature_extractor(x_nchw, prepared, *, max_strip_rows=None):
    """Matches FeatureExtractor.forward (eval-mode BN).  NCHW in, NCHW out."""
    orig_dtype = x_nchw.dtype
    x = jnp.transpose(x_nchw, (0, 2, 3, 1))             # NCHW -> NHWC
    pools = (False, True, False, True)
    for (w_k, bias), pool in zip(prepared, pools):
        merge_ky = (w_k.shape[0] == 1)
        act_dtype = w_k.dtype
        quant = 16 if act_dtype.itemsize == 2 else 8
        if x.shape[2] % quant != 0:
            # bf16 sublane packing needs W % 16; fall back to f32 this layer.
            act_dtype = jnp.dtype(jnp.float32)
            w_k = w_k.astype(jnp.float32)
        x = conv3x3_bn_relu_pool(x.astype(act_dtype), w_k, bias, pool=pool,
                                 merge_ky=merge_ky,
                                 max_strip_rows=max_strip_rows)
    return jnp.transpose(x, (0, 3, 1, 2)).astype(orig_dtype)   # NHWC -> NCHW


# Pure-JAX reference (XLA) with matched bf16 casts for a correctness check.
def _reference_forward(x_nchw, params, act_dtype=jnp.bfloat16):
    x = jnp.transpose(x_nchw, (0, 2, 3, 1))
    pools = (False, True, False, True)
    for (w, scale, bias), pool in zip(params, pools):
        w_f = (w * scale.reshape(1, 1, 1, -1)).astype(act_dtype)
        y = lax.conv_general_dilated(
            x.astype(act_dtype), w_f, window_strides=(1, 1), padding="SAME",
            dimension_numbers=("NHWC", "HWIO", "NHWC"),
            preferred_element_type=jnp.float32)
        y = jnp.maximum(y + bias.reshape(1, 1, 1, -1), 0.0)
        x = y.astype(act_dtype)
        if pool:
            n, h, ww, c = x.shape
            x = jnp.max(x.reshape(n, h // 2, 2, ww // 2, 2, c), axis=(2, 4))
    return jnp.transpose(x, (0, 3, 1, 2)).astype(x_nchw.dtype)


if __name__ == "__main__":
    key = jax.random.PRNGKey(0)
    params = init_params(key)
    prepared = prepare_params(params, act_dtype=jnp.bfloat16)

    # 32x32 spatial keeps W a multiple of 16 after the first pool so every
    # layer stays on the bf16 fast path; still a small demo shape.
    x = jax.random.normal(jax.random.fold_in(key, 100), (2, 3, 32, 32),
                          dtype=jnp.float32)

    # max_strip_rows=8 exercises the multi-strip halo path at these tiny demo
    # shapes; at production resolutions leave it None (auto, ~2 MiB strips).
    fwd = jax.jit(functools.partial(feature_extractor, max_strip_rows=8))
    out = jax.block_until_ready(fwd(x, prepared))

    assert out.shape == (2, 128, 8, 8), out.shape
    assert out.dtype == jnp.float32
    assert bool(jnp.all(jnp.isfinite(out)))

    ref = _reference_forward(x, params, act_dtype=jnp.bfloat16)
    err = float(jnp.max(jnp.abs(out - ref)))
    tol = 2e-2 * (1.0 + float(jnp.max(jnp.abs(ref))))
    assert err <= tol, (err, tol)

    print("KERNEL_OK")
</pallas_src>

<mosaic_0001>
module attributes {stable_mosaic.version = 11 : i64} {
  func.func @_conv_bn_relu_pool_kernel(%arg0: i32, %arg1: i32, %arg2: memref<1x32x3xbf16, #tpu.memory_space<vmem>>, %arg3: memref<1x256x3xbf16, #tpu.memory_space<vmem>>, %arg4: memref<1x32x3xbf16, #tpu.memory_space<vmem>>, %arg5: memref<1x27x64xbf16, #tpu.memory_space<vmem>>, %arg6: memref<1x64xf32, #tpu.memory_space<vmem>>, %arg7: memref<1x256x64xbf16, #tpu.memory_space<vmem>>) attributes {dimension_semantics = [#tpu.dimension_semantics<parallel>, #tpu.dimension_semantics<parallel>], iteration_bounds = array<i64: 2, 4>, scalar_prefetch = 0 : i64, scratch_operands = 0 : i64, tpu.core_type = #tpu.core_type<tc>, window_params = [{transform_indices = @transform_0, window_bounds = array<i64: 1, 32, 3>}, {transform_indices = @transform_1, window_bounds = array<i64: 1, 256, 3>}, {transform_indices = @transform_2, window_bounds = array<i64: 1, 32, 3>}, {pipeline_mode = #tpu.pipeline_mode<synchronous>, transform_indices = @transform_3, window_bounds = array<i64: 1, 27, 64>}, {pipeline_mode = #tpu.pipeline_mode<synchronous>, transform_indices = @transform_4, window_bounds = array<i64: 1, 64>}, {transform_indices = @transform_5, window_bounds = array<i64: 1, 256, 64>}]} {
    %c0 = arith.constant 0 : index
    %c0_0 = arith.constant 0 : index
    %c0_1 = arith.constant 0 : index
    %0 = vector.load %arg2[%c0, %c0_0, %c0_1] : memref<1x32x3xbf16, #tpu.memory_space<vmem>>, vector<1x32x3xbf16>
    %1 = vector.shape_cast %0 : vector<1x32x3xbf16> to vector<32x3xbf16>
    %c0_i32 = arith.constant 0 : i32
    %2 = arith.cmpi sgt, %arg1, %c0_i32 : i32
    %3 = arith.extui %2 : i1 to i32
    %4 = arith.sitofp %3 : i32 to f32
    %5 = arith.truncf %4 : f32 to bf16
    %6 = vector.broadcast %5 : bf16 to vector<32x3xbf16>
    %7 = arith.mulf %1, %6 : vector<32x3xbf16>
    %c0_2 = arith.constant 0 : index
    %c0_3 = arith.constant 0 : index
    %c0_4 = arith.constant 0 : index
    %8 = vector.load %arg4[%c0_2, %c0_3, %c0_4] : memref<1x32x3xbf16, #tpu.memory_space<vmem>>, vector<1x32x3xbf16>
    %9 = vector.shape_cast %8 : vector<1x32x3xbf16> to vector<32x3xbf16>
    %c3_i32 = arith.constant 3 : i32
    %10 = arith.cmpi slt, %arg1, %c3_i32 : i32
    %11 = arith.extui %10 : i1 to i32
    %12 = arith.sitofp %11 : i32 to f32
    %13 = arith.truncf %12 : f32 to bf16
    %14 = vector.broadcast %13 : bf16 to vector<32x3xbf16>
    %15 = arith.mulf %9, %14 : vector<32x3xbf16>
    %cst = arith.constant 0.000000e+00 : bf16
    %16 = vector.broadcast %cst : bf16 to vector<32x3xbf16>
    %c0_5 = arith.constant 0 : index
    %c0_6 = arith.constant 0 : index
    %c0_7 = arith.constant 0 : index
    %17 = vector.load %arg3[%c0_5, %c0_6, %c0_7] : memref<1x256x3xbf16, #tpu.memory_space<vmem>>, vector<1x256x3xbf16>
    %18 = vector.shape_cast %17 : vector<1x256x3xbf16> to vector<256x3xbf16>
    %19 = tpu.concatenate %16, %7, %18, %15, %16 in 0 : vector<32x3xbf16>, vector<32x3xbf16>, vector<256x3xbf16>, vector<32x3xbf16>, vector<32x3xbf16> -> vector<384x3xbf16>
    %20 = vector.extract_strided_slice %19 {offsets = [32, 0], sizes = [320, 3], strides = [1, 1]} : vector<384x3xbf16> to vector<320x3xbf16>
    %21 = arith.extf %19 : vector<384x3xbf16> to vector<384x3xf32>
    %22 = tpu.iota {dimensions = array<i32: 0>} : vector<320x1xi32>
    %c32_i32 = arith.constant 32 : i32
    %c0_i32_8 = arith.constant 0 : i32
    %23 = arith.cmpi eq, %c32_i32, %c0_i32_8 : i32
    %c1_i32 = arith.constant 1 : i32
    %24 = arith.select %23, %c1_i32, %c32_i32 : i32
    %25 = vector.broadcast %24 : i32 to vector<320x1xi32>
    %26 = arith.remsi %22, %25 : vector<320x1xi32>
    %c0_i32_9 = arith.constant 0 : i32
    %27 = vector.broadcast %c0_i32_9 : i32 to vector<320x1xi32>
    %28 = arith.cmpi ne, %26, %27 : vector<320x1xi32>
    %c0_i32_10 = arith.constant 0 : i32
    %29 = vector.broadcast %c0_i32_10 : i32 to vector<320x1xi32>
    %30 = arith.cmpi slt, %26, %29 : vector<320x1xi32>
    %c0_i32_11 = arith.constant 0 : i32
    %31 = arith.cmpi slt, %24, %c0_i32_11 : i32
    %32 = vector.broadcast %31 : i1 to vector<320x1xi1>
    %33 = vector.broadcast %32 : vector<320x1xi1> to vector<320x1xi1>
    %34 = arith.xori %30, %33 : vector<320x1xi1>
    %35 = arith.andi %34, %28 : vector<320x1xi1>
    %36 = vector.broadcast %24 : i32 to vector<320x1xi32>
    %37 = arith.addi %26, %36 : vector<320x1xi32>
    %38 = arith.select %35, %37, %26 : vector<320x1xi1>, vector<320x1xi32>
    %c0_i32_12 = arith.constant 0 : i32
    %39 = vector.broadcast %c0_i32_12 : i32 to vector<320x1xi32>
    %40 = arith.cmpi eq, %38, %39 : vector<320x1xi32>
    %41 = vector.extract_strided_slice %21 {offsets = [31, 0], sizes = [320, 3], strides = [1, 1]} : vector<384x3xf32> to vector<320x3xf32>
    %cst_13 = arith.constant 0.000000e+00 : f32
    %42 = vector.shape_cast %40 : vector<320x1xi1> to vector<320x1xi1>
    %43 = vector.broadcast %42 : vector<320x1xi1> to vector<320x3xi1>
    %44 = vector.broadcast %cst_13 : f32 to vector<320x3xf32>
    %45 = arith.select %43, %44, %41 : vector<320x3xi1>, vector<320x3xf32>
    %46 = arith.truncf %45 : vector<320x3xf32> to vector<320x3xbf16>
    %c31_i32 = arith.constant 31 : i32
    %47 = vector.broadcast %c31_i32 : i32 to vector<320x1xi32>
    %48 = arith.cmpi eq, %38, %47 : vector<320x1xi32>
    %49 = vector.extract_strided_slice %21 {offsets = [33, 0], sizes = [320, 3], strides = [1, 1]} : vector<384x3xf32> to vector<320x3xf32>
    %cst_14 = arith.constant 0.000000e+00 : f32
    %50 = vector.shape_cast %48 : vector<320x1xi1> to vector<320x1xi1>
    %51 = vector.broadcast %50 : vector<320x1xi1> to vector<320x3xi1>
    %52 = vector.broadcast %cst_14 : f32 to vector<320x3xf32>
    %53 = arith.select %51, %52, %49 : vector<320x3xi1>, vector<320x3xf32>
    %54 = arith.truncf %53 : vector<320x3xf32> to vector<320x3xbf16>
    %55 = tpu.concatenate %46, %20, %54 in 1 : vector<320x3xbf16>, vector<320x3xbf16>, vector<320x3xbf16> -> vector<320x9xbf16>
    %56 = vector.extract_strided_slice %55 {offsets = [0, 0], sizes = [256, 9], strides = [1, 1]} : vector<320x9xbf16> to vector<256x9xbf16>
    %57 = vector.extract_strided_slice %55 {offsets = [32, 0], sizes = [256, 9], strides = [1, 1]} : vector<320x9xbf16> to vector<256x9xbf16>
    %58 = vector.extract_strided_slice %55 {offsets = [64, 0], sizes = [256, 9], strides = [1, 1]} : vector<320x9xbf16> to vector<256x9xbf16>
    %59 = tpu.concatenate %56, %57, %58 in 1 : vector<256x9xbf16>, vector<256x9xbf16>, vector<256x9xbf16> -> vector<256x27xbf16>
    %c0_15 = arith.constant 0 : index
    %c0_16 = arith.constant 0 : index
    %c0_17 = arith.constant 0 : index
    %60 = vector.load %arg5[%c0_15, %c0_16, %c0_17] : memref<1x27x64xbf16, #tpu.memory_space<vmem>>, vector<1x27x64xbf16>
    %61 = vector.shape_cast %60 : vector<1x27x64xbf16> to vector<27x64xbf16>
    %cst_18 = arith.constant dense<0.000000e+00> : vector<256x64xf32>
    %62 = tpu.matmul %59, %61, %cst_18 {dimension_numbers = #tpu.dot_dimension_numbers<[1], [0], [0], [1], [0, 0, 1, 1], [], []>} : vector<256x27xbf16>, vector<27x64xbf16>, vector<256x64xf32> -> vector<256x64xf32>
    %c0_19 = arith.constant 0 : index
    %c0_20 = arith.constant 0 : index
    %63 = vector.load %arg6[%c0_19, %c0_20] : memref<1x64xf32, #tpu.memory_space<vmem>>, vector<1x64xf32>
    %64 = vector.broadcast %63 : vector<1x64xf32> to vector<256x64xf32>
    %65 = arith.addf %62, %64 : vector<256x64xf32>
    %cst_21 = arith.constant 0.000000e+00 : f32
    %66 = vector.broadcast %cst_21 : f32 to vector<256x64xf32>
    %67 = arith.maximumf %65, %66 : vector<256x64xf32>
    %68 = arith.truncf %67 : vector<256x64xf32> to vector<256x64xbf16>
    %c0_22 = arith.constant 0 : index
    %c0_23 = arith.constant 0 : index
    %c0_24 = arith.constant 0 : index
    %69 = vector.load %arg7[%c0_22, %c0_23, %c0_24] : memref<1x256x64xbf16, #tpu.memory_space<vmem>>, vector<1x256x64xbf16>
    %70 = vector.shape_cast %69 : vector<1x256x64xbf16> to vector<256x64xbf16>
    %71 = vector.shape_cast %68 : vector<256x64xbf16> to vector<1x256x64xbf16>
    tpu.vector_store %arg7[%c0_22, %c0_23, %c0_24], %71 {strides = array<i32>} : memref<1x256x64xbf16, #tpu.memory_space<vmem>>, vector<1x256x64xbf16>,
    return
  }
  func.func @transform_0(%arg0: i32, %arg1: i32) -> (i32, i32, i32) {
    %c8_i32 = arith.constant 8 : i32
    %0 = arith.muli %arg1, %c8_i32 : i32
    %c1_i32 = arith.constant 1 : i32
    %1 = arith.subi %0, %c1_i32 : i32
    %c0_i32 = arith.constant 0 : i32
    %2 = arith.maxsi %1, %c0_i32 : i32
    %c0_i32_0 = arith.constant 0 : i32
    %c0_i32_1 = arith.constant 0 : i32
    return %arg0, %2, %c0_i32_0 : i32, i32, i32
  }
  func.func @transform_1(%arg0: i32, %arg1: i32) -> (i32, i32, i32) {
    %c0_i32 = arith.constant 0 : i32
    %c0_i32_0 = arith.constant 0 : i32
    return %arg0, %arg1, %c0_i32 : i32, i32, i32
  }
  func.func @transform_2(%arg0: i32, %arg1: i32) -> (i32, i32, i32) {
    %c1_i32 = arith.constant 1 : i32
    %0 = arith.addi %arg1, %c1_i32 : i32
    %c8_i32 = arith.constant 8 : i32
    %1 = arith.muli %0, %c8_i32 : i32
    %c31_i32 = arith.constant 31 : i32
    %2 = arith.minsi %1, %c31_i32 : i32
    %c0_i32 = arith.constant 0 : i32
    %c0_i32_0 = arith.constant 0 : i32
    return %arg0, %2, %c0_i32 : i32, i32, i32
  }
  func.func @transform_3(%arg0: i32, %arg1: i32) -> (i32, i32, i32) {
    %c0_i32 = arith.constant 0 : i32
    %c0_i32_0 = arith.constant 0 : i32
    %c0_i32_1 = arith.constant 0 : i32
    %c0_i32_2 = arith.constant 0 : i32
    return %c0_i32, %c0_i32_0, %c0_i32_1 : i32, i32, i32
  }
  func.func @transform_4(%arg0: i32, %arg1: i32) -> (i32, i32) {
    %c0_i32 = arith.constant 0 : i32
    %c0_i32_0 = arith.constant 0 : i32
    %c0_i32_1 = arith.constant 0 : i32
    return %c0_i32, %c0_i32_0 : i32, i32
  }
  func.func @transform_5(%arg0: i32, %arg1: i32) -> (i32, i32, i32) {
    %c0_i32 = arith.constant 0 : i32
    %c0_i32_0 = arith.constant 0 : i32
    return %arg0, %arg1, %c0_i32 : i32, i32, i32
  }
}

module attributes {stable_mosaic.version = 11 : i64} {
  func.func @_conv_bn_relu_pool_kernel(%arg0: i32, %arg1: i32, %arg2: memref<1x32x64xbf16, #tpu.memory_space<vmem>>, %arg3: memref<1x256x64xbf16, #tpu.memory_space<vmem>>, %arg4: memref<1x32x64xbf16, #tpu.memory_space<vmem>>, %arg5: memref<3x192x64xbf16, #tpu.memory_space<vmem>>, %arg6: memref<1x64xf32, #tpu.memory_space<vmem>>, %arg7: memref<1x64x64xbf16, #tpu.memory_space<vmem>>, %arg8: memref<128x64xf32, #tpu.memory_space<vmem>>) attributes {dimension_semantics = [#tpu.dimension_semantics<parallel>, #tpu.dimension_semantics<parallel>], iteration_bounds = array<i64: 2, 4>, scalar_prefetch = 0 : i64, scratch_operands = 1 : i64, tpu.core_type = #tpu.core_type<tc>, window_params = [{transform_indices = @transform_0, window_bounds = array<i64: 1, 32, 64>}, {transform_indices = @transform_1, window_bounds = array<i64: 1, 256, 64>}, {transform_indices = @transform_2, window_bounds = array<i64: 1, 32, 64>}, {pipeline_mode = #tpu.pipeline_mode<synchronous>, transform_indices = @transform_3, window_bounds = array<i64: 3, 192, 64>}, {pipeline_mode = #tpu.pipeline_mode<synchronous>, transform_indices = @transform_4, window_bounds = array<i64: 1, 64>}, {transform_indices = @transform_5, window_bounds = array<i64: 1, 64, 64>}]} {
    %c0 = arith.constant 0 : index
    %c0_0 = arith.constant 0 : index
    %c0_1 = arith.constant 0 : index
    %0 = vector.load %arg2[%c0, %c0_0, %c0_1] : memref<1x32x64xbf16, #tpu.memory_space<vmem>>, vector<1x32x64xbf16>
    %1 = vector.shape_cast %0 : vector<1x32x64xbf16> to vector<32x64xbf16>
    %c0_i32 = arith.constant 0 : i32
    %2 = arith.cmpi sgt, %arg1, %c0_i32 : i32
    %3 = arith.extui %2 : i1 to i32
    %4 = arith.sitofp %3 : i32 to f32
    %5 = arith.truncf %4 : f32 to bf16
    %6 = vector.broadcast %5 : bf16 to vector<32x64xbf16>
    %7 = arith.mulf %1, %6 : vector<32x64xbf16>
    %c0_2 = arith.constant 0 : index
    %c0_3 = arith.constant 0 : index
    %c0_4 = arith.constant 0 : index
    %8 = vector.load %arg4[%c0_2, %c0_3, %c0_4] : memref<1x32x64xbf16, #tpu.memory_space<vmem>>, vector<1x32x64xbf16>
    %9 = vector.shape_cast %8 : vector<1x32x64xbf16> to vector<32x64xbf16>
    %c3_i32 = arith.constant 3 : i32
    %10 = arith.cmpi slt, %arg1, %c3_i32 : i32
    %11 = arith.extui %10 : i1 to i32
    %12 = arith.sitofp %11 : i32 to f32
    %13 = arith.truncf %12 : f32 to bf16
    %14 = vector.broadcast %13 : bf16 to vector<32x64xbf16>
    %15 = arith.mulf %9, %14 : vector<32x64xbf16>
    %cst = arith.constant 0.000000e+00 : bf16
    %16 = vector.broadcast %cst : bf16 to vector<32x64xbf16>
    %c0_5 = arith.constant 0 : index
    %c0_6 = arith.constant 0 : index
    %c0_7 = arith.constant 0 : index
    %17 = vector.load %arg3[%c0_5, %c0_6, %c0_7] : memref<1x256x64xbf16, #tpu.memory_space<vmem>>, vector<1x256x64xbf16>
    %18 = vector.shape_cast %17 : vector<1x256x64xbf16> to vector<256x64xbf16>
    %19 = tpu.concatenate %16, %7, %18, %15, %16 in 0 : vector<32x64xbf16>, vector<32x64xbf16>, vector<256x64xbf16>, vector<32x64xbf16>, vector<32x64xbf16> -> vector<384x64xbf16>
    %20 = vector.extract_strided_slice %19 {offsets = [32, 0], sizes = [320, 64], strides = [1, 1]} : vector<384x64xbf16> to vector<320x64xbf16>
    %21 = arith.extf %19 : vector<384x64xbf16> to vector<384x64xf32>
    %22 = tpu.iota {dimensions = array<i32: 0>} : vector<320x1xi32>
    %c32_i32 = arith.constant 32 : i32
    %c0_i32_8 = arith.constant 0 : i32
    %23 = arith.cmpi eq, %c32_i32, %c0_i32_8 : i32
    %c1_i32 = arith.constant 1 : i32
    %24 = arith.select %23, %c1_i32, %c32_i32 : i32
    %25 = vector.broadcast %24 : i32 to vector<320x1xi32>
    %26 = arith.remsi %22, %25 : vector<320x1xi32>
    %c0_i32_9 = arith.constant 0 : i32
    %27 = vector.broadcast %c0_i32_9 : i32 to vector<320x1xi32>
    %28 = arith.cmpi ne, %26, %27 : vector<320x1xi32>
    %c0_i32_10 = arith.constant 0 : i32
    %29 = vector.broadcast %c0_i32_10 : i32 to vector<320x1xi32>
    %30 = arith.cmpi slt, %26, %29 : vector<320x1xi32>
    %c0_i32_11 = arith.constant 0 : i32
    %31 = arith.cmpi slt, %24, %c0_i32_11 : i32
    %32 = vector.broadcast %31 : i1 to vector<320x1xi1>
    %33 = vector.broadcast %32 : vector<320x1xi1> to vector<320x1xi1>
    %34 = arith.xori %30, %33 : vector<320x1xi1>
    %35 = arith.andi %34, %28 : vector<320x1xi1>
    %36 = vector.broadcast %24 : i32 to vector<320x1xi32>
    %37 = arith.addi %26, %36 : vector<320x1xi32>
    %38 = arith.select %35, %37, %26 : vector<320x1xi1>, vector<320x1xi32>
    %c0_i32_12 = arith.constant 0 : i32
    %39 = vector.broadcast %c0_i32_12 : i32 to vector<320x1xi32>
    %40 = arith.cmpi eq, %38, %39 : vector<320x1xi32>
    %41 = vector.extract_strided_slice %21 {offsets = [31, 0], sizes = [320, 64], strides = [1, 1]} : vector<384x64xf32> to vector<320x64xf32>
    %cst_13 = arith.constant 0.000000e+00 : f32
    %42 = vector.shape_cast %40 : vector<320x1xi1> to vector<320x1xi1>
    %43 = vector.broadcast %42 : vector<320x1xi1> to vector<320x64xi1>
    %44 = vector.broadcast %cst_13 : f32 to vector<320x64xf32>
    %45 = arith.select %43, %44, %41 : vector<320x64xi1>, vector<320x64xf32>
    %46 = arith.truncf %45 : vector<320x64xf32> to vector<320x64xbf16>
    %c31_i32 = arith.constant 31 : i32
    %47 = vector.broadcast %c31_i32 : i32 to vector<320x1xi32>
    %48 = arith.cmpi eq, %38, %47 : vector<320x1xi32>
    %49 = vector.extract_strided_slice %21 {offsets = [33, 0], sizes = [320, 64], strides = [1, 1]} : vector<384x64xf32> to vector<320x64xf32>
    %cst_14 = arith.constant 0.000000e+00 : f32
    %50 = vector.shape_cast %48 : vector<320x1xi1> to vector<320x1xi1>
    %51 = vector.broadcast %50 : vector<320x1xi1> to vector<320x64xi1>
    %52 = vector.broadcast %cst_14 : f32 to vector<320x64xf32>
    %53 = arith.select %51, %52, %49 : vector<320x64xi1>, vector<320x64xf32>
    %54 = arith.truncf %53 : vector<320x64xf32> to vector<320x64xbf16>
    %55 = tpu.concatenate %46, %20, %54 in 1 : vector<320x64xbf16>, vector<320x64xbf16>, vector<320x64xbf16> -> vector<320x192xbf16>
    %56 = vector.extract_strided_slice %55 {offsets = [0, 0], sizes = [256, 192], strides = [1, 1]} : vector<320x192xbf16> to vector<256x192xbf16>
    %c0_15 = arith.constant 0 : index
    %c0_16 = arith.constant 0 : index
    %c0_17 = arith.constant 0 : index
    %57 = vector.load %arg5[%c0_15, %c0_16, %c0_17] : memref<3x192x64xbf16, #tpu.memory_space<vmem>>, vector<1x192x64xbf16>
    %58 = vector.shape_cast %57 : vector<1x192x64xbf16> to vector<192x64xbf16>
    %cst_18 = arith.constant dense<0.000000e+00> : vector<256x64xf32>
    %59 = tpu.matmul %56, %58, %cst_18 {dimension_numbers = #tpu.dot_dimension_numbers<[1], [0], [0], [1], [0, 0, 1, 1], [], []>} : vector<256x192xbf16>, vector<192x64xbf16>, vector<256x64xf32> -> vector<256x64xf32>
    %60 = vector.extract_strided_slice %55 {offsets = [32, 0], sizes = [256, 192], strides = [1, 1]} : vector<320x192xbf16> to vector<256x192xbf16>
    %c1 = arith.constant 1 : index
    %c0_19 = arith.constant 0 : index
    %c0_20 = arith.constant 0 : index
    %61 = vector.load %arg5[%c1, %c0_19, %c0_20] : memref<3x192x64xbf16, #tpu.memory_space<vmem>>, vector<1x192x64xbf16>
    %62 = vector.shape_cast %61 : vector<1x192x64xbf16> to vector<192x64xbf16>
    %cst_21 = arith.constant dense<0.000000e+00> : vector<256x64xf32>
    %63 = tpu.matmul %60, %62, %cst_21 {dimension_numbers = #tpu.dot_dimension_numbers<[1], [0], [0], [1], [0, 0, 1, 1], [], []>} : vector<256x192xbf16>, vector<192x64xbf16>, vector<256x64xf32> -> vector<256x64xf32>
    %64 = arith.addf %59, %63 : vector<256x64xf32>
    %65 = vector.extract_strided_slice %55 {offsets = [64, 0], sizes = [256, 192], strides = [1, 1]} : vector<320x192xbf16> to vector<256x192xbf16>
    %c2 = arith.constant 2 : index
    %c0_22 = arith.constant 0 : index
    %c0_23 = arith.constant 0 : index
    %66 = vector.load %arg5[%c2, %c0_22, %c0_23] : memref<3x192x64xbf16, #tpu.memory_space<vmem>>, vector<1x192x64xbf16>
    %67 = vector.shape_cast %66 : vector<1x192x64xbf16> to vector<192x64xbf16>
    %cst_24 = arith.constant dense<0.000000e+00> : vector<256x64xf32>
    %68 = tpu.matmul %65, %67, %cst_24 {dimension_numbers = #tpu.dot_dimension_numbers<[1], [0], [0], [1], [0, 0, 1, 1], [], []>} : vector<256x192xbf16>, vector<192x64xbf16>, vector<256x64xf32> -> vector<256x64xf32>
    %69 = arith.addf %64, %68 : vector<256x64xf32>
    %c0_25 = arith.constant 0 : index
    %c0_26 = arith.constant 0 : index
    %70 = vector.load %arg6[%c0_25, %c0_26] : memref<1x64xf32, #tpu.memory_space<vmem>>, vector<1x64xf32>
    %71 = vector.broadcast %70 : vector<1x64xf32> to vector<256x64xf32>
    %72 = arith.addf %69, %71 : vector<256x64xf32>
    %cst_27 = arith.constant 0.000000e+00 : f32
    %73 = vector.broadcast %cst_27 : f32 to vector<256x64xf32>
    %74 = arith.maximumf %72, %73 : vector<256x64xf32>
    %75 = vector.shape_cast %74 : vector<256x64xf32> to vector<4x64x64xf32>
    %76 = vector.extract_strided_slice %75 {offsets = [0, 0, 0], sizes = [4, 32, 64], strides = [1, 1, 1]} : vector<4x64x64xf32> to vector<4x32x64xf32>
    %77 = vector.extract_strided_slice %75 {offsets = [0, 32, 0], sizes = [4, 32, 64], strides = [1, 1, 1]} : vector<4x64x64xf32> to vector<4x32x64xf32>
    %78 = arith.maximumf %76, %77 : vector<4x32x64xf32>
    %79 = vector.shape_cast %78 : vector<4x32x64xf32> to vector<128x64xf32>
    %c0_28 = arith.constant 0 : index
    %c0_29 = arith.constant 0 : index
    %80 = vector.load %arg8[%c0_28, %c0_29] : memref<128x64xf32, #tpu.memory_space<vmem>>, vector<128x64xf32>
    tpu.vector_store %arg8[%c0_28, %c0_29], %79 {strides = array<i32>} : memref<128x64xf32, #tpu.memory_space<vmem>>, vector<128x64xf32>,
    %c0_30 = arith.constant 0 : index
    %c0_31 = arith.constant 0 : index
    %81 = tpu.strided_load %arg8[%c0_30, %c0_31] {strides = array<i32: 2, 1>} : memref<128x64xf32, #tpu.memory_space<vmem>>, vector<64x64xf32>
    %c1_32 = arith.constant 1 : index
    %c0_33 = arith.constant 0 : index
    %82 = tpu.strided_load %arg8[%c1_32, %c0_33] {strides = array<i32: 2, 1>} : memref<128x64xf32, #tpu.memory_space<vmem>>, vector<64x64xf32>
    %83 = arith.maximumf %81, %82 : vector<64x64xf32>
    %84 = arith.truncf %83 : vector<64x64xf32> to vector<64x64xbf16>
    %c0_34 = arith.constant 0 : index
    %c0_35 = arith.constant 0 : index
    %c0_36 = arith.constant 0 : index
    %85 = vector.load %arg7[%c0_34, %c0_35, %c0_36] : memref<1x64x64xbf16, #tpu.memory_space<vmem>>, vector<1x64x64xbf16>
    %86 = vector.shape_cast %85 : vector<1x64x64xbf16> to vector<64x64xbf16>
    %87 = vector.shape_cast %84 : vector<64x64xbf16> to vector<1x64x64xbf16>
    tpu.vector_store %arg7[%c0_34, %c0_35, %c0_36], %87 {strides = array<i32>} : memref<1x64x64xbf16, #tpu.memory_space<vmem>>, vector<1x64x64xbf16>,
    return
  }
  func.func @transform_0(%arg0: i32, %arg1: i32) -> (i32, i32, i32) {
    %c8_i32 = arith.constant 8 : i32
    %0 = arith.muli %arg1, %c8_i32 : i32
    %c1_i32 = arith.constant 1 : i32
    %1 = arith.subi %0, %c1_i32 : i32
    %c0_i32 = arith.constant 0 : i32
    %2 = arith.maxsi %1, %c0_i32 : i32
    %c0_i32_0 = arith.constant 0 : i32
    %c0_i32_1 = arith.constant 0 : i32
    return %arg0, %2, %c0_i32_0 : i32, i32, i32
  }
  func.func @transform_1(%arg0: i32, %arg1: i32) -> (i32, i32, i32) {
    %c0_i32 = arith.constant 0 : i32
    %c0_i32_0 = arith.constant 0 : i32
    return %arg0, %arg1, %c0_i32 : i32, i32, i32
  }
  func.func @transform_2(%arg0: i32, %arg1: i32) -> (i32, i32, i32) {
    %c1_i32 = arith.constant 1 : i32
    %0 = arith.addi %arg1, %c1_i32 : i32
    %c8_i32 = arith.constant 8 : i32
    %1 = arith.muli %0, %c8_i32 : i32
    %c31_i32 = arith.constant 31 : i32
    %2 = arith.minsi %1, %c31_i32 : i32
    %c0_i32 = arith.constant 0 : i32
    %c0_i32_0 = arith.constant 0 : i32
    return %arg0, %2, %c0_i32 : i32, i32, i32
  }
  func.func @transform_3(%arg0: i32, %arg1: i32) -> (i32, i32, i32) {
    %c0_i32 = arith.constant 0 : i32
    %c0_i32_0 = arith.constant 0 : i32
    %c0_i32_1 = arith.constant 0 : i32
    %c0_i32_2 = arith.constant 0 : i32
    return %c0_i32, %c0_i32_0, %c0_i32_1 : i32, i32, i32
  }
  func.func @transform_4(%arg0: i32, %arg1: i32) -> (i32, i32) {
    %c0_i32 = arith.constant 0 : i32
    %c0_i32_0 = arith.constant 0 : i32
    %c0_i32_1 = arith.constant 0 : i32
    return %c0_i32, %c0_i32_0 : i32, i32
  }
  func.func @transform_5(%arg0: i32, %arg1: i32) -> (i32, i32, i32) {
    %c0_i32 = arith.constant 0 : i32
    %c0_i32_0 = arith.constant 0 : i32
    return %arg0, %arg1, %c0_i32 : i32, i32, i32
  }
}

module attributes {stable_mosaic.version = 11 : i64} {
  func.func @_conv_bn_relu_pool_kernel(%arg0: i32, %arg1: i32, %arg2: memref<1x16x64xbf16, #tpu.memory_space<vmem>>, %arg3: memref<1x128x64xbf16, #tpu.memory_space<vmem>>, %arg4: memref<1x16x64xbf16, #tpu.memory_space<vmem>>, %arg5: memref<3x192x128xbf16, #tpu.memory_space<vmem>>, %arg6: memref<1x128xf32, #tpu.memory_space<vmem>>, %arg7: memref<1x128x128xbf16, #tpu.memory_space<vmem>>) attributes {dimension_semantics = [#tpu.dimension_semantics<parallel>, #tpu.dimension_semantics<parallel>], iteration_bounds = array<i64: 2, 2>, scalar_prefetch = 0 : i64, scratch_operands = 0 : i64, tpu.core_type = #tpu.core_type<tc>, window_params = [{transform_indices = @transform_0, window_bounds = array<i64: 1, 16, 64>}, {transform_indices = @transform_1, window_bounds = array<i64: 1, 128, 64>}, {transform_indices = @transform_2, window_bounds = array<i64: 1, 16, 64>}, {pipeline_mode = #tpu.pipeline_mode<synchronous>, transform_indices = @transform_3, window_bounds = array<i64: 3, 192, 128>}, {pipeline_mode = #tpu.pipeline_mode<synchronous>, transform_indices = @transform_4, window_bounds = array<i64: 1, 128>}, {transform_indices = @transform_5, window_bounds = array<i64: 1, 128, 128>}]} {
    %c0 = arith.constant 0 : index
    %c0_0 = arith.constant 0 : index
    %c0_1 = arith.constant 0 : index
    %0 = vector.load %arg2[%c0, %c0_0, %c0_1] : memref<1x16x64xbf16, #tpu.memory_space<vmem>>, vector<1x16x64xbf16>
    %1 = vector.shape_cast %0 : vector<1x16x64xbf16> to vector<16x64xbf16>
    %c0_i32 = arith.constant 0 : i32
    %2 = arith.cmpi sgt, %arg1, %c0_i32 : i32
    %3 = arith.extui %2 : i1 to i32
    %4 = arith.sitofp %3 : i32 to f32
    %5 = arith.truncf %4 : f32 to bf16
    %6 = vector.broadcast %5 : bf16 to vector<16x64xbf16>
    %7 = arith.mulf %1, %6 : vector<16x64xbf16>
    %c0_2 = arith.constant 0 : index
    %c0_3 = arith.constant 0 : index
    %c0_4 = arith.constant 0 : index
    %8 = vector.load %arg4[%c0_2, %c0_3, %c0_4] : memref<1x16x64xbf16, #tpu.memory_space<vmem>>, vector<1x16x64xbf16>
    %9 = vector.shape_cast %8 : vector<1x16x64xbf16> to vector<16x64xbf16>
    %c1_i32 = arith.constant 1 : i32
    %10 = arith.cmpi slt, %arg1, %c1_i32 : i32
    %11 = arith.extui %10 : i1 to i32
    %12 = arith.sitofp %11 : i32 to f32
    %13 = arith.truncf %12 : f32 to bf16
    %14 = vector.broadcast %13 : bf16 to vector<16x64xbf16>
    %15 = arith.mulf %9, %14 : vector<16x64xbf16>
    %cst = arith.constant 0.000000e+00 : bf16
    %16 = vector.broadcast %cst : bf16 to vector<16x64xbf16>
    %c0_5 = arith.constant 0 : index
    %c0_6 = arith.constant 0 : index
    %c0_7 = arith.constant 0 : index
    %17 = vector.load %arg3[%c0_5, %c0_6, %c0_7] : memref<1x128x64xbf16, #tpu.memory_space<vmem>>, vector<1x128x64xbf16>
    %18 = vector.shape_cast %17 : vector<1x128x64xbf16> to vector<128x64xbf16>
    %19 = tpu.concatenate %16, %7, %18, %15, %16 in 0 : vector<16x64xbf16>, vector<16x64xbf16>, vector<128x64xbf16>, vector<16x64xbf16>, vector<16x64xbf16> -> vector<192x64xbf16>
    %20 = vector.extract_strided_slice %19 {offsets = [16, 0], sizes = [160, 64], strides = [1, 1]} : vector<192x64xbf16> to vector<160x64xbf16>
    %21 = arith.extf %19 : vector<192x64xbf16> to vector<192x64xf32>
    %22 = tpu.iota {dimensions = array<i32: 0>} : vector<160x1xi32>
    %c16_i32 = arith.constant 16 : i32
    %c0_i32_8 = arith.constant 0 : i32
    %23 = arith.cmpi eq, %c16_i32, %c0_i32_8 : i32
    %c1_i32_9 = arith.constant 1 : i32
    %24 = arith.select %23, %c1_i32_9, %c16_i32 : i32
    %25 = vector.broadcast %24 : i32 to vector<160x1xi32>
    %26 = arith.remsi %22, %25 : vector<160x1xi32>
    %c0_i32_10 = arith.constant 0 : i32
    %27 = vector.broadcast %c0_i32_10 : i32 to vector<160x1xi32>
    %28 = arith.cmpi ne, %26, %27 : vector<160x1xi32>
    %c0_i32_11 = arith.constant 0 : i32
    %29 = vector.broadcast %c0_i32_11 : i32 to vector<160x1xi32>
    %30 = arith.cmpi slt, %26, %29 : vector<160x1xi32>
    %c0_i32_12 = arith.constant 0 : i32
    %31 = arith.cmpi slt, %24, %c0_i32_12 : i32
    %32 = vector.broadcast %31 : i1 to vector<160x1xi1>
    %33 = vector.broadcast %32 : vector<160x1xi1> to vector<160x1xi1>
    %34 = arith.xori %30, %33 : vector<160x1xi1>
    %35 = arith.andi %34, %28 : vector<160x1xi1>
    %36 = vector.broadcast %24 : i32 to vector<160x1xi32>
    %37 = arith.addi %26, %36 : vector<160x1xi32>
    %38 = arith.select %35, %37, %26 : vector<160x1xi1>, vector<160x1xi32>
    %c0_i32_13 = arith.constant 0 : i32
    %39 = vector.broadcast %c0_i32_13 : i32 to vector<160x1xi32>
    %40 = arith.cmpi eq, %38, %39 : vector<160x1xi32>
    %41 = vector.extract_strided_slice %21 {offsets = [15, 0], sizes = [160, 64], strides = [1, 1]} : vector<192x64xf32> to vector<160x64xf32>
    %cst_14 = arith.constant 0.000000e+00 : f32
    %42 = vector.shape_cast %40 : vector<160x1xi1> to vector<160x1xi1>
    %43 = vector.broadcast %42 : vector<160x1xi1> to vector<160x64xi1>
    %44 = vector.broadcast %cst_14 : f32 to vector<160x64xf32>
    %45 = arith.select %43, %44, %41 : vector<160x64xi1>, vector<160x64xf32>
    %46 = arith.truncf %45 : vector<160x64xf32> to vector<160x64xbf16>
    %c15_i32 = arith.constant 15 : i32
    %47 = vector.broadcast %c15_i32 : i32 to vector<160x1xi32>
    %48 = arith.cmpi eq, %38, %47 : vector<160x1xi32>
    %49 = vector.extract_strided_slice %21 {offsets = [17, 0], sizes = [160, 64], strides = [1, 1]} : vector<192x64xf32> to vector<160x64xf32>
    %cst_15 = arith.constant 0.000000e+00 : f32
    %50 = vector.shape_cast %48 : vector<160x1xi1> to vector<160x1xi1>
    %51 = vector.broadcast %50 : vector<160x1xi1> to vector<160x64xi1>
    %52 = vector.broadcast %cst_15 : f32 to vector<160x64xf32>
    %53 = arith.select %51, %52, %49 : vector<160x64xi1>, vector<160x64xf32>
    %54 = arith.truncf %53 : vector<160x64xf32> to vector<160x64xbf16>
    %55 = tpu.concatenate %46, %20, %54 in 1 : vector<160x64xbf16>, vector<160x64xbf16>, vector<160x64xbf16> -> vector<160x192xbf16>
    %56 = vector.extract_strided_slice %55 {offsets = [0, 0], sizes = [128, 192], strides = [1, 1]} : vector<160x192xbf16> to vector<128x192xbf16>
    %c0_16 = arith.constant 0 : index
    %c0_17 = arith.constant 0 : index
    %c0_18 = arith.constant 0 : index
    %57 = vector.load %arg5[%c0_16, %c0_17, %c0_18] : memref<3x192x128xbf16, #tpu.memory_space<vmem>>, vector<1x192x128xbf16>
    %58 = vector.shape_cast %57 : vector<1x192x128xbf16> to vector<192x128xbf16>
    %cst_19 = arith.constant dense<0.000000e+00> : vector<128x128xf32>
    %59 = tpu.matmul %56, %58, %cst_19 {dimension_numbers = #tpu.dot_dimension_numbers<[1], [0], [0], [1], [0, 0, 1, 1], [], []>} : vector<128x192xbf16>, vector<192x128xbf16>, vector<128x128xf32> -> vector<128x128xf32>
    %60 = vector.extract_strided_slice %55 {offsets = [16, 0], sizes = [128, 192], strides = [1, 1]} : vector<160x192xbf16> to vector<128x192xbf16>
    %c1 = arith.constant 1 : index
    %c0_20 = arith.constant 0 : index
    %c0_21 = arith.constant 0 : index
    %61 = vector.load %arg5[%c1, %c0_20, %c0_21] : memref<3x192x128xbf16, #tpu.memory_space<vmem>>, vector<1x192x128xbf16>
    %62 = vector.shape_cast %61 : vector<1x192x128xbf16> to vector<192x128xbf16>
    %cst_22 = arith.constant dense<0.000000e+00> : vector<128x128xf32>
    %63 = tpu.matmul %60, %62, %cst_22 {dimension_numbers = #tpu.dot_dimension_numbers<[1], [0], [0], [1], [0, 0, 1, 1], [], []>} : vector<128x192xbf16>, vector<192x128xbf16>, vector<128x128xf32> -> vector<128x128xf32>
    %64 = arith.addf %59, %63 : vector<128x128xf32>
    %65 = vector.extract_strided_slice %55 {offsets = [32, 0], sizes = [128, 192], strides = [1, 1]} : vector<160x192xbf16> to vector<128x192xbf16>
    %c2 = arith.constant 2 : index
    %c0_23 = arith.constant 0 : index
    %c0_24 = arith.constant 0 : index
    %66 = vector.load %arg5[%c2, %c0_23, %c0_24] : memref<3x192x128xbf16, #tpu.memory_space<vmem>>, vector<1x192x128xbf16>
    %67 = vector.shape_cast %66 : vector<1x192x128xbf16> to vector<192x128xbf16>
    %cst_25 = arith.constant dense<0.000000e+00> : vector<128x128xf32>
    %68 = tpu.matmul %65, %67, %cst_25 {dimension_numbers = #tpu.dot_dimension_numbers<[1], [0], [0], [1], [0, 0, 1, 1], [], []>} : vector<128x192xbf16>, vector<192x128xbf16>, vector<128x128xf32> -> vector<128x128xf32>
    %69 = arith.addf %64, %68 : vector<128x128xf32>
    %c0_26 = arith.constant 0 : index
    %c0_27 = arith.constant 0 : index
    %70 = vector.load %arg6[%c0_26, %c0_27] : memref<1x128xf32, #tpu.memory_space<vmem>>, vector<1x128xf32>
    %71 = vector.broadcast %70 : vector<1x128xf32> to vector<128x128xf32>
    %72 = arith.addf %69, %71 : vector<128x128xf32>
    %cst_28 = arith.constant 0.000000e+00 : f32
    %73 = vector.broadcast %cst_28 : f32 to vector<128x128xf32>
    %74 = arith.maximumf %72, %73 : vector<128x128xf32>
    %75 = arith.truncf %74 : vector<128x128xf32> to vector<128x128xbf16>
    %c0_29 = arith.constant 0 : index
    %c0_30 = arith.constant 0 : index
    %c0_31 = arith.constant 0 : index
    %76 = vector.load %arg7[%c0_29, %c0_30, %c0_31] : memref<1x128x128xbf16, #tpu.memory_space<vmem>>, vector<1x128x128xbf16>
    %77 = vector.shape_cast %76 : vector<1x128x128xbf16> to vector<128x128xbf16>
    %78 = vector.shape_cast %75 : vector<128x128xbf16> to vector<1x128x128xbf16>
    tpu.vector_store %arg7[%c0_29, %c0_30, %c0_31], %78 {strides = array<i32>} : memref<1x128x128xbf16, #tpu.memory_space<vmem>>, vector<1x128x128xbf16>,
    return
  }
  func.func @transform_0(%arg0: i32, %arg1: i32) -> (i32, i32, i32) {
    %c8_i32 = arith.constant 8 : i32
    %0 = arith.muli %arg1, %c8_i32 : i32
    %c1_i32 = arith.constant 1 : i32
    %1 = arith.subi %0, %c1_i32 : i32
    %c0_i32 = arith.constant 0 : i32
    %2 = arith.maxsi %1, %c0_i32 : i32
    %c0_i32_0 = arith.constant 0 : i32
    %c0_i32_1 = arith.constant 0 : i32
    return %arg0, %2, %c0_i32_0 : i32, i32, i32
  }
  func.func @transform_1(%arg0: i32, %arg1: i32) -> (i32, i32, i32) {
    %c0_i32 = arith.constant 0 : i32
    %c0_i32_0 = arith.constant 0 : i32
    return %arg0, %arg1, %c0_i32 : i32, i32, i32
  }
  func.func @transform_2(%arg0: i32, %arg1: i32) -> (i32, i32, i32) {
    %c1_i32 = arith.constant 1 : i32
    %0 = arith.addi %arg1, %c1_i32 : i32
    %c8_i32 = arith.constant 8 : i32
    %1 = arith.muli %0, %c8_i32 : i32
    %c15_i32 = arith.constant 15 : i32
    %2 = arith.minsi %1, %c15_i32 : i32
    %c0_i32 = arith.constant 0 : i32
    %c0_i32_0 = arith.constant 0 : i32
    return %arg0, %2, %c0_i32 : i32, i32, i32
  }
  func.func @transform_3(%arg0: i32, %arg1: i32) -> (i32, i32, i32) {
    %c0_i32 = arith.constant 0 : i32
    %c0_i32_0 = arith.constant 0 : i32
    %c0_i32_1 = arith.constant 0 : i32
    %c0_i32_2 = arith.constant 0 : i32
    return %c0_i32, %c0_i32_0, %c0_i32_1 : i32, i32, i32
  }
  func.func @transform_4(%arg0: i32, %arg1: i32) -> (i32, i32) {
    %c0_i32 = arith.constant 0 : i32
    %c0_i32_0 = arith.constant 0 : i32
    %c0_i32_1 = arith.constant 0 : i32
    return %c0_i32, %c0_i32_0 : i32, i32
  }
  func.func @transform_5(%arg0: i32, %arg1: i32) -> (i32, i32, i32) {
    %c0_i32 = arith.constant 0 : i32
    %c0_i32_0 = arith.constant 0 : i32
    return %arg0, %arg1, %c0_i32 : i32, i32, i32
  }
}

module attributes {stable_mosaic.version = 11 : i64} {
  func.func @_conv_bn_relu_pool_kernel(%arg0: i32, %arg1: i32, %arg2: memref<1x16x128xbf16, #tpu.memory_space<vmem>>, %arg3: memref<1x128x128xbf16, #tpu.memory_space<vmem>>, %arg4: memref<1x16x128xbf16, #tpu.memory_space<vmem>>, %arg5: memref<3x384x128xbf16, #tpu.memory_space<vmem>>, %arg6: memref<1x128xf32, #tpu.memory_space<vmem>>, %arg7: memref<1x32x128xbf16, #tpu.memory_space<vmem>>, %arg8: memref<64x128xf32, #tpu.memory_space<vmem>>) attributes {dimension_semantics = [#tpu.dimension_semantics<parallel>, #tpu.dimension_semantics<parallel>], iteration_bounds = array<i64: 2, 2>, scalar_prefetch = 0 : i64, scratch_operands = 1 : i64, tpu.core_type = #tpu.core_type<tc>, window_params = [{transform_indices = @transform_0, window_bounds = array<i64: 1, 16, 128>}, {transform_indices = @transform_1, window_bounds = array<i64: 1, 128, 128>}, {transform_indices = @transform_2, window_bounds = array<i64: 1, 16, 128>}, {pipeline_mode = #tpu.pipeline_mode<synchronous>, transform_indices = @transform_3, window_bounds = array<i64: 3, 384, 128>}, {pipeline_mode = #tpu.pipeline_mode<synchronous>, transform_indices = @transform_4, window_bounds = array<i64: 1, 128>}, {transform_indices = @transform_5, window_bounds = array<i64: 1, 32, 128>}]} {
    %c0 = arith.constant 0 : index
    %c0_0 = arith.constant 0 : index
    %c0_1 = arith.constant 0 : index
    %0 = vector.load %arg2[%c0, %c0_0, %c0_1] : memref<1x16x128xbf16, #tpu.memory_space<vmem>>, vector<1x16x128xbf16>
    %1 = vector.shape_cast %0 : vector<1x16x128xbf16> to vector<16x128xbf16>
    %c0_i32 = arith.constant 0 : i32
    %2 = arith.cmpi sgt, %arg1, %c0_i32 : i32
    %3 = arith.extui %2 : i1 to i32
    %4 = arith.sitofp %3 : i32 to f32
    %5 = arith.truncf %4 : f32 to bf16
    %6 = vector.broadcast %5 : bf16 to vector<16x128xbf16>
    %7 = arith.mulf %1, %6 : vector<16x128xbf16>
    %c0_2 = arith.constant 0 : index
    %c0_3 = arith.constant 0 : index
    %c0_4 = arith.constant 0 : index
    %8 = vector.load %arg4[%c0_2, %c0_3, %c0_4] : memref<1x16x128xbf16, #tpu.memory_space<vmem>>, vector<1x16x128xbf16>
    %9 = vector.shape_cast %8 : vector<1x16x128xbf16> to vector<16x128xbf16>
    %c1_i32 = arith.constant 1 : i32
    %10 = arith.cmpi slt, %arg1, %c1_i32 : i32
    %11 = arith.extui %10 : i1 to i32
    %12 = arith.sitofp %11 : i32 to f32
    %13 = arith.truncf %12 : f32 to bf16
    %14 = vector.broadcast %13 : bf16 to vector<16x128xbf16>
    %15 = arith.mulf %9, %14 : vector<16x128xbf16>
    %cst = arith.constant 0.000000e+00 : bf16
    %16 = vector.broadcast %cst : bf16 to vector<16x128xbf16>
    %c0_5 = arith.constant 0 : index
    %c0_6 = arith.constant 0 : index
    %c0_7 = arith.constant 0 : index
    %17 = vector.load %arg3[%c0_5, %c0_6, %c0_7] : memref<1x128x128xbf16, #tpu.memory_space<vmem>>, vector<1x128x128xbf16>
    %18 = vector.shape_cast %17 : vector<1x128x128xbf16> to vector<128x128xbf16>
    %19 = tpu.concatenate %16, %7, %18, %15, %16 in 0 : vector<16x128xbf16>, vector<16x128xbf16>, vector<128x128xbf16>, vector<16x128xbf16>, vector<16x128xbf16> -> vector<192x128xbf16>
    %20 = vector.extract_strided_slice %19 {offsets = [16, 0], sizes = [160, 128], strides = [1, 1]} : vector<192x128xbf16> to vector<160x128xbf16>
    %21 = arith.extf %19 : vector<192x128xbf16> to vector<192x128xf32>
    %22 = tpu.iota {dimensions = array<i32: 0>} : vector<160x1xi32>
    %c16_i32 = arith.constant 16 : i32
    %c0_i32_8 = arith.constant 0 : i32
    %23 = arith.cmpi eq, %c16_i32, %c0_i32_8 : i32
    %c1_i32_9 = arith.constant 1 : i32
    %24 = arith.select %23, %c1_i32_9, %c16_i32 : i32
    %25 = vector.broadcast %24 : i32 to vector<160x1xi32>
    %26 = arith.remsi %22, %25 : vector<160x1xi32>
    %c0_i32_10 = arith.constant 0 : i32
    %27 = vector.broadcast %c0_i32_10 : i32 to vector<160x1xi32>
    %28 = arith.cmpi ne, %26, %27 : vector<160x1xi32>
    %c0_i32_11 = arith.constant 0 : i32
    %29 = vector.broadcast %c0_i32_11 : i32 to vector<160x1xi32>
    %30 = arith.cmpi slt, %26, %29 : vector<160x1xi32>
    %c0_i32_12 = arith.constant 0 : i32
    %31 = arith.cmpi slt, %24, %c0_i32_12 : i32
    %32 = vector.broadcast %31 : i1 to vector<160x1xi1>
    %33 = vector.broadcast %32 : vector<160x1xi1> to vector<160x1xi1>
    %34 = arith.xori %30, %33 : vector<160x1xi1>
    %35 = arith.andi %34, %28 : vector<160x1xi1>
    %36 = vector.broadcast %24 : i32 to vector<160x1xi32>
    %37 = arith.addi %26, %36 : vector<160x1xi32>
    %38 = arith.select %35, %37, %26 : vector<160x1xi1>, vector<160x1xi32>
    %c0_i32_13 = arith.constant 0 : i32
    %39 = vector.broadcast %c0_i32_13 : i32 to vector<160x1xi32>
    %40 = arith.cmpi eq, %38, %39 : vector<160x1xi32>
    %41 = vector.extract_strided_slice %21 {offsets = [15, 0], sizes = [160, 128], strides = [1, 1]} : vector<192x128xf32> to vector<160x128xf32>
    %cst_14 = arith.constant 0.000000e+00 : f32
    %42 = vector.shape_cast %40 : vector<160x1xi1> to vector<160x1xi1>
    %43 = vector.broadcast %42 : vector<160x1xi1> to vector<160x128xi1>
    %44 = vector.broadcast %cst_14 : f32 to vector<160x128xf32>
    %45 = arith.select %43, %44, %41 : vector<160x128xi1>, vector<160x128xf32>
    %46 = arith.truncf %45 : vector<160x128xf32> to vector<160x128xbf16>
    %c15_i32 = arith.constant 15 : i32
    %47 = vector.broadcast %c15_i32 : i32 to vector<160x1xi32>
    %48 = arith.cmpi eq, %38, %47 : vector<160x1xi32>
    %49 = vector.extract_strided_slice %21 {offsets = [17, 0], sizes = [160, 128], strides = [1, 1]} : vector<192x128xf32> to vector<160x128xf32>
    %cst_15 = arith.constant 0.000000e+00 : f32
    %50 = vector.shape_cast %48 : vector<160x1xi1> to vector<160x1xi1>
    %51 = vector.broadcast %50 : vector<160x1xi1> to vector<160x128xi1>
    %52 = vector.broadcast %cst_15 : f32 to vector<160x128xf32>
    %53 = arith.select %51, %52, %49 : vector<160x128xi1>, vector<160x128xf32>
    %54 = arith.truncf %53 : vector<160x128xf32> to vector<160x128xbf16>
    %55 = tpu.concatenate %46, %20, %54 in 1 : vector<160x128xbf16>, vector<160x128xbf16>, vector<160x128xbf16> -> vector<160x384xbf16>
    %56 = vector.extract_strided_slice %55 {offsets = [0, 0], sizes = [128, 384], strides = [1, 1]} : vector<160x384xbf16> to vector<128x384xbf16>
    %c0_16 = arith.constant 0 : index
    %c0_17 = arith.constant 0 : index
    %c0_18 = arith.constant 0 : index
    %57 = vector.load %arg5[%c0_16, %c0_17, %c0_18] : memref<3x384x128xbf16, #tpu.memory_space<vmem>>, vector<1x384x128xbf16>
    %58 = vector.shape_cast %57 : vector<1x384x128xbf16> to vector<384x128xbf16>
    %cst_19 = arith.constant dense<0.000000e+00> : vector<128x128xf32>
    %59 = tpu.matmul %56, %58, %cst_19 {dimension_numbers = #tpu.dot_dimension_numbers<[1], [0], [0], [1], [0, 0, 1, 1], [], []>} : vector<128x384xbf16>, vector<384x128xbf16>, vector<128x128xf32> -> vector<128x128xf32>
    %60 = vector.extract_strided_slice %55 {offsets = [16, 0], sizes = [128, 384], strides = [1, 1]} : vector<160x384xbf16> to vector<128x384xbf16>
    %c1 = arith.constant 1 : index
    %c0_20 = arith.constant 0 : index
    %c0_21 = arith.constant 0 : index
    %61 = vector.load %arg5[%c1, %c0_20, %c0_21] : memref<3x384x128xbf16, #tpu.memory_space<vmem>>, vector<1x384x128xbf16>
    %62 = vector.shape_cast %61 : vector<1x384x128xbf16> to vector<384x128xbf16>
    %cst_22 = arith.constant dense<0.000000e+00> : vector<128x128xf32>
    %63 = tpu.matmul %60, %62, %cst_22 {dimension_numbers = #tpu.dot_dimension_numbers<[1], [0], [0], [1], [0, 0, 1, 1], [], []>} : vector<128x384xbf16>, vector<384x128xbf16>, vector<128x128xf32> -> vector<128x128xf32>
    %64 = arith.addf %59, %63 : vector<128x128xf32>
    %65 = vector.extract_strided_slice %55 {offsets = [32, 0], sizes = [128, 384], strides = [1, 1]} : vector<160x384xbf16> to vector<128x384xbf16>
    %c2 = arith.constant 2 : index
    %c0_23 = arith.constant 0 : index
    %c0_24 = arith.constant 0 : index
    %66 = vector.load %arg5[%c2, %c0_23, %c0_24] : memref<3x384x128xbf16, #tpu.memory_space<vmem>>, vector<1x384x128xbf16>
    %67 = vector.shape_cast %66 : vector<1x384x128xbf16> to vector<384x128xbf16>
    %cst_25 = arith.constant dense<0.000000e+00> : vector<128x128xf32>
    %68 = tpu.matmul %65, %67, %cst_25 {dimension_numbers = #tpu.dot_dimension_numbers<[1], [0], [0], [1], [0, 0, 1, 1], [], []>} : vector<128x384xbf16>, vector<384x128xbf16>, vector<128x128xf32> -> vector<128x128xf32>
    %69 = arith.addf %64, %68 : vector<128x128xf32>
    %c0_26 = arith.constant 0 : index
    %c0_27 = arith.constant 0 : index
    %70 = vector.load %arg6[%c0_26, %c0_27] : memref<1x128xf32, #tpu.memory_space<vmem>>, vector<1x128xf32>
    %71 = vector.broadcast %70 : vector<1x128xf32> to vector<128x128xf32>
    %72 = arith.addf %69, %71 : vector<128x128xf32>
    %cst_28 = arith.constant 0.000000e+00 : f32
    %73 = vector.broadcast %cst_28 : f32 to vector<128x128xf32>
    %74 = arith.maximumf %72, %73 : vector<128x128xf32>
    %75 = vector.shape_cast %74 : vector<128x128xf32> to vector<4x32x128xf32>
    %76 = vector.extract_strided_slice %75 {offsets = [0, 0, 0], sizes = [4, 16, 128], strides = [1, 1, 1]} : vector<4x32x128xf32> to vector<4x16x128xf32>
    %77 = vector.extract_strided_slice %75 {offsets = [0, 16, 0], sizes = [4, 16, 128], strides = [1, 1, 1]} : vector<4x32x128xf32> to vector<4x16x128xf32>
    %78 = arith.maximumf %76, %77 : vector<4x16x128xf32>
    %79 = vector.shape_cast %78 : vector<4x16x128xf32> to vector<64x128xf32>
    %c0_29 = arith.constant 0 : index
    %c0_30 = arith.constant 0 : index
    %80 = vector.load %arg8[%c0_29, %c0_30] : memref<64x128xf32, #tpu.memory_space<vmem>>, vector<64x128xf32>
    tpu.vector_store %arg8[%c0_29, %c0_30], %79 {strides = array<i32>} : memref<64x128xf32, #tpu.memory_space<vmem>>, vector<64x128xf32>,
    %c0_31 = arith.constant 0 : index
    %c0_32 = arith.constant 0 : index
    %81 = tpu.strided_load %arg8[%c0_31, %c0_32] {strides = array<i32: 2, 1>} : memref<64x128xf32, #tpu.memory_space<vmem>>, vector<32x128xf32>
    %c1_33 = arith.constant 1 : index
    %c0_34 = arith.constant 0 : index
    %82 = tpu.strided_load %arg8[%c1_33, %c0_34] {strides = array<i32: 2, 1>} : memref<64x128xf32, #tpu.memory_space<vmem>>, vector<32x128xf32>
    %83 = arith.maximumf %81, %82 : vector<32x128xf32>
    %84 = arith.truncf %83 : vector<32x128xf32> to vector<32x128xbf16>
    %c0_35 = arith.constant 0 : index
    %c0_36 = arith.constant 0 : index
    %c0_37 = arith.constant 0 : index
    %85 = vector.load %arg7[%c0_35, %c0_36, %c0_37] : memref<1x32x128xbf16, #tpu.memory_space<vmem>>, vector<1x32x128xbf16>
    %86 = vector.shape_cast %85 : vector<1x32x128xbf16> to vector<32x128xbf16>
    %87 = vector.shape_cast %84 : vector<32x128xbf16> to vector<1x32x128xbf16>
    tpu.vector_store %arg7[%c0_35, %c0_36, %c0_37], %87 {strides = array<i32>} : memref<1x32x128xbf16, #tpu.memory_space<vmem>>, vector<1x32x128xbf16>,
    return
  }
  func.func @transform_0(%arg0: i32, %arg1: i32) -> (i32, i32, i32) {
    %c8_i32 = arith.constant 8 : i32
    %0 = arith.muli %arg1, %c8_i32 : i32
    %c1_i32 = arith.constant 1 : i32
    %1 = arith.subi %0, %c1_i32 : i32
    %c0_i32 = arith.constant 0 : i32
    %2 = arith.maxsi %1, %c0_i32 : i32
    %c0_i32_0 = arith.constant 0 : i32
    %c0_i32_1 = arith.constant 0 : i32
    return %arg0, %2, %c0_i32_0 : i32, i32, i32
  }
  func.func @transform_1(%arg0: i32, %arg1: i32) -> (i32, i32, i32) {
    %c0_i32 = arith.constant 0 : i32
    %c0_i32_0 = arith.constant 0 : i32
    return %arg0, %arg1, %c0_i32 : i32, i32, i32
  }
  func.func @transform_2(%arg0: i32, %arg1: i32) -> (i32, i32, i32) {
    %c1_i32 = arith.constant 1 : i32
    %0 = arith.addi %arg1, %c1_i32 : i32
    %c8_i32 = arith.constant 8 : i32
    %1 = arith.muli %0, %c8_i32 : i32
    %c15_i32 = arith.constant 15 : i32
    %2 = arith.minsi %1, %c15_i32 : i32
    %c0_i32 = arith.constant 0 : i32
    %c0_i32_0 = arith.constant 0 : i32
    return %arg0, %2, %c0_i32 : i32, i32, i32
  }
  func.func @transform_3(%arg0: i32, %arg1: i32) -> (i32, i32, i32) {
    %c0_i32 = arith.constant 0 : i32
    %c0_i32_0 = arith.constant 0 : i32
    %c0_i32_1 = arith.constant 0 : i32
    %c0_i32_2 = arith.constant 0 : i32
    return %c0_i32, %c0_i32_0, %c0_i32_1 : i32, i32, i32
  }
  func.func @transform_4(%arg0: i32, %arg1: i32) -> (i32, i32) {
    %c0_i32 = arith.constant 0 : i32
    %c0_i32_0 = arith.constant 0 : i32
    %c0_i32_1 = arith.constant 0 : i32
    return %c0_i32, %c0_i32_0 : i32, i32
  }
  func.func @transform_5(%arg0: i32, %arg1: i32) -> (i32, i32, i32) {
    %c0_i32 = arith.constant 0 : i32
    %c0_i32_0 = arith.constant 0 : i32
    return %arg0, %arg1, %c0_i32 : i32, i32, i32
  }
}

</mosaic_0001>

<bundles_post_ra>
// kernel: feature_extractor.4
= control target key start
LH: loop header
LB: loop body
LE: loop exit
PB: predicated region body
PF: predicated region fallthrough
CT: control target
= control target key end

     0   :  { %s3031_s18 = smov 0   ;;  %s3033_s19 = smov 0   ;;  %s4190_s0 = inlined_call_operand.vmem [shape: bf16[2,1024,3], index: 0, kind: input, shape index: {}, may-alias: {0,1,2}]   ;;  %s4191_s1 = inlined_call_operand.vmem [shape: bf16[2,1024,3], index: 1, kind: input, shape index: {}, may-alias: {0,1,2}]   ;;  %s4192_s2 = inlined_call_operand.vmem [shape: bf16[2,1024,3], index: 2, kind: input, shape index: {}, may-alias: {0,1,2}]   ;;  %s4193_s3 = inlined_call_operand.vmem [shape: bf16[1,27,64], index: 3, kind: input, shape index: {}]   ;;  %s4194_s4 = inlined_call_operand.vmem [shape: f32[1,64], index: 4, kind: input, shape index: {}]   ;;  %s4195_s5 = inlined_call_operand.vmem [shape: bf16[2,1024,64], index: 5, kind: output, shape index: {}]  }
   0x1   :  { %s3035_s20 = smov 0   ;;  %s3037_s21 = smov 0  }
   0x2   :  { %s3039_s22 = smov 0  }
   0x3 LB: > { %s24_s23 = sadd.s32 1, %s2985_s20  ;;  %s27_s24 = sadd.s32 1, %s2989_s21  ;;  %s2993_s22 = sphi %s3039_s22, %s15_s22   ;;  %s2989_s21 = sphi %s3037_s21, %s4250_s21   ;;  %s2985_s20 = sphi %s3035_s20, %s4249_s20   ;;  %s2981_s19 = sphi %s3033_s19, %s4248_s19   ;;  %s2977_s18 = sphi %s3031_s18, %s4247_s18  }
   0x4   : > { %p25_p0 = scmp.ge.s32.totalorder %s24_s23, 4  ;;  %p2706_p1 = scmp.ge.s32.totalorder %s2993_s22, 1 }
   0x5   : > { %p274_p2 = scmp.lt.s32.totalorder %s2993_s22, 9 }
   0x6   : > { %s4252_s23 = smov (%p25_p0, %s24_s23), 0  ;;  %s4254_s24 = smov (!%p25_p0, %s27_s24), %s2989_s21 }
   0x7   : > { %p275_p3 = pnand %p2706_p1, %p274_p2  ;;  %p29_p4 = scmp.ge.s32.totalorder %s4254_s24, 2 }
   0x8   : > { %p341_p5 = scmp.lt.s32.totalorder (!%p275_p3), %s2981_s19, 1  ;;  %s2712_s25 = sshll.u32 (!%p275_p3), %s2977_s18, 5  ;;  %v637_v0 = vlaneseq (!%p275_p3)  ;;  %v4196_v2 = vmov (!%p275_p3), 0   ;;  %vm1319_vm0 = vcmask (!%p275_p3), 1040384   ;;  %vm1622_vm1 = vcmask (!%p275_p3), 1046528  }
   0x9   : > { %s4256_s24 = smov (%p29_p4, %s4254_s24), 0  ;;  %278 = sbr.rel (%p275_p3) target bundleno = 572 (0x23c), region = 40 }
   0xa   : > { %p357_p6 = scmp.lt.s32.totalorder (!%p275_p3), %s2712_s25, 127  ;;  %v3064_v1 = vshrl.u32 (!%p275_p3), %v637_v0, 7  ;;  %v3067_v3 = vunpack.c.l.bf16 (!%p275_p3), %v4196_v2  ;;  %s2707_s7 = sshll.u32 (!%p275_p3), %s2977_s18, 3 }
   0xb   : > { %s2996_s8 = smov (!%p275_p3), 3   ;;  %s3136_s9 = sadd.s32 (!%p275_p3), 8, %s2707_s7 }
   0xc   : > { %v645_v4 = vadd.s32 (!%p275_p3), 56, %v3064_v1  ;;  %v3073_v5 = vadd.s32 (!%p275_p3), 184, %v3064_v1  ;;  %v3076_v6 = vadd.s32 (!%p275_p3), 216, %v3064_v1  ;;  %v3079_v7 = vadd.s32 (!%p275_p3), 88, %v3064_v1  ;;  %p366_p7 = scmp.lt.s32.totalorder (!%p275_p3), %s3136_s9, 31  ;;  %s2997_s10 = smov (!%p275_p3), 6  }
   0xd   : > { %v3083_v8 = vadd.s32 (!%p275_p3), 248, %v3064_v1  ;;  %v3086_v9 = vadd.s32 (!%p275_p3), 120, %v3064_v1  ;;  %v3091_v10 = vadd.s32 (!%p275_p3), 152, %v3064_v1  ;;  %v3094_v11 = vadd.s32 (!%p275_p3), 280, %v3064_v1  ;;  %p422_p8 = scmp.lt.s32.totalorder (!%p275_p3), %s2977_s18, 3  ;;  %p397_p11 = scmp.gt.s32.totalorder (!%p275_p3), %s2977_s18, 0 }
   0xe   : > { %v731_v13 = vand.u32 (!%p275_p3), 31, %v645_v4  ;;  %v843_v14 = vand.u32 (!%p275_p3), 31, %v3073_v5  ;;  %v871_v15 = vand.u32 (!%p275_p3), 31, %v3076_v6  ;;  %v759_v16 = vand.u32 (!%p275_p3), 31, %v3079_v7 }
   0xf   : > { %v899_v18 = vand.u32 (!%p275_p3), 31, %v3083_v8  ;;  %v787_v20 = vand.u32 (!%p275_p3), 31, %v3086_v9  ;;  %v815_v24 = vand.u32 (!%p275_p3), 31, %v3091_v10  ;;  %v927_v27 = vand.u32 (!%p275_p3), 31, %v3094_v11 }
  0x10   : > { %s4258_s19 = smov (!%p341_p5, %s2981_s19), 1  ;;  %s4260_s25 = smov (!%p357_p6, %s2712_s25), 127  ;;  %vm3143_vm2 = vcmp.eq.s32.totalorder %v731_v13, 31  ;;  %vm3177_vm3 = vcmp.eq.s32.totalorder %v843_v14, 31  ;;  %vm3201_vm4 = vcmp.eq.s32.totalorder %v871_v15, 31  ;;  %vm3210_vm5 = vcmp.eq.s32.totalorder %v759_v16, 31 }
  0x11   : > { %s3069_s26 = sshll.u32 %s4258_s19, 7  ;;  %s4262_s9 = smov (!%p366_p7, %s3136_s9), 31  ;;  %vm3315_vm6 = vcmp.eq.s32.totalorder %v899_v18, 31  ;;  %vm3328_vm7 = vcmp.eq.s32.totalorder %v787_v20, 31  ;;  %vm3406_vm8 = vcmp.eq.s32.totalorder %v815_v24, 31  ;;  %vm3435_vm9 = vcmp.eq.s32.totalorder %v927_v27, 31 }
  0x12   : > { %s360_s27 = sadd.s32 %s3069_s26, %s4260_s25  ;;  %s2716_s11 = sshll.u32 %s4262_s9, 2 }
  0x13   : > { %s3088_s28 = sshll.u32 %s360_s27, 2  ;;  %p371_p9 = scmp.lt.s32.totalorder %s2716_s11, 127 }
  0x14   : > { %s3101_s6 = scalar_lea.vmem %s4191_s1, %s3088_s28 }
  0x15   : > { %v3108_v17 = vld [vmem:[%s3101_s6 + $0x8] sm:$0xff]   ;;  %v2938_v19 = vld [vmem:[%s3101_s6] sm:$0xff]   ;;  %v2939_v23 = vld [vmem:[%s3101_s6 + $0x10] sm:$0xff]   ;;  %s423_s12 = scalar_select %p422_p8, 1, 0 }
  0x16   : > { %1810 = vrot.lane.b32.xlu1 %v3108_v17, %s2996_s8  ;;  %v602_v21 = vunpack.c.l.bf16 %v3108_v17  ;;  %v603_v22 = vunpack.c.h.bf16 %v3108_v17  ;;  %1808 = vrot.lane.b32.xlu0 %v2938_v19, %s2996_s8  ;;  %v600_v25 = vunpack.c.l.bf16 %v2938_v19  ;;  %v2940_v26 = vld [vmem:[%s3101_s6 + $0x40] sm:$0xff]   ;;  %v601_v30 = vunpack.c.h.bf16 %v2938_v19  ;;  %v2941_v36 = vld [vmem:[%s3101_s6 + $0x50] sm:$0xff]   ;;  %s4264_s11 = smov (!%p371_p9, %s2716_s11), 127 }
  0x17   : > { %v604_v31 = vunpack.c.l.bf16 %v2939_v23  ;;  %v605_v33 = vunpack.c.h.bf16 %v2939_v23  ;;  %v616_v34 = vunpack.c.l.bf16 %v2940_v26  ;;  %v617_v35 = vunpack.c.h.bf16 %v2940_v26  ;;  %v3132_v37 = vld [vmem:[%s3101_s6 + $0x48] sm:$0xff]   ;;  %v3158_v45 = vld [vmem:[%s3101_s6 + $0x58] sm:$0xff]   ;;  %v3196_v13 = vld [vmem:[%s3101_s6 + $0x60] sm:$0xff]   ;;  %s3279_s13 = scvt.s32.f32 %s423_s12  ;;  %s374_s14 = sadd.s32 %s3069_s26, %s4264_s11 }
  0x18   : > { %v3122_v28 = vrot.slane %v602_v21, 7  ;;  %v3126_v29 = vrot.slane %v603_v22, 7  ;;  %v3128_v32 = vrot.slane %v600_v25, 7  ;;  %v3138_v38 = vrot.slane %v601_v30, 7  ;;  %v3161_v46 = vld [vmem:[%s3101_s6 + $0x18] sm:$0xff]   ;;  %s2718_s16 = sshll.u32 %s374_s14, 2 }
  0x19   : > { %v3140_v39 = vrot.slane %v604_v31, 7  ;;  %v3152_v42 = vrot.slane %v605_v33, 7  ;;  %v3154_v43 = vrot.slane %v616_v34, 7  ;;  %v620_v44 = vunpack.c.l.bf16 %v2941_v36  ;;  %s427_s15 = sshrl.u32 %s3279_s13, 16  ;;  %p426_p10 = scmp.ne.f32.partialorder %s3279_s13, %s3279_s13 }
  0x1a   : > { %1812 = vrot.lane.b32.xlu1 %v2939_v23, %s2996_s8  ;;  %v3150_v41 = vsel %vm1319_vm0, %v3122_v28, %v3126_v29  ;;  %1824 = vrot.lane.b32.xlu0 %v2940_v26, %s2996_s8  ;;  %v621_v47 = vunpack.c.h.bf16 %v2941_v36  ;;  %v618_v48 = vunpack.c.l.bf16 %v3132_v37  ;;  %v3164_v49 = vrot.slane %v616_v34, 1  ;;  %s428_s17 = sand.u32 1, %s427_s15  ;;  %s3358_s30 = scalar_lea.vmem %s4192_s2, %s2718_s16 }
  0x1b   : > { %v1664_v50 = vrot.slane %v617_v35, 1  ;;  %v3166_v51 = vrot.slane %v617_v35, 7  ;;  %v3168_v52 = vrot.slane %v620_v44, 7  ;;  %v619_v53 = vunpack.c.h.bf16 %v3132_v37  ;;  %v3206_v35 = vld [vmem:[%s3101_s6 + $0x20] sm:$0xff]   ;;  %s429_s19 = sadd.s32 32767, %s428_s17  ;;  %s3387_s12 = sadd.s32 4294967295, %s2707_s7 }
  0x1c   : > { %v3171_v54 = vrot.slane %v621_v47, 7  ;;  %v622_v55 = vunpack.c.l.bf16 %v3158_v45  ;;  %v623_v56 = vunpack.c.h.bf16 %v3158_v45  ;;  %v606_v57 = vunpack.c.l.bf16 %v3161_v46  ;;  %s430_s25 = sadd.s32 %s429_s19, %s3279_s13  ;;  %v421_v10 = vld [vmem:[%s3358_s30 + $0xc] sm:$0xf]  ;;  %p338_p13 = scmp.gt.s32.totalorder %s3387_s12, 0 }
  0x1d   : > { %v3181_v59 = vrot.slane %v618_v48, 7  ;;  %v3183_v60 = vrot.slane %v619_v53, 7  ;;  %v1665_v61 = vsel %vm1622_vm1, %v3164_v49, %v1664_v50  ;;  %v1666_v62 = vrot.slane %v618_v48, 1  ;;  %s398_s9 = scalar_select %p397_p11, 1, 0 }
  0x1e   : > { %1828 = vrot.lane.b32.xlu1 %v2941_v36, %s2996_s8  ;;  %1826 = vrot.lane.b32.xlu0 %v3132_v37, %s2996_s8  ;;  %v3190_v63 = vrot.slane %v622_v55, 7  ;;  %v607_v0 = vunpack.c.h.bf16 %v3161_v46  ;;  %v3193_v4 = vrot.slane %v600_v25, 1  ;;  %v1632_v5 = vrot.slane %v601_v30, 1  ;;  %v3301_v25 = vld [vmem:[%s3101_s6 + $0x78] sm:$0xff]   ;;  %s4270_s12 = smov (!%p338_p13, %s3387_s12), 0 }
  0x1f   : > { %v1667_v14 = vsel %vm1622_vm1, %v1664_v50, %v1666_v62  ;;  %v1634_v19 = vrot.slane %v602_v21, 1  ;;  %v1638_v23 = vrot.slane %v604_v31, 1  ;;  %v1640_v26 = vrot.slane %v605_v33, 1  ;;  %s3398_s14 = scvt.s32.f32 %s398_s9  ;;  %s2709_s29 = sshll.u32 %s4270_s12, 2 }
  0x20   : > { %v1794_v21 = vpack.c.bf16 %v1667_v14, %v1665_v61  ;;  %v1633_v6 = vsel %vm1622_vm1, %v3193_v4, %v1632_v5  ;;  %v1642_v15 = vrot.slane %v606_v57, 1  ;;  %v1636_v30 = vrot.slane %v603_v22, 1  ;;  %v3235_v61 = vld [vmem:[%s3101_s6 + $0x68] sm:$0xff]   ;;  %p343_p0 = scmp.lt.s32.totalorder %s2709_s29, 127 }
  0x21   : > { %v1635_v7 = vsel %vm1622_vm1, %v1632_v5, %v1634_v19  ;;  %v1641_v16 = vsel %vm1622_vm1, %v1638_v23, %v1640_v26  ;;  %v1670_v31 = vrot.slane %v620_v44, 1  ;;  %v1672_v33 = vrot.slane %v621_v47, 1  ;;  %v3238_v44 = vld [vmem:[%s3101_s6 + $0x28] sm:$0xff]   ;;  %s402_s7 = sshrl.u32 %s3398_s14, 16  ;;  %p401_p12 = scmp.ne.f32.partialorder %s3398_s14, %s3398_s14 }
  0x22   : > { %1830 = vrot.lane.b32.xlu1 %v3158_v45, %s2996_s8  ;;  %1814 = vrot.lane.b32.xlu0 %v3161_v46, %s2996_s8  ;;  %v1786_v36 = vpack.c.bf16 %v1635_v7, %v1633_v6  ;;  %v1643_v37 = vsel %vm1622_vm1, %v1640_v26, %v1642_v15  ;;  %v1637_v45 = vsel %vm1622_vm1, %v1634_v19, %v1636_v30  ;;  %v1674_v50 = vrot.slane %v622_v55, 1  ;;  %s403_s15 = sand.u32 1, %s402_s7  ;;  %s4272_s29 = smov (!%p343_p0, %s2709_s29), 127 }
  0x23   : > { %v1639_v48 = vsel %vm1622_vm1, %v1636_v30, %v1638_v23  ;;  %v1788_v17 = vpack.c.bf16 %v1643_v37, %v1641_v16  ;;  %v1673_v47 = vsel %vm1622_vm1, %v1670_v31, %v1672_v33  ;;  %v1668_v5 = vrot.slane %v619_v53, 1  ;;  %s404_s16 = sadd.s32 32767, %s403_s15 }
  0x24   : > { %v1751_v22 = vsel %vm3143_vm2, 0.0, %v1639_v48  ;;  %v4204_v14 = vunpack.c.l.bf16 %v3196_v13  ;;  %v1676_v19 = vrot.slane %v623_v56, 1  ;;  %v1675_v23 = vsel %vm1622_vm1, %v1672_v33, %v1674_v50  ;;  %s405_s17 = sadd.s32 %s404_s16, %s3398_s14 }
  0x25   : > { %v1787_v40 = vpack.c.bf16 %v1751_v22, %v1637_v45  ;;  %v4201_v55 = vunpack.c.l.bf16 %v3206_v35  ;;  %v1644_v26 = vrot.slane %v607_v0, 1  ;;  %v3252_v6 = vrot.slane %v606_v57, 7  ;;  %v3277_v22 = vld [vmem:[%s3101_s6 + $0x30] sm:$0xff]   ;;  %s406_s19 = sand.u32 4294901760, %s405_s17 }
  0x26   : > { %1884 = vrot.lane.b32.xlu1 %v1794_v21, %s2997_s10  ;;  %1868 = vrot.lane.b32.xlu0 %v1786_v36, %s2997_s10  ;;  %v3250_v21 = vrot.slane %v623_v56, 7  ;;  %v1669_v53 = vsel %vm1622_vm1, %v1666_v62, %v1668_v5  ;;  %v1671_v30 = vsel %vm1622_vm1, %v1668_v5, %v1670_v31  ;;  %v1678_v16 = vrot.slane %v4204_v14, 1  ;;  %v3267_v36 = vld [vmem:[%s3101_s6 + $0x70] sm:$0xff]   ;;  %v420_v14 = vld [vmem:[%s3358_s30 + $0x8] sm:$0xf]  ;;  %s4268_s19 = smov (%p401_p12, %s406_s19), 2143289344 }
  0x27   : > { %v1767_v7 = vsel %vm3177_vm3, 0.0, %v1671_v30  ;;  %v1646_v33 = vrot.slane %v4201_v55, 1  ;;  %v626_v56 = vunpack.c.l.bf16 %v3235_v61  ;;  %v1796_v57 = vpack.c.bf16 %v1675_v23, %v1673_v47 }
  0x28   : > { %v1795_v62 = vpack.c.bf16 %v1767_v7, %v1669_v53  ;;  %v1677_v31 = vsel %vm1622_vm1, %v1674_v50, %v1676_v19  ;;  %v610_v58 = vunpack.c.l.bf16 %v3238_v44  ;;  %v1679_v37 = vsel %vm1622_vm1, %v1676_v19, %v1678_v16 }
  0x29   : > { %v1647_v45 = vsel %vm1622_vm1, %v1644_v26, %v1646_v33  ;;  %v627_v48 = vunpack.c.h.bf16 %v3235_v61  ;;  %v3283_v50 = vrot.slane %v607_v0, 7  ;;  %v1771_v47 = vsel %vm3201_vm4, 0.0, %v1679_v37 }
  0x2a   : > { %1872 = vrot.lane.b32.xlu1 %v1788_v17, %s2997_s10  ;;  %1870 = vrot.lane.b32.xlu0 %v1787_v40, %s2997_s10  ;;  %v4202_v17 = vunpack.c.h.bf16 %v3196_v13  ;;  %v1645_v5 = vsel %vm1622_vm1, %v1642_v15, %v1644_v26  ;;  %v1755_v19 = vsel %vm3210_vm5, 0.0, %v1647_v45  ;;  %v1797_v40 = vpack.c.bf16 %v1771_v47, %v1677_v31  ;;  %v3335_v47 = vld [vmem:[%s3101_s6 + $0x38] sm:$0xff]   ;;  %s431_s6 = sand.u32 4294901760, %s430_s25  ;;  %s409_s25 = sshrl.u32 %s4268_s19, 16 }
  0x2b   : > { %v3292_v23 = vrot.slane %v626_v56, 7  ;;  %v611_v53 = vunpack.c.h.bf16 %v3238_v44  ;;  %v1682_v0 = vrot.slane %v626_v56, 1  ;;  %v4199_v34 = vunpack.c.h.bf16 %v3206_v35  ;;  %s4266_s6 = smov (%p426_p10, %s431_s6), 2143289344  ;;  %s410_s27 = sshll.u32 %s409_s25, 16 }
  0x2c   : > { %v1680_v46 = vrot.slane %v4202_v17, 1  ;;  %v1650_v30 = vrot.slane %v610_v58, 1  ;;  %v4198_v15 = vunpack.c.l.bf16 %v3267_v36  ;;  %v1789_v26 = vpack.c.bf16 %v1755_v19, %v1645_v5  ;;  %s434_s11 = sshrl.u32 %s4266_s6, 16  ;;  %s346_s6 = sadd.s32 %s3069_s26, %s4272_s29 }
  0x2d   : > { %v3305_v7 = vrot.slane %v627_v48, 7  ;;  %v1684_v31 = vrot.slane %v627_v48, 1  ;;  %v1648_v37 = vrot.slane %v4199_v34, 1  ;;  %v1652_v8 = vrot.slane %v611_v53, 1  ;;  %s435_s13 = sshll.u32 %s434_s11, 16  ;;  %s2711_s9 = sshll.u32 %s346_s6, 2 }
  0x2e   : > { %1888 = vrot.lane.b32.xlu1 %v1796_v57, %s2997_s10  ;;  %1886 = vrot.lane.b32.xlu0 %v1795_v62, %s2997_s10  ;;  %v4197_v57 = vunpack.c.l.bf16 %v3277_v22  ;;  %v3309_v56 = vsel %vm1622_vm1, %v1678_v16, %v1680_v46  ;;  %v1686_v62 = vrot.slane %v4198_v15, 1  ;;  %v3324_v48 = vsel %vm1622_vm1, %v1680_v46, %v1682_v0  ;;  %s436_s18 = sor.u32 %s435_s13, %s434_s11  ;;  %s348_s12 = scalar_lea.vmem %s4190_s0, %s2711_s9 }
  0x2f   : > { %v3340_v5 = vsel %vm1622_vm1, %v1646_v33, %v1648_v37  ;;  %v3343_v9 = vsel %vm1622_vm1, %v1648_v37, %v1650_v30  ;;  %v630_v19 = vunpack.c.l.bf16 %v3301_v25  ;;  %v3349_v46 = vrot.slane %v610_v58, 7 }
  0x30   : > { %v1654_v18 = vrot.slane %v4197_v57, 1  ;;  %v1687_v20 = vsel %vm1622_vm1, %v1684_v31, %v1686_v62  ;;  %v3360_v37 = vrot.slane %v611_v53, 7  ;;  %v1798_v58 = vpack.c.bf16 %v3324_v48, %v3309_v56  ;;  %v418_v57 = vld [vmem:[%s3358_s30] sm:$0xf] }
  0x31   : > { %v1775_v33 = vsel %vm3315_vm6, 0.0, %v1687_v20  ;;  %v614_v45 = vunpack.c.l.bf16 %v3335_v47  ;;  %v615_v53 = vunpack.c.h.bf16 %v3335_v47  ;;  %v4200_v20 = vunpack.c.h.bf16 %v3267_v36 }
  0x32   : > { %1890 = vrot.lane.b32.xlu1 %v1797_v40, %s2997_s10  ;;  %1874 = vrot.lane.b32.xlu0 %v1789_v26, %s2997_s10  ;;  %v1685_v40 = vsel %vm1622_vm1, %v1682_v0, %v1684_v31  ;;  %v1655_v2 = vsel %vm1622_vm1, %v1652_v8, %v1654_v18  ;;  %v1653_v26 = vsel %vm1622_vm1, %v1650_v30, %v1652_v8  ;;  %v3382_v56 = vrot.slane %v630_v19, 1 }
  0x33   : > { %v1759_v0 = vsel %vm3328_vm7, 0.0, %v1655_v2  ;;  %v3379_v30 = vpack.c.bf16 %v1775_v33, %v1685_v40  ;;  %v631_v2 = vunpack.c.h.bf16 %v3301_v25  ;;  %v4203_v48 = vunpack.c.h.bf16 %v3277_v22 }
  0x34   : > { %v3391_v16 = vpack.c.bf16 %v1759_v0, %v1653_v26  ;;  %v3393_v8 = vrot.slane %v630_v19, 7  ;;  %v1688_v40 = vrot.slane %v4200_v20, 1  ;;  %v1658_v33 = vrot.slane %v614_v45, 1  ;;  %v419_v0 = vld [vmem:[%s3358_s30 + $0x4] sm:$0xf]  ;;  %s411_s30 = sor.u32 %s410_s27, %s409_s25  ;;  %s4082_s25 = scalar_lea.vmem %s4195_s5, %s3088_s28 }
  0x35   : > { %v3400_v15 = vrot.slane %v631_v2, 7  ;;  %v1656_v34 = vrot.slane %v4203_v48, 1  ;;  %v1660_v26 = vrot.slane %v615_v53, 1  ;;  %v3411_v20 = vrot.slane %v614_v45, 7 }
  0x36   : > { %1832 = vrot.lane.b32.xlu1 %v3196_v13, %s2996_s8  ;;  %1816 = vrot.lane.b32.xlu0 %v3206_v35, %s2996_s8  ;;  %v3414_v55 = vsel %vm1622_vm1, %v1686_v62, %v1688_v40  ;;  %v3418_v17 = vsel %vm1622_vm1, %v1688_v40, %v3382_v56  ;;  %v437_v48 = vstv %s436_s18  ;;  %v3425_v24 = vrot.slane %v615_v53, 7 }
  0x37   : > { %v3428_v45 = vsel %vm1622_vm1, %v1654_v18, %v1656_v34  ;;  %v3431_v62 = vsel %vm1622_vm1, %v1656_v34, %v1658_v33  ;;  %v439_v18 = vmul.bf16 %v437_v48, %v418_v57  ;;  %v440_v53 = vmul.bf16 %v437_v48, %v419_v0 }
  0x38   : > { %v677_v34 = vadd.s32 312, %v3064_v1  ;;  %v1800_v11 = vpack.c.bf16 %v3418_v17, %v3414_v55  ;;  %v1692_v27 = vrot.slane %v631_v2, 1  ;;  %v441_v12 = vmul.bf16 %v437_v48, %v420_v14 }
  0x39   : > { %v442_v31 = vmul.bf16 %v437_v48, %v421_v10  ;;  %v3453_v57 = vcombine.low %v439_v18, %v440_v53  ;;  %v3458_v0 = vsel %vm1319_vm0, %v3138_v38, %v3122_v28  ;;  %v4225_v28 = vpack.c.bf16 %v3343_v9, %v3340_v5 }
  0x3a   : > { %1834 = vrot.lane.b32.xlu1 %v3235_v61, %s2996_s8  ;;  %1818 = vrot.lane.b32.xlu0 %v3238_v44, %s2996_s8  ;;  %v1663_v61 = vsel %vm1622_vm1, %v1660_v26, %v3164_v49  ;;  %v1792_v49 = vpack.c.bf16 %v3431_v62, %v3428_v45  ;;  %v1661_v44 = vsel %vm1622_vm1, %v1658_v33, %v1660_v26  ;;  %v646_v19 = vadd.s32 64, %v3064_v1 }
  0x3b   : > { %v1763_v14 = vsel %vm3406_vm8, 0.0, %v1663_v61  ;;  %v3463_v2 = vcombine.low %v441_v12, %v442_v31  ;;  %v3473_v33 = vsel %vm1319_vm0, %v3128_v32, %v3138_v38  ;;  %v4207_v12 = vunpack.c.h.bf16 %v3453_v57 }
  0x3c   : > { %v955_v31 = vand.u32 31, %v677_v34  ;;  %v642_v10 = vadd.s32 32, %v3064_v1  ;;  %v1340_v5 = vsel %vm1319_vm0, %v3140_v39, %v3152_v42  ;;  %v738_v18 = vand.u32 31, %v646_v19 }
  0x3d   : > { %v4206_v26 = vunpack.c.l.bf16 %v3463_v2  ;;  %v4205_v38 = vunpack.c.h.bf16 %v3463_v2  ;;  %v1696_v61 = vrot.slane %v4207_v12, 1  ;;  %v1338_v53 = vsel %vm1319_vm0, %v3126_v29, %v3140_v39 }
  0x3e   : > { %1892 = vrot.lane.b32.xlu1 %v1798_v58, %s2997_s10  ;;  %1876 = vrot.lane.b32.xlu0 %v4225_v28, %s2997_s10  ;;  %v4208_v58 = vunpack.c.l.bf16 %v3453_v57  ;;  %v1693_v34 = vsel %vm1622_vm1, %v3382_v56, %v1692_v27  ;;  %v658_v19 = vadd.s32 160, %v3064_v1  ;;  %v3512_v29 = vpack.c.bf16 %v1763_v14, %v1661_v44 }
  0x3f   : > { %v1698_v28 = vrot.slane %v4206_v26, 1  ;;  %v1700_v48 = vrot.slane %v4205_v38, 1  ;;  %vm3515_vm10 = vcmp.eq.s32.totalorder %v955_v31, 31  ;;  %vm1166_vm11 = vcmp.eq.s32.totalorder %v738_v18, 0  ;;  %v396_v18 = vld [vmem:[%s348_s12 + $0xc] sm:$0xf] }
  0x40   : > { %v1694_v9 = vrot.slane %v4208_v58, 1  ;;  %v4228_v38 = vrot.slane %v3067_v3, 1  ;;  %v412_v12 = vstv %s411_s30  ;;  %v710_v58 = vand.u32 31, %v642_v10 }
  0x41   : > { %v1701_v44 = vsel %vm1622_vm1, %v1698_v28, %v1700_v48  ;;  %v1449_v14 = vsel %vm1166_vm11, 0.0, %v1338_v53  ;;  %v1362_v40 = vsel %vm1319_vm0, %v3425_v24, %v3154_v43  ;;  %v662_v10 = vadd.s32 192, %v3064_v1 }
  0x42   : > { %1894 = vrot.lane.b32.xlu1 %v3379_v30, %s2997_s10  ;;  %1878 = vrot.lane.b32.xlu0 %v3391_v16, %s2997_s10  ;;  %v1695_v39 = vsel %vm1622_vm1, %v1692_v27, %v1694_v9  ;;  %v3520_v56 = vsel %vm1622_vm1, %v1694_v9, %v1696_v61  ;;  %v1703_v26 = vsel %vm1622_vm1, %v1700_v48, %v4228_v38  ;;  %v822_v38 = vand.u32 31, %v658_v19  ;;  %v394_v30 = vld [vmem:[%s348_s12 + $0x4] sm:$0xf] }
  0x43   : > { %v1779_v16 = vsel %vm3435_vm9, 0.0, %v1695_v39  ;;  %v3528_v27 = vsel %vm1622_vm1, %v1696_v61, %v1698_v28  ;;  %v1783_v3 = vsel %vm3515_vm10, 0.0, %v1703_v26  ;;  %v3536_v31 = vpack.c.bf16 %v1340_v5, %v1449_v14 }
  0x44   : > { %v1364_v48 = vsel %vm1319_vm0, %v3154_v43, %v3166_v51  ;;  %v1370_v26 = vsel %vm1319_vm0, %v3183_v60, %v3168_v52  ;;  %v1372_v5 = vsel %vm1319_vm0, %v3168_v52, %v3171_v54  ;;  %vm3553_vm12 = vcmp.eq.s32.totalorder %v710_v58, 0  ;;  %v395_v58 = vld [vmem:[%s348_s12 + $0x8] sm:$0xf] }
  0x45   : > { %vm1178_vm13 = vcmp.eq.s32.totalorder %v822_v38, 0  ;;  %v3563_v43 = vsel %vm1319_vm0, %v3166_v51, %v3181_v59  ;;  %v3568_v61 = vsel %vm1319_vm0, %v3181_v59, %v3183_v60  ;;  %v3573_v52 = vsel %vm1319_vm0, %v3171_v54, %v3190_v63  ;;  %v393_v54 = vld [vmem:[%s348_s12] sm:$0xf] }
  0x46   : > { %1836 = vrot.lane.b32.xlu1 %v3267_v36, %s2996_s8  ;;  %1820 = vrot.lane.b32.xlu0 %v3277_v22, %s2996_s8  ;;  %v1461_v53 = vsel %vm1178_vm13, 0.0, %v1362_v40  ;;  %v850_v28 = vand.u32 31, %v662_v10  ;;  %v1492_v19 = vpack.c.bf16 %v3568_v61, %v3563_v43  ;;  %v3580_v51 = vsel %vm1319_vm0, %v3190_v63, %v3250_v21 }
  0x47   : > { %v416_v59 = vmul.bf16 %v412_v12, %v395_v58  ;;  %v417_v60 = vmul.bf16 %v412_v12, %v396_v18  ;;  %v3584_v39 = vpack.c.bf16 %v1364_v48, %v1461_v53  ;;  %v1494_v14 = vpack.c.bf16 %v3580_v51, %v3573_v52 }
  0x48   : > { %vm1182_vm14 = vcmp.eq.s32.totalorder %v850_v28, 0  ;;  %v414_v38 = vmul.bf16 %v412_v12, %v393_v54  ;;  %v415_v40 = vmul.bf16 %v412_v12, %v394_v30  ;;  %v3593_v63 = vsel %vm1319_vm0, %v3152_v42, %v3252_v6 }
  0x49   : > { %v1465_v48 = vsel %vm1182_vm14, 0.0, %v1370_v26  ;;  %v3600_v10 = vsel %vm1319_vm0, %v3252_v6, %v3283_v50  ;;  %v641_v58 = vadd.s32 24, %v3064_v1  ;;  %v1801_v18 = vpack.c.bf16 %v1779_v16, %v1693_v34 }
  0x4a   : > { %1838 = vrot.lane.b32.xlu1 %v3301_v25, %s2996_s8  ;;  %1822 = vrot.lane.b32.xlu0 %v3335_v47, %s2996_s8  ;;  %v3595_v25 = vcombine.low %v416_v59, %v417_v60  ;;  %v3603_v47 = vpack.c.bf16 %v1372_v5, %v1465_v48  ;;  %v3605_v53 = vcombine.low %v414_v38, %v415_v40  ;;  %v666_v28 = vadd.s32 224, %v3064_v1 }
  0x4b   : > { %v1486_v12 = vpack.c.bf16 %v3600_v10, %v3593_v63  ;;  %v703_v26 = vand.u32 31, %v641_v58  ;;  %v1802_v34 = vpack.c.bf16 %v3528_v27, %v3520_v56  ;;  %v1803_v16 = vpack.c.bf16 %v1783_v3, %v1701_v44 }
  0x4c   : > { %v599_v42 = vunpack.c.h.bf16 %v3595_v25  ;;  %v598_v6 = vunpack.c.l.bf16 %v3595_v25  ;;  %v596_v5 = vunpack.c.l.bf16 %v3605_v53  ;;  %v597_v55 = vunpack.c.h.bf16 %v3605_v53 }
  0x4d   : > { %vm3626_vm15 = vcmp.eq.s32.totalorder %v703_v26, 31  ;;  %v4234_v27 = vunpack.c.h.bf16 %v3196_v13  ;;  %v878_v38 = vand.u32 31, %v666_v28  ;;  %v4235_v26 = vunpack.c.l.bf16 %v3206_v35 }
  0x4e   : > { %1896 = vrot.lane.b32.xlu1 %v1800_v11, %s2997_s10  ;;  %1880 = vrot.lane.b32.xlu0 %v1792_v49, %s2997_s10  ;;  %v3624_v17 = vrot.slane %v599_v42, 7  ;;  %v1626_v59 = vrot.slane %v598_v6, 1  ;;  %v1628_v60 = vrot.slane %v599_v42, 1  ;;  %v1623_v45 = vrot.slane %v596_v5, 1 }
  0x4f   : > { %v1624_v62 = vrot.slane %v597_v55, 1  ;;  %v4233_v49 = vunpack.c.l.bf16 %v3196_v13  ;;  %v1379_v44 = vrot.slane %v4234_v27, 7  ;;  %vm1186_vm2 = vcmp.eq.s32.totalorder %v878_v38, 0 }
  0x50   : > { %v1330_v3 = vsel %vm1319_vm0, %v3624_v17, %v3128_v32  ;;  %v1629_v54 = vsel %vm1622_vm1, %v1626_v59, %v1628_v60  ;;  %v1631_v30 = vsel %vm1622_vm1, %v1628_v60, %v3193_v4  ;;  %v650_v42 = vadd.s32 96, %v3064_v1 }
  0x51   : > { %v1377_v56 = vrot.slane %v4233_v49, 7  ;;  %v1445_v40 = vsel %vm3553_vm12, 0.0, %v1330_v3  ;;  %v1747_v13 = vsel %vm3626_vm15, 0.0, %v1631_v30  ;;  %v3654_v48 = vsel %vm1622_vm1, %v1623_v45, %v1624_v62 }
  0x52   : > { %1898 = vrot.lane.b32.xlu1 %v1801_v18, %s2997_s10  ;;  %1882 = vrot.lane.b32.xlu0 %v3512_v29, %s2997_s10  ;;  %v3657_v32 = vsel %vm1622_vm1, %v1624_v62, %v1626_v59  ;;  %v3660_v58 = vpack.c.bf16 %v3473_v33, %v1445_v40  ;;  %v1785_v4 = vpack.c.bf16 %v1747_v13, %v1629_v54  ;;  %v1345_v28 = vrot.slane %v4235_v26, 7 }
  0x53   : > { %v1784_v18 = vpack.c.bf16 %v3657_v32, %v3654_v48  ;;  %v1378_v29 = vsel %vm1319_vm0, %v3250_v21, %v1377_v56  ;;  %v1380_v9 = vsel %vm1319_vm0, %v1377_v56, %v1379_v44  ;;  %v4236_v11 = vunpack.c.h.bf16 %v3206_v35 }
  0x54   : > { %v1469_v33 = vsel %vm1186_vm2, 0.0, %v1378_v29  ;;  %v3676_v60 = vsel %vm1319_vm0, %v1379_v44, %v3292_v23  ;;  %v3681_v21 = vsel %vm1319_vm0, %v3292_v23, %v3305_v7  ;;  %v766_v62 = vand.u32 31, %v650_v42 }
  0x55   : > { %v1347_v59 = vrot.slane %v4236_v11, 7  ;;  %v3685_v45 = vpack.c.bf16 %v1380_v9, %v1469_v33  ;;  %v1346_v49 = vsel %vm1319_vm0, %v3283_v50, %v1345_v28  ;;  %v1496_v35 = vpack.c.bf16 %v3681_v21, %v3676_v60 }
  0x56   : > { %1842 = vrot.lane.b32.xlu1 %v3463_v2, %s2996_s8  ;;  %1840 = vrot.lane.b32.xlu0 %v3453_v57, %s2996_s8  ;;  %v3699_v23 = vsel %vm1319_vm0, %v3349_v46, %v3360_v37  ;;  %v670_v44 = vadd.s32 256, %v3064_v1  ;;  %vm1170_vm1 = vcmp.eq.s32.totalorder %v766_v62, 0  ;;  %v4237_v3 = vunpack.c.l.bf16 %v3267_v36 }
  0x57   : > { %v1348_v56 = vsel %vm1319_vm0, %v1345_v28, %v1347_v59  ;;  %v3694_v27 = vsel %vm1319_vm0, %v1347_v59, %v3349_v46  ;;  %v4238_v30 = vunpack.c.h.bf16 %v3267_v36  ;;  %v1453_v40 = vsel %vm1170_vm1, 0.0, %v1346_v49 }
  0x58   : > { %v1488_v50 = vpack.c.bf16 %v3699_v23, %v3694_v27  ;;  %v1385_v54 = vrot.slane %v4237_v3, 7  ;;  %v906_v13 = vand.u32 31, %v670_v44  ;;  %v654_v29 = vadd.s32 128, %v3064_v1 }
  0x59   : > { %v1387_v38 = vrot.slane %v4238_v30, 7  ;;  %v4239_v46 = vunpack.c.l.bf16 %v3277_v22  ;;  %v3713_v42 = vpack.c.bf16 %v1348_v56, %v1453_v40  ;;  %v4240_v36 = vunpack.c.h.bf16 %v3277_v22 }
  0x5a   : > { %1902 = vrot.lane.b32.xlu1 %v1803_v16, %s2997_s10  ;;  %1900 = vrot.lane.b32.xlu0 %v1802_v34, %s2997_s10  ;;  %v1386_v26 = vsel %vm1319_vm0, %v3305_v7, %v1385_v54  ;;  %vm1190_vm3 = vcmp.eq.s32.totalorder %v906_v13, 0  ;;  %v794_v16 = vand.u32 31, %v654_v29  ;;  %v3730_v7 = vsel %vm1319_vm0, %v3393_v8, %v3400_v15 }
  0x5b   : > { %v1353_v9 = vrot.slane %v4239_v46, 7  ;;  %v1388_v28 = vsel %vm1319_vm0, %v1385_v54, %v1387_v38  ;;  %v1355_v33 = vrot.slane %v4240_v36, 7  ;;  %v3724_v59 = vsel %vm1319_vm0, %v1387_v38, %v3393_v8 }
  0x5c   : > { %v1473_v34 = vsel %vm1190_vm3, 0.0, %v1386_v26  ;;  %vm1174_vm4 = vcmp.eq.s32.totalorder %v794_v16, 0  ;;  %v1498_v49 = vpack.c.bf16 %v3730_v7, %v3724_v59  ;;  %v3745_v56 = vsel %vm1319_vm0, %v3411_v20, %v3425_v24 }
  0x5d   : > { %v1354_v11 = vsel %vm1319_vm0, %v3360_v37, %v1353_v9  ;;  %v1356_v62 = vsel %vm1319_vm0, %v1353_v9, %v1355_v33  ;;  %v3734_v22 = vsel %vm1319_vm0, %v1355_v33, %v3411_v20  ;;  %v3738_v37 = vpack.c.bf16 %v1388_v28, %v1473_v34 }
  0x5e   : > { %1806 = vrot.lane.b32.xlu1 %v3595_v25, %s2996_s8  ;;  %1804 = vrot.lane.b32.xlu0 %v3605_v53, %s2996_s8  ;;  %v1457_v8 = vsel %vm1174_vm4, 0.0, %v1354_v11  ;;  %v1490_v44 = vpack.c.bf16 %v3745_v56, %v3734_v22  ;;  %v674_v3 = vadd.s32 288, %v3064_v1  ;;  %v4241_v54 = vunpack.c.l.bf16 %v3453_v57  ;;  %s2998_s8 = smov 9  }
  0x5f   : > { %v3754_v38 = vpack.c.bf16 %v1356_v62, %v1457_v8  ;;  %v4242_v40 = vunpack.c.h.bf16 %v3453_v57  ;;  %v4243_v20 = vunpack.c.l.bf16 %v3463_v2  ;;  %v4244_v29 = vunpack.c.h.bf16 %v3463_v2 }
  0x60   : > { %v1393_v30 = vrot.slane %v4241_v54, 7  ;;  %v934_v9 = vand.u32 31, %v674_v3  ;;  %v1321_v11 = vrot.slane %v596_v5, 7  ;;  %v1323_v34 = vrot.slane %v597_v55, 7 }
  0x61   : > { %v1395_v13 = vrot.slane %v4242_v40, 7  ;;  %v1397_v24 = vrot.slane %v4243_v20, 7  ;;  %v1399_v46 = vrot.slane %v4244_v29, 7  ;;  %v1325_v62 = vrot.slane %v598_v6, 7 }
  0x62   : > { %v1394_v26 = vsel %vm1319_vm0, %v3400_v15, %v1393_v30  ;;  %1866 = vrot.lane.b32.xlu1 %v1785_v4, %s2997_s10  ;;  %1864 = vrot.lane.b32.xlu0 %v1784_v18, %s2997_s10  ;;  %vm1194_vm5 = vcmp.eq.s32.totalorder %v934_v9, 0  ;;  %v4245_v4 = vmov 0   ;;  %v682_v48 = vand.u32 31, %v3064_v1  ;;  %s2999_s10 = smov 18  }
  0x63   : > { %v1396_v28 = vsel %vm1319_vm0, %v1393_v30, %v1395_v13  ;;  %v3767_v36 = vsel %vm1319_vm0, %v1395_v13, %v1397_v24  ;;  %v3770_v57 = vsel %vm1319_vm0, %v1397_v24, %v1399_v46  ;;  %v1477_v15 = vsel %vm1194_vm5, 0.0, %v1394_v26 }
  0x64   : > { %v1500_v2 = vpack.c.bf16 %v3770_v57, %v3767_v36  ;;  %v3778_v33 = vpack.c.bf16 %v1396_v28, %v1477_v15  ;;  %v595_v16 = vunpack.c.h.bf16 %v4245_v4  ;;  %v1324_v18 = vsel %vm1319_vm0, %v1321_v11, %v1323_v34 }
  0x65   : > { %v3790_v8 = vsel %vm1319_vm0, %v1323_v34, %v1325_v62  ;;  %v3794_v3 = vsel %vm1319_vm0, %v1325_v62, %v3624_v17  ;;  %vm1158_vm6 = vcmp.eq.s32.totalorder %v682_v48, 0  ;;  %vm1904_vm7 = vcmask 23552  }
  0x66   : > { %v1320_v32 = vrot.slane %v595_v16, 7  ;;  %v1482_v53 = vpack.c.bf16 %v3794_v3, %v3790_v8  ;;  %v4246_v55 = vpack.c.bf16 %v3150_v41, %v3458_v0  ;;  %vm2209_vm8 = vcmask 1044480  }
  0x67   : > { %vm2210_vm9 = vcmask 1045504   ;;  %vm2088_vm10 = vcmask 72704   ;;  %vm2121_vm11 = vcmask 146432   ;;  %vm2176_vm12 = vcmask 220160  }
  0x68   : > { %v1322_v5 = vsel %vm1319_vm0, %v1320_v32, %v1321_v11  ;;  %vm1965_vm0 = vcmask 48128   ;;  %vm2537_vm13 = vcmask 519168  }
  0x69   : > { %v1441_v25 = vsel %vm1158_vm6, 0.0, %v1322_v5 }
  0x6a   : > { %v3799_v6 = vpack.c.bf16 %v1324_v18, %v1441_v25 }
  0x88   : > { %v1811_v1 = vpop.permute.xlu1 %1810  ;;  %v1809_v30 = vpop.permute.xlu0 %1808 }
  0x89   : > { %v3805_v54 = vsel %vm1904_vm7, %v4246_v55, %v1811_v1  ;;  %v1913_v41 = vsel %vm1904_vm7, %v3660_v58, %v1809_v30 }
  0x8c   : > { %v1813_v17 = vpop.permute.xlu1 %1812  ;;  %v1825_v40 = vpop.permute.xlu0 %1824 }
  0x8d   : > { %v1937_v46 = vsel %vm1904_vm7, %v3584_v39, %v1825_v40  ;;  %v1919_v39 = vsel %vm1904_vm7, %v3536_v31, %v1813_v17 }
  0x90   : > { %v1829_v13 = vpop.permute.xlu1 %1828  ;;  %v3807_v20 = vpop.permute.xlu0 %1826 }
  0x91   : > { %v1943_v16 = vsel %vm1904_vm7, %v3603_v47, %v1829_v13  ;;  %v1940_v59 = vsel %vm1904_vm7, %v1492_v19, %v3807_v20 }
  0x94   : > { %v3809_v24 = vpop.permute.xlu1 %1830  ;;  %v3811_v29 = vpop.permute.xlu0 %1814 }
  0x95   : > { %v1946_v19 = vsel %vm1904_vm7, %v1494_v14, %v3809_v24  ;;  %v1922_v36 = vsel %vm1904_vm7, %v1486_v12, %v3811_v29 }
  0x98   : > { %v1885_v9 = vpop.permute.xlu1 %1884  ;;  %v1869_v0 = vpop.permute.xlu0 %1868 }
  0x99   : > { %v3818_v26 = vsel %vm1965_vm0, %v1937_v46, %v1885_v9  ;;  %v3823_v28 = vsel %vm1965_vm0, %v1913_v41, %v1869_v0  ;;  %v2953_v9 = vld [vmem:[%s4193_s3] sm:$0xff]   ;;  %v2954_v41 = vld [vmem:[%s4193_s3 + $0x8] sm:$0x3f]   ;;  %v3000_v0 = vmov 65535  }
  0x9a   : > { %2038 = vrot.lane.b32.xlu1 %v3818_v26, %s2998_s8  ;;  %2022 = vrot.lane.b32.xlu0 %v3823_v28, %s2998_s8 }
  0x9b   : > { %2851 = vmatprep.subr.bf16.mxu0 %v2953_v9  ;;  %2887 = vmatprep.subr.bf16.mxu1 %v2953_v9 }
  0x9c   : > { %v1873_v15 = vpop.permute.xlu1 %1872  ;;  %v3829_v4 = vpop.permute.xlu0 %1870  ;;  %2852 = vmatpush3.bf16.msra.mxu0 %v2953_v9  ;;  %2889 = vmatpush3.bf16.msra.mxu1 %v2953_v9 }
  0x9d   : > { %v3832_v58 = vsel %vm1965_vm0, %v1919_v39, %v1873_v15  ;;  %v2211_v39 = vsel %vm2209_vm8, 4294967295, %v3000_v0  ;;  %v3922_v56 = vsel %vm1965_vm0, %v3805_v54, %v3829_v4 }
  0x9e   : > { %2056 = vrot.lane.b32.xlu0 %v3832_v58, %s2999_s10 }
  0xa0   : > { %v1889_v11 = vpop.permute.xlu1 %1888  ;;  %v1887_v34 = vpop.permute.xlu0 %1886 }
  0xa1   : > { %v3839_v62 = vsel %vm1965_vm0, %v1943_v16, %v1889_v11  ;;  %v2212_v16 = vsel %vm2210_vm9, %v2211_v39, 0  ;;  %v3915_v22 = vsel %vm1965_vm0, %v1940_v59, %v1887_v34 }
  0xa2   : > { %2072 = vrot.lane.b32.xlu1 %v3839_v62, %s2999_s10  ;;  %2026 = vrot.lane.b32.xlu0 %v3832_v58, %s2998_s8 }
  0xa4   : > { %v3845_v31 = vpop.permute.xlu1 %1890  ;;  %v3847_v48 = vpop.permute.xlu0 %1874 }
  0xa5   : > { %v3944_v57 = vsel %vm1965_vm0, %v1946_v19, %v3845_v31  ;;  %v3951_v52 = vsel %vm1965_vm0, %v1922_v36, %v3847_v48 }
  0xa6   : > { %2042 = vrot.lane.b32.xlu1 %v3839_v62, %s2998_s8 }
  0xa8   : > { %v1833_v32 = vpop.permute.xlu1 %1832  ;;  %v1817_v47 = vpop.permute.xlu0 %1816 }
  0xa9   : > { %v1949_v25 = vsel %vm1904_vm7, %v3685_v45, %v1833_v32  ;;  %v1925_v55 = vsel %vm1904_vm7, %v3713_v42, %v1817_v47  ;;  %v2214_v32 = vand.u32 %v2954_v41, %v2212_v16 }
  0xab   : > { %2853 = vmatprep.subr.bf16.mxu0 %v2214_v32  ;;  %2888 = vmatprep.subr.bf16.mxu1 %v2214_v32 }
  0xac   : > { %v3851_v18 = vpop.permute.xlu1 %1834  ;;  %v3853_v5 = vpop.permute.xlu0 %1818  ;;  %2854 = vmatpush3.bf16.msra.mxu0 %v2214_v32  ;;  %2890 = vmatpush3.bf16.msra.mxu1 %v2214_v32 }
  0xad   : > { %v1952_v54 = vsel %vm1904_vm7, %v1496_v35, %v3851_v18  ;;  %v1928_v8 = vsel %vm1904_vm7, %v1488_v50, %v3853_v5 }
  0xb0   : > { %v1893_v1 = vpop.permute.xlu1 %1892  ;;  %v1877_v30 = vpop.permute.xlu0 %1876 }
  0xb1   : > { %v3860_v17 = vsel %vm1965_vm0, %v1949_v25, %v1893_v1  ;;  %v3865_v40 = vsel %vm1965_vm0, %v1925_v55, %v1877_v30 }
  0xb2   : > { %2076 = vrot.lane.b32.xlu1 %v3860_v17, %s2999_s10  ;;  %2060 = vrot.lane.b32.xlu0 %v3865_v40, %s2999_s10 }
  0xb4   : > { %v3869_v13 = vpop.permute.xlu1 %1894  ;;  %v3871_v45 = vpop.permute.xlu0 %1878 }
  0xb5   : > { %v3978_v3 = vsel %vm1965_vm0, %v1952_v54, %v3869_v13  ;;  %v3985_v60 = vsel %vm1965_vm0, %v1928_v8, %v3871_v45 }
  0xb6   : > { %2046 = vrot.lane.b32.xlu1 %v3860_v17, %s2998_s8  ;;  %2030 = vrot.lane.b32.xlu0 %v3865_v40, %s2998_s8 }
  0xb8   : > { %v1837_v42 = vpop.permute.xlu1 %1836  ;;  %v1821_v46 = vpop.permute.xlu0 %1820 }
  0xb9   : > { %v1955_v47 = vsel %vm1904_vm7, %v3738_v37, %v1837_v42  ;;  %v1931_v1 = vsel %vm1904_vm7, %v3754_v38, %v1821_v46 }
  0xbc   : > { %v1839_v15 = vpop.permute.xlu1 %1838  ;;  %v1823_v11 = vpop.permute.xlu0 %1822 }
  0xbd   : > { %v1958_v37 = vsel %vm1904_vm7, %v1498_v49, %v1839_v15  ;;  %v1934_v38 = vsel %vm1904_vm7, %v1490_v44, %v1823_v11 }
  0xc0   : > { %v1897_v25 = vpop.permute.xlu1 %1896  ;;  %v1881_v55 = vpop.permute.xlu0 %1880 }
  0xc1   : > { %v1999_v30 = vsel %vm1965_vm0, %v1955_v47, %v1897_v25  ;;  %v3890_v9 = vsel %vm1965_vm0, %v1931_v1, %v1881_v55 }
  0xc2   : > { %2080 = vrot.lane.b32.xlu1 %v1999_v30, %s2999_s10  ;;  %2064 = vrot.lane.b32.xlu0 %v3890_v9, %s2999_s10 }
  0xc4   : > { %v1899_v42 = vpop.permute.xlu1 %1898  ;;  %v1883_v46 = vpop.permute.xlu0 %1882 }
  0xc5   : > { %v2001_v41 = vsel %vm1965_vm0, %v1958_v37, %v1899_v42  ;;  %v3905_v0 = vsel %vm1965_vm0, %v1934_v38, %v1883_v46 }
  0xc6   : > { %2050 = vrot.lane.b32.xlu1 %v1999_v30, %s2998_s8  ;;  %2034 = vrot.lane.b32.xlu0 %v3890_v9, %s2998_s8 }
  0xc8   : > { %v1843_v7 = vpop.permute.xlu1 %1842  ;;  %v1841_v49 = vpop.permute.xlu0 %1840 }
  0xc9   : > { %v1964_v43 = vsel %vm1904_vm7, %v1500_v2, %v1843_v7  ;;  %v1961_v61 = vsel %vm1904_vm7, %v3778_v33, %v1841_v49 }
  0xca   : > { %2040 = vrot.lane.b32.xlu1 %v3915_v22, %s2998_s8  ;;  %2024 = vrot.lane.b32.xlu0 %v3922_v56, %s2998_s8 }
  0xcc   : > { %v1903_v44 = vpop.permute.xlu1 %1902  ;;  %v1901_v2 = vpop.permute.xlu0 %1900 }
  0xcd   : > { %v2005_v33 = vsel %vm1965_vm0, %v1964_v43, %v1903_v44  ;;  %v2003_v51 = vsel %vm1965_vm0, %v1961_v61, %v1901_v2 }
  0xce   : > { %2074 = vrot.lane.b32.xlu1 %v3944_v57, %s2999_s10  ;;  %2058 = vrot.lane.b32.xlu0 %v3951_v52, %s2999_s10 }
  0xd0   : > { %v1807_v14 = vpop.permute.xlu1 %1806  ;;  %v1805_v63 = vpop.permute.xlu0 %1804 }
  0xd1   : > { %v1910_v10 = vsel %vm1904_vm7, %v1482_v53, %v1807_v14  ;;  %v1907_v12 = vsel %vm1904_vm7, %v3799_v6, %v1805_v63 }
  0xd2   : > { %2044 = vrot.lane.b32.xlu1 %v3944_v57, %s2998_s8  ;;  %2028 = vrot.lane.b32.xlu0 %v3951_v52, %s2998_s8 }
  0xd4   : > { %v1867_v20 = vpop.permute.xlu1 %1866  ;;  %v1865_v6 = vpop.permute.xlu0 %1864 }
  0xd5   : > { %v1969_v53 = vsel %vm1965_vm0, %v1910_v10, %v1867_v20  ;;  %v1967_v21 = vsel %vm1965_vm0, %v1907_v12, %v1865_v6 }
  0xd6   : > { %2078 = vrot.lane.b32.xlu1 %v3978_v3, %s2999_s10  ;;  %2062 = vrot.lane.b32.xlu0 %v3985_v60, %s2999_s10 }
  0xda   : > { %2048 = vrot.lane.b32.xlu1 %v3978_v3, %s2998_s8  ;;  %2032 = vrot.lane.b32.xlu0 %v3985_v60, %s2998_s8 }
  0xde   : > { %2084 = vrot.lane.b32.xlu1 %v2003_v51, %s2999_s10  ;;  %2066 = vrot.lane.b32.xlu0 %v3905_v0, %s2999_s10 }
  0xe2   : > { %2082 = vrot.lane.b32.xlu1 %v2001_v41, %s2999_s10  ;;  %2036 = vrot.lane.b32.xlu0 %v3905_v0, %s2998_s8 }
  0xe6   : > { %2052 = vrot.lane.b32.xlu1 %v2001_v41, %s2998_s8  ;;  %2068 = vrot.lane.b32.xlu0 %v3818_v26, %s2999_s10 }
  0xea   : > { %2086 = vrot.lane.b32.xlu1 %v2005_v33, %s2999_s10  ;;  %2070 = vrot.lane.b32.xlu0 %v3915_v22, %s2999_s10 }
 0x10c   : > { %v2023_v35 = vpop.permute.xlu0 %2022  ;;  %v2039_v27 = vpop.permute.xlu1 %2038 }
 0x10d   : > { %v2090_v23 = vsel %vm2088_vm10, %v1967_v21, %v2023_v35  ;;  %v2106_v29 = vsel %vm2088_vm10, %v3890_v9, %v2039_v27 }
 0x110   : > { %v2057_v50 = vpop.permute.xlu0 %2056 }
 0x111   : > { %v2123_v24 = vsel %vm2121_vm11, %v2090_v23, %v2057_v50 }
 0x112   : > { %2855 = vmatprep.mubr.msk.bf16.mxu0 %vm2176_vm12, %v2123_v24 }
 0x114   : > { %v2073_v4 = vpop.permute.xlu1 %2072  ;;  %v2027_v48 = vpop.permute.xlu0 %2026 }
 0x115   : > { %v2139_v34 = vsel %vm2121_vm11, %v2106_v29, %v2073_v4  ;;  %v2094_v42 = vsel %vm2088_vm10, %v3823_v28, %v2027_v48 }
 0x116   : > { %2871 = vmatprep.mubr.msk.bf16.mxu1 %vm2176_vm12, %v2139_v34 }
 0x118   : > { %v2043_v31 = vpop.permute.xlu1 %2042 }
 0x119   : > { %v2110_v55 = vsel %vm2088_vm10, %v3818_v26, %v2043_v31 }
 0x124   : > { %v2077_v18 = vpop.permute.xlu1 %2076  ;;  %v2061_v5 = vpop.permute.xlu0 %2060 }
 0x125   : > { %v2143_v38 = vsel %vm2121_vm11, %v2110_v55, %v2077_v18  ;;  %v2127_v41 = vsel %vm2121_vm11, %v2094_v42, %v2061_v5 }
 0x128   : > { %v2047_v13 = vpop.permute.xlu1 %2046  ;;  %v2031_v45 = vpop.permute.xlu0 %2030 }
 0x129   : > { %v2114_v7 = vsel %vm2088_vm10, %v3839_v62, %v2047_v13  ;;  %v2098_v19 = vsel %vm2088_vm10, %v3832_v58, %v2031_v45 }
 0x134   : > { %v2081_v39 = vpop.permute.xlu1 %2080  ;;  %v2065_v15 = vpop.permute.xlu0 %2064 }
 0x135   : > { %v2147_v44 = vsel %vm2121_vm11, %v2114_v7, %v2081_v39 }
 0x138   : > { %v2051_v16 = vpop.permute.xlu1 %2050  ;;  %v2035_v11 = vpop.permute.xlu0 %2034 }
 0x139   : > { %v2118_v10 = vsel %vm2088_vm10, %v3860_v17, %v2051_v16  ;;  %v2102_v8 = vsel %vm2088_vm10, %v3865_v40, %v2035_v11  ;;  %v4071_v40 = vld [vmem:[%s4194_s4] ss:$0 sm:$0xff] }
 0x13c   : > { %v2041_v32 = vpop.permute.xlu1 %2040  ;;  %v2025_v47 = vpop.permute.xlu0 %2024 }
 0x13d   : > { %v2108_v25 = vsel %vm2088_vm10, %v3905_v0, %v2041_v32  ;;  %v2092_v30 = vsel %vm2088_vm10, %v1969_v53, %v2025_v47 }
 0x140   : > { %v2075_v1 = vpop.permute.xlu1 %2074  ;;  %v2059_v37 = vpop.permute.xlu0 %2058 }
 0x141   : > { %v2141_v9 = vsel %vm2121_vm11, %v2108_v25, %v2075_v1  ;;  %v2125_v46 = vsel %vm2121_vm11, %v2092_v30, %v2059_v37 }
 0x142   : > { %2872 = vmatmul.mubr.msk.bf16.vlgmr.msra.gmra.mrb[0].mxu1 %vm2176_vm12, %v2141_v9  ;;  %2856 = vmatmul.mubr.msk.bf16.vlgmr.msra.gmra.mrb[0].mxu0 %vm2176_vm12, %v2125_v46 }
 0x143   : > { %2875 = vmatprep.mubr.msk.bf16.mxu1 %vm2176_vm12, %v2143_v38  ;;  %2859 = vmatprep.mubr.msk.bf16.mxu0 %vm2176_vm12, %v2127_v41 }
 0x144   : > { %v2045_v26 = vpop.permute.xlu1 %2044  ;;  %v2029_v0 = vpop.permute.xlu0 %2028 }
 0x145   : > { %v2112_v59 = vsel %vm2088_vm10, %v3915_v22, %v2045_v26  ;;  %v2096_v49 = vsel %vm2088_vm10, %v3922_v56, %v2029_v0  ;;  %v2131_v22 = vsel %vm2121_vm11, %v2098_v19, %v2065_v15 }
 0x148   : > { %v2079_v28 = vpop.permute.xlu1 %2078  ;;  %v2063_v61 = vpop.permute.xlu0 %2062 }
 0x149   : > { %v2145_v43 = vsel %vm2121_vm11, %v2112_v59, %v2079_v28  ;;  %v2129_v36 = vsel %vm2121_vm11, %v2096_v49, %v2063_v61 }
 0x14a   : > { %2876 = vmatmul.mubr.msk.bf16.gmra.mrb[4].mxu1 %vm2176_vm12, %v2145_v43  ;;  %2860 = vmatmul.mubr.msk.bf16.gmra.mrb[4].mxu0 %vm2176_vm12, %v2129_v36 }
 0x14b   : > { %2879 = vmatprep.mubr.msk.bf16.mxu1 %vm2176_vm12, %v2147_v44  ;;  %2863 = vmatprep.mubr.msk.bf16.mxu0 %vm2176_vm12, %v2131_v22 }
 0x14c   : > { %v2049_v62 = vpop.permute.xlu1 %2048  ;;  %v2033_v56 = vpop.permute.xlu0 %2032 }
 0x14d   : > { %v2100_v58 = vsel %vm2088_vm10, %v3951_v52, %v2033_v56  ;;  %v2116_v14 = vsel %vm2088_vm10, %v3944_v57, %v2049_v62 }
 0x150   : > { %v2085_v2 = vpop.permute.xlu1 %2084  ;;  %v2067_v33 = vpop.permute.xlu0 %2066 }
 0x151   : > { %v2133_v51 = vsel %vm2121_vm11, %v2100_v58, %v2067_v33  ;;  %v2151_v20 = vsel %vm2121_vm11, %v2118_v10, %v2085_v2 }
 0x152   : > { %2864 = vmatmul.mubr.msk.bf16.gmra.mrb[8].mxu0 %vm2176_vm12, %v2133_v51 }
 0x154   : > { %v2083_v63 = vpop.permute.xlu1 %2082  ;;  %v2037_v54 = vpop.permute.xlu0 %2036 }
 0x155   : > { %v2149_v12 = vsel %vm2121_vm11, %v2116_v14, %v2083_v63  ;;  %v2104_v21 = vsel %vm2088_vm10, %v3985_v60, %v2037_v54 }
 0x156   : > { %2880 = vmatmul.mubr.msk.bf16.gmra.mrb[8].mxu1 %vm2176_vm12, %v2149_v12 }
 0x157   : > { %2883 = vmatprep.mubr.msk.bf16.mxu1 %vm2176_vm12, %v2151_v20 }
 0x158   : > { %v2053_v52 = vpop.permute.xlu1 %2052  ;;  %v2069_v53 = vpop.permute.xlu0 %2068 }
 0x159   : > { %v2135_v57 = vsel %vm2121_vm11, %v2102_v8, %v2069_v53  ;;  %v2120_v17 = vsel %vm2088_vm10, %v3978_v3, %v2053_v52 }
 0x15a   : > { %2867 = vmatprep.mubr.msk.bf16.mxu0 %vm2176_vm12, %v2135_v57 }
 0x15c   : > { %v2087_v6 = vpop.permute.xlu1 %2086  ;;  %v2071_v27 = vpop.permute.xlu0 %2070 }
 0x15d   : > { %v2153_v35 = vsel %vm2121_vm11, %v2120_v17, %v2087_v6  ;;  %v2137_v23 = vsel %vm2121_vm11, %v2104_v21, %v2071_v27 }
 0x15e   : > { %2884 = vmatmul.mubr.msk.bf16.gmra.mrb[12].mxu1 %vm2176_vm12, %v2153_v35  ;;  %2868 = vmatmul.mubr.msk.bf16.gmra.mrb[12].mxu0 %vm2176_vm12, %v2137_v23 }
 0x215   : > { %v2873_v3 = vpop.f32.mrb[0].mxu1  ;;  %v2857_v50 = vpop.f32.mrb[0].mxu0 }
 0x216   : > { %v2323_v24 = vadd.f32 %v2873_v3, %v4071_v40  ;;  %v2314_v60 = vpop.f32.mrb[1].mxu1  ;;  %v2259_v29 = vadd.f32 %v2857_v50, %v4071_v40  ;;  %v2250_v4 = vpop.f32.mrb[1].mxu0 }
 0x217   : > { %v2315_v34 = vadd.f32 %v4071_v40, %v2314_v60  ;;  %v2874_v31 = vpop.f32.mrb[2].mxu1  ;;  %v2251_v18 = vadd.f32 %v4071_v40, %v2250_v4  ;;  %v2858_v5 = vpop.f32.mrb[2].mxu0 }
 0x218   : > { %v2395_v48 = vmax.f32 %v2323_v24, 0.0  ;;  %v2326_v13 = vadd.f32 %v2874_v31, %v4071_v40  ;;  %v2317_v45 = vpop.f32.mrb[3].mxu1  ;;  %v2379_v39 = vmax.f32 %v2259_v29, 0.0  ;;  %v2262_v16 = vadd.f32 %v2858_v5, %v4071_v40  ;;  %v2253_v11 = vpop.f32.mrb[3].mxu0 }
 0x219   : > { %v2393_v15 = vmax.f32 %v2315_v34, 0.0  ;;  %v2318_v32 = vadd.f32 %v4071_v40, %v2317_v45  ;;  %v2377_v25 = vmax.f32 %v2251_v18, 0.0  ;;  %v2254_v55 = vadd.f32 %v4071_v40, %v2253_v11 }
 0x21a   : > { %v2819_v47 = vpack.c.bf16 %v2395_v48, %v2395_v48  ;;  %v2396_v1 = vmax.f32 %v2326_v13, 0.0  ;;  %v2803_v30 = vpack.c.bf16 %v2379_v39, %v2379_v39  ;;  %v2380_v37 = vmax.f32 %v2262_v16, 0.0 }
 0x21b   : > { %v2817_v9 = vpack.c.bf16 %v2393_v15, %v2393_v15  ;;  %v2394_v42 = vmax.f32 %v2318_v32, 0.0  ;;  %v2801_v38 = vpack.c.bf16 %v2377_v25, %v2377_v25  ;;  %v2378_v41 = vmax.f32 %v2254_v55, 0.0 }
 0x21c   : > { %2556 = vst.msk [vmem:[%s4082_s25 + $0x48] sm:$0xf] %vm2537_vm13, %v2819_v47  ;;  %v2820_v46 = vpack.c.bf16 %v2396_v1, %v2396_v1  ;;  %2540 = vst.msk [vmem:[%s4082_s25 + $0x8] sm:$0xf] %vm2537_vm13, %v2803_v30  ;;  %v2804_v26 = vpack.c.bf16 %v2380_v37, %v2380_v37 }
 0x21d   : > { %2554 = vst.msk [vmem:[%s4082_s25 + $0x40] sm:$0xf] %vm2537_vm13, %v2817_v9  ;;  %v2818_v0 = vpack.c.bf16 %v2394_v42, %v2394_v42  ;;  %v2877_v59 = vpop.f32.mrb[4].mxu1  ;;  %2538 = vst.msk [vmem:[%s4082_s25] sm:$0xf] %vm2537_vm13, %v2801_v38  ;;  %v2802_v28 = vpack.c.bf16 %v2378_v41, %v2378_v41  ;;  %v2861_v7 = vpop.f32.mrb[4].mxu0 }
 0x21e   : > { %2557 = vst.msk [vmem:[%s4082_s25 + $0x4c] sm:$0xf] %vm2537_vm13, %v2820_v46  ;;  %v2339_v49 = vadd.f32 %v2877_v59, %v4071_v40  ;;  %v2330_v43 = vpop.f32.mrb[5].mxu1  ;;  %2541 = vst.msk [vmem:[%s4082_s25 + $0xc] sm:$0xf] %vm2537_vm13, %v2804_v26  ;;  %v2275_v61 = vadd.f32 %v2861_v7, %v4071_v40  ;;  %v2266_v19 = vpop.f32.mrb[5].mxu0 }
 0x21f   : > { %2555 = vst.msk [vmem:[%s4082_s25 + $0x44] sm:$0xf] %vm2537_vm13, %v2818_v0  ;;  %v2331_v44 = vadd.f32 %v4071_v40, %v2330_v43  ;;  %v2878_v36 = vpop.f32.mrb[6].mxu1  ;;  %2539 = vst.msk [vmem:[%s4082_s25 + $0x4] sm:$0xf] %vm2537_vm13, %v2802_v28  ;;  %v2267_v62 = vadd.f32 %v4071_v40, %v2266_v19  ;;  %v2862_v56 = vpop.f32.mrb[6].mxu0 }
 0x220   : > { %v2399_v22 = vmax.f32 %v2339_v49, 0.0  ;;  %v2342_v2 = vadd.f32 %v2878_v36, %v4071_v40  ;;  %v2333_v58 = vpop.f32.mrb[7].mxu1  ;;  %v2383_v33 = vmax.f32 %v2275_v61, 0.0  ;;  %v2278_v14 = vadd.f32 %v2862_v56, %v4071_v40  ;;  %v2269_v63 = vpop.f32.mrb[7].mxu0 }
 0x221   : > { %v2397_v51 = vmax.f32 %v2331_v44, 0.0  ;;  %v2334_v10 = vadd.f32 %v4071_v40, %v2333_v58  ;;  %v2381_v54 = vmax.f32 %v2267_v62, 0.0  ;;  %v2270_v52 = vadd.f32 %v4071_v40, %v2269_v63 }
 0x222   : > { %v2823_v12 = vpack.c.bf16 %v2399_v22, %v2399_v22  ;;  %v2400_v20 = vmax.f32 %v2342_v2, 0.0  ;;  %v2807_v8 = vpack.c.bf16 %v2383_v33, %v2383_v33  ;;  %v2384_v57 = vmax.f32 %v2278_v14, 0.0 }
 0x223   : > { %v2821_v53 = vpack.c.bf16 %v2397_v51, %v2397_v51  ;;  %v2398_v17 = vmax.f32 %v2334_v10, 0.0  ;;  %v2805_v6 = vpack.c.bf16 %v2381_v54, %v2381_v54  ;;  %v2382_v35 = vmax.f32 %v2270_v52, 0.0 }
 0x224   : > { %2560 = vst.msk [vmem:[%s4082_s25 + $0x58] sm:$0xf] %vm2537_vm13, %v2823_v12  ;;  %v2824_v21 = vpack.c.bf16 %v2400_v20, %v2400_v20  ;;  %2544 = vst.msk [vmem:[%s4082_s25 + $0x18] sm:$0xf] %vm2537_vm13, %v2807_v8  ;;  %v2808_v27 = vpack.c.bf16 %v2384_v57, %v2384_v57 }
 0x225   : > { %2558 = vst.msk [vmem:[%s4082_s25 + $0x50] sm:$0xf] %vm2537_vm13, %v2821_v53  ;;  %v2822_v23 = vpack.c.bf16 %v2398_v17, %v2398_v17  ;;  %2542 = vst.msk [vmem:[%s4082_s25 + $0x10] sm:$0xf] %vm2537_vm13, %v2805_v6  ;;  %v2806_v3 = vpack.c.bf16 %v2382_v35, %v2382_v35  ;;  %v2865_v50 = vpop.f32.mrb[8].mxu0 }
 0x226   : > { %2561 = vst.msk [vmem:[%s4082_s25 + $0x5c] sm:$0xf] %vm2537_vm13, %v2824_v21  ;;  %2545 = vst.msk [vmem:[%s4082_s25 + $0x1c] sm:$0xf] %vm2537_vm13, %v2808_v27  ;;  %v2291_v24 = vadd.f32 %v2865_v50, %v4071_v40  ;;  %v2282_v60 = vpop.f32.mrb[9].mxu0 }
 0x227   : > { %2559 = vst.msk [vmem:[%s4082_s25 + $0x54] sm:$0xf] %vm2537_vm13, %v2822_v23  ;;  %2543 = vst.msk [vmem:[%s4082_s25 + $0x14] sm:$0xf] %vm2537_vm13, %v2806_v3  ;;  %v2283_v29 = vadd.f32 %v4071_v40, %v2282_v60  ;;  %v2866_v4 = vpop.f32.mrb[10].mxu0 }
 0x228   : > { %v2387_v34 = vmax.f32 %v2291_v24, 0.0  ;;  %v2294_v31 = vadd.f32 %v2866_v4, %v4071_v40  ;;  %v2285_v48 = vpop.f32.mrb[11].mxu0 }
 0x229   : > { %v2881_v18 = vpop.f32.mrb[8].mxu1  ;;  %v2385_v5 = vmax.f32 %v2283_v29, 0.0  ;;  %v2286_v13 = vadd.f32 %v4071_v40, %v2285_v48 }
 0x22a   : > { %v2355_v45 = vadd.f32 %v2881_v18, %v4071_v40  ;;  %v2346_v39 = vpop.f32.mrb[9].mxu1  ;;  %v2811_v15 = vpack.c.bf16 %v2387_v34, %v2387_v34  ;;  %v2388_v16 = vmax.f32 %v2294_v31, 0.0 }
 0x22b   : > { %v2347_v11 = vadd.f32 %v4071_v40, %v2346_v39  ;;  %v2882_v32 = vpop.f32.mrb[10].mxu1  ;;  %v2809_v47 = vpack.c.bf16 %v2385_v5, %v2385_v5  ;;  %v2386_v25 = vmax.f32 %v2286_v13, 0.0 }
 0x22c   : > { %v2403_v1 = vmax.f32 %v2355_v45, 0.0  ;;  %v2358_v55 = vadd.f32 %v2882_v32, %v4071_v40  ;;  %v2349_v30 = vpop.f32.mrb[11].mxu1  ;;  %2548 = vst.msk [vmem:[%s4082_s25 + $0x28] sm:$0xf] %vm2537_vm13, %v2811_v15  ;;  %v2812_v9 = vpack.c.bf16 %v2388_v16, %v2388_v16 }
 0x22d   : > { %v2401_v37 = vmax.f32 %v2347_v11, 0.0  ;;  %v2350_v42 = vadd.f32 %v4071_v40, %v2349_v30  ;;  %2546 = vst.msk [vmem:[%s4082_s25 + $0x20] sm:$0xf] %vm2537_vm13, %v2809_v47  ;;  %v2810_v38 = vpack.c.bf16 %v2386_v25, %v2386_v25 }
 0x22e   : > { %v2827_v46 = vpack.c.bf16 %v2403_v1, %v2403_v1  ;;  %v2404_v41 = vmax.f32 %v2358_v55, 0.0  ;;  %2549 = vst.msk [vmem:[%s4082_s25 + $0x2c] sm:$0xf] %vm2537_vm13, %v2812_v9 }
 0x22f   : > { %v2825_v26 = vpack.c.bf16 %v2401_v37, %v2401_v37  ;;  %v2402_v0 = vmax.f32 %v2350_v42, 0.0  ;;  %2547 = vst.msk [vmem:[%s4082_s25 + $0x24] sm:$0xf] %vm2537_vm13, %v2810_v38 }
 0x230   : > { %2564 = vst.msk [vmem:[%s4082_s25 + $0x68] sm:$0xf] %vm2537_vm13, %v2827_v46  ;;  %v2828_v59 = vpack.c.bf16 %v2404_v41, %v2404_v41 }
 0x231   : > { %2562 = vst.msk [vmem:[%s4082_s25 + $0x60] sm:$0xf] %vm2537_vm13, %v2825_v26  ;;  %v2826_v28 = vpack.c.bf16 %v2402_v0, %v2402_v0  ;;  %v2885_v7 = vpop.f32.mrb[12].mxu1  ;;  %v2869_v49 = vpop.f32.mrb[12].mxu0 }
 0x232   : > { %2565 = vst.msk [vmem:[%s4082_s25 + $0x6c] sm:$0xf] %vm2537_vm13, %v2828_v59  ;;  %v2371_v43 = vadd.f32 %v2885_v7, %v4071_v40  ;;  %v2362_v61 = vpop.f32.mrb[13].mxu1  ;;  %v2307_v19 = vadd.f32 %v2869_v49, %v4071_v40  ;;  %v2298_v44 = vpop.f32.mrb[13].mxu0 }
 0x233   : > { %2563 = vst.msk [vmem:[%s4082_s25 + $0x64] sm:$0xf] %vm2537_vm13, %v2826_v28  ;;  %v2363_v36 = vadd.f32 %v4071_v40, %v2362_v61  ;;  %v2886_v22 = vpop.f32.mrb[14].mxu1  ;;  %v2299_v56 = vadd.f32 %v4071_v40, %v2298_v44  ;;  %v2870_v2 = vpop.f32.mrb[14].mxu0 }
 0x234   : > { %v2407_v62 = vmax.f32 %v2371_v43, 0.0  ;;  %v2374_v58 = vadd.f32 %v2886_v22, %v4071_v40  ;;  %v2365_v33 = vpop.f32.mrb[15].mxu1  ;;  %v2391_v51 = vmax.f32 %v2307_v19, 0.0  ;;  %v2310_v63 = vadd.f32 %v2870_v2, %v4071_v40  ;;  %v2301_v10 = vpop.f32.mrb[15].mxu0 }
 0x235   : > { %v2405_v14 = vmax.f32 %v2363_v36, 0.0  ;;  %v2366_v12 = vadd.f32 %v4071_v40, %v2365_v33  ;;  %v2389_v20 = vmax.f32 %v2299_v56, 0.0  ;;  %v2302_v8 = vadd.f32 %v4071_v40, %v2301_v10 }
 0x236   : > { %v2831_v54 = vpack.c.bf16 %v2407_v62, %v2407_v62  ;;  %v2408_v52 = vmax.f32 %v2374_v58, 0.0  ;;  %v2815_v53 = vpack.c.bf16 %v2391_v51, %v2391_v51  ;;  %v2392_v17 = vmax.f32 %v2310_v63, 0.0 }
 0x237   : > { %v2829_v57 = vpack.c.bf16 %v2405_v14, %v2405_v14  ;;  %v2406_v6 = vmax.f32 %v2366_v12, 0.0  ;;  %v2813_v21 = vpack.c.bf16 %v2389_v20, %v2389_v20  ;;  %v2390_v27 = vmax.f32 %v2302_v8, 0.0 }
 0x238   : > { %2568 = vst.msk [vmem:[%s4082_s25 + $0x78] sm:$0xf] %vm2537_vm13, %v2831_v54  ;;  %v2832_v35 = vpack.c.bf16 %v2408_v52, %v2408_v52  ;;  %2552 = vst.msk [vmem:[%s4082_s25 + $0x38] sm:$0xf] %vm2537_vm13, %v2815_v53  ;;  %v2816_v23 = vpack.c.bf16 %v2392_v17, %v2392_v17 }
 0x239   : > { %2566 = vst.msk [vmem:[%s4082_s25 + $0x70] sm:$0xf] %vm2537_vm13, %v2829_v57  ;;  %v2830_v3 = vpack.c.bf16 %v2406_v6, %v2406_v6  ;;  %2550 = vst.msk [vmem:[%s4082_s25 + $0x30] sm:$0xf] %vm2537_vm13, %v2813_v21  ;;  %v2814_v40 = vpack.c.bf16 %v2390_v27, %v2390_v27 }
 0x23a   : > { %2569 = vst.msk [vmem:[%s4082_s25 + $0x7c] sm:$0xf] %vm2537_vm13, %v2832_v35  ;;  %2553 = vst.msk [vmem:[%s4082_s25 + $0x3c] sm:$0xf] %vm2537_vm13, %v2816_v23 }
 0x23b   : > { %2567 = vst.msk [vmem:[%s4082_s25 + $0x74] sm:$0xf] %vm2537_vm13, %v2830_v3  ;;  %2551 = vst.msk [vmem:[%s4082_s25 + $0x34] sm:$0xf] %vm2537_vm13, %v2814_v40 }
 0x23c PF: > { %s15_s22 = sadd.s32 1, %s2993_s22   ;;  %s4247_s18 = smov %s2985_s20 }
 0x23d   : > { %p12_p1 = scmp.ge.s32.totalorder %s15_s22, 10   ;;  %s4248_s19 = smov %s2989_s21 }
 0x23e   : > { %s4249_s20 = smov %s4252_s23  ;;  %s4250_s21 = smov %s4256_s24 }
 0x23f   :  { %14 = sbr.rel (!%p12_p1) target bundleno = 3 (0x3), region = 76 }

// kernel: feature_extractor.6
= control target key start
LH: loop header
LB: loop body
LE: loop exit
PB: predicated region body
PF: predicated region fallthrough
CT: control target
= control target key end

     0   :  { %s2467_s18 = smov 0   ;;  %s2469_s19 = smov 0   ;;  %s3174_s0 = inlined_call_operand.vmem [shape: bf16[2,256,64], index: 0, kind: input, shape index: {}, may-alias: {0,1,2}]   ;;  %s3175_s1 = inlined_call_operand.vmem [shape: bf16[2,256,64], index: 1, kind: input, shape index: {}, may-alias: {0,1,2}]   ;;  %s3176_s2 = inlined_call_operand.vmem [shape: bf16[2,256,64], index: 2, kind: input, shape index: {}, may-alias: {0,1,2}]   ;;  %s3177_s3 = inlined_call_operand.vmem [shape: bf16[3,192,128], index: 3, kind: input, shape index: {}]   ;;  %s3178_s4 = inlined_call_operand.vmem [shape: f32[1,128], index: 4, kind: input, shape index: {}]   ;;  %s3179_s5 = inlined_call_operand.vmem [shape: bf16[2,256,128], index: 5, kind: output, shape index: {}]  }
   0x1   :  { %s2471_s20 = smov 0   ;;  %s2473_s21 = smov 0  }
   0x2   :  { %s2475_s22 = smov 0  }
   0x3 LB: > { %s24_s23 = sadd.s32 1, %s2425_s20  ;;  %s27_s24 = sadd.s32 1, %s2429_s21  ;;  %s2433_s22 = sphi %s2475_s22, %s15_s22   ;;  %s2429_s21 = sphi %s2473_s21, %s3186_s21   ;;  %s2425_s20 = sphi %s2471_s20, %s3185_s20   ;;  %s2421_s19 = sphi %s2469_s19, %s3184_s19   ;;  %s2417_s18 = sphi %s2467_s18, %s3183_s18  }
   0x4   : > { %p25_p0 = scmp.ge.s32.totalorder %s24_s23, 2  ;;  %p2063_p1 = scmp.ge.s32.totalorder %s2433_s22, 1 }
   0x5   : > { %p274_p2 = scmp.lt.s32.totalorder %s2433_s22, 5 }
   0x6   : > { %s3188_s23 = smov (%p25_p0, %s24_s23), 0  ;;  %s3190_s24 = smov (!%p25_p0, %s27_s24), %s2429_s21 }
   0x7   : > { %p275_p3 = pnand %p2063_p1, %p274_p2  ;;  %p29_p4 = scmp.ge.s32.totalorder %s3190_s24, 2 }
   0x8   : > { %s2064_s25 = sshll.u32 (!%p275_p3), %s2417_s18, 3  ;;  %p341_p5 = scmp.lt.s32.totalorder (!%p275_p3), %s2421_s19, 1  ;;  %v2359_v0 = vld [vmem:[%s3177_s3] sm:$0xff] (!%p275_p3)   ;;  %v2435_v1 = vmov (!%p275_p3), 0   ;;  %v2361_v3 = vld [vmem:[%s3177_s3 + $0x8] sm:$0xff] (!%p275_p3)   ;;  %v2363_v5 = vld [vmem:[%s3177_s3 + $0x10] sm:$0xff] (!%p275_p3)   ;;  %v533_v16 = vlaneseq (!%p275_p3) }
   0x9   : > { %s3192_s24 = smov (%p29_p4, %s3190_s24), 0  ;;  %278 = sbr.rel (%p275_p3) target bundleno = 471 (0x1d7), region = 40 }
   0xa   : > { %s2065_s28 = sadd.s32 (!%p275_p3), 4294967295, %s2064_s25  ;;  %s2069_s29 = sshll.u32 (!%p275_p3), %s2417_s18, 4  ;;  %1498 = vmatprep.subr.bf16.mxu1 (!%p275_p3), %v2435_v1  ;;  %1326 = vmatprep.subr.bf16.mxu0 (!%p275_p3), %v2435_v1  ;;  %v2360_v2 = vld [vmem:[%s3177_s3 + $0x60] sm:$0xff] (!%p275_p3)   ;;  %v2362_v4 = vld [vmem:[%s3177_s3 + $0x68] sm:$0xff] (!%p275_p3)   ;;  %v2364_v6 = vld [vmem:[%s3177_s3 + $0x70] sm:$0xff] (!%p275_p3)   ;;  %v2622_v30 = vshrl.u32 (!%p275_p3), %v533_v16, 7 }
   0xb   : > { %p338_p6 = scmp.gt.s32.totalorder (!%p275_p3), %s2065_s28, 0  ;;  %p2508_p7 = scmp.lt.s32.totalorder (!%p275_p3), %s2069_s29, 31  ;;  %1499 = vmatpush1.bf16.msra.mxu1 (!%p275_p3), %v2359_v0  ;;  %1327 = vmatpush1.bf16.msra.mxu0 (!%p275_p3), %v2360_v2  ;;  %v2365_v7 = vld [vmem:[%s3177_s3 + $0x18] sm:$0xff] (!%p275_p3)   ;;  %v2367_v9 = vld [vmem:[%s3177_s3 + $0x20] sm:$0xff] (!%p275_p3)   ;;  %v2369_v14 = vld [vmem:[%s3177_s3 + $0x28] sm:$0xff] (!%p275_p3)   ;;  %vm1028_vm0 = vcmask (!%p275_p3), 1046528  }
   0xc   : > { %1500 = vmatprep.subr.bf16.mxu1 (!%p275_p3), %v2435_v1  ;;  %1328 = vmatprep.subr.bf16.mxu0 (!%p275_p3), %v2435_v1  ;;  %p395_p9 = scmp.gt.s32.totalorder (!%p275_p3), %s2417_s18, 0  ;;  %v2366_v8 = vld [vmem:[%s3177_s3 + $0x78] sm:$0xff] (!%p275_p3)   ;;  %v2368_v10 = vld [vmem:[%s3177_s3 + $0x80] sm:$0xff] (!%p275_p3)   ;;  %s2436_s27 = smov (!%p275_p3), 64   ;;  %v2370_v29 = vld [vmem:[%s3177_s3 + $0x88] sm:$0xff] (!%p275_p3)   ;;  %vm1140_vm1 = vcmask (!%p275_p3), 523264  }
   0xd   : > { %p416_p12 = scmp.lt.s32.totalorder (!%p275_p3), %s2417_s18, 1  ;;  %v2371_v42 = vld [vmem:[%s3177_s3 + $0x30] sm:$0xff] (!%p275_p3)   ;;  %v2373_v50 = vld [vmem:[%s3177_s3 + $0x38] sm:$0xff] (!%p275_p3)   ;;  %v2375_v61 = vld [vmem:[%s3177_s3 + $0x40] sm:$0xff] (!%p275_p3)   ;;  %vm875_vm2 = vcmask (!%p275_p3), 1040384  }
   0xe   : > { %v2372_v47 = vld [vmem:[%s3177_s3 + $0x90] sm:$0xff] (!%p275_p3)   ;;  %v2374_v57 = vld [vmem:[%s3177_s3 + $0x98] sm:$0xff] (!%p275_p3)   ;;  %v2376_v62 = vld [vmem:[%s3177_s3 + $0xa0] sm:$0xff] (!%p275_p3)  }
   0xf   : > { %1501 = vmatpush1.bf16.msra.mxu1 (!%p275_p3), %v2361_v3  ;;  %1329 = vmatpush1.bf16.msra.mxu0 (!%p275_p3), %v2362_v4 }
  0x10   : > { %s3194_s19 = smov (!%p341_p5, %s2421_s19), 1  ;;  %s3196_s28 = smov (!%p338_p6, %s2065_s28), 0  ;;  %1502 = vmatprep.subr.bf16.mxu1 %v2435_v1  ;;  %1330 = vmatprep.subr.bf16.mxu0 %v2435_v1 }
  0x11   : > { %s2066_s12 = sshll.u32 %s3196_s28, 1  ;;  %s2526_s15 = sshll.u32 %s3194_s19, 5 }
  0x12   : > { %p343_p8 = scmp.lt.s32.totalorder %s2066_s12, 31  ;;  %s3198_s29 = smov (!%p2508_p7, %s2069_s29), 31 }
  0x13   : > { %s360_s26 = sadd.s32 %s2526_s15, %s3198_s29  ;;  %1503 = vmatpush1.bf16.msra.mxu1 %v2363_v5  ;;  %1331 = vmatpush1.bf16.msra.mxu0 %v2364_v6  ;;  %v2377_v6 = vld [vmem:[%s3177_s3 + $0x48] sm:$0xff]  }
  0x14   : > { %s3200_s12 = smov (!%p343_p8, %s2066_s12), 31  ;;  %s2540_s28 = sshll.u32 %s360_s26, 2  ;;  %1504 = vmatprep.subr.bf16.mxu1 %v2435_v1  ;;  %1332 = vmatprep.subr.bf16.mxu0 %v2435_v1 }
  0x15   : > { %s2547_s7 = scalar_lea.vmem %s3175_s1, %s2540_s28  ;;  %s346_s9 = sadd.s32 %s2526_s15, %s3200_s12 }
  0x16   : > { %s396_s10 = scalar_select %p395_p9, 1, 0  ;;  %v2561_v11 = vld [vmem:[%s2547_s7 + $0x8] sm:$0xff]   ;;  %v2567_v12 = vld [vmem:[%s2547_s7] sm:$0xff]   ;;  %v2353_v13 = vld [vmem:[%s2547_s7 + $0x10] sm:$0xff]  }
  0x17   : > { %1505 = vmatpush1.bf16.msra.mxu1 %v2365_v7  ;;  %1333 = vmatpush1.bf16.msra.mxu0 %v2366_v8  ;;  %s2571_s12 = sadd.s32 8, %s2064_s25  ;;  %s2068_s26 = sshll.u32 %s346_s9, 2  ;;  %v515_v15 = vunpack.c.h.bf16 %v2567_v12  ;;  %v517_v17 = vunpack.c.h.bf16 %v2561_v11  ;;  %v519_v18 = vunpack.c.h.bf16 %v2353_v13  ;;  %v2587_v19 = vld [vmem:[%s2547_s7 + $0x18] sm:$0xff]   ;;  %v2355_v20 = vld [vmem:[%s2547_s7 + $0x20] sm:$0xff]   ;;  %v514_v21 = vunpack.c.l.bf16 %v2567_v12  ;;  %v2639_v41 = vld [vmem:[%s2547_s7 + $0x30] sm:$0xff]  }
  0x18   : > { %1506 = vmatprep.subr.bf16.mxu1 %v2435_v1  ;;  %s2564_s17 = scvt.s32.f32 %s396_s10  ;;  %1124 = vrot.lane.b32.xlu1 %v2561_v11, %s2436_s27  ;;  %s348_s10 = scalar_lea.vmem %s3174_s0, %s2068_s26  ;;  %v516_v22 = vunpack.c.l.bf16 %v2561_v11  ;;  %v518_v23 = vunpack.c.l.bf16 %v2353_v13  ;;  %v520_v24 = vunpack.c.l.bf16 %v2587_v19  ;;  %v521_v25 = vunpack.c.h.bf16 %v2587_v19  ;;  %v2658_v48 = vld [vmem:[%s2547_s7 + $0x28] sm:$0xff]  }
  0x19   : > { %1334 = vmatprep.subr.bf16.mxu0 %v2435_v1  ;;  %p366_p11 = scmp.lt.s32.totalorder %s2571_s12, 15  ;;  %v2608_v26 = vrot.slane %v514_v21, 7  ;;  %v2612_v27 = vrot.slane %v515_v15, 7  ;;  %v393_v31 = vld [vmem:[%s348_s10] sm:$0xf]  ;;  %v2624_v33 = vrot.slane %v517_v17, 7  ;;  %v522_v39 = vunpack.c.l.bf16 %v2355_v20  ;;  %s3127_s26 = scalar_lea.vmem %s3179_s5, %s2540_s28 }
  0x1a   : > { %s400_s19 = sshrl.u32 %s2564_s17, 16  ;;  %p399_p10 = scmp.ne.f32.partialorder %s2564_s17, %s2564_s17  ;;  %v2616_v28 = vrot.slane %v516_v22, 7  ;;  %v394_v32 = vld [vmem:[%s348_s10 + $0x4] sm:$0xf]  ;;  %v2626_v34 = vrot.slane %v517_v17, 1  ;;  %v2628_v35 = vrot.slane %v518_v23, 7  ;;  %v523_v40 = vunpack.c.h.bf16 %v2355_v20 }
  0x1b   : > { %1507 = vmatpush1.bf16.msra.mxu1 %v2367_v9  ;;  %s401_s25 = sand.u32 1, %s400_s19  ;;  %1335 = vmatpush1.bf16.msra.mxu0 %v2368_v10  ;;  %v2630_v36 = vrot.slane %v519_v18, 7  ;;  %v2633_v37 = vrot.slane %v518_v23, 1  ;;  %v2635_v38 = vrot.slane %v519_v18, 1  ;;  %v2645_v43 = vrot.slane %v520_v24, 7  ;;  %s3204_s12 = smov (!%p366_p11, %s2571_s12), 15 }
  0x1c   : > { %1508 = vmatprep.subr.bf16.mxu1 %v2435_v1  ;;  %s402_s29 = sadd.s32 32767, %s401_s25  ;;  %1126 = vrot.lane.b32.xlu1 %v2353_v13, %s2436_s27  ;;  %v2647_v44 = vrot.slane %v521_v25, 7  ;;  %v2649_v45 = vrot.slane %v520_v24, 1  ;;  %v2651_v46 = vrot.slane %v521_v25, 1  ;;  %v2667_v53 = vrot.slane %v522_v39, 7  ;;  %v2378_v9 = vld [vmem:[%s3177_s3 + $0xa8] sm:$0xff]  }
  0x1d   : > { %s403_s11 = sadd.s32 %s402_s29, %s2564_s17  ;;  %1336 = vmatprep.subr.bf16.mxu0 %v2435_v1  ;;  %v2669_v54 = vrot.slane %v523_v40, 7  ;;  %v2675_v55 = vrot.slane %v522_v39, 1  ;;  %v2677_v56 = vrot.slane %v523_v40, 1  ;;  %v524_v59 = vunpack.c.l.bf16 %v2658_v48  ;;  %v2379_v18 = vld [vmem:[%s3177_s3 + $0x50] sm:$0xff]  }
  0x1e   : > { %s404_s13 = sand.u32 4294901760, %s403_s11  ;;  %s2073_s11 = sshll.u32 %s3204_s12, 1  ;;  %v525_v60 = vunpack.c.h.bf16 %v2658_v48  ;;  %v527_v3 = vunpack.c.h.bf16 %v2639_v41  ;;  %v526_v8 = vunpack.c.l.bf16 %v2639_v41  ;;  %v511_v10 = vunpack.c.h.bf16 %v2435_v1 }
  0x1f   : > { %1509 = vmatpush1.bf16.msra.mxu1 %v2369_v14  ;;  %s3202_s13 = smov (%p399_p10, %s404_s13), 2143289344  ;;  %1337 = vmatpush1.bf16.msra.mxu0 %v2370_v29  ;;  %p371_p13 = scmp.lt.s32.totalorder %s2073_s11, 31  ;;  %v2695_v2 = vrot.slane %v524_v59, 7  ;;  %v2704_v5 = vrot.slane %v524_v59, 1  ;;  %v2380_v29 = vld [vmem:[%s3177_s3 + $0xb0] sm:$0xff]   ;;  %v2749_v39 = vsel %vm1028_vm0, %v2626_v34, %v2633_v37 }
  0x20   : > { %1510 = vmatprep.subr.bf16.mxu1 %v2435_v1  ;;  %s407_s17 = sshrl.u32 %s3202_s13, 16  ;;  %1130 = vrot.lane.b32.xlu1 %v2355_v20, %s2436_s27  ;;  %v2702_v4 = vrot.slane %v525_v60, 7  ;;  %v2710_v7 = vrot.slane %v525_v60, 1  ;;  %v2726_v16 = vrot.slane %v526_v8, 7  ;;  %v2730_v17 = vrot.slane %v527_v3, 7 }
  0x21   : > { %s408_s30 = sshll.u32 %s407_s17, 16  ;;  %1338 = vmatprep.subr.bf16.mxu0 %v2435_v1  ;;  %s3206_s11 = smov (!%p371_p13, %s2073_s11), 31  ;;  %v535_v20 = vadd.s32 8, %v2622_v30 }
  0x22   : > { %s409_s29 = sor.u32 %s408_s30, %s407_s17  ;;  %s374_s30 = sadd.s32 %s2526_s15, %s3206_s11 }
  0x23   : > { %1511 = vmatpush1.bf16.msra.mxu1 %v2371_v42  ;;  %v410_v49 = vstv %s409_s29  ;;  %s417_s10 = scalar_select %p416_p12, 1, 0  ;;  %1339 = vmatpush1.bf16.msra.mxu0 %v2372_v47  ;;  %v565_v40 = vand.u32 15, %v535_v20  ;;  %v558_v42 = vand.u32 15, %v2622_v30  ;;  %v884_v20 = vsel %vm875_vm2, %v2608_v26, %v2612_v27 }
  0x24   : > { %1512 = vmatprep.subr.bf16.mxu1 %v2435_v1  ;;  %v412_v51 = vmul.bf16 %v410_v49, %v393_v31  ;;  %v413_v52 = vmul.bf16 %v410_v49, %v394_v32  ;;  %1134 = vrot.lane.b32.xlu1 %v2639_v41, %s2436_s27  ;;  %s2075_s8 = sshll.u32 %s374_s30, 2  ;;  %v1032_v32 = vrot.slane %v514_v21, 1  ;;  %v876_v49 = vrot.slane %v511_v10, 7 }
  0x25   : > { %1340 = vmatprep.subr.bf16.mxu0 %v2435_v1  ;;  %s2685_s18 = scvt.s32.f32 %s417_s10  ;;  %s376_s14 = scalar_lea.vmem %s3176_s2, %s2075_s8  ;;  %vm968_vm3 = vcmp.eq.s32.totalorder %v565_v40, 15  ;;  %vm2761_vm4 = vcmp.eq.s32.totalorder %v558_v42, 0  ;;  %v2817_v42 = vrot.slane %v527_v3, 1 }
  0x26   : > { %v2079_v58 = vcombine.low %v412_v51, %v413_v52  ;;  %v414_v24 = vld [vmem:[%s376_s14] sm:$0xf]  ;;  %v415_v25 = vld [vmem:[%s376_s14 + $0x4] sm:$0xf]  ;;  %v537_v52 = vadd.s32 24, %v2622_v30 }
  0x27   : > { %1513 = vmatpush1.bf16.msra.mxu1 %v2373_v50  ;;  %1341 = vmatpush1.bf16.msra.mxu0 %v2374_v57  ;;  %p420_p0 = scmp.ne.f32.partialorder %s2685_s18, %s2685_s18  ;;  %s421_s19 = sshrl.u32 %s2685_s18, 16  ;;  %v1034_v57 = vrot.slane %v515_v15, 1  ;;  %v2382_v15 = vld [vmem:[%s3177_s3 + $0xb8] sm:$0xff]  }
  0x28   : > { %1514 = vmatprep.subr.bf16.mxu1 %v2435_v1  ;;  %1120 = vrot.lane.b32.xlu0 %v2079_v58, %s2436_s27  ;;  %v512_v63 = vunpack.c.l.bf16 %v2079_v58  ;;  %v513_v0 = vunpack.c.h.bf16 %v2079_v58  ;;  %s422_s6 = sand.u32 1, %s421_s19 }
  0x29   : > { %1342 = vmatprep.subr.bf16.mxu0 %v2435_v1  ;;  %s423_s9 = sadd.s32 32767, %s422_s6 }
  0x2a   : > { %s424_s16 = sadd.s32 %s423_s9, %s2685_s18  ;;  %v877_v13 = vrot.slane %v512_v63, 7  ;;  %v879_v14 = vrot.slane %v513_v0, 7  ;;  %v1029_v23 = vrot.slane %v512_v63, 1  ;;  %v1030_v31 = vrot.slane %v513_v0, 1 }
  0x2b   : > { %1515 = vmatpush1.bf16.msra.mxu1 %v2375_v61  ;;  %1343 = vmatpush1.bf16.msra.mxu0 %v2376_v62  ;;  %s425_s17 = sand.u32 4294901760, %s424_s16  ;;  %v1036_v61 = vrot.slane %v516_v22, 1  ;;  %v2775_v62 = vld [vmem:[%s2547_s7 + $0x38] sm:$0xff]   ;;  %v579_v22 = vand.u32 15, %v537_v52 }
  0x2c   : > { %1516 = vmatprep.subr.bf16.mxu1 %v2435_v1  ;;  %1122 = vrot.lane.b32.xlu0 %v2567_v12, %s2436_s27  ;;  %s3208_s17 = smov (%p420_p0, %s425_s17), 2143289344  ;;  %v1031_v21 = vsel %vm1028_vm0, %v1029_v23, %v1030_v31  ;;  %v1033_v47 = vsel %vm1028_vm0, %v1030_v31, %v1032_v32  ;;  %v880_v50 = vsel %vm875_vm2, %v877_v13, %v879_v14  ;;  %v539_v23 = vadd.s32 40, %v2622_v30 }
  0x2d   : > { %1344 = vmatprep.subr.bf16.mxu0 %v2435_v1  ;;  %s428_s18 = sshrl.u32 %s3208_s17, 16  ;;  %v1091_v59 = vsel %vm968_vm3, 0.0, %v1033_v47  ;;  %v878_v60 = vsel %vm875_vm2, %v876_v49, %v877_v13  ;;  %v536_v13 = vadd.s32 16, %v2622_v30  ;;  %vm970_vm5 = vcmp.eq.s32.totalorder %v579_v22, 15 }
  0x2e   : > { %s429_s6 = sshll.u32 %s428_s18, 16  ;;  %v937_v12 = vsel %vm2761_vm4, 0.0, %v878_v60  ;;  %v1043_v49 = vsel %vm1028_vm0, %v2633_v37, %v2635_v38  ;;  %v543_v60 = vadd.s32 72, %v2622_v30 }
  0x2f   : > { %1517 = vmatpush1.bf16.msra.mxu1 %v2377_v6  ;;  %1345 = vmatpush1.bf16.msra.mxu0 %v2378_v9  ;;  %s430_s25 = sor.u32 %s429_s6, %s428_s18  ;;  %v1110_v6 = vpack.c.bf16 %v1091_v59, %v1031_v21  ;;  %v2783_v11 = vpack.c.bf16 %v880_v50, %v937_v12  ;;  %v1037_v9 = vsel %vm1028_vm0, %v1034_v57, %v1036_v61  ;;  %v572_v31 = vand.u32 15, %v536_v13 }
  0x30   : > { %1518 = vmatprep.subr.bf16.mxu1 %v2435_v1  ;;  %1128 = vrot.lane.b32.xlu0 %v2587_v19, %s2436_s27  ;;  %v2381_v19 = vld [vmem:[%s3177_s3 + $0x58] sm:$0xff]   ;;  %v431_v58 = vstv %s430_s25  ;;  %v529_v21 = vunpack.c.h.bf16 %v2775_v62  ;;  %v540_v59 = vadd.s32 48, %v2622_v30  ;;  %v621_v12 = vand.u32 15, %v543_v60 }
  0x31   : > { %1346 = vmatprep.subr.bf16.mxu0 %v2435_v1  ;;  %v433_v63 = vmul.bf16 %v431_v58, %v414_v24  ;;  %v434_v0 = vmul.bf16 %v431_v58, %v415_v25  ;;  %2145 = vmatprep.mubr.msk.bf16.mxu1 %vm1140_vm1, %v1110_v6  ;;  %v1039_v24 = vsel %vm1028_vm0, %v1036_v61, %v2626_v34  ;;  %v538_v25 = vadd.s32 32, %v2622_v30 }
  0x32   : > { %v593_v34 = vand.u32 15, %v539_v23  ;;  %vm796_vm6 = vcmp.eq.s32.totalorder %v572_v31, 0  ;;  %v1047_v61 = vsel %vm1028_vm0, %v2649_v45, %v2651_v46  ;;  %vm976_vm11 = vcmp.eq.s32.totalorder %v621_v12, 15 }
  0x33   : > { %1519 = vmatpush1.bf16.msra.mxu1 %v2379_v18  ;;  %1347 = vmatpush1.bf16.msra.mxu0 %v2380_v29  ;;  %v2787_v10 = vcombine.low %v433_v63, %v434_v0  ;;  %v882_v18 = vsel %vm875_vm2, %v879_v14, %v2608_v26  ;;  %v2803_v29 = vrot.slane %v526_v8, 1  ;;  %v528_v14 = vunpack.c.l.bf16 %v2775_v62 }
  0x34   : > { %1520 = vmatprep.subr.bf16.mxu1 %v2435_v1  ;;  %1132 = vrot.lane.b32.xlu0 %v2658_v48, %s2436_s27  ;;  %v1035_v48 = vsel %vm1028_vm0, %v1032_v32, %v1034_v57  ;;  %v1093_v26 = vsel %vm970_vm5, 0.0, %v1037_v9  ;;  %v586_v40 = vand.u32 15, %v538_v25  ;;  %v886_v8 = vsel %vm875_vm2, %v2612_v27, %v2616_v28 }
  0x35   : > { %1348 = vmatprep.subr.bf16.mxu0 %v2435_v1  ;;  %1138 = vrot.lane.b32.xlu1 %v2787_v10, %s2436_s27  ;;  %v2810_v32 = vpack.c.bf16 %v1093_v26, %v1035_v48  ;;  %v2820_v47 = vrot.slane %v528_v14, 7  ;;  %vm972_vm7 = vcmp.eq.s32.totalorder %v593_v34, 15  ;;  %v888_v27 = vsel %vm875_vm2, %v2616_v28, %v2624_v33 }
  0x36   : > { %vm798_vm8 = vcmp.eq.s32.totalorder %v586_v40, 0  ;;  %v939_v41 = vsel %vm796_vm6, 0.0, %v882_v18  ;;  %v1095_v3 = vsel %vm972_vm7, 0.0, %v2749_v39  ;;  %v1045_v57 = vsel %vm1028_vm0, %v2635_v38, %v2649_v45 }
  0x37   : > { %1521 = vmatpush1.bf16.msra.mxu1 %v2381_v19  ;;  %1349 = vmatpush1.bf16.msra.mxu0 %v2382_v15  ;;  %v941_v50 = vsel %vm798_vm8, 0.0, %v886_v8  ;;  %v541_v19 = vadd.s32 56, %v2622_v30  ;;  %v2833_v51 = vpack.c.bf16 %v884_v20, %v939_v41  ;;  %v2835_v52 = vpack.c.bf16 %v1095_v3, %v1039_v24 }
  0x38   : > { %2285 = vmatprep.subr.bf16.mxu1 %v2435_v1  ;;  %1136 = vrot.lane.b32.xlu0 %v2775_v62, %s2436_s27  ;;  %v2837_v37 = vpack.c.bf16 %v888_v27, %v941_v50  ;;  %v890_v28 = vsel %vm875_vm2, %v2624_v33, %v2628_v35  ;;  %v892_v39 = vsel %vm875_vm2, %v2628_v35, %v2630_v36  ;;  %v542_v63 = vadd.s32 64, %v2622_v30 }
  0x39   : > { %1695 = vmatprep.subr.bf16.mxu0 %v2435_v1  ;;  %2125 = vmatprep.mubr.msk.bf16.mxu0 %vm1140_vm1, %v2810_v32  ;;  %v607_v58 = vand.u32 15, %v541_v19  ;;  %v1049_v38 = vsel %vm1028_vm0, %v2651_v46, %v2675_v55  ;;  %v600_v0 = vand.u32 15, %v540_v59  ;;  %v894_v33 = vsel %vm875_vm2, %v2630_v36, %v2645_v43 }
  0x3a   : > { %v896_v35 = vsel %vm875_vm2, %v2645_v43, %v2647_v44  ;;  %v614_v15 = vand.u32 15, %v542_v63  ;;  %v545_v45 = vadd.s32 88, %v2622_v30  ;;  %v1051_v46 = vsel %vm1028_vm0, %v2675_v55, %v2677_v56 }
  0x3b   : > { %vm974_vm9 = vcmp.eq.s32.totalorder %v607_v58, 15  ;;  %vm800_vm10 = vcmp.eq.s32.totalorder %v600_v0, 0  ;;  %v1053_v36 = vsel %vm1028_vm0, %v2677_v56, %v2704_v5  ;;  %v1099_v13 = vsel %vm976_vm11, 0.0, %v1049_v38 }
  0x3c   : > { %v1097_v6 = vsel %vm974_vm9, 0.0, %v1045_v57  ;;  %v943_v48 = vsel %vm800_vm10, 0.0, %v890_v28  ;;  %vm802_vm12 = vcmp.eq.s32.totalorder %v614_v15, 0  ;;  %v635_v43 = vand.u32 15, %v545_v45 }
  0x3d   : > { %v2864_v22 = vpack.c.bf16 %v1097_v6, %v1043_v49  ;;  %v2872_v9 = vpack.c.bf16 %v892_v39, %v943_v48  ;;  %v945_v18 = vsel %vm802_vm12, 0.0, %v894_v33  ;;  %v544_v20 = vadd.s32 80, %v2622_v30 }
  0x3e   : > { %v2875_v23 = vpack.c.bf16 %v1099_v13, %v1047_v61  ;;  %v2877_v24 = vpack.c.bf16 %v896_v35, %v945_v18  ;;  %vm978_vm13 = vcmp.eq.s32.totalorder %v635_v43, 15  ;;  %v898_v55 = vsel %vm875_vm2, %v2647_v44, %v2667_v53 }
  0x3f   : > { %v1060_v56 = vrot.slane %v528_v14, 1  ;;  %v1101_v25 = vsel %vm978_vm13, 0.0, %v1053_v36  ;;  %v628_v26 = vand.u32 15, %v544_v20  ;;  %v547_v31 = vadd.s32 104, %v2622_v30 }
  0x40   : > { %v2883_v34 = vpack.c.bf16 %v1101_v25, %v1051_v46  ;;  %v900_v40 = vsel %vm875_vm2, %v2667_v53, %v2669_v54  ;;  %v1057_v8 = vsel %vm1028_vm0, %v2710_v7, %v2803_v29  ;;  %v546_v49 = vadd.s32 96, %v2622_v30 }
  0x41   : > { %vm804_vm14 = vcmp.eq.s32.totalorder %v628_v26, 0  ;;  %v649_v27 = vand.u32 15, %v547_v31  ;;  %v1055_v44 = vsel %vm1028_vm0, %v2704_v5, %v2710_v7  ;;  %v902_v14 = vsel %vm875_vm2, %v2669_v54, %v2695_v2 }
  0x42   : > { %v947_v41 = vsel %vm804_vm14, 0.0, %v898_v55  ;;  %v642_v3 = vand.u32 15, %v546_v49  ;;  %v549_v53 = vadd.s32 120, %v2622_v30  ;;  %v548_v50 = vadd.s32 112, %v2622_v30 }
  0x43   : > { %v530_v19 = vunpack.c.l.bf16 %v2787_v10  ;;  %v2901_v57 = vpack.c.bf16 %v900_v40, %v947_v41  ;;  %vm980_vm15 = vcmp.eq.s32.totalorder %v649_v27, 15  ;;  %v904_v58 = vsel %vm875_vm2, %v2695_v2, %v2702_v4 }
  0x44   : > { %v1103_v5 = vsel %vm980_vm15, 0.0, %v1057_v8  ;;  %vm806_vm3 = vcmp.eq.s32.totalorder %v642_v3, 0  ;;  %v663_v7 = vand.u32 15, %v549_v53  ;;  %v1061_v54 = vsel %vm1028_vm0, %v2817_v42, %v1060_v56 }
  0x45   : > { %v2908_v59 = vpack.c.bf16 %v1103_v5, %v1055_v44  ;;  %v949_v28 = vsel %vm806_vm3, 0.0, %v902_v14  ;;  %v1059_v39 = vsel %vm1028_vm0, %v2803_v29, %v2817_v42  ;;  %v656_v60 = vand.u32 15, %v548_v50 }
  0x46   : > { %v2913_v61 = vpack.c.bf16 %v904_v58, %v949_v28  ;;  %vm982_vm4 = vcmp.eq.s32.totalorder %v663_v7, 15  ;;  %v906_v2 = vsel %vm875_vm2, %v2702_v4, %v2726_v16  ;;  %v908_v38 = vsel %vm875_vm2, %v2726_v16, %v2730_v17  ;;  %v2386_v7 = vld [vmem:[%s3177_s3 + $0xd8] sm:$0xff]  }
  0x47   : > { %v1062_v63 = vrot.slane %v529_v21, 1  ;;  %v1064_v0 = vrot.slane %v530_v19, 1  ;;  %v1105_v33 = vsel %vm982_vm4, 0.0, %v1061_v54  ;;  %vm808_vm5 = vcmp.eq.s32.totalorder %v656_v60, 0  ;;  %v2387_v54 = vld [vmem:[%s3177_s3 + $0xe0] sm:$0xff]   ;;  %v2389_v60 = vld [vmem:[%s3177_s3 + $0xf0] sm:$0xff]  }
  0x48   : > { %v2923_v35 = vpack.c.bf16 %v1105_v33, %v1059_v39  ;;  %v951_v29 = vsel %vm808_vm5, 0.0, %v906_v2  ;;  %v551_v42 = vadd.s32 136, %v2622_v30  ;;  %v550_v6 = vadd.s32 128, %v2622_v30  ;;  %v2388_v39 = vld [vmem:[%s3177_s3 + $0xe8] sm:$0xff]  }
  0x49   : > { %v911_v4 = vrot.slane %v529_v21, 7  ;;  %v2929_v12 = vpack.c.bf16 %v908_v38, %v951_v29  ;;  %v1065_v45 = vsel %vm1028_vm0, %v1062_v63, %v1064_v0  ;;  %v910_v46 = vsel %vm875_vm2, %v2730_v17, %v2820_v47  ;;  %v2390_v38 = vld [vmem:[%s3177_s3 + $0xf8] sm:$0xff]   ;;  %v2392_v33 = vld [vmem:[%s3177_s3 + $0x108] sm:$0xff]  }
  0x4a   : > { %v677_v15 = vand.u32 15, %v551_v42  ;;  %v670_v16 = vand.u32 15, %v550_v6  ;;  %v1063_v36 = vsel %vm1028_vm0, %v1060_v56, %v1062_v63  ;;  %v531_v18 = vunpack.c.h.bf16 %v2787_v10  ;;  %v2391_v63 = vld [vmem:[%s3177_s3 + $0x100] sm:$0xff]   ;;  %v2394_v6 = vld [vmem:[%s3177_s3 + $0x118] sm:$0xff]  }
  0x4b   : > { %v912_v43 = vsel %vm875_vm2, %v2820_v47, %v911_v4  ;;  %v913_v20 = vrot.slane %v530_v19, 7  ;;  %v532_v25 = vunpack.c.l.bf16 %v2435_v1  ;;  %v553_v26 = vadd.s32 152, %v2622_v30  ;;  %v2384_v19 = vld [vmem:[%s3177_s3 + $0xc8] sm:$0xff]  }
  0x4c   : > { %vm984_vm6 = vcmp.eq.s32.totalorder %v677_v15, 15  ;;  %vm810_vm7 = vcmp.eq.s32.totalorder %v670_v16, 0  ;;  %v1066_v55 = vrot.slane %v531_v18, 1  ;;  %v552_v17 = vadd.s32 144, %v2622_v30  ;;  %v2383_v30 = vld [vmem:[%s3177_s3 + $0xc0] sm:$0xff]  }
  0x4d   : > { %v1107_v48 = vsel %vm984_vm6, 0.0, %v1065_v45  ;;  %v953_v62 = vsel %vm810_vm7, 0.0, %v910_v46  ;;  %v915_v56 = vrot.slane %v531_v18, 7  ;;  %v691_v31 = vand.u32 15, %v553_v26 }
  0x4e   : > { %v2938_v21 = vpack.c.bf16 %v1107_v48, %v1063_v36  ;;  %v2940_v13 = vpack.c.bf16 %v912_v43, %v953_v62  ;;  %v1068_v40 = vrot.slane %v532_v25, 1  ;;  %v684_v8 = vand.u32 15, %v552_v17 }
  0x4f   : > { %vm986_vm8 = vcmp.eq.s32.totalorder %v691_v31, 15  ;;  %v914_v49 = vsel %vm875_vm2, %v911_v4, %v913_v20  ;;  %v1067_v10 = vsel %vm1028_vm0, %v1064_v0, %v1066_v55  ;;  %v916_v44 = vsel %vm875_vm2, %v913_v20, %v915_v56 }
  0x50   : > { %v1069_v47 = vsel %vm1028_vm0, %v1066_v55, %v1068_v40  ;;  %vm812_vm9 = vcmp.eq.s32.totalorder %v684_v8, 0 }
  0x51   : > { %v1109_v27 = vsel %vm986_vm8, 0.0, %v1069_v47  ;;  %v955_v14 = vsel %vm812_vm9, 0.0, %v914_v49 }
  0x52   : > { %v2950_v41 = vpack.c.bf16 %v1109_v27, %v1067_v10  ;;  %v2952_v3 = vpack.c.bf16 %v916_v44, %v955_v14 }
  0x9a   : > { %v1121_v53 = vpop.permute.xlu0 %1120 }
  0x9b   : > { %v1143_v50 = vsel %vm1140_vm1, %v2783_v11, %v1121_v53  ;;  %v1125_v11 = vpop.permute.xlu1 %1124 }
  0x9c   : > { %1531 = vmatmul.mubr.bf16.vlgmr.msra.gmra.mrb[0].mxu1 %v1143_v50 }
  0x9d   : > { %2297 = vmatpush1.bf16.msra.mxu1 %v2383_v30  ;;  %2146 = vmatprep.mubr.msk.bf16.mxu1 %vm1140_vm1, %v2810_v32  ;;  %v2385_v32 = vld [vmem:[%s3177_s3 + $0xd0] sm:$0xff]  }
  0x9e   : > { %v1123_v58 = vpop.permute.xlu0 %1122  ;;  %2286 = vmatprep.subr.bf16.mxu1 %v2435_v1 }
  0x9f   : > { %v1147_v5 = vsel %vm1140_vm1, %v2833_v51, %v1123_v58  ;;  %v2976_v51 = vsel %vm1140_vm1, %v2837_v37, %v1125_v11  ;;  %v1127_v37 = vpop.permute.xlu1 %1126 }
  0xa0   : > { %1359 = vmatmul.mubr.bf16.vlgmr.msra.gmra.mrb[0].mxu0 %v1147_v5  ;;  %v2996_v28 = vsel %vm1140_vm1, %v2872_v9, %v1127_v37 }
  0xa1   : > { %1696 = vmatpush1.bf16.msra.mxu0 %v2383_v30  ;;  %2298 = vmatpush1.bf16.msra.mxu1 %v2384_v19 }
  0xa2   : > { %1697 = vmatprep.subr.bf16.mxu0 %v2435_v1  ;;  %2126 = vmatprep.mubr.msk.bf16.mxu0 %vm1140_vm1, %v2835_v52  ;;  %v1129_v9 = vpop.permute.xlu0 %1128 }
  0xa3   : > { %2287 = vmatprep.subr.bf16.mxu1 %v2435_v1  ;;  %v3016_v2 = vsel %vm1140_vm1, %v2877_v24, %v1129_v9  ;;  %v1131_v24 = vpop.permute.xlu1 %1130 }
  0xa4   : > { %1539 = vmatmul.mubr.bf16.gmra.mrb[4].mxu1 %v1147_v5  ;;  %v1163_v0 = vsel %vm1140_vm1, %v2901_v57, %v1131_v24  ;;  %v2393_v57 = vld [vmem:[%s3177_s3 + $0x110] sm:$0xff]  }
  0xa5   : > { %1698 = vmatpush1.bf16.msra.mxu0 %v2384_v19  ;;  %2147 = vmatprep.mubr.msk.bf16.mxu1 %vm1140_vm1, %v2835_v52 }
  0xa6   : > { %1699 = vmatprep.subr.bf16.mxu0 %v2435_v1  ;;  %2299 = vmatpush1.bf16.msra.mxu1 %v2385_v32  ;;  %v1133_v29 = vpop.permute.xlu0 %1132 }
  0xa7   : > { %2288 = vmatprep.subr.bf16.mxu1 %v2435_v1  ;;  %v1167_v42 = vsel %vm1140_vm1, %v2913_v61, %v1133_v29  ;;  %v1135_v4 = vpop.permute.xlu1 %1134 }
  0xa8   : > { %1367 = vmatmul.mubr.bf16.gmra.mrb[4].mxu0 %v2976_v51  ;;  %v1171_v61 = vsel %vm1140_vm1, %v2929_v12, %v1135_v4 }
  0xa9   : > { %1700 = vmatpush1.bf16.msra.mxu0 %v2385_v32  ;;  %2127 = vmatprep.mubr.msk.bf16.mxu0 %vm1140_vm1, %v2864_v22 }
  0xaa   : > { %1701 = vmatprep.subr.bf16.mxu0 %v2435_v1  ;;  %2300 = vmatpush1.bf16.msra.mxu1 %v2386_v7  ;;  %v1137_v15 = vpop.permute.xlu0 %1136 }
  0xab   : > { %2289 = vmatprep.subr.bf16.mxu1 %v2435_v1  ;;  %v1175_v16 = vsel %vm1140_vm1, %v2940_v13, %v1137_v15 }
  0xac   : > { %1547 = vmatmul.mubr.bf16.gmra.mrb[8].mxu1 %v2976_v51 }
  0xad   : > { %1702 = vmatpush1.bf16.msra.mxu0 %v2386_v7  ;;  %2148 = vmatprep.mubr.msk.bf16.mxu1 %vm1140_vm1, %v2864_v22 }
  0xae   : > { %1703 = vmatprep.subr.bf16.mxu0 %v2435_v1  ;;  %2301 = vmatpush1.bf16.msra.mxu1 %v2387_v54 }
  0xaf   : > { %2290 = vmatprep.subr.bf16.mxu1 %v2435_v1 }
  0xb0   : > { %1375 = vmatmul.mubr.bf16.gmra.mrb[8].mxu0 %v2996_v28 }
  0xb1   : > { %1704 = vmatpush1.bf16.msra.mxu0 %v2387_v54  ;;  %2128 = vmatprep.mubr.msk.bf16.mxu0 %vm1140_vm1, %v2875_v23 }
  0xb2   : > { %1705 = vmatprep.subr.bf16.mxu0 %v2435_v1  ;;  %2302 = vmatpush1.bf16.msra.mxu1 %v2388_v39 }
  0xb3   : > { %2291 = vmatprep.subr.bf16.mxu1 %v2435_v1 }
  0xb4   : > { %1555 = vmatmul.mubr.bf16.gmra.mrb[12].mxu1 %v2996_v28 }
  0xb5   : > { %2149 = vmatprep.mubr.msk.bf16.mxu1 %vm1140_vm1, %v2875_v23  ;;  %1706 = vmatpush1.bf16.msra.mxu0 %v2388_v39 }
  0xb6   : > { %1707 = vmatprep.subr.bf16.mxu0 %v2435_v1  ;;  %2303 = vmatpush1.bf16.msra.mxu1 %v2389_v60 }
  0xb7   : > { %2292 = vmatprep.subr.bf16.mxu1 %v2435_v1 }
  0xb8   : > { %1383 = vmatmul.mubr.bf16.gmra.mrb[12].mxu0 %v3016_v2 }
  0xb9   : > { %2129 = vmatprep.mubr.msk.bf16.mxu0 %vm1140_vm1, %v2883_v34  ;;  %1708 = vmatpush1.bf16.msra.mxu0 %v2389_v60 }
  0xba   : > { %1709 = vmatprep.subr.bf16.mxu0 %v2435_v1  ;;  %2304 = vmatpush1.bf16.msra.mxu1 %v2390_v38 }
  0xbb   : > { %2293 = vmatprep.subr.bf16.mxu1 %v2435_v1 }
  0xbc   : > { %1563 = vmatmul.mubr.bf16.gmra.mrb[16].mxu1 %v3016_v2 }
  0xbd   : > { %2150 = vmatprep.mubr.msk.bf16.mxu1 %vm1140_vm1, %v2883_v34  ;;  %1710 = vmatpush1.bf16.msra.mxu0 %v2390_v38 }
  0xbe   : > { %1711 = vmatprep.subr.bf16.mxu0 %v2435_v1  ;;  %2305 = vmatpush1.bf16.msra.mxu1 %v2391_v63 }
  0xbf   : > { %2294 = vmatprep.subr.bf16.mxu1 %v2435_v1 }
  0xc0   : > { %1391 = vmatmul.mubr.bf16.gmra.mrb[16].mxu0 %v1163_v0 }
  0xc1   : > { %2130 = vmatprep.mubr.msk.bf16.mxu0 %vm1140_vm1, %v2908_v59  ;;  %1712 = vmatpush1.bf16.msra.mxu0 %v2391_v63 }
  0xc2   : > { %1713 = vmatprep.subr.bf16.mxu0 %v2435_v1  ;;  %2306 = vmatpush1.bf16.msra.mxu1 %v2392_v33 }
  0xc3   : > { %2295 = vmatprep.subr.bf16.mxu1 %v2435_v1 }
  0xc4   : > { %1571 = vmatmul.mubr.bf16.gmra.mrb[20].mxu1 %v1163_v0 }
  0xc5   : > { %2151 = vmatprep.mubr.msk.bf16.mxu1 %vm1140_vm1, %v2908_v59  ;;  %1714 = vmatpush1.bf16.msra.mxu0 %v2392_v33 }
  0xc6   : > { %1715 = vmatprep.subr.bf16.mxu0 %v2435_v1  ;;  %2307 = vmatpush1.bf16.msra.mxu1 %v2393_v57 }
  0xc7   : > { %2296 = vmatprep.subr.bf16.mxu1 %v2435_v1 }
  0xc8   : > { %1399 = vmatmul.mubr.bf16.gmra.mrb[20].mxu0 %v1167_v42 }
  0xc9   : > { %2131 = vmatprep.mubr.msk.bf16.mxu0 %vm1140_vm1, %v2923_v35  ;;  %1716 = vmatpush1.bf16.msra.mxu0 %v2393_v57 }
  0xca   : > { %2308 = vmatpush1.bf16.msra.mxu1 %v2394_v6  ;;  %1717 = vmatprep.subr.bf16.mxu0 %v2435_v1  ;;  %v1139_v1 = vpop.permute.xlu1 %1138 }
  0xcc   : > { %1579 = vmatmul.mubr.bf16.gmra.mrb[24].mxu1 %v1167_v42 }
  0xcd   : > { %2152 = vmatprep.mubr.msk.bf16.mxu1 %vm1140_vm1, %v2923_v35  ;;  %1718 = vmatpush1.bf16.msra.mxu0 %v2394_v6 }
  0xd0   : > { %1407 = vmatmul.mubr.bf16.gmra.mrb[24].mxu0 %v1171_v61 }
  0xd1   : > { %2132 = vmatprep.mubr.msk.bf16.mxu0 %vm1140_vm1, %v2938_v21 }
  0xd4   : > { %1587 = vmatmul.mubr.bf16.gmra.mrb[28].mxu1 %v1171_v61 }
  0xd5   : > { %2193 = vmatprep.mubr.msk.bf16.mxu1 %vm1140_vm1, %v2908_v59 }
  0xd8   : > { %1415 = vmatmul.mubr.bf16.gmra.mrb[28].mxu0 %v1175_v16 }
  0xd9   : > { %2189 = vmatprep.mubr.msk.bf16.mxu0 %vm1140_vm1, %v2835_v52  ;;  %v1179_v52 = vsel %vm1140_vm1, %v2952_v3, %v1139_v1 }
  0xdc   : > { %1760 = vmatmul.mubr.bf16.vlgmr.msra.gmra.mrb[32].mxu1 %v1167_v42 }
  0xdd   : > { %2194 = vmatprep.mubr.msk.bf16.mxu1 %vm1140_vm1, %v2923_v35 }
  0xe0   : > { %1728 = vmatmul.mubr.bf16.vlgmr.msra.gmra.mrb[32].mxu0 %v2976_v51 }
  0xe1   : > { %2190 = vmatprep.mubr.msk.bf16.mxu0 %vm1140_vm1, %v2864_v22 }
  0xe4   : > { %1768 = vmatmul.mubr.bf16.gmra.mrb[36].mxu1 %v1171_v61 }
  0xe5   : > { %2195 = vmatprep.mubr.msk.bf16.mxu1 %vm1140_vm1, %v2938_v21 }
  0xe8   : > { %1736 = vmatmul.mubr.bf16.gmra.mrb[36].mxu0 %v2996_v28 }
  0xe9   : > { %2191 = vmatprep.mubr.msk.bf16.mxu0 %vm1140_vm1, %v2875_v23 }
  0xec   : > { %1776 = vmatmul.mubr.bf16.gmra.mrb[40].mxu1 %v1175_v16 }
  0xed   : > { %2196 = vmatprep.mubr.msk.bf16.mxu1 %vm1140_vm1, %v2950_v41 }
  0xf0   : > { %1744 = vmatmul.mubr.bf16.gmra.mrb[40].mxu0 %v3016_v2 }
  0xf1   : > { %2192 = vmatprep.mubr.msk.bf16.mxu0 %vm1140_vm1, %v2883_v34 }
  0xf4   : > { %1784 = vmatmul.mubr.bf16.gmra.mrb[44].mxu1 %v1179_v52 }
  0xf8   : > { %1752 = vmatmul.mubr.bf16.gmra.mrb[44].mxu0 %v1163_v0 }
 0x16f   : > { %v1532_v22 = vpop.f32.mrb[0].mxu1 }
 0x170   : > { %v1534_v59 = vpop.f32.mrb[1].mxu1 }
 0x171   : > { %v1535_v35 = vpop.f32.mrb[2].mxu1 }
 0x172   : > { %v1537_v12 = vpop.f32.mrb[3].mxu1 }
 0x173   : > { %v1360_v23 = vpop.f32.mrb[0].mxu0 }
 0x174   : > { %v3091_v45 = vadd.f32 %v1532_v22, %v1360_v23  ;;  %v1362_v46 = vpop.f32.mrb[1].mxu0 }
 0x175   : > { %v1363_v36 = vpop.f32.mrb[2].mxu0 }
 0x176   : > { %v3093_v48 = vadd.f32 %v1535_v35, %v1363_v36  ;;  %v1365_v43 = vpop.f32.mrb[3].mxu0 }
 0x177   : > { %v1540_v62 = vpop.f32.mrb[4].mxu1 }
 0x178   : > { %v1542_v21 = vpop.f32.mrb[5].mxu1 }
 0x179   : > { %v1543_v13 = vpop.f32.mrb[6].mxu1 }
 0x17a   : > { %v1545_v18 = vpop.f32.mrb[7].mxu1 }
 0x17b   : > { %v1368_v20 = vpop.f32.mrb[4].mxu0 }
 0x17c   : > { %v3095_v34 = vadd.f32 %v1540_v62, %v1368_v20  ;;  %v1370_v55 = vpop.f32.mrb[5].mxu0 }
 0x17d   : > { %v1371_v25 = vpop.f32.mrb[6].mxu0 }
 0x17e   : > { %v3097_v26 = vadd.f32 %v1543_v13, %v1371_v25  ;;  %v1373_v17 = vpop.f32.mrb[7].mxu0 }
 0x17f   : > { %v1548_v56 = vpop.f32.mrb[8].mxu1 }
 0x180   : > { %v1550_v31 = vpop.f32.mrb[9].mxu1 }
 0x181   : > { %v1551_v40 = vpop.f32.mrb[10].mxu1  ;;  %v3116_v31 = vld [vmem:[%s3178_s4] ss:$0 sm:$0xff] }
 0x182   : > { %v1553_v8 = vpop.f32.mrb[11].mxu1 }
 0x183   : > { %v1376_v47 = vpop.f32.mrb[8].mxu0 }
 0x184   : > { %v3099_v49 = vadd.f32 %v1548_v56, %v1376_v47  ;;  %v1378_v10 = vpop.f32.mrb[9].mxu0 }
 0x185   : > { %v1379_v27 = vpop.f32.mrb[10].mxu0 }
 0x186   : > { %v3101_v44 = vadd.f32 %v1551_v40, %v1379_v27  ;;  %v1381_v14 = vpop.f32.mrb[11].mxu0 }
 0x187   : > { %v1556_v41 = vpop.f32.mrb[12].mxu1 }
 0x188   : > { %v1558_v3 = vpop.f32.mrb[13].mxu1 }
 0x189   : > { %v1559_v30 = vpop.f32.mrb[14].mxu1 }
 0x18a   : > { %v1561_v53 = vpop.f32.mrb[15].mxu1 }
 0x18b   : > { %v1384_v50 = vpop.f32.mrb[12].mxu0 }
 0x18c   : > { %v3103_v19 = vadd.f32 %v1556_v41, %v1384_v50  ;;  %v1386_v58 = vpop.f32.mrb[13].mxu0 }
 0x18d   : > { %v1387_v5 = vpop.f32.mrb[14].mxu0 }
 0x18e   : > { %v3105_v11 = vadd.f32 %v1559_v30, %v1387_v5  ;;  %v1389_v32 = vpop.f32.mrb[15].mxu0 }
 0x18f   : > { %v1564_v51 = vpop.f32.mrb[16].mxu1 }
 0x190   : > { %v1566_v7 = vpop.f32.mrb[17].mxu1 }
 0x191   : > { %v1567_v37 = vpop.f32.mrb[18].mxu1 }
 0x192   : > { %v1569_v54 = vpop.f32.mrb[19].mxu1 }
 0x193   : > { %v1392_v28 = vpop.f32.mrb[16].mxu0 }
 0x194   : > { %v1565_v39 = vadd.f32 %v1564_v51, %v1392_v28  ;;  %v1394_v9 = vpop.f32.mrb[17].mxu0 }
 0x195   : > { %v1395_v60 = vpop.f32.mrb[18].mxu0 }
 0x196   : > { %v1568_v2 = vadd.f32 %v1567_v37, %v1395_v60  ;;  %v1397_v38 = vpop.f32.mrb[19].mxu0 }
 0x197   : > { %v1572_v24 = vpop.f32.mrb[20].mxu1 }
 0x198   : > { %v1574_v63 = vpop.f32.mrb[21].mxu1 }
 0x199   : > { %v1575_v0 = vpop.f32.mrb[22].mxu1 }
 0x19a   : > { %v1577_v33 = vpop.f32.mrb[23].mxu1 }
 0x19b   : > { %v1400_v29 = vpop.f32.mrb[20].mxu0 }
 0x19c   : > { %v1573_v57 = vadd.f32 %v1572_v24, %v1400_v29  ;;  %v1402_v42 = vpop.f32.mrb[21].mxu0 }
 0x19d   : > { %v1403_v6 = vpop.f32.mrb[22].mxu0 }
 0x19e   : > { %v1576_v4 = vadd.f32 %v1575_v0, %v1403_v6  ;;  %v1405_v61 = vpop.f32.mrb[23].mxu0 }
 0x19f   : > { %v1580_v15 = vpop.f32.mrb[24].mxu1 }
 0x1a0   : > { %v1582_v16 = vpop.f32.mrb[25].mxu1 }
 0x1a1   : > { %v1583_v1 = vpop.f32.mrb[26].mxu1 }
 0x1a2   : > { %v1585_v52 = vpop.f32.mrb[27].mxu1 }
 0x1a3   : > { %v1408_v22 = vpop.f32.mrb[24].mxu0 }
 0x1a4   : > { %v1581_v59 = vadd.f32 %v1580_v15, %v1408_v22  ;;  %v1410_v35 = vpop.f32.mrb[25].mxu0 }
 0x1a5   : > { %v1411_v12 = vpop.f32.mrb[26].mxu0 }
 0x1a6   : > { %v3107_v23 = vadd.f32 %v1583_v1, %v1411_v12  ;;  %v1413_v46 = vpop.f32.mrb[27].mxu0 }
 0x1a7   : > { %v1588_v36 = vpop.f32.mrb[28].mxu1 }
 0x1a8   : > { %v1590_v43 = vpop.f32.mrb[29].mxu1 }
 0x1a9   : > { %v1591_v62 = vpop.f32.mrb[30].mxu1 }
 0x1aa   : > { %v1593_v21 = vpop.f32.mrb[31].mxu1 }
 0x1ab   : > { %v1416_v13 = vpop.f32.mrb[28].mxu0 }
 0x1ac   : > { %v3109_v18 = vadd.f32 %v1588_v36, %v1416_v13  ;;  %v1418_v20 = vpop.f32.mrb[29].mxu0 }
 0x1ad   : > { %v1419_v55 = vpop.f32.mrb[30].mxu0 }
 0x1ae   : > { %v3111_v25 = vadd.f32 %v1591_v62, %v1419_v55  ;;  %v1421_v17 = vpop.f32.mrb[31].mxu0 }
 0x1af   : > { %v1761_v56 = vpop.f32.mrb[32].mxu1 }
 0x1b0   : > { %v1800_v40 = vadd.f32 %v1761_v56, %v1565_v39  ;;  %v1763_v8 = vpop.f32.mrb[33].mxu1 }
 0x1b1   : > { %v1764_v47 = vpop.f32.mrb[34].mxu1 }
 0x1b2   : > { %v1823_v10 = vadd.f32 %v3116_v31, %v1800_v40  ;;  %v1801_v27 = vadd.f32 %v1764_v47, %v1568_v2  ;;  %v1766_v14 = vpop.f32.mrb[35].mxu1 }
 0x1b3   : > { %v1729_v41 = vpop.f32.mrb[32].mxu0 }
 0x1b4   : > { %v1824_v3 = vadd.f32 %v3116_v31, %v1801_v27  ;;  %v1792_v30 = vadd.f32 %v1729_v41, %v3091_v45  ;;  %v1731_v53 = vpop.f32.mrb[33].mxu0  ;;  %v1839_v58 = vmax.f32 %v1823_v10, 0.0 }
 0x1b5   : > { %v1732_v50 = vpop.f32.mrb[34].mxu0 }
 0x1b6   : > { %v1840_v5 = vmax.f32 %v1824_v3, 0.0  ;;  %v1815_v32 = vadd.f32 %v3116_v31, %v1792_v30  ;;  %v1793_v51 = vadd.f32 %v1732_v50, %v3093_v48  ;;  %v1734_v7 = vpop.f32.mrb[35].mxu0 }
 0x1b7   : > { %v1769_v37 = vpop.f32.mrb[36].mxu1 }
 0x1b8   : > { %v2261_v54 = vpack.c.bf16 %v1840_v5, %v1839_v58  ;;  %v1816_v28 = vadd.f32 %v3116_v31, %v1793_v51  ;;  %v1802_v45 = vadd.f32 %v1769_v37, %v1573_v57  ;;  %v1771_v39 = vpop.f32.mrb[37].mxu1  ;;  %v1831_v60 = vmax.f32 %v1815_v32, 0.0 }
 0x1b9   : > { %v1772_v9 = vpop.f32.mrb[38].mxu1 }
 0x1ba   : > { %2281 = vst [vmem:[%s3127_s26 + $0x20] sm:$0xff] %v2261_v54   ;;  %v1832_v2 = vmax.f32 %v1816_v28, 0.0  ;;  %v1825_v48 = vadd.f32 %v3116_v31, %v1802_v45  ;;  %v1803_v38 = vadd.f32 %v1772_v9, %v1576_v4  ;;  %v1774_v24 = vpop.f32.mrb[39].mxu1 }
 0x1bb   : > { %v1737_v63 = vpop.f32.mrb[36].mxu0 }
 0x1bc   : > { %v2241_v0 = vpack.c.bf16 %v1832_v2, %v1831_v60  ;;  %v1826_v33 = vadd.f32 %v3116_v31, %v1803_v38  ;;  %v1794_v29 = vadd.f32 %v1737_v63, %v3095_v34  ;;  %v1739_v42 = vpop.f32.mrb[37].mxu0  ;;  %v1841_v57 = vmax.f32 %v1825_v48, 0.0 }
 0x1bd   : > { %v1740_v6 = vpop.f32.mrb[38].mxu0 }
 0x1be   : > { %2242 = vst [vmem:[%s3127_s26] sm:$0xff] %v2241_v0   ;;  %v1842_v61 = vmax.f32 %v1826_v33, 0.0  ;;  %v1817_v15 = vadd.f32 %v3116_v31, %v1794_v29  ;;  %v1795_v16 = vadd.f32 %v1740_v6, %v3097_v26  ;;  %v1742_v1 = vpop.f32.mrb[39].mxu0 }
 0x1bf   : > { %v1777_v52 = vpop.f32.mrb[40].mxu1 }
 0x1c0   : > { %v2266_v4 = vpack.c.bf16 %v1842_v61, %v1841_v57  ;;  %v1818_v22 = vadd.f32 %v3116_v31, %v1795_v16  ;;  %v1804_v35 = vadd.f32 %v1777_v52, %v1581_v59  ;;  %v1779_v12 = vpop.f32.mrb[41].mxu1  ;;  %v1833_v34 = vmax.f32 %v1817_v15, 0.0 }
 0x1c1   : > { %v1780_v46 = vpop.f32.mrb[42].mxu1 }
 0x1c2   : > { %2282 = vst [vmem:[%s3127_s26 + $0x28] sm:$0xff] %v2266_v4   ;;  %v1834_v36 = vmax.f32 %v1818_v22, 0.0  ;;  %v1827_v43 = vadd.f32 %v3116_v31, %v1804_v35  ;;  %v1805_v62 = vadd.f32 %v1780_v46, %v3107_v23  ;;  %v1782_v21 = vpop.f32.mrb[43].mxu1 }
 0x1c3   : > { %v1745_v13 = vpop.f32.mrb[40].mxu0 }
 0x1c4   : > { %v2246_v20 = vpack.c.bf16 %v1834_v36, %v1833_v34  ;;  %v1828_v26 = vadd.f32 %v3116_v31, %v1805_v62  ;;  %v1796_v55 = vadd.f32 %v1745_v13, %v3099_v49  ;;  %v1747_v17 = vpop.f32.mrb[41].mxu0  ;;  %v1843_v59 = vmax.f32 %v1827_v43, 0.0 }
 0x1c5   : > { %v1748_v56 = vpop.f32.mrb[42].mxu0 }
 0x1c6   : > { %2278 = vst [vmem:[%s3127_s26 + $0x8] sm:$0xff] %v2246_v20   ;;  %v1844_v40 = vmax.f32 %v1828_v26, 0.0  ;;  %v1819_v8 = vadd.f32 %v3116_v31, %v1796_v55  ;;  %v1797_v47 = vadd.f32 %v1748_v56, %v3101_v44  ;;  %v1750_v10 = vpop.f32.mrb[43].mxu0 }
 0x1c7   : > { %v1785_v27 = vpop.f32.mrb[44].mxu1 }
 0x1c8   : > { %v2271_v23 = vpack.c.bf16 %v1844_v40, %v1843_v59  ;;  %v1820_v14 = vadd.f32 %v3116_v31, %v1797_v47  ;;  %v1806_v41 = vadd.f32 %v1785_v27, %v3109_v18  ;;  %v1787_v3 = vpop.f32.mrb[45].mxu1  ;;  %v1835_v49 = vmax.f32 %v1819_v8, 0.0 }
 0x1c9   : > { %v1788_v30 = vpop.f32.mrb[46].mxu1 }
 0x1ca   : > { %2283 = vst [vmem:[%s3127_s26 + $0x30] sm:$0xff] %v2271_v23   ;;  %v1836_v53 = vmax.f32 %v1820_v14, 0.0  ;;  %v1829_v50 = vadd.f32 %v3116_v31, %v1806_v41  ;;  %v1807_v58 = vadd.f32 %v1788_v30, %v3111_v25  ;;  %v1790_v5 = vpop.f32.mrb[47].mxu1 }
 0x1cb   : > { %v1753_v44 = vpop.f32.mrb[44].mxu0 }
 0x1cc   : > { %v2251_v32 = vpack.c.bf16 %v1836_v53, %v1835_v49  ;;  %v1830_v51 = vadd.f32 %v3116_v31, %v1807_v58  ;;  %v1798_v7 = vadd.f32 %v1753_v44, %v3103_v19  ;;  %v1755_v37 = vpop.f32.mrb[45].mxu0  ;;  %v1845_v54 = vmax.f32 %v1829_v50, 0.0 }
 0x1cd   : > { %v1756_v18 = vpop.f32.mrb[46].mxu0 }
 0x1ce   : > { %2279 = vst [vmem:[%s3127_s26 + $0x10] sm:$0xff] %v2251_v32   ;;  %v1846_v28 = vmax.f32 %v1830_v51, 0.0  ;;  %v1821_v45 = vadd.f32 %v3116_v31, %v1798_v7  ;;  %v1799_v39 = vadd.f32 %v1756_v18, %v3105_v11  ;;  %v1758_v9 = vpop.f32.mrb[47].mxu0 }
 0x1d0   : > { %v2276_v25 = vpack.c.bf16 %v1846_v28, %v1845_v54  ;;  %v1822_v60 = vadd.f32 %v3116_v31, %v1799_v39  ;;  %v1837_v2 = vmax.f32 %v1821_v45, 0.0 }
 0x1d2   : > { %2284 = vst [vmem:[%s3127_s26 + $0x38] sm:$0xff] %v2276_v25   ;;  %v1838_v48 = vmax.f32 %v1822_v60, 0.0 }
 0x1d4   : > { %v2256_v38 = vpack.c.bf16 %v1838_v48, %v1837_v2 }
 0x1d6   : > { %2280 = vst [vmem:[%s3127_s26 + $0x18] sm:$0xff] %v2256_v38  }
 0x1d7 PF: > { %s15_s22 = sadd.s32 1, %s2433_s22   ;;  %s3183_s18 = smov %s2425_s20 }
 0x1d8   : > { %p12_p1 = scmp.ge.s32.totalorder %s15_s22, 6   ;;  %s3184_s19 = smov %s2429_s21 }
 0x1d9   : > { %s3185_s20 = smov %s3188_s23  ;;  %s3186_s21 = smov %s3192_s24 }
 0x1da   :  { %14 = sbr.rel (!%p12_p1) target bundleno = 3 (0x3), region = 78 }

// kernel: feature_extractor.5
= control target key start
LH: loop header
LB: loop body
LE: loop exit
PB: predicated region body
PF: predicated region fallthrough
CT: control target
= control target key end

     0   :  { %s3492_s18 = smov 0   ;;  %s3494_s19 = smov 0   ;;  %s4823_s0 = inlined_call_operand.vmem [shape: bf16[2,1024,64], index: 0, kind: input, shape index: {}, may-alias: {0,1,2}]   ;;  %s4824_s1 = inlined_call_operand.vmem [shape: bf16[2,1024,64], index: 1, kind: input, shape index: {}, may-alias: {0,1,2}]   ;;  %s4825_s2 = inlined_call_operand.vmem [shape: bf16[2,1024,64], index: 2, kind: input, shape index: {}, may-alias: {0,1,2}]   ;;  %s4826_s3 = inlined_call_operand.vmem [shape: bf16[3,192,64], index: 3, kind: input, shape index: {}]   ;;  %s4827_s4 = inlined_call_operand.vmem [shape: f32[1,64], index: 4, kind: input, shape index: {}]   ;;  %s4828_s5 = inlined_call_operand.vmem [shape: bf16[2,256,64], index: 5, kind: output, shape index: {}]  }
   0x1   :  { %s3496_s20 = smov 0   ;;  %s3498_s21 = smov 0  }
   0x2   :  { %s3500_s22 = smov 0  }
   0x3 LB: > { %s24_s23 = sadd.s32 1, %s3450_s20  ;;  %s27_s24 = sadd.s32 1, %s3454_s21  ;;  %s3458_s22 = sphi %s3500_s22, %s15_s22   ;;  %s3454_s21 = sphi %s3498_s21, %s4929_s21   ;;  %s3450_s20 = sphi %s3496_s20, %s4928_s20   ;;  %s3446_s19 = sphi %s3494_s19, %s4927_s19   ;;  %s3442_s18 = sphi %s3492_s18, %s4926_s18  }
   0x4   : > { %p25_p0 = scmp.ge.s32.totalorder %s24_s23, 4  ;;  %p3109_p1 = scmp.ge.s32.totalorder %s3458_s22, 1 }
   0x5   : > { %p274_p2 = scmp.lt.s32.totalorder %s3458_s22, 9 }
   0x6   : > { %s4931_s23 = smov (%p25_p0, %s24_s23), 0  ;;  %s4933_s24 = smov (!%p25_p0, %s27_s24), %s3454_s21 }
   0x7   : > { %p275_p3 = pnand %p3109_p1, %p274_p2  ;;  %p29_p4 = scmp.ge.s32.totalorder %s4933_s24, 2 }
   0x9   : > { %s4935_s24 = smov (%p29_p4, %s4933_s24), 0  ;;  %278 = sbr.rel (%p275_p3) target bundleno = 563 (0x233), region = 40 }
  0x10   : > { %p341_p5 = scmp.lt.s32.totalorder %s3446_s19, 1  ;;  %s3115_s25 = sshll.u32 %s3442_s18, 5  ;;  %v3384_v0 = vld [vmem:[%s4826_s3 + $0x60] sm:$0xff]   ;;  %v4835_v1 = vmov 0   ;;  %v3385_v2 = vld [vmem:[%s4826_s3 + $0x68] sm:$0xff]   ;;  %v3386_v3 = vld [vmem:[%s4826_s3 + $0x70] sm:$0xff]  }
  0x11   : > { %p357_p6 = scmp.lt.s32.totalorder %s3115_s25, 127  ;;  %3302 = vmatprep.subr.bf16.mxu1 %v4835_v1  ;;  %2094 = vmatprep.subr.bf16.mxu0 %v4835_v1  ;;  %s3555_s13 = sshll.u32 %s3442_s18, 3  ;;  %v3387_v5 = vld [vmem:[%s4826_s3 + $0x78] sm:$0xff]   ;;  %v3388_v15 = vld [vmem:[%s4826_s3 + $0x80] sm:$0xff]   ;;  %v3389_v34 = vld [vmem:[%s4826_s3 + $0x88] sm:$0xff]   ;;  %vm1622_vm0 = vcmask 1046528  }
  0x12   : > { %s4937_s19 = smov (!%p341_p5, %s3446_s19), 1  ;;  %3314 = vmatpush1.bf16.msra.mxu1 %v3384_v0  ;;  %2095 = vmatpush1.bf16.msra.mxu0 %v3384_v0  ;;  %s3461_s16 = smov 64   ;;  %v3390_v44 = vld [vmem:[%s4826_s3 + $0x90] sm:$0xff]   ;;  %vm1844_vm1 = vcmask 523264   ;;  %vm1319_vm2 = vcmask 1040384  }
  0x13   : > { %s4939_s25 = smov (!%p357_p6, %s3115_s25), 127  ;;  %3303 = vmatprep.subr.bf16.mxu1 %v4835_v1  ;;  %2096 = vmatprep.subr.bf16.mxu0 %v4835_v1  ;;  %s3538_s30 = sshll.u32 %s4937_s19, 7 }
  0x14   : > { %s360_s6 = sadd.s32 %s3538_s30, %s4939_s25  ;;  %s3111_s17 = sadd.s32 4294967295, %s3555_s13 }
  0x15   : > { %s3117_s7 = sshll.u32 %s360_s6, 2  ;;  %p3599_p7 = scmp.gt.s32.totalorder %s3111_s17, 0 }
  0x16   : > { %3315 = vmatpush1.bf16.msra.mxu1 %v3385_v2  ;;  %2097 = vmatpush1.bf16.msra.mxu0 %v3385_v2  ;;  %s3547_s12 = scalar_lea.vmem %s4824_s1, %s3117_s7  ;;  %s3293_s9 = sadd.s32 8, %s3555_s13 }
  0x17   : > { %3304 = vmatprep.subr.bf16.mxu1 %v4835_v1  ;;  %2098 = vmatprep.subr.bf16.mxu0 %v4835_v1  ;;  %v3552_v4 = vld [vmem:[%s3547_s12 + $0x40] sm:$0xff]   ;;  %v3568_v9 = vld [vmem:[%s3547_s12 + $0x48] sm:$0xff]   ;;  %v3372_v19 = vld [vmem:[%s3547_s12 + $0x50] sm:$0xff]   ;;  %s4941_s17 = smov (!%p3599_p7, %s3111_s17), 0  ;;  %p3734_p9 = scmp.lt.s32.totalorder %s3293_s9, 31 }
  0x18   : > { %v3561_v6 = vld [vmem:[%s3547_s12] sm:$0xff]   ;;  %1824 = vrot.lane.b32.xlu0 %v3552_v4, %s3461_s16  ;;  %v4834_v7 = vunpack.c.l.bf16 %v3552_v4  ;;  %v4833_v8 = vunpack.c.h.bf16 %v3552_v4  ;;  %1826 = vrot.lane.b32.xlu1 %v3568_v9, %s3461_s16  ;;  %v3577_v12 = vld [vmem:[%s3547_s12 + $0x8] sm:$0xff]   ;;  %v4832_v13 = vunpack.c.l.bf16 %v3568_v9  ;;  %v619_v14 = vunpack.c.h.bf16 %v3568_v9  ;;  %s3112_s8 = sshll.u32 %s4941_s17, 2  ;;  %p385_p10 = scmp.lt.s32.totalorder %s3555_s13, 31 }
  0x19   : > { %v4831_v10 = vunpack.c.l.bf16 %v3561_v6  ;;  %v4830_v11 = vunpack.c.h.bf16 %v3561_v6  ;;  %v603_v18 = vunpack.c.h.bf16 %v3577_v12  ;;  %v3373_v23 = vld [vmem:[%s3547_s12 + $0x10] sm:$0xff]   ;;  %v4829_v24 = vunpack.c.l.bf16 %v3577_v12  ;;  %v3374_v29 = vld [vmem:[%s3547_s12 + $0x58] sm:$0xff]   ;;  %v3376_v48 = vld [vmem:[%s3547_s12 + $0x60] sm:$0xff]   ;;  %p3704_p8 = scmp.lt.s32.totalorder %s3112_s8, 127  ;;  %s4945_s9 = smov (!%p3734_p9, %s3293_s9), 31 }
  0x1a   : > { %3316 = vmatpush1.bf16.msra.mxu1 %v3386_v3  ;;  %2099 = vmatpush1.bf16.msra.mxu0 %v3386_v3  ;;  %v3587_v16 = vrot.slane %v4834_v7, 7  ;;  %v3591_v17 = vrot.slane %v4833_v8, 7  ;;  %v3613_v22 = vrot.slane %v4832_v13, 7  ;;  %v620_v25 = vunpack.c.l.bf16 %v3372_v19  ;;  %v3375_v39 = vld [vmem:[%s3547_s12 + $0x18] sm:$0xff]   ;;  %v3377_v55 = vld [vmem:[%s3547_s12 + $0x20] sm:$0xff]   ;;  %v3378_v59 = vld [vmem:[%s3547_s12 + $0x68] sm:$0xff]  }
  0x1b   : > { %3305 = vmatprep.subr.bf16.mxu1 %v4835_v1  ;;  %2100 = vmatprep.subr.bf16.mxu0 %v4835_v1  ;;  %v3605_v20 = vrot.slane %v4831_v10, 7  ;;  %v3609_v21 = vrot.slane %v4830_v11, 7  ;;  %v621_v26 = vunpack.c.h.bf16 %v3372_v19  ;;  %v3621_v27 = vrot.slane %v619_v14, 7  ;;  %s4943_s8 = smov (!%p3704_p8, %s3112_s8), 127  ;;  %v3768_v10 = vld [vmem:[%s3547_s12 + $0x78] sm:$0xff]   ;;  %p397_p11 = scmp.gt.s32.totalorder %s3442_s18, 0 }
  0x1c   : > { %1808 = vrot.lane.b32.xlu0 %v3561_v6, %s3461_s16  ;;  %1810 = vrot.lane.b32.xlu1 %v3577_v12, %s3461_s16  ;;  %v605_v28 = vunpack.c.h.bf16 %v3373_v23  ;;  %v3624_v30 = vrot.slane %v619_v14, 1  ;;  %v3628_v31 = vrot.slane %v4829_v24, 7  ;;  %v3630_v32 = vrot.slane %v603_v18, 7  ;;  %s386_s17 = scalar_select %p385_p10, %s3555_s13, 31 }
  0x1d   : > { %v604_v33 = vunpack.c.l.bf16 %v3373_v23  ;;  %v3636_v35 = vrot.slane %v603_v18, 1  ;;  %v3638_v36 = vrot.slane %v620_v25, 7  ;;  %v622_v37 = vunpack.c.l.bf16 %v3374_v29  ;;  %v3379_v18 = vld [vmem:[%s3547_s12 + $0x28] sm:$0xff]   ;;  %s3123_s13 = sshll.u32 %s4937_s19, 5  ;;  %s346_s19 = sadd.s32 %s3538_s30, %s4943_s8 }
  0x1e   : > { %3317 = vmatpush1.bf16.msra.mxu1 %v3387_v5  ;;  %2101 = vmatpush1.bf16.msra.mxu0 %v3387_v5  ;;  %v623_v38 = vunpack.c.h.bf16 %v3374_v29  ;;  %v3648_v40 = vrot.slane %v621_v26, 7  ;;  %v3650_v41 = vrot.slane %v620_v25, 1  ;;  %v3652_v42 = vrot.slane %v621_v26, 1  ;;  %v3380_v25 = vld [vmem:[%s3547_s12 + $0x70] sm:$0xff]   ;;  %s3804_s28 = sadd.s32 %s3123_s13, %s386_s17  ;;  %s3849_s8 = sshll.u32 %s346_s19, 2 }
  0x1f   : > { %3306 = vmatprep.subr.bf16.mxu1 %v4835_v1  ;;  %2102 = vmatprep.subr.bf16.mxu0 %v4835_v1  ;;  %v3654_v43 = vrot.slane %v604_v33, 7  ;;  %v3661_v45 = vrot.slane %v605_v28, 7  ;;  %v606_v46 = vunpack.c.l.bf16 %v3375_v39  ;;  %v607_v47 = vunpack.c.h.bf16 %v3375_v39  ;;  %s398_s7 = scalar_select %p397_p11, 1, 0 }
  0x20   : > { %1828 = vrot.lane.b32.xlu0 %v3372_v19, %s3461_s16  ;;  %1812 = vrot.lane.b32.xlu1 %v3373_v23, %s3461_s16  ;;  %v3664_v49 = vrot.slane %v604_v33, 1  ;;  %v3666_v50 = vrot.slane %v605_v28, 1  ;;  %v3669_v51 = vrot.slane %v622_v37, 7  ;;  %v3671_v52 = vrot.slane %v623_v38, 7  ;;  %v3391_v28 = vld [vmem:[%s4826_s3 + $0x98] sm:$0xff]   ;;  %p422_p0 = scmp.lt.s32.totalorder %s3442_s18, 3 }
  0x21   : > { %v624_v53 = vunpack.c.l.bf16 %v3376_v48  ;;  %v625_v54 = vunpack.c.h.bf16 %v3376_v48  ;;  %v3676_v56 = vrot.slane %v622_v37, 1  ;;  %v3678_v57 = vrot.slane %v623_v38, 1  ;;  %v3381_v38 = vld [vmem:[%s3547_s12 + $0x30] sm:$0xff]   ;;  %s3851_s10 = scvt.s32.f32 %s398_s7  ;;  %s3124_s17 = sshll.u32 %s3804_s28, 2 }
  0x22   : > { %3318 = vmatpush1.bf16.msra.mxu1 %v3388_v15  ;;  %2103 = vmatpush1.bf16.msra.mxu0 %v3388_v15  ;;  %v3680_v58 = vrot.slane %v606_v46, 7  ;;  %v3685_v60 = vrot.slane %v607_v47, 7  ;;  %v3687_v61 = vrot.slane %v606_v46, 1  ;;  %v3689_v62 = vrot.slane %v607_v47, 1  ;;  %s423_s11 = scalar_select %p422_p0, 1, 0 }
  0x23   : > { %3307 = vmatprep.subr.bf16.mxu1 %v4835_v1  ;;  %2104 = vmatprep.subr.bf16.mxu0 %v4835_v1  ;;  %v609_v63 = vunpack.c.h.bf16 %v3377_v55  ;;  %v608_v0 = vunpack.c.l.bf16 %v3377_v55  ;;  %v626_v2 = vunpack.c.l.bf16 %v3378_v59  ;;  %v3693_v3 = vrot.slane %v624_v53, 7  ;;  %s402_s15 = sshrl.u32 %s3851_s10, 16  ;;  %p401_p12 = scmp.ne.f32.partialorder %s3851_s10, %s3851_s10 }
  0x24   : > { %1830 = vrot.lane.b32.xlu0 %v3374_v29, %s3461_s16  ;;  %1814 = vrot.lane.b32.xlu1 %v3375_v39, %s3461_s16  ;;  %v3695_v5 = vrot.slane %v625_v54, 7  ;;  %v3697_v14 = vrot.slane %v624_v53, 1  ;;  %v3699_v15 = vrot.slane %v625_v54, 1  ;;  %v627_v23 = vunpack.c.h.bf16 %v3378_v59  ;;  %v3392_v53 = vld [vmem:[%s4826_s3 + $0xa0] sm:$0xff]   ;;  %s403_s25 = sand.u32 1, %s402_s15  ;;  %s4124_s18 = scvt.s32.f32 %s423_s11 }
  0x25   : > { %v3709_v19 = vrot.slane %v608_v0, 7  ;;  %v3714_v26 = vrot.slane %v609_v63, 7  ;;  %v3719_v29 = vrot.slane %v608_v0, 1  ;;  %v3721_v33 = vrot.slane %v609_v63, 1  ;;  %s404_s26 = sadd.s32 32767, %s403_s25 }
  0x26   : > { %3319 = vmatpush1.bf16.msra.mxu1 %v3389_v34  ;;  %2105 = vmatpush1.bf16.msra.mxu0 %v3389_v34  ;;  %v610_v34 = vunpack.c.l.bf16 %v3379_v18  ;;  %v611_v37 = vunpack.c.h.bf16 %v3379_v18  ;;  %v3725_v39 = vrot.slane %v626_v2, 7  ;;  %v628_v46 = vunpack.c.l.bf16 %v3380_v25  ;;  %s405_s13 = sadd.s32 %s404_s26, %s3851_s10  ;;  %s427_s14 = sshrl.u32 %s4124_s18, 16 }
  0x27   : > { %3308 = vmatprep.subr.bf16.mxu1 %v4835_v1  ;;  %2106 = vmatprep.subr.bf16.mxu0 %v4835_v1  ;;  %v629_v47 = vunpack.c.h.bf16 %v3380_v25  ;;  %v3742_v54 = vrot.slane %v627_v23, 7  ;;  %v613_v63 = vunpack.c.h.bf16 %v3381_v38  ;;  %s406_s29 = sand.u32 4294901760, %s405_s13  ;;  %p426_p1 = scmp.ne.f32.partialorder %s4124_s18, %s4124_s18 }
  0x28   : > { %1832 = vrot.lane.b32.xlu0 %v3376_v48, %s3461_s16  ;;  %1816 = vrot.lane.b32.xlu1 %v3377_v55, %s3461_s16  ;;  %v3730_v48 = vld [vmem:[%s3547_s12 + $0x38] sm:$0xff]   ;;  %v3744_v55 = vrot.slane %v627_v23, 1  ;;  %v3748_v0 = vrot.slane %v610_v34, 7  ;;  %v637_v23 = vlaneseq  ;;  %v3762_v24 = vrot.slane %v611_v37, 1  ;;  %s348_s12 = scalar_lea.vmem %s4823_s0, %s3849_s8  ;;  %s4947_s29 = smov (%p401_p12, %s406_s29), 2143289344 }
  0x29   : > { %v3764_v11 = vrot.slane %v628_v46, 7  ;;  %v3773_v13 = vrot.slane %v629_v47, 7  ;;  %v3775_v8 = vrot.slane %v628_v46, 1  ;;  %v3777_v7 = vrot.slane %v629_v47, 1  ;;  %s409_s6 = sshrl.u32 %s4947_s29, 16  ;;  %s3119_s8 = sshll.u32 %s4945_s9, 2 }
  0x2a   : > { %3320 = vmatpush1.bf16.msra.mxu1 %v3390_v44  ;;  %2107 = vmatpush1.bf16.msra.mxu0 %v3390_v44  ;;  %v3727_v44 = vrot.slane %v626_v2, 1  ;;  %4862 = vst [vmem:[#allocation3_spill] sm:$0xff] %v3748_v0  ;;  %v4837_v2 = vunpack.c.h.bf16 %v3730_v48  ;;  %v3794_v47 = vrot.slane %v613_v63, 1  ;;  %v4882_v0 = vunpack.c.l.bf16 %v3768_v10  ;;  %s410_s19 = sshll.u32 %s409_s6, 16  ;;  %p3985_p13 = scmp.lt.s32.totalorder %s3119_s8, 127 }
  0x2b   : > { %3309 = vmatprep.subr.bf16.mxu1 %v4835_v1  ;;  %2108 = vmatprep.subr.bf16.mxu0 %v4835_v1  ;;  %4864 = vst [vmem:[#allocation5_spill] sm:$0xff] %v3764_v11  ;;  %4865 = vst [vmem:[#allocation6_spill] sm:$0xff] %v3773_v13  ;;  %v4875_v13 = vunpack.c.h.bf16 %v3552_v4  ;;  %s411_s7 = sor.u32 %s410_s19, %s409_s6  ;;  %s428_s15 = sand.u32 1, %s427_s14 }
  0x2c   : > { %1834 = vrot.lane.b32.xlu0 %v3378_v59, %s3461_s16  ;;  %1818 = vrot.lane.b32.xlu1 %v3379_v18, %s3461_s16  ;;  %v612_v59 = vunpack.c.l.bf16 %v3381_v38  ;;  %v3760_v18 = vrot.slane %v610_v34, 1  ;;  %4866 = vst [vmem:[#allocation7_spill] sm:$0xff] %v3777_v7  ;;  %4870 = vst [vmem:[#allocation11_spill] sm:$0xff] %v3794_v47  ;;  %v3829_v47 = vshrl.u32 %v637_v23, 7  ;;  %v4880_v7 = vunpack.c.h.bf16 %v3561_v6  ;;  %s4949_s8 = smov (!%p3985_p13, %s3119_s8), 127  ;;  %s429_s25 = sadd.s32 32767, %s428_s15 }
  0x2d   : > { %s374_s9 = sadd.s32 %s3538_s30, %s4949_s8  ;;  %s430_s26 = sadd.s32 %s429_s25, %s4124_s18 }
  0x2e   : > { %3321 = vmatpush1.bf16.msra.mxu1 %v3391_v28  ;;  %2109 = vmatpush1.bf16.msra.mxu0 %v3391_v28  ;;  %v3758_v28 = vrot.slane %v611_v37, 7  ;;  %v3779_v34 = vrot.slane %v612_v59, 7  ;;  %v3790_v37 = vrot.slane %v613_v63, 7  ;;  %v3792_v46 = vrot.slane %v612_v59, 1  ;;  %s3121_s30 = sshll.u32 %s374_s9, 2  ;;  %s431_s13 = sand.u32 4294901760, %s430_s26 }
  0x2f   : > { %3310 = vmatprep.subr.bf16.mxu1 %v4835_v1  ;;  %2110 = vmatprep.subr.bf16.mxu0 %v4835_v1  ;;  %v3799_v1 = vrot.slane %v4837_v2, 7  ;;  %v4873_v2 = vunpack.c.l.bf16 %v3552_v4  ;;  %v1664_v59 = vrot.slane %v4875_v13, 1  ;;  %v4876_v63 = vunpack.c.l.bf16 %v3568_v9  ;;  %s4951_s13 = smov (%p426_p1, %s431_s13), 2143289344 }
  0x30   : > { %4863 = vst [vmem:[#allocation4_spill] sm:$0xff] %v3758_v28  ;;  %1836 = vrot.lane.b32.xlu0 %v3380_v25, %s3461_s16  ;;  %4867 = vst [vmem:[#allocation8_spill] sm:$0xff] %v3779_v34  ;;  %v3393_v25 = vld [vmem:[%s4826_s3 + $0xa8] sm:$0xff]   ;;  %1820 = vrot.lane.b32.xlu1 %v3381_v38, %s3461_s16  ;;  %v3394_v38 = vld [vmem:[%s4826_s3 + $0xb0] sm:$0xff]   ;;  %v3837_v4 = vsel %vm1622_vm0, %v3636_v35, %v3664_v49  ;;  %v658_v11 = vadd.s32 160, %v3829_v47  ;;  %v4881_v28 = vunpack.c.l.bf16 %v3577_v12  ;;  %s434_s29 = sshrl.u32 %s4951_s13, 16  ;;  %s4732_s13 = scalar_lea.vmem %s4828_s5, %s3124_s17 }
  0x31   : > { %4868 = vst [vmem:[#allocation9_spill] sm:$0xff] %v3790_v37  ;;  %4869 = vst [vmem:[#allocation10_spill] sm:$0xff] %v3792_v46  ;;  %v3818_v37 = vrot.slane %v4873_v2, 1  ;;  %v1666_v34 = vrot.slane %v4876_v63, 1  ;;  %v1671_v2 = vsel %vm1622_vm0, %v3624_v30, %v3650_v41  ;;  %v1362_v23 = vsel %vm1319_vm2, %v3799_v1, %v3587_v16  ;;  %s435_s6 = sshll.u32 %s434_s29, 16 }
  0x32   : > { %3322 = vmatpush1.bf16.msra.mxu1 %v3392_v53  ;;  %2111 = vmatpush1.bf16.msra.mxu0 %v3392_v53  ;;  %4871 = vst [vmem:[#allocation12_spill] sm:$0xff] %v3799_v1  ;;  %v4872_v53 = vmov 0   ;;  %v1632_v1 = vrot.slane %v4880_v7, 1  ;;  %v822_v7 = vand.u32 31, %v658_v11  ;;  %v3890_v46 = vrot.slane %v4882_v0, 7  ;;  %s436_s19 = sor.u32 %s435_s6, %s434_s29 }
  0x33   : > { %3311 = vmatprep.subr.bf16.mxu1 %v4872_v53  ;;  %2112 = vmatprep.subr.bf16.mxu0 %v4872_v53  ;;  %4874 = vst [vmem:[#allocation13_spill] sm:$0xff] %v3818_v37  ;;  %v1665_v9 = vsel %vm1622_vm0, %v3818_v37, %v1664_v59  ;;  %v1667_v13 = vsel %vm1622_vm0, %v1664_v59, %v1666_v34  ;;  %v4878_v37 = vunpack.c.l.bf16 %v3561_v6  ;;  %v661_v6 = vadd.s32 184, %v3829_v47 }
  0x34   : > { %1838 = vrot.lane.b32.xlu0 %v3768_v10, %s3461_s16  ;;  %1822 = vrot.lane.b32.xlu1 %v3730_v48, %s3461_s16  ;;  %v3853_v63 = vpack.c.bf16 %v1667_v13, %v1665_v9  ;;  %v1634_v9 = vrot.slane %v4881_v28, 1  ;;  %v3868_v13 = vadd.s32 32, %v3829_v47  ;;  %v1669_v28 = vsel %vm1622_vm0, %v1666_v34, %v3624_v30 }
  0x35   : > { %v3858_v59 = vrot.slane %v4878_v37, 1  ;;  %v3873_v37 = vsel %vm1319_vm2, %v3605_v20, %v3609_v21  ;;  %v3900_v30 = vsel %vm1319_vm2, %v3613_v22, %v3621_v27  ;;  %vm1178_vm3 = vcmp.eq.s32.totalorder %v822_v7, 0 }
  0x36   : > { %3323 = vmatpush1.bf16.msra.mxu1 %v3393_v25  ;;  %2113 = vmatpush1.bf16.msra.mxu0 %v3393_v25  ;;  %v1364_v25 = vsel %vm1319_vm2, %v3587_v16, %v3591_v17  ;;  %4877 = vst [vmem:[#allocation14_spill] sm:$0xff] %v3853_v63  ;;  %v3395_v16 = vld [vmem:[%s4826_s3 + $0xb8] sm:$0xff]   ;;  %v1635_v11 = vsel %vm1622_vm0, %v1632_v1, %v1634_v9  ;;  %v645_v34 = vadd.s32 56, %v3829_v47  ;;  %v646_v0 = vadd.s32 64, %v3829_v47 }
  0x37   : > { %3312 = vmatprep.subr.bf16.mxu1 %v4872_v53  ;;  %2114 = vmatprep.subr.bf16.mxu0 %v4872_v53  ;;  %4879 = vst [vmem:[#allocation15_spill] sm:$0xff] %v3858_v59  ;;  %v1633_v12 = vsel %vm1622_vm0, %v3858_v59, %v1632_v1  ;;  %v843_v59 = vand.u32 31, %v661_v6  ;;  %v1461_v1 = vsel %vm1178_vm3, 0.0, %v1362_v23  ;;  %v1637_v6 = vsel %vm1622_vm0, %v1634_v9, %v3636_v35  ;;  %v395_v9 = vld [vmem:[%s348_s12 + $0x8] sm:$0xf] }
  0x38   : > { %3189 = vmatprep.mubr.msk.bf16.mxu1 %vm1844_vm1, %v3853_v63  ;;  %v3915_v7 = vpack.c.bf16 %v1364_v25, %v1461_v1  ;;  %v3923_v23 = vsel %vm1319_vm2, %v3609_v21, %v3628_v31  ;;  %v3934_v25 = vsel %vm1319_vm2, %v3628_v31, %v3630_v32  ;;  %v1675_v21 = vsel %vm1622_vm0, %v3652_v42, %v3676_v56 }
  0x39   : > { %vm1524_vm4 = vcmp.eq.s32.totalorder %v843_v59, 31  ;;  %v393_v59 = vld [vmem:[%s348_s12] sm:$0xf]  ;;  %v662_v31 = vadd.s32 192, %v3829_v47 }
  0x3a   : > { %3324 = vmatpush1.bf16.msra.mxu1 %v3394_v38  ;;  %2115 = vmatpush1.bf16.msra.mxu0 %v3394_v38  ;;  %v3886_v38 = vsel %vm1319_vm2, %v3591_v17, %v3613_v22  ;;  %v3902_v17 = vpack.c.bf16 %v1635_v11, %v1633_v12  ;;  %v1767_v12 = vsel %vm1524_vm4, 0.0, %v1671_v2  ;;  %v731_v11 = vand.u32 31, %v645_v34  ;;  %v396_v34 = vld [vmem:[%s348_s12 + $0xc] sm:$0xf] }
  0x3b   : > { %3313 = vmatprep.subr.bf16.mxu1 %v4872_v53  ;;  %2116 = vmatprep.subr.bf16.mxu0 %v4872_v53  ;;  %v3929_v35 = vpack.c.bf16 %v1767_v12, %v1669_v28  ;;  %v1673_v2 = vsel %vm1622_vm0, %v3650_v41, %v3652_v42  ;;  %v614_v12 = vunpack.c.l.bf16 %v3730_v48  ;;  %v1370_v42 = vsel %vm1319_vm2, %v3621_v27, %v3638_v36 }
  0x3c   : > { %4883 = vst [vmem:[#allocation16_spill] sm:$0xff] %v3902_v17  ;;  %3181 = vmatprep.mubr.msk.bf16.mxu0 %vm1844_vm1, %v3902_v17  ;;  %vm1508_vm5 = vcmp.eq.s32.totalorder %v731_v11, 31  ;;  %v3944_v1 = vpack.c.bf16 %v1675_v21, %v1673_v2  ;;  %v1641_v11 = vsel %vm1622_vm0, %v3664_v49, %v3666_v50  ;;  %v850_v2 = vand.u32 31, %v662_v31 }
  0x3d   : > { %v1751_v41 = vsel %vm1508_vm5, 0.0, %v3837_v4  ;;  %v1643_v21 = vsel %vm1622_vm0, %v3666_v50, %v3687_v61  ;;  %v1372_v4 = vsel %vm1319_vm2, %v3638_v36, %v3648_v40  ;;  %v1338_v49 = vsel %vm1319_vm2, %v3630_v32, %v3654_v43 }
  0x3e   : > { %3325 = vmatpush1.bf16.msra.mxu1 %v3395_v16  ;;  %2117 = vmatpush1.bf16.msra.mxu0 %v3395_v16  ;;  %v394_v16 = vld [vmem:[%s348_s12 + $0x4] sm:$0xf]  ;;  %4884 = vst [vmem:[#allocation17_spill] sm:$0xff] %v3944_v1  ;;  %v3955_v28 = vpack.c.bf16 %v1751_v41, %v1637_v6  ;;  %v3964_v27 = vpack.c.bf16 %v1643_v21, %v1641_v11  ;;  %v665_v6 = vadd.s32 216, %v3829_v47  ;;  %v412_v31 = vstv %s411_s7  ;;  %s4176_s12 = scalar_lea.vmem %s4825_s2, %s3121_s30 }
  0x3f   : > { %2333 = vmatprep.subr.bf16.mxu1 %v4872_v53  ;;  %2597 = vmatprep.subr.bf16.mxu0 %v4872_v53  ;;  %vm1182_vm6 = vcmp.eq.s32.totalorder %v850_v2, 0  ;;  %v738_v50 = vand.u32 31, %v646_v0  ;;  %v1340_v41 = vsel %vm1319_vm2, %v3654_v43, %v3661_v45  ;;  %v414_v22 = vmul.bf16 %v412_v31, %v393_v59 }
  0x40   : > { %4885 = vst [vmem:[#allocation18_spill] sm:$0xff] %v3964_v27  ;;  %v415_v63 = vmul.bf16 %v412_v31, %v394_v16  ;;  %v416_v36 = vmul.bf16 %v412_v31, %v395_v9  ;;  %v417_v11 = vmul.bf16 %v412_v31, %v396_v34  ;;  %v1465_v21 = vsel %vm1182_vm6, 0.0, %v1370_v42 }
  0x41   : > { %vm1166_vm7 = vcmp.eq.s32.totalorder %v738_v50, 0  ;;  %v871_v17 = vand.u32 31, %v665_v6  ;;  %v1679_v32 = vsel %vm1622_vm0, %v3678_v57, %v3697_v14  ;;  %v3981_v0 = vpack.c.bf16 %v1372_v4, %v1465_v21 }
  0x42   : > { %v3977_v27 = vcombine.low %v414_v22, %v415_v63  ;;  %v3979_v1 = vcombine.low %v416_v36, %v417_v11  ;;  %v1449_v2 = vsel %vm1166_vm7, 0.0, %v1338_v49  ;;  %v3998_v63 = vsel %vm1319_vm2, %v3648_v40, %v3669_v51 }
  0x43   : > { %v3989_v43 = vpack.c.bf16 %v1340_v41, %v1449_v2  ;;  %vm3991_vm8 = vcmp.eq.s32.totalorder %v871_v17, 31  ;;  %v4003_v22 = vsel %vm1319_vm2, %v3669_v51, %v3671_v52  ;;  %v4889_v16 = vunpack.c.h.bf16 %v3768_v10 }
  0x44   : > { %v4891_v17 = vunpack.c.l.bf16 %v3768_v10  ;;  %1804 = vrot.lane.b32.xlu0 %v3977_v27, %s3461_s16  ;;  %1806 = vrot.lane.b32.xlu1 %v3979_v1, %s3461_s16  ;;  %v4857_v40 = vunpack.c.h.bf16 %v3979_v1  ;;  %v1677_v51 = vsel %vm1622_vm0, %v3676_v56, %v3678_v57  ;;  %v1771_v42 = vsel %vm3991_vm8, 0.0, %v1679_v32 }
  0x45   : > { %v4007_v9 = vrot.slane %v4889_v16, 7  ;;  %v649_v49 = vadd.s32 88, %v3829_v47  ;;  %v4026_v6 = vrot.slane %v614_v12, 7  ;;  %v4028_v31 = vrot.slane %v614_v12, 1 }
  0x46   : > { %v4011_v34 = vrot.slane %v4891_v17, 1  ;;  %v4892_v50 = vunpack.c.h.bf16 %v3730_v48  ;;  %v4893_v36 = vand.u32 31, %v3868_v13  ;;  %v4855_v57 = vunpack.c.l.bf16 %v3977_v27 }
  0x47   : > { %4890 = vst [vmem:[#allocation19_spill] sm:$0xff] %v4007_v9  ;;  %v4856_v11 = vunpack.c.h.bf16 %v3977_v27  ;;  %v4050_v12 = vrot.slane %v4857_v40, 7  ;;  %v1645_v48 = vsel %vm1622_vm0, %v3687_v61, %v3689_v62  ;;  %v4055_v13 = vpack.c.bf16 %v1771_v42, %v1677_v51 }
  0x48   : > { %v4032_v41 = vrot.slane %v4892_v50, 1  ;;  %vm4036_vm9 = vcmp.eq.s32.totalorder %v4893_v36, 0  ;;  %v759_v21 = vand.u32 31, %v649_v49  ;;  %v1647_v32 = vsel %vm1622_vm0, %v3689_v62, %v3719_v29 }
  0x49   : > { %v4063_v2 = vsel %vm1319_vm2, %v3661_v45, %v3680_v58  ;;  %v1330_v59 = vsel %vm1319_vm2, %v4050_v12, %v3605_v20  ;;  %v4072_v61 = vsel %vm1319_vm2, %v3680_v58, %v3685_v60  ;;  %v1681_v62 = vsel %vm1622_vm0, %v3697_v14, %v3699_v15 }
  0x4a   : > { %v1683_v45 = vsel %vm1622_vm0, %v3699_v15, %v3727_v44  ;;  %v1445_v16 = vsel %vm4036_vm9, 0.0, %v1330_v59  ;;  %vm1512_vm10 = vcmp.eq.s32.totalorder %v759_v21, 31  ;;  %v666_v42 = vadd.s32 224, %v3829_v47 }
  0x4b   : > { %v4084_v17 = vpack.c.bf16 %v1683_v45, %v1681_v62  ;;  %v4087_v58 = vpack.c.bf16 %v3873_v37, %v1445_v16  ;;  %v1755_v51 = vsel %vm1512_vm10, 0.0, %v1647_v32  ;;  %v1378_v14 = vsel %vm1319_vm2, %v3671_v52, %v3693_v3  ;;  %v4896_v16 = vld [vmem:[#allocation10_spill] sm:$0xff] }
  0x4c   : > { %v4095_v15 = vpack.c.bf16 %v1755_v51, %v1645_v48  ;;  %v1380_v49 = vsel %vm1319_vm2, %v3693_v3, %v3695_v5  ;;  %v1649_v50 = vsel %vm1622_vm0, %v3719_v29, %v3721_v33  ;;  %v1651_v37 = vsel %vm1622_vm0, %v3721_v33, %v3760_v18 }
  0x4d   : > { %v878_v36 = vand.u32 31, %v666_v42  ;;  %v4108_v56 = vpack.c.bf16 %v1651_v37, %v1649_v50  ;;  %v650_v52 = vadd.s32 96, %v3829_v47  ;;  %v1346_v48 = vsel %vm1319_vm2, %v3685_v60, %v3709_v19  ;;  %v4898_v37 = vld [vmem:[#allocation4_spill] sm:$0xff] }
  0x4e   : > { %v1348_v3 = vsel %vm1319_vm2, %v3709_v19, %v3714_v26  ;;  %v669_v29 = vadd.s32 248, %v3829_v47  ;;  %v1685_v33 = vsel %vm1622_vm0, %v3727_v44, %v3744_v55  ;;  %v1687_v21 = vsel %vm1622_vm0, %v3744_v55, %v3775_v8 }
  0x4f   : > { %vm1186_vm11 = vcmp.eq.s32.totalorder %v878_v36, 0  ;;  %v766_v60 = vand.u32 31, %v650_v52  ;;  %v4129_v19 = vsel %vm1319_vm2, %v3695_v5, %v3725_v39  ;;  %v4134_v32 = vsel %vm1319_vm2, %v3725_v39, %v3742_v54  ;;  %v4899_v36 = vld [vmem:[#allocation7_spill] sm:$0xff] }
  0x50   : > { %v1469_v44 = vsel %vm1186_vm11, 0.0, %v1378_v14  ;;  %v899_v59 = vand.u32 31, %v669_v29  ;;  %v653_v62 = vadd.s32 120, %v3829_v47  ;;  %v1653_v5 = vsel %vm1622_vm0, %v3760_v18, %v3762_v24  ;;  %v4897_v14 = vld [vmem:[#allocation3_spill] sm:$0xff] }
  0x51   : > { %v4140_v45 = vpack.c.bf16 %v1380_v49, %v1469_v44  ;;  %vm1170_vm12 = vcmp.eq.s32.totalorder %v766_v60, 0  ;;  %v1655_v39 = vsel %vm1622_vm0, %v3762_v24, %v4896_v16  ;;  %v4153_v49 = vsel %vm1319_vm2, %v3714_v26, %v4897_v14 }
  0x52   : > { %v1453_v51 = vsel %vm1170_vm12, 0.0, %v1346_v48  ;;  %vm1532_vm13 = vcmp.eq.s32.totalorder %v899_v59, 31  ;;  %v787_v42 = vand.u32 31, %v653_v62  ;;  %v4160_v24 = vsel %vm1319_vm2, %v4897_v14, %v4898_v37  ;;  %v4901_v62 = vld [vmem:[#allocation11_spill] sm:$0xff] }
  0x53   : > { %v4155_v50 = vpack.c.bf16 %v1348_v3, %v1453_v51  ;;  %v1775_v18 = vsel %vm1532_vm13, 0.0, %v1687_v21  ;;  %v1689_v52 = vsel %vm1622_vm0, %v3775_v8, %v4899_v36  ;;  %v1691_v3 = vsel %vm1622_vm0, %v4899_v36, %v4011_v34 }
  0x54   : > { %v4166_v48 = vpack.c.bf16 %v1775_v18, %v1685_v33  ;;  %vm1516_vm14 = vcmp.eq.s32.totalorder %v787_v42, 31  ;;  %v4178_v21 = vpack.c.bf16 %v1691_v3, %v1689_v52  ;;  %v670_v8 = vadd.s32 256, %v3829_v47  ;;  %v4900_v33 = vld [vmem:[#allocation5_spill] sm:$0xff]  ;;  %v4902_v18 = vld [vmem:[#allocation8_spill] sm:$0xff] }
  0x55   : > { %v1759_v29 = vsel %vm1516_vm14, 0.0, %v1655_v39  ;;  %v1386_v60 = vsel %vm1319_vm2, %v3742_v54, %v4900_v33  ;;  %v1623_v44 = vrot.slane %v4855_v57, 1  ;;  %v1657_v39 = vsel %vm1622_vm0, %v4896_v16, %v4901_v62  ;;  %v4903_v16 = vld [vmem:[#allocation6_spill] sm:$0xff] }
  0x56   : > { %v4189_v59 = vpack.c.bf16 %v1759_v29, %v1653_v5  ;;  %v1659_v51 = vsel %vm1622_vm0, %v4901_v62, %v4028_v31  ;;  %v906_v42 = vand.u32 31, %v670_v8  ;;  %v654_v54 = vadd.s32 128, %v3829_v47  ;;  %v418_v29 = vld [vmem:[%s4176_s12] sm:$0xf]  ;;  %v419_v8 = vld [vmem:[%s4176_s12 + $0x4] sm:$0xf] }
  0x57   : > { %v4197_v14 = vpack.c.bf16 %v1659_v51, %v1657_v39  ;;  %v1354_v36 = vsel %vm1319_vm2, %v4898_v37, %v4902_v18  ;;  %v1624_v5 = vrot.slane %v4856_v11, 1  ;;  %v598_v52 = vunpack.c.l.bf16 %v3979_v1 }
  0x58   : > { %v1388_v3 = vsel %vm1319_vm2, %v4900_v33, %v4903_v16  ;;  %v4214_v62 = vsel %vm1319_vm2, %v4903_v16, %v3890_v46  ;;  %vm1190_vm15 = vcmp.eq.s32.totalorder %v906_v42, 0  ;;  %v794_v37 = vand.u32 31, %v654_v54  ;;  %v4904_v33 = vld [vmem:[#allocation9_spill] sm:$0xff] }
  0x59   : > { %v4219_v39 = vsel %vm1319_vm2, %v3890_v46, %v4007_v9  ;;  %v657_v51 = vadd.s32 152, %v3829_v47  ;;  %v1473_v57 = vsel %vm1190_vm15, 0.0, %v1386_v60  ;;  %v1356_v26 = vsel %vm1319_vm2, %v4902_v18, %v4904_v33  ;;  %v4905_v9 = vld [vmem:[#allocation13_spill] sm:$0xff] }
  0x5a   : > { %v437_v55 = vstv %s436_s19  ;;  %v1498_v16 = vpack.c.bf16 %v4219_v39, %v4214_v62  ;;  %v4227_v20 = vpack.c.bf16 %v1388_v3, %v1473_v57  ;;  %vm1174_vm3 = vcmp.eq.s32.totalorder %v794_v37, 0 }
  0x5b   : > { %v439_v42 = vmul.bf16 %v437_v55, %v418_v29  ;;  %v440_v54 = vmul.bf16 %v437_v55, %v419_v8  ;;  %v1626_v4 = vrot.slane %v598_v52, 1  ;;  %v1457_v46 = vsel %vm1174_vm3, 0.0, %v1354_v36  ;;  %v4906_v36 = vld [vmem:[#allocation12_spill] sm:$0xff] }
  0x5c   : > { %v815_v11 = vand.u32 31, %v657_v51  ;;  %v1661_v60 = vsel %vm1622_vm0, %v4028_v31, %v4032_v41  ;;  %v4232_v40 = vpack.c.bf16 %v1356_v26, %v1457_v46  ;;  %v1663_v57 = vsel %vm1622_vm0, %v4032_v41, %v4905_v9  ;;  %v420_v9 = vld [vmem:[%s4176_s12 + $0x8] sm:$0xf] }
  0x5d   : > { %v4234_v18 = vcombine.low %v439_v42, %v440_v54  ;;  %v4242_v3 = vsel %vm1319_vm2, %v4904_v33, %v4026_v6  ;;  %v4247_v29 = vsel %vm1319_vm2, %v4026_v6, %v4906_v36  ;;  %v4907_v31 = vunpack.c.h.bf16 %v3979_v1  ;;  %v421_v33 = vld [vmem:[%s4176_s12 + $0xc] sm:$0xf] }
  0x5e   : > { %vm1520_vm4 = vcmp.eq.s32.totalorder %v815_v11, 31  ;;  %v1490_v37 = vpack.c.bf16 %v4247_v29, %v4242_v3  ;;  %v1325_v41 = vrot.slane %v598_v52, 7  ;;  %v4259_v11 = vsel %vm1622_vm0, %v1623_v44, %v1624_v5 }
  0x5f   : > { %v1628_v26 = vrot.slane %v4907_v31, 1  ;;  %v1763_v8 = vsel %vm1520_vm4, 0.0, %v1663_v57  ;;  %1840 = vrot.lane.b32.xlu0 %v4234_v18, %s3461_s16  ;;  %v4263_v6 = vsel %vm1622_vm0, %v1624_v5, %v1626_v4  ;;  %v641_v1 = vadd.s32 24, %v3829_v47 }
  0x60   : > { %v4256_v51 = vpack.c.bf16 %v1763_v8, %v1661_v60  ;;  %v4908_v42 = vunpack.c.h.bf16 %v3977_v27  ;;  %v441_v57 = vmul.bf16 %v437_v55, %v420_v9  ;;  %v4909_v60 = vld [vmem:[#allocation15_spill] sm:$0xff]  ;;  %v442_v44 = vmul.bf16 %v437_v55, %v421_v33  ;;  %v3398_v33 = vld [vmem:[%s4826_s3 + $0x8] sm:$0xff]  }
  0x61   : > { %v703_v52 = vand.u32 31, %v641_v1  ;;  %v1631_v36 = vsel %vm1622_vm0, %v1628_v26, %v4909_v60  ;;  %v1629_v31 = vsel %vm1622_vm0, %v1626_v4, %v1628_v26  ;;  %v4281_v8 = vsel %vm1319_vm2, %v1325_v41, %v4050_v12  ;;  %v3396_v4 = vld [vmem:[%s4826_s3] sm:$0xff]  }
  0x62   : > { %v4268_v54 = vrot.slane %v4908_v42, 7  ;;  %v4283_v42 = vcombine.low %v441_v57, %v442_v44  ;;  %v3400_v44 = vld [vmem:[%s4826_s3 + $0x10] sm:$0xff]   ;;  %v4922_v62 = vpack.c.bf16 %v4263_v6, %v4259_v11 }
  0x63   : > { %vm1504_vm5 = vcmp.eq.s32.totalorder %v703_v52, 31  ;;  %v4910_v52 = vpack.c.bf16 %v3900_v30, %v3886_v38  ;;  %v4911_v38 = vpack.c.bf16 %v3934_v25, %v3923_v23  ;;  %v3403_v25 = vld [vmem:[%s4826_s3 + $0xd8] sm:$0xff]  }
  0x64   : > { %v4277_v5 = vsel %vm1319_vm2, %v4268_v54, %v1325_v41  ;;  %v1747_v1 = vsel %vm1504_vm5, 0.0, %v1631_v36  ;;  %1842 = vrot.lane.b32.xlu1 %v4283_v42, %s3461_s16  ;;  %v3397_v41 = vld [vmem:[%s4826_s3 + $0xc0] sm:$0xff]   ;;  %v3399_v36 = vld [vmem:[%s4826_s3 + $0xc8] sm:$0xff]  }
  0x65   : > { %v1482_v9 = vpack.c.bf16 %v4281_v8, %v4277_v5  ;;  %v4287_v46 = vpack.c.bf16 %v1747_v1, %v1629_v31  ;;  %v3401_v31 = vld [vmem:[%s4826_s3 + $0xd0] sm:$0xff]   ;;  %v3402_v1 = vld [vmem:[%s4826_s3 + $0x18] sm:$0xff]  }
  0x8a   : > { %v1825_v55 = vpop.permute.xlu0 %1824  ;;  %v1827_v26 = vpop.permute.xlu1 %1826 }
  0x8b   : > { %v4296_v12 = vsel %vm1844_vm1, %v3915_v7, %v1825_v55  ;;  %v4317_v60 = vsel %vm1844_vm1, %v4910_v52, %v1827_v26  ;;  %v4912_v55 = vld [vmem:[#allocation17_spill] sm:$0xff] }
  0x8c   : > { %2191 = vmatmul.mubr.bf16.vlgmr.msra.gmra.mrb[0].mxu1 %v4296_v12 }
  0x8d   : > { %2334 = vmatpush1.bf16.msra.mxu1 %v3396_v4  ;;  %3190 = vmatprep.mubr.msk.bf16.mxu1 %vm1844_vm1, %v3929_v35 }
  0x8e   : > { %v1809_v57 = vpop.permute.xlu0 %1808  ;;  %2335 = vmatprep.subr.bf16.mxu1 %v4872_v53 }
  0x8f   : > { %v4310_v7 = vsel %vm1844_vm1, %v4087_v58, %v1809_v57  ;;  %v1811_v58 = vpop.permute.xlu1 %1810  ;;  %v3405_v57 = vld [vmem:[%s4826_s3 + $0xe0] sm:$0xff]  }
  0x90   : > { %2127 = vmatmul.mubr.bf16.vlgmr.msra.gmra.mrb[0].mxu0 %v4310_v7  ;;  %v4334_v30 = vsel %vm1844_vm1, %v4911_v38, %v1811_v58  ;;  %v3407_v58 = vld [vmem:[%s4826_s3 + $0xe8] sm:$0xff]  }
  0x91   : > { %2598 = vmatpush1.bf16.msra.mxu0 %v3397_v41  ;;  %2336 = vmatpush1.bf16.msra.mxu1 %v3398_v33  ;;  %v4913_v41 = vld [vmem:[#allocation18_spill] sm:$0xff]  ;;  %v3404_v33 = vld [vmem:[%s4826_s3 + $0x20] sm:$0xff]  }
  0x92   : > { %2599 = vmatprep.subr.bf16.mxu0 %v4872_v53  ;;  %3182 = vmatprep.mubr.msk.bf16.mxu0 %vm1844_vm1, %v3955_v28  ;;  %v1829_v4 = vpop.permute.xlu0 %1828 }
  0x93   : > { %2337 = vmatprep.subr.bf16.mxu1 %v4872_v53  ;;  %v4349_v23 = vsel %vm1844_vm1, %v3981_v0, %v1829_v4  ;;  %v1813_v26 = vpop.permute.xlu1 %1812 }
  0x94   : > { %2199 = vmatmul.mubr.bf16.gmra.mrb[4].mxu1 %v4317_v60  ;;  %v4364_v0 = vsel %vm1844_vm1, %v3989_v43, %v1813_v26  ;;  %v4914_v43 = vpack.c.bf16 %v4003_v22, %v3998_v63  ;;  %v4915_v63 = vpack.c.bf16 %v4072_v61, %v4063_v2  ;;  %v3411_v61 = vld [vmem:[%s4826_s3 + $0xf8] sm:$0xff]  }
  0x95   : > { %2600 = vmatpush1.bf16.msra.mxu0 %v3399_v36  ;;  %2338 = vmatpush1.bf16.msra.mxu1 %v3400_v44  ;;  %v3406_v36 = vld [vmem:[%s4826_s3 + $0x28] sm:$0xff]  }
  0x96   : > { %2601 = vmatprep.subr.bf16.mxu0 %v4872_v53  ;;  %3191 = vmatprep.mubr.msk.bf16.mxu1 %vm1844_vm1, %v4912_v55  ;;  %v1831_v52 = vpop.permute.xlu0 %1830 }
  0x97   : > { %2339 = vmatprep.subr.bf16.mxu1 %v4872_v53  ;;  %v4381_v44 = vsel %vm1844_vm1, %v4914_v43, %v1831_v52  ;;  %v1815_v38 = vpop.permute.xlu1 %1814 }
  0x98   : > { %2135 = vmatmul.mubr.bf16.gmra.mrb[4].mxu0 %v4334_v30  ;;  %v4398_v22 = vsel %vm1844_vm1, %v4915_v63, %v1815_v38  ;;  %v4916_v38 = vunpack.c.h.bf16 %v3768_v10  ;;  %v3415_v10 = vld [vmem:[%s4826_s3 + $0x108] sm:$0xff]  }
  0x99   : > { %2602 = vmatpush1.bf16.msra.mxu0 %v3401_v31  ;;  %2340 = vmatpush1.bf16.msra.mxu1 %v3402_v1  ;;  %v3408_v31 = vld [vmem:[%s4826_s3 + $0x30] sm:$0xff]  }
  0x9a   : > { %3183 = vmatprep.mubr.msk.bf16.mxu0 %vm1844_vm1, %v4913_v41  ;;  %2603 = vmatprep.subr.bf16.mxu0 %v4872_v53  ;;  %v3409_v1 = vld [vmem:[%s4826_s3 + $0xf0] sm:$0xff]   ;;  %v1833_v4 = vpop.permute.xlu0 %1832 }
  0x9b   : > { %2341 = vmatprep.subr.bf16.mxu1 %v4872_v53  ;;  %v4413_v2 = vsel %vm1844_vm1, %v4140_v45, %v1833_v4  ;;  %v1817_v26 = vpop.permute.xlu1 %1816  ;;  %v632_v45 = vunpack.c.l.bf16 %v4234_v18 }
  0x9c   : > { %2207 = vmatmul.mubr.bf16.gmra.mrb[8].mxu1 %v4349_v23  ;;  %v4430_v52 = vsel %vm1844_vm1, %v4155_v50, %v1817_v26  ;;  %v1692_v50 = vrot.slane %v4916_v38, 1  ;;  %v4920_v26 = vpack.c.bf16 %v4160_v24, %v4153_v49  ;;  %v3418_v49 = vld [vmem:[%s4826_s3 + $0x58] sm:$0xff]   ;;  %v595_v24 = vunpack.c.h.bf16 %v4872_v53 }
  0x9d   : > { %2604 = vmatpush1.bf16.msra.mxu0 %v3403_v25  ;;  %3192 = vmatprep.mubr.msk.bf16.mxu1 %vm1844_vm1, %v4055_v13  ;;  %v3410_v25 = vld [vmem:[%s4826_s3 + $0x38] sm:$0xff]   ;;  %v4446_v63 = vrot.slane %v632_v45, 1  ;;  %v1393_v6 = vrot.slane %v632_v45, 7 }
  0x9e   : > { %2342 = vmatpush1.bf16.msra.mxu1 %v3404_v33  ;;  %2605 = vmatprep.subr.bf16.mxu0 %v4872_v53  ;;  %v3412_v33 = vld [vmem:[%s4826_s3 + $0x40] sm:$0xff]   ;;  %v1835_v43 = vpop.permute.xlu0 %1834 }
  0x9f   : > { %2343 = vmatprep.subr.bf16.mxu1 %v4872_v53 }
  0xa0   : > { %2143 = vmatmul.mubr.bf16.gmra.mrb[8].mxu0 %v4364_v0 }
  0xa1   : > { %2606 = vmatpush1.bf16.msra.mxu0 %v3405_v57  ;;  %3184 = vmatprep.mubr.msk.bf16.mxu0 %vm1844_vm1, %v4095_v15  ;;  %v673_v57 = vadd.s32 280, %v3829_v47 }
  0xa2   : > { %2344 = vmatpush1.bf16.msra.mxu1 %v3406_v36  ;;  %2607 = vmatprep.subr.bf16.mxu0 %v4872_v53  ;;  %v3413_v36 = vld [vmem:[%s4826_s3 + $0x100] sm:$0xff]  }
  0xa3   : > { %2345 = vmatprep.subr.bf16.mxu1 %v4872_v53 }
  0xa4   : > { %2215 = vmatmul.mubr.bf16.gmra.mrb[12].mxu1 %v4381_v44 }
  0xa5   : > { %3193 = vmatprep.mubr.msk.bf16.mxu1 %vm1844_vm1, %v4084_v17  ;;  %2608 = vmatpush1.bf16.msra.mxu0 %v3407_v58  ;;  %v3414_v58 = vld [vmem:[%s4826_s3 + $0x48] sm:$0xff]  }
  0xa6   : > { %2346 = vmatpush1.bf16.msra.mxu1 %v3408_v31  ;;  %2609 = vmatprep.subr.bf16.mxu0 %v4872_v53  ;;  %v927_v31 = vand.u32 31, %v673_v57  ;;  %v3417_v57 = vld [vmem:[%s4826_s3 + $0x110] sm:$0xff]  }
  0xa7   : > { %2347 = vmatprep.subr.bf16.mxu1 %v4872_v53 }
  0xa8   : > { %2151 = vmatmul.mubr.bf16.gmra.mrb[12].mxu0 %v4398_v22  ;;  %vm4464_vm6 = vcmp.eq.s32.totalorder %v927_v31, 31 }
  0xa9   : > { %3185 = vmatprep.mubr.msk.bf16.mxu0 %vm1844_vm1, %v4108_v56  ;;  %2610 = vmatpush1.bf16.msra.mxu0 %v3409_v1  ;;  %v4917_v1 = vpack.c.bf16 %v4134_v32, %v4129_v19  ;;  %v1695_v32 = vsel %vm1622_vm0, %v1692_v50, %v4446_v63 }
  0xaa   : > { %2348 = vmatpush1.bf16.msra.mxu1 %v3410_v25  ;;  %2611 = vmatprep.subr.bf16.mxu0 %v4872_v53  ;;  %v1819_v25 = vpop.permute.xlu1 %1818 }
  0xab   : > { %2349 = vmatprep.subr.bf16.mxu1 %v4872_v53  ;;  %v4453_v4 = vsel %vm1844_vm1, %v4917_v1, %v1835_v43  ;;  %v1693_v43 = vsel %vm1622_vm0, %v4011_v34, %v1692_v50  ;;  %v3419_v50 = vld [vmem:[%s4826_s3 + $0x118] sm:$0xff]   ;;  %v4921_v1 = vunpack.c.l.bf16 %v3977_v27 }
  0xac   : > { %2223 = vmatmul.mubr.bf16.gmra.mrb[16].mxu1 %v4413_v2 }
  0xad   : > { %3194 = vmatprep.mubr.msk.bf16.mxu1 %vm1844_vm1, %v4166_v48  ;;  %2612 = vmatpush1.bf16.msra.mxu0 %v3411_v61  ;;  %v3416_v61 = vld [vmem:[%s4826_s3 + $0x50] sm:$0xff]  }
  0xae   : > { %2350 = vmatpush1.bf16.msra.mxu1 %v3412_v33  ;;  %2613 = vmatprep.subr.bf16.mxu0 %v4872_v53  ;;  %v4476_v33 = vsel %vm1844_vm1, %v4920_v26, %v1819_v25  ;;  %v1821_v31 = vpop.permute.xlu1 %1820  ;;  %v1320_v25 = vrot.slane %v595_v24, 7 }
  0xaf   : > { %2351 = vmatprep.subr.bf16.mxu1 %v4872_v53 }
  0xb0   : > { %2159 = vmatmul.mubr.bf16.gmra.mrb[16].mxu0 %v4430_v52 }
  0xb1   : > { %3186 = vmatprep.mubr.msk.bf16.mxu0 %vm1844_vm1, %v4189_v59  ;;  %2614 = vmatpush1.bf16.msra.mxu0 %v3413_v36  ;;  %v1837_v36 = vpop.permute.xlu0 %1836 }
  0xb2   : > { %2352 = vmatpush1.bf16.msra.mxu1 %v3414_v58  ;;  %2615 = vmatprep.subr.bf16.mxu0 %v4872_v53  ;;  %v1779_v58 = vsel %vm4464_vm6, 0.0, %v1695_v32  ;;  %v4496_v38 = vsel %vm1844_vm1, %v4227_v20, %v1837_v36  ;;  %v682_v20 = vand.u32 31, %v3829_v47  ;;  %v1823_v26 = vpop.permute.xlu1 %1822 }
  0xb3   : > { %2353 = vmatprep.subr.bf16.mxu1 %v4872_v53  ;;  %v4500_v34 = vpack.c.bf16 %v1779_v58, %v1693_v43  ;;  %v1883_v36 = vsel %vm1844_vm1, %v1490_v37, %v1823_v26  ;;  %v4923_v37 = vld [vmem:[#allocation16_spill] sm:$0xff] }
  0xb4   : > { %2231 = vmatmul.mubr.bf16.gmra.mrb[20].mxu1 %v4453_v4  ;;  %vm1158_vm7 = vcmp.eq.s32.totalorder %v682_v20, 0 }
  0xb5   : > { %3195 = vmatprep.mubr.msk.bf16.mxu1 %vm1844_vm1, %v4178_v21  ;;  %2616 = vmatpush1.bf16.msra.mxu0 %v3415_v10  ;;  %v1321_v10 = vrot.slane %v4921_v1, 7  ;;  %v1839_v19 = vpop.permute.xlu0 %1838 }
  0xb6   : > { %2354 = vmatpush1.bf16.msra.mxu1 %v3416_v61  ;;  %2617 = vmatprep.subr.bf16.mxu0 %v4872_v53  ;;  %v1879_v61 = vsel %vm1844_vm1, %v4232_v40, %v1821_v31  ;;  %v4519_v27 = vsel %vm1844_vm1, %v1498_v16, %v1839_v19  ;;  %v1807_v3 = vpop.permute.xlu1 %1806 }
  0xb7   : > { %2355 = vmatprep.subr.bf16.mxu1 %v4872_v53  ;;  %v1322_v32 = vsel %vm1319_vm2, %v1320_v25, %v1321_v10  ;;  %v1324_v40 = vsel %vm1319_vm2, %v1321_v10, %v4268_v54  ;;  %v1851_v29 = vsel %vm1844_vm1, %v1482_v9, %v1807_v3  ;;  %v677_v54 = vadd.s32 312, %v3829_v47 }
  0xb8   : > { %2167 = vmatmul.mubr.bf16.gmra.mrb[20].mxu0 %v4476_v33 }
  0xb9   : > { %3187 = vmatprep.mubr.msk.bf16.mxu0 %vm1844_vm1, %v4197_v14  ;;  %2618 = vmatpush1.bf16.msra.mxu0 %v3417_v57  ;;  %v1441_v57 = vsel %vm1158_vm7, 0.0, %v1322_v32  ;;  %v1805_v39 = vpop.permute.xlu0 %1804  ;;  %v955_v9 = vand.u32 31, %v677_v54 }
  0xba   : > { %2356 = vmatpush1.bf16.msra.mxu1 %v3418_v49  ;;  %2619 = vmatprep.subr.bf16.mxu0 %v4872_v53  ;;  %v1481_v43 = vpack.c.bf16 %v1324_v40, %v1441_v57 }
  0xbb   : > { %vm1540_vm9 = vcmp.eq.s32.totalorder %v955_v9, 31 }
  0xbc   : > { %2239 = vmatmul.mubr.bf16.gmra.mrb[24].mxu1 %v4496_v38  ;;  %v1847_v16 = vsel %vm1844_vm1, %v1481_v43, %v1805_v39 }
  0xbd   : > { %3196 = vmatprep.mubr.msk.bf16.mxu1 %vm1844_vm1, %v4500_v34  ;;  %2620 = vmatpush1.bf16.msra.mxu0 %v3419_v50 }
  0xc0   : > { %2175 = vmatmul.mubr.bf16.gmra.mrb[24].mxu0 %v1879_v61 }
  0xc1   : > { %3188 = vmatprep.mubr.msk.bf16.mxu0 %vm1844_vm1, %v4256_v51 }
  0xc4   : > { %2247 = vmatmul.mubr.bf16.gmra.mrb[28].mxu1 %v4519_v27 }
  0xc5   : > { %3209 = vmatprep.mubr.msk.bf16.mxu1 %vm1844_vm1, %v4922_v62 }
  0xc8   : > { %2183 = vmatmul.mubr.bf16.gmra.mrb[28].mxu0 %v1883_v36 }
  0xc9   : > { %3261 = vmatprep.mubr.msk.bf16.mxu0 %vm1844_vm1, %v4913_v41 }
  0xcc   : > { %2366 = vmatmul.mubr.bf16.vlgmr.msra.gmra.mrb[32].mxu1 %v1847_v16 }
  0xcd   : > { %3210 = vmatprep.mubr.msk.bf16.mxu1 %vm1844_vm1, %v4287_v46 }
  0xd0   : > { %2630 = vmatmul.mubr.bf16.vlgmr.msra.gmra.mrb[32].mxu0 %v4364_v0 }
  0xd1   : > { %3262 = vmatprep.mubr.msk.bf16.mxu0 %vm1844_vm1, %v4095_v15 }
  0xd4   : > { %2374 = vmatmul.mubr.bf16.gmra.mrb[36].mxu1 %v1851_v29 }
  0xd5   : > { %3211 = vmatprep.mubr.msk.bf16.mxu1 %vm1844_vm1, %v4923_v37 }
  0xd8   : > { %2638 = vmatmul.mubr.bf16.gmra.mrb[36].mxu0 %v4398_v22 }
  0xd9   : > { %3263 = vmatprep.mubr.msk.bf16.mxu0 %vm1844_vm1, %v4108_v56 }
  0xdc   : > { %2382 = vmatmul.mubr.bf16.gmra.mrb[40].mxu1 %v4310_v7 }
  0xdd   : > { %3212 = vmatprep.mubr.msk.bf16.mxu1 %vm1844_vm1, %v3955_v28  ;;  %v4924_v28 = vld [vmem:[#allocation14_spill] sm:$0xff] }
  0xe0   : > { %2646 = vmatmul.mubr.bf16.gmra.mrb[40].mxu0 %v4430_v52 }
  0xe1   : > { %3264 = vmatprep.mubr.msk.bf16.mxu0 %vm1844_vm1, %v4189_v59 }
  0xe4   : > { %2390 = vmatmul.mubr.bf16.gmra.mrb[44].mxu1 %v4334_v30 }
  0xe5   : > { %3213 = vmatprep.mubr.msk.bf16.mxu1 %vm1844_vm1, %v4913_v41  ;;  %v1841_v41 = vpop.permute.xlu0 %1840 }
  0xe8   : > { %2654 = vmatmul.mubr.bf16.gmra.mrb[44].mxu0 %v4476_v33 }
  0xe9   : > { %3265 = vmatprep.mubr.msk.bf16.mxu0 %vm1844_vm1, %v4197_v14 }
  0xec   : > { %2398 = vmatmul.mubr.bf16.gmra.mrb[48].mxu1 %v4364_v0 }
  0xed   : > { %3214 = vmatprep.mubr.msk.bf16.mxu1 %vm1844_vm1, %v4095_v15  ;;  %v634_v15 = vunpack.c.l.bf16 %v4283_v42 }
  0xf0   : > { %2662 = vmatmul.mubr.bf16.gmra.mrb[48].mxu0 %v1879_v61 }
  0xf1   : > { %3266 = vmatprep.mubr.msk.bf16.mxu0 %vm1844_vm1, %v4256_v51 }
  0xf4   : > { %2406 = vmatmul.mubr.bf16.gmra.mrb[52].mxu1 %v4398_v22 }
  0xf5   : > { %3215 = vmatprep.mubr.msk.bf16.mxu1 %vm1844_vm1, %v4108_v56  ;;  %v633_v56 = vunpack.c.h.bf16 %v4234_v18 }
  0xf7   : > { %v1395_v8 = vrot.slane %v633_v56, 7 }
  0xf8   : > { %2670 = vmatmul.mubr.bf16.gmra.mrb[52].mxu0 %v1883_v36 }
  0xf9   : > { %3267 = vmatprep.mubr.msk.bf16.mxu0 %vm1844_vm1, %v4924_v28 }
  0xfc   : > { %2414 = vmatmul.mubr.bf16.gmra.mrb[56].mxu1 %v4430_v52 }
  0xfd   : > { %3216 = vmatprep.mubr.msk.bf16.mxu1 %vm1844_vm1, %v4189_v59  ;;  %v635_v59 = vunpack.c.h.bf16 %v4283_v42  ;;  %v4925_v42 = vld [vmem:[#allocation19_spill] sm:$0xff] }
  0xfe   : > { %v1394_v18 = vsel %vm1319_vm2, %v4925_v42, %v1393_v6 }
  0xff   : > { %v1700_v46 = vrot.slane %v635_v59, 1 }
 0x100   : > { %2678 = vmatmul.mubr.bf16.gmra.mrb[56].mxu0 %v4296_v12 }
 0x101   : > { %3268 = vmatprep.mubr.msk.bf16.mxu0 %vm1844_vm1, %v3929_v35 }
 0x104   : > { %2422 = vmatmul.mubr.bf16.gmra.mrb[60].mxu1 %v4476_v33  ;;  %v1843_v33 = vpop.permute.xlu1 %1842 }
 0x105   : > { %3217 = vmatprep.mubr.msk.bf16.mxu1 %vm1844_vm1, %v4197_v14  ;;  %v1698_v14 = vrot.slane %v634_v15, 1 }
 0x107   : > { %v1701_v0 = vsel %vm1622_vm0, %v1698_v14, %v1700_v46 }
 0x108   : > { %2686 = vmatmul.mubr.bf16.gmra.mrb[60].mxu0 %v4317_v60 }
 0x109   : > { %3269 = vmatprep.mubr.msk.bf16.mxu0 %vm1844_vm1, %v4912_v55 }
 0x10c   : > { %2430 = vmatmul.mubr.bf16.gmra.mrb[64].mxu1 %v1879_v61 }
 0x10d   : > { %3218 = vmatprep.mubr.msk.bf16.mxu1 %vm1844_vm1, %v4256_v51  ;;  %v1696_v51 = vrot.slane %v633_v56, 1 }
 0x10f   : > { %v1699_v5 = vsel %vm1622_vm0, %v1696_v51, %v1698_v14 }
 0x110   : > { %2694 = vmatmul.mubr.bf16.gmra.mrb[64].mxu0 %v4349_v23 }
 0x111   : > { %3270 = vmatprep.mubr.msk.bf16.mxu0 %vm1844_vm1, %v4055_v13 }
 0x114   : > { %2438 = vmatmul.mubr.bf16.gmra.mrb[68].mxu1 %v1883_v36 }
 0x115   : > { %3219 = vmatprep.mubr.msk.bf16.mxu1 %vm1844_vm1, %v4924_v28 }
 0x118   : > { %2702 = vmatmul.mubr.bf16.gmra.mrb[68].mxu0 %v4381_v44 }
 0x119   : > { %3271 = vmatprep.mubr.msk.bf16.mxu0 %vm1844_vm1, %v4084_v17 }
 0x11c   : > { %2446 = vmatmul.mubr.bf16.gmra.mrb[72].mxu1 %v4296_v12  ;;  %v1396_v12 = vsel %vm1319_vm2, %v1393_v6, %v1395_v8 }
 0x11d   : > { %3220 = vmatprep.mubr.msk.bf16.mxu1 %vm1844_vm1, %v3929_v35  ;;  %v674_v35 = vadd.s32 288, %v3829_v47 }
 0x11f   : > { %v934_v11 = vand.u32 31, %v674_v35 }
 0x120   : > { %2710 = vmatmul.mubr.bf16.gmra.mrb[72].mxu0 %v4413_v2 }
 0x121   : > { %3272 = vmatprep.mubr.msk.bf16.mxu0 %vm1844_vm1, %v4166_v48  ;;  %vm1194_vm8 = vcmp.eq.s32.totalorder %v934_v11, 0 }
 0x122   : > { %v1477_v7 = vsel %vm1194_vm8, 0.0, %v1394_v18 }
 0x123   : > { %v1499_v30 = vpack.c.bf16 %v1396_v12, %v1477_v7 }
 0x124   : > { %2454 = vmatmul.mubr.bf16.gmra.mrb[76].mxu1 %v4317_v60 }
 0x125   : > { %3221 = vmatprep.mubr.msk.bf16.mxu1 %vm1844_vm1, %v4912_v55  ;;  %v1397_v55 = vrot.slane %v634_v15, 7 }
 0x127   : > { %v1398_v45 = vsel %vm1319_vm2, %v1395_v8, %v1397_v55 }
 0x128   : > { %2718 = vmatmul.mubr.bf16.gmra.mrb[76].mxu0 %v4453_v4 }
 0x129   : > { %3273 = vmatprep.mubr.msk.bf16.mxu0 %vm1844_vm1, %v4178_v21  ;;  %v636_v21 = vunpack.c.l.bf16 %v4872_v53 }
 0x12b   : > { %v1702_v53 = vrot.slane %v636_v21, 1 }
 0x12c   : > { %2462 = vmatmul.mubr.bf16.gmra.mrb[80].mxu1 %v4349_v23  ;;  %v1399_v23 = vrot.slane %v635_v59, 7 }
 0x12d   : > { %3222 = vmatprep.mubr.msk.bf16.mxu1 %vm1844_vm1, %v4055_v13  ;;  %v1697_v13 = vsel %vm1622_vm0, %v4446_v63, %v1696_v51  ;;  %v1703_v60 = vsel %vm1622_vm0, %v1700_v46, %v1702_v53  ;;  %vm2964_vm0 = vcmask 519168  }
 0x12e   : > { %v1802_v47 = vpack.c.bf16 %v1699_v5, %v1697_v13  ;;  %v1400_v52 = vsel %vm1319_vm2, %v1397_v55, %v1399_v23 }
 0x12f   : > { %v1500_v63 = vpack.c.bf16 %v1400_v52, %v1398_v45 }
 0x130   : > { %2726 = vmatmul.mubr.bf16.gmra.mrb[80].mxu0 %v4496_v38 }
 0x131   : > { %3274 = vmatprep.mubr.msk.bf16.mxu0 %vm1844_vm1, %v4500_v34  ;;  %v1923_v58 = vsel %vm1844_vm1, %v1500_v63, %v1843_v33 }
 0x134   : > { %2470 = vmatmul.mubr.bf16.gmra.mrb[84].mxu1 %v4381_v44  ;;  %v1783_v44 = vsel %vm1540_vm9, 0.0, %v1703_v60 }
 0x135   : > { %3223 = vmatprep.mubr.msk.bf16.mxu1 %vm1844_vm1, %v4084_v17  ;;  %v1919_v17 = vsel %vm1844_vm1, %v1499_v30, %v1841_v41  ;;  %v1803_v22 = vpack.c.bf16 %v1783_v44, %v1701_v0 }
 0x138   : > { %2734 = vmatmul.mubr.bf16.gmra.mrb[84].mxu0 %v4519_v27 }
 0x139   : > { %3275 = vmatprep.mubr.msk.bf16.mxu0 %vm1844_vm1, %v1802_v47 }
 0x13c   : > { %2478 = vmatmul.mubr.bf16.gmra.mrb[88].mxu1 %v4413_v2 }
 0x13d   : > { %3224 = vmatprep.mubr.msk.bf16.mxu1 %vm1844_vm1, %v4166_v48 }
 0x140   : > { %2742 = vmatmul.mubr.bf16.gmra.mrb[88].mxu0 %v1919_v17 }
 0x141   : > { %3276 = vmatprep.mubr.msk.bf16.mxu0 %vm1844_vm1, %v1803_v22 }
 0x144   : > { %2486 = vmatmul.mubr.bf16.gmra.mrb[92].mxu1 %v4453_v4 }
 0x148   : > { %2750 = vmatmul.mubr.bf16.gmra.mrb[92].mxu0 %v1923_v58 }
 0x15f   : > { %v4643_v2 = vpop.f32.mrb[0].mxu1 }
 0x160   : > { %v2194_v49 = vpop.f32.mrb[1].mxu1 }
 0x161   : > { %v4645_v24 = vpop.f32.mrb[2].mxu1 }
 0x162   : > { %v2197_v48 = vpop.f32.mrb[3].mxu1 }
 0x163   : > { %v2128_v38 = vpop.f32.mrb[0].mxu0 }
 0x164   : > { %v2130_v34 = vpop.f32.mrb[1].mxu0 }
 0x165   : > { %v2131_v50 = vpop.f32.mrb[2].mxu0 }
 0x166   : > { %v2133_v31 = vpop.f32.mrb[3].mxu0 }
 0x167   : > { %v4647_v1 = vpop.f32.mrb[4].mxu1 }
 0x168   : > { %v2202_v10 = vpop.f32.mrb[5].mxu1 }
 0x169   : > { %v4649_v20 = vpop.f32.mrb[6].mxu1 }
 0x16a   : > { %v2205_v25 = vpop.f32.mrb[7].mxu1 }
 0x16b   : > { %v4651_v4 = vpop.f32.mrb[4].mxu0 }
 0x16c   : > { %v2138_v61 = vpop.f32.mrb[5].mxu0 }
 0x16d   : > { %v4653_v19 = vpop.f32.mrb[6].mxu0 }
 0x16e   : > { %v2141_v32 = vpop.f32.mrb[7].mxu0 }
 0x16f   : > { %v4655_v27 = vpop.f32.mrb[8].mxu1 }
 0x170   : > { %v2210_v26 = vpop.f32.mrb[9].mxu1 }
 0x171   : > { %v4657_v40 = vpop.f32.mrb[10].mxu1 }
 0x172   : > { %v2213_v57 = vpop.f32.mrb[11].mxu1 }
 0x173   : > { %v4659_v36 = vpop.f32.mrb[8].mxu0 }
 0x174   : > { %v2146_v43 = vpop.f32.mrb[9].mxu0 }
 0x175   : > { %v4661_v62 = vpop.f32.mrb[10].mxu0 }
 0x176   : > { %v2149_v39 = vpop.f32.mrb[11].mxu0 }
 0x177   : > { %v4663_v16 = vpop.f32.mrb[12].mxu1 }
 0x178   : > { %v2218_v3 = vpop.f32.mrb[13].mxu1 }
 0x179   : > { %v4665_v29 = vpop.f32.mrb[14].mxu1 }
 0x17a   : > { %v2221_v37 = vpop.f32.mrb[15].mxu1 }
 0x17b   : > { %v4667_v28 = vpop.f32.mrb[12].mxu0 }
 0x17c   : > { %v2154_v15 = vpop.f32.mrb[13].mxu0 }
 0x17d   : > { %v4669_v56 = vpop.f32.mrb[14].mxu0 }
 0x17e   : > { %v2157_v35 = vpop.f32.mrb[15].mxu0 }
 0x17f   : > { %v4671_v59 = vpop.f32.mrb[16].mxu1 }
 0x180   : > { %v2226_v14 = vpop.f32.mrb[17].mxu1 }
 0x181   : > { %v4673_v51 = vpop.f32.mrb[18].mxu1 }
 0x182   : > { %v2229_v11 = vpop.f32.mrb[19].mxu1 }
 0x183   : > { %v4675_v6 = vpop.f32.mrb[16].mxu0 }
 0x184   : > { %v2162_v21 = vpop.f32.mrb[17].mxu0 }
 0x185   : > { %v4677_v54 = vpop.f32.mrb[18].mxu0 }
 0x186   : > { %v2165_v46 = vpop.f32.mrb[19].mxu0 }
 0x187   : > { %v4679_v13 = vpop.f32.mrb[20].mxu1 }
 0x188   : > { %v2234_v5 = vpop.f32.mrb[21].mxu1 }
 0x189   : > { %v4681_v8 = vpop.f32.mrb[22].mxu1 }
 0x18a   : > { %v2237_v42 = vpop.f32.mrb[23].mxu1 }
 0x18b   : > { %v4683_v18 = vpop.f32.mrb[20].mxu0 }
 0x18c   : > { %v2170_v9 = vpop.f32.mrb[21].mxu0 }
 0x18d   : > { %v4685_v53 = vpop.f32.mrb[22].mxu0 }
 0x18e   : > { %v2173_v47 = vpop.f32.mrb[23].mxu0 }
 0x18f   : > { %v4687_v12 = vpop.f32.mrb[24].mxu1 }
 0x190   : > { %v2242_v7 = vpop.f32.mrb[25].mxu1 }
 0x191   : > { %v4689_v60 = vpop.f32.mrb[26].mxu1 }
 0x192   : > { %v2245_v30 = vpop.f32.mrb[27].mxu1 }
 0x193   : > { %v4691_v55 = vpop.f32.mrb[24].mxu0  ;;  %v4709_v30 = vld [vmem:[%s4827_s4] ss:$0 sm:$0xff] }
 0x194   : > { %v2178_v23 = vpop.f32.mrb[25].mxu0 }
 0x195   : > { %v4693_v41 = vpop.f32.mrb[26].mxu0 }
 0x196   : > { %v2181_v0 = vpop.f32.mrb[27].mxu0 }
 0x197   : > { %v4695_v44 = vpop.f32.mrb[28].mxu1 }
 0x198   : > { %v2250_v17 = vpop.f32.mrb[29].mxu1 }
 0x199   : > { %v4697_v22 = vpop.f32.mrb[30].mxu1 }
 0x19a   : > { %v2253_v45 = vpop.f32.mrb[31].mxu1 }
 0x19b   : > { %v4699_v52 = vpop.f32.mrb[28].mxu0 }
 0x19c   : > { %v2186_v63 = vpop.f32.mrb[29].mxu0 }
 0x19d   : > { %v4701_v33 = vpop.f32.mrb[30].mxu0 }
 0x19e   : > { %v2189_v58 = vpop.f32.mrb[31].mxu0 }
 0x19f   : > { %v2367_v49 = vpop.f32.mrb[32].mxu1 }
 0x1a0   : > { %v2368_v48 = vadd.f32 %v2367_v49, %v2128_v38  ;;  %v2369_v34 = vpop.f32.mrb[33].mxu1 }
 0x1a1   : > { %v2370_v31 = vpop.f32.mrb[34].mxu1 }
 0x1a2   : > { %v2371_v10 = vadd.f32 %v2370_v31, %v2131_v50  ;;  %v2372_v25 = vpop.f32.mrb[35].mxu1 }
 0x1a3   : > { %v2631_v61 = vpop.f32.mrb[32].mxu0 }
 0x1a4   : > { %v2758_v32 = vadd.f32 %v2631_v61, %v2368_v48  ;;  %v2633_v26 = vpop.f32.mrb[33].mxu0 }
 0x1a5   : > { %v2634_v57 = vpop.f32.mrb[34].mxu0 }
 0x1a6   : > { %v2759_v43 = vadd.f32 %v2634_v57, %v2371_v10  ;;  %v2636_v39 = vpop.f32.mrb[35].mxu0  ;;  %v2797_v17 = vadd.f32 %v4709_v30, %v2758_v32 }
 0x1a7   : > { %v2375_v3 = vpop.f32.mrb[36].mxu1 }
 0x1a8   : > { %v2376_v37 = vadd.f32 %v2375_v3, %v4651_v4  ;;  %v2377_v15 = vpop.f32.mrb[37].mxu1  ;;  %v2798_v49 = vadd.f32 %v4709_v30, %v2759_v43  ;;  %v2829_v10 = vmax.f32 %v2797_v17, 0.0 }
 0x1a9   : > { %v2378_v35 = vpop.f32.mrb[38].mxu1 }
 0x1aa   : > { %v2379_v14 = vadd.f32 %v2378_v35, %v4653_v19  ;;  %v2380_v11 = vpop.f32.mrb[39].mxu1  ;;  %v2830_v39 = vmax.f32 %v2798_v49, 0.0 }
 0x1ab   : > { %v2639_v21 = vpop.f32.mrb[36].mxu0 }
 0x1ac   : > { %v2760_v38 = vadd.f32 %v2639_v21, %v2376_v37  ;;  %v2641_v46 = vpop.f32.mrb[37].mxu0 }
 0x1ad   : > { %v2642_v5 = vpop.f32.mrb[38].mxu0 }
 0x1ae   : > { %v2761_v50 = vadd.f32 %v2642_v5, %v2379_v14  ;;  %v2644_v42 = vpop.f32.mrb[39].mxu0  ;;  %v2799_v35 = vadd.f32 %v4709_v30, %v2760_v38 }
 0x1af   : > { %v2383_v9 = vpop.f32.mrb[40].mxu1 }
 0x1b0   : > { %v2384_v47 = vadd.f32 %v2383_v9, %v4659_v36  ;;  %v2385_v7 = vpop.f32.mrb[41].mxu1  ;;  %v2800_v5 = vadd.f32 %v4709_v30, %v2761_v50 }
 0x1b1   : > { %v2386_v4 = vpop.f32.mrb[42].mxu1 }
 0x1b2   : > { %v2387_v23 = vadd.f32 %v2386_v4, %v4661_v62  ;;  %v2388_v19 = vpop.f32.mrb[43].mxu1 }
 0x1b3   : > { %v2647_v0 = vpop.f32.mrb[40].mxu0 }
 0x1b4   : > { %v2762_v45 = vadd.f32 %v2647_v0, %v2384_v47  ;;  %v2649_v63 = vpop.f32.mrb[41].mxu0  ;;  %v2831_v47 = vmax.f32 %v2799_v35, 0.0  ;;  %v2832_v0 = vmax.f32 %v2800_v5, 0.0 }
 0x1b5   : > { %v2650_v58 = vpop.f32.mrb[42].mxu0 }
 0x1b6   : > { %v2801_v36 = vadd.f32 %v4709_v30, %v2762_v45  ;;  %v2763_v48 = vadd.f32 %v2650_v58, %v2387_v23  ;;  %v2652_v34 = vpop.f32.mrb[43].mxu0 }
 0x1b7   : > { %v2391_v31 = vpop.f32.mrb[44].mxu1 }
 0x1b8   : > { %v2833_v25 = vmax.f32 %v2801_v36, 0.0  ;;  %v2802_v61 = vadd.f32 %v4709_v30, %v2763_v48  ;;  %v2392_v62 = vadd.f32 %v2391_v31, %v4667_v28  ;;  %v2393_v26 = vpop.f32.mrb[45].mxu1 }
 0x1b9   : > { %v2394_v57 = vpop.f32.mrb[46].mxu1 }
 0x1ba   : > { %v2861_v32 = vmax.f32 %v2829_v10, %v2833_v25  ;;  %v2834_v3 = vmax.f32 %v2802_v61, 0.0  ;;  %v2395_v37 = vadd.f32 %v2394_v57, %v4669_v56  ;;  %v2396_v15 = vpop.f32.mrb[47].mxu1 }
 0x1bb   : > { %v2655_v43 = vpop.f32.mrb[44].mxu0 }
 0x1bc   : > { %2877 = vst.msk [vmem:[#allocation2] sm:$0xff] %vm1844_vm1, %v2861_v32  ;;  %v2862_v14 = vmax.f32 %v2830_v39, %v2834_v3  ;;  %v2764_v11 = vadd.f32 %v2655_v43, %v2392_v62  ;;  %v2657_v21 = vpop.f32.mrb[45].mxu0 }
 0x1bd   : > { %v2658_v46 = vpop.f32.mrb[46].mxu0 }
 0x1be   : > { %2878 = vst.msk [vmem:[#allocation2 + $0x8] sm:$0xff] %vm1844_vm1, %v2862_v14  ;;  %v2803_v28 = vadd.f32 %v4709_v30, %v2764_v11  ;;  %v2765_v42 = vadd.f32 %v2658_v46, %v2395_v37  ;;  %v2660_v9 = vpop.f32.mrb[47].mxu0 }
 0x1bf   : > { %v2399_v56 = vpop.f32.mrb[48].mxu1 }
 0x1c0   : > { %v2835_v7 = vmax.f32 %v2803_v28, 0.0  ;;  %v2804_v38 = vadd.f32 %v4709_v30, %v2765_v42  ;;  %v2400_v4 = vadd.f32 %v2399_v56, %v4675_v6  ;;  %v2401_v23 = vpop.f32.mrb[49].mxu1 }
 0x1c1   : > { %v2402_v19 = vpop.f32.mrb[50].mxu1 }
 0x1c2   : > { %v2863_v17 = vmax.f32 %v2831_v47, %v2835_v7  ;;  %v2836_v45 = vmax.f32 %v2804_v38, 0.0  ;;  %v2403_v50 = vadd.f32 %v2402_v19, %v4677_v54  ;;  %v2404_v63 = vpop.f32.mrb[51].mxu1 }
 0x1c3   : > { %v2663_v58 = vpop.f32.mrb[48].mxu0 }
 0x1c4   : > { %2879 = vst.msk [vmem:[#allocation2 + $0x10] sm:$0xff] %vm1844_vm1, %v2863_v17  ;;  %v2864_v49 = vmax.f32 %v2832_v0, %v2836_v45  ;;  %v2766_v36 = vadd.f32 %v2663_v58, %v2400_v4  ;;  %v2665_v48 = vpop.f32.mrb[49].mxu0 }
 0x1c5   : > { %v2893_v34 = vld [vmem:[#allocation2] ss:$2 sm:$0xff]  ;;  %v2909_v31 = vld [vmem:[#allocation2 + $0x1] ss:$2 sm:$0xff]  ;;  %v2666_v10 = vpop.f32.mrb[50].mxu0 }
 0x1c6   : > { %v2924_v25 = vmax.f32 %v2893_v34, %v2909_v31  ;;  %2880 = vst.msk [vmem:[#allocation2 + $0x18] sm:$0xff] %vm1844_vm1, %v2864_v49  ;;  %v2767_v6 = vadd.f32 %v2666_v10, %v2403_v50  ;;  %v2668_v61 = vpop.f32.mrb[51].mxu0  ;;  %v2805_v38 = vadd.f32 %v4709_v30, %v2766_v36 }
 0x1c7   : > { %v2407_v54 = vpop.f32.mrb[52].mxu1 }
 0x1c8   : > { %v3294_v62 = vpack.c.bf16 %v2924_v25, %v2924_v25  ;;  %v2408_v26 = vadd.f32 %v2407_v54, %v4683_v18  ;;  %v2409_v57 = vpop.f32.mrb[53].mxu1  ;;  %v2806_v0 = vadd.f32 %v4709_v30, %v2767_v6  ;;  %v2837_v63 = vmax.f32 %v2805_v38, 0.0 }
 0x1c9   : > { %v2410_v39 = vpop.f32.mrb[54].mxu1 }
 0x1ca   : > { %2965 = vst.msk [vmem:[%s4732_s13] sm:$0xf] %vm2964_vm0, %v3294_v62  ;;  %v2411_v32 = vadd.f32 %v2410_v39, %v4685_v53  ;;  %v2412_v3 = vpop.f32.mrb[55].mxu1  ;;  %v2838_v31 = vmax.f32 %v2806_v0, 0.0 }
 0x1cb   : > { %v2671_v37 = vpop.f32.mrb[52].mxu0 }
 0x1cc   : > { %v2768_v15 = vadd.f32 %v2671_v37, %v2408_v26  ;;  %v2673_v43 = vpop.f32.mrb[53].mxu0 }
 0x1cd   : > { %v2895_v35 = vld [vmem:[#allocation2 + $0x10] ss:$2 sm:$0xff]  ;;  %v2911_v14 = vld [vmem:[#allocation2 + $0x11] ss:$2 sm:$0xff]  ;;  %v2674_v11 = vpop.f32.mrb[54].mxu0 }
 0x1ce   : > { %v2925_v21 = vmax.f32 %v2895_v35, %v2911_v14  ;;  %v2769_v46 = vadd.f32 %v2674_v11, %v2411_v32  ;;  %v2676_v5 = vpop.f32.mrb[55].mxu0  ;;  %v2807_v54 = vadd.f32 %v4709_v30, %v2768_v15 }
 0x1cf   : > { %v2415_v28 = vpop.f32.mrb[56].mxu1 }
 0x1d0   : > { %v3295_v42 = vpack.c.bf16 %v2925_v21, %v2925_v21  ;;  %v2416_v18 = vadd.f32 %v2415_v28, %v4691_v55  ;;  %v2417_v9 = vpop.f32.mrb[57].mxu1  ;;  %v2808_v32 = vadd.f32 %v4709_v30, %v2769_v46 }
 0x1d1   : > { %v2418_v56 = vpop.f32.mrb[58].mxu1 }
 0x1d2   : > { %2966 = vst.msk [vmem:[%s4732_s13 + $0x4] sm:$0xf] %vm2964_vm0, %v3295_v42  ;;  %v2419_v53 = vadd.f32 %v2418_v56, %v4693_v41  ;;  %v2420_v47 = vpop.f32.mrb[59].mxu1  ;;  %v2840_v5 = vmax.f32 %v2808_v32, 0.0 }
 0x1d3   : > { %v2679_v7 = vpop.f32.mrb[56].mxu0 }
 0x1d4   : > { %v2770_v4 = vadd.f32 %v2679_v7, %v2416_v18  ;;  %v2681_v23 = vpop.f32.mrb[57].mxu0 }
 0x1d5   : > { %v2682_v19 = vpop.f32.mrb[58].mxu0 }
 0x1d6   : > { %v2809_v17 = vadd.f32 %v4709_v30, %v2770_v4  ;;  %v2771_v45 = vadd.f32 %v2682_v19, %v2419_v53  ;;  %v2684_v50 = vpop.f32.mrb[59].mxu0 }
 0x1d7   : > { %v2423_v55 = vpop.f32.mrb[60].mxu1 }
 0x1d8   : > { %v2841_v58 = vmax.f32 %v2809_v17, 0.0  ;;  %v2810_v49 = vadd.f32 %v4709_v30, %v2771_v45  ;;  %v2424_v41 = vadd.f32 %v2423_v55, %v4699_v52  ;;  %v2425_v48 = vpop.f32.mrb[61].mxu1 }
 0x1d9   : > { %v2426_v34 = vpop.f32.mrb[62].mxu1 }
 0x1da   : > { %v2865_v36 = vmax.f32 %v2837_v63, %v2841_v58  ;;  %v2842_v10 = vmax.f32 %v2810_v49, 0.0  ;;  %v2427_v25 = vadd.f32 %v2426_v34, %v4701_v33  ;;  %v2428_v61 = vpop.f32.mrb[63].mxu1  ;;  %v2839_v33 = vmax.f32 %v2807_v54, 0.0 }
 0x1db   : > { %v2687_v6 = vpop.f32.mrb[60].mxu0 }
 0x1dc   : > { %2881 = vst.msk [vmem:[#allocation2 + $0x20] sm:$0xff] %vm1844_vm1, %v2865_v36  ;;  %v2866_v62 = vmax.f32 %v2838_v31, %v2842_v10  ;;  %v2772_v26 = vadd.f32 %v2687_v6, %v2424_v41  ;;  %v2689_v57 = vpop.f32.mrb[61].mxu0 }
 0x1dd   : > { %v2690_v39 = vpop.f32.mrb[62].mxu0 }
 0x1de   : > { %2882 = vst.msk [vmem:[#allocation2 + $0x28] sm:$0xff] %vm1844_vm1, %v2866_v62  ;;  %v2811_v52 = vadd.f32 %v4709_v30, %v2772_v26  ;;  %v2773_v3 = vadd.f32 %v2690_v39, %v2427_v25  ;;  %v2692_v37 = vpop.f32.mrb[63].mxu0 }
 0x1df   : > { %v2431_v43 = vpop.f32.mrb[64].mxu1 }
 0x1e0   : > { %v2843_v35 = vmax.f32 %v2811_v52, 0.0  ;;  %v2812_v14 = vadd.f32 %v4709_v30, %v2773_v3  ;;  %v2432_v15 = vadd.f32 %v2431_v43, %v4643_v2  ;;  %v2433_v11 = vpop.f32.mrb[65].mxu1 }
 0x1e1   : > { %v2434_v21 = vpop.f32.mrb[66].mxu1 }
 0x1e2   : > { %v2867_v28 = vmax.f32 %v2839_v33, %v2843_v35  ;;  %v2844_v42 = vmax.f32 %v2812_v14, 0.0  ;;  %v2435_v46 = vadd.f32 %v2434_v21, %v4645_v24  ;;  %v2436_v18 = vpop.f32.mrb[67].mxu1 }
 0x1e3   : > { %v2695_v9 = vpop.f32.mrb[64].mxu0 }
 0x1e4   : > { %2883 = vst.msk [vmem:[#allocation2 + $0x30] sm:$0xff] %vm1844_vm1, %v2867_v28  ;;  %v2868_v56 = vmax.f32 %v2840_v5, %v2844_v42  ;;  %v2774_v53 = vadd.f32 %v2695_v9, %v2432_v15  ;;  %v2697_v47 = vpop.f32.mrb[65].mxu0 }
 0x1e5   : > { %v2897_v7 = vld [vmem:[#allocation2 + $0x20] ss:$2 sm:$0xff]  ;;  %v2913_v38 = vld [vmem:[#allocation2 + $0x21] ss:$2 sm:$0xff]  ;;  %v2698_v4 = vpop.f32.mrb[66].mxu0 }
 0x1e6   : > { %v2926_v23 = vmax.f32 %v2897_v7, %v2913_v38  ;;  %2884 = vst.msk [vmem:[#allocation2 + $0x38] sm:$0xff] %vm1844_vm1, %v2868_v56  ;;  %v2775_v2 = vadd.f32 %v2698_v4, %v2435_v46  ;;  %v2700_v19 = vpop.f32.mrb[67].mxu0  ;;  %v2813_v39 = vadd.f32 %v4709_v30, %v2774_v53 }
 0x1e7   : > { %v2439_v0 = vpop.f32.mrb[68].mxu1 }
 0x1e8   : > { %v3296_v17 = vpack.c.bf16 %v2926_v23, %v2926_v23  ;;  %v2440_v24 = vadd.f32 %v2439_v0, %v4647_v1  ;;  %v2441_v45 = vpop.f32.mrb[69].mxu1  ;;  %v2814_v37 = vadd.f32 %v4709_v30, %v2775_v2  ;;  %v2845_v14 = vmax.f32 %v2813_v39, 0.0 }
 0x1e9   : > { %v2442_v50 = vpop.f32.mrb[70].mxu1 }
 0x1ea   : > { %2967 = vst.msk [vmem:[%s4732_s13 + $0x8] sm:$0xf] %vm2964_vm0, %v3296_v17  ;;  %v2443_v55 = vadd.f32 %v2442_v50, %v4649_v20  ;;  %v2444_v63 = vpop.f32.mrb[71].mxu1  ;;  %v2846_v28 = vmax.f32 %v2814_v37, 0.0 }
 0x1eb   : > { %v2703_v58 = vpop.f32.mrb[68].mxu0 }
 0x1ec   : > { %v2776_v49 = vadd.f32 %v2703_v58, %v2440_v24  ;;  %v2705_v41 = vpop.f32.mrb[69].mxu0 }
 0x1ed   : > { %v2899_v48 = vld [vmem:[#allocation2 + $0x30] ss:$2 sm:$0xff]  ;;  %v2915_v34 = vld [vmem:[#allocation2 + $0x31] ss:$2 sm:$0xff]  ;;  %v2706_v31 = vpop.f32.mrb[70].mxu0 }
 0x1ee   : > { %v2927_v36 = vmax.f32 %v2899_v48, %v2915_v34  ;;  %v2777_v10 = vadd.f32 %v2706_v31, %v2443_v55  ;;  %v2708_v25 = vpop.f32.mrb[71].mxu0  ;;  %v2815_v53 = vadd.f32 %v4709_v30, %v2776_v49 }
 0x1ef   : > { %v2447_v61 = vpop.f32.mrb[72].mxu1 }
 0x1f0   : > { %v3297_v6 = vpack.c.bf16 %v2927_v36, %v2927_v36  ;;  %v2448_v1 = vadd.f32 %v2447_v61, %v4655_v27  ;;  %v2449_v54 = vpop.f32.mrb[73].mxu1  ;;  %v2816_v23 = vadd.f32 %v4709_v30, %v2777_v10 }
 0x1f1   : > { %v2450_v62 = vpop.f32.mrb[74].mxu1 }
 0x1f2   : > { %2968 = vst.msk [vmem:[%s4732_s13 + $0xc] sm:$0xf] %vm2964_vm0, %v3297_v6  ;;  %v2451_v20 = vadd.f32 %v2450_v62, %v4657_v40  ;;  %v2452_v26 = vpop.f32.mrb[75].mxu1  ;;  %v2848_v63 = vmax.f32 %v2816_v23, 0.0 }
 0x1f3   : > { %v2711_v57 = vpop.f32.mrb[72].mxu0 }
 0x1f4   : > { %v2778_v32 = vadd.f32 %v2711_v57, %v2448_v1  ;;  %v2713_v52 = vpop.f32.mrb[73].mxu0 }
 0x1f5   : > { %v2714_v3 = vpop.f32.mrb[74].mxu0 }
 0x1f6   : > { %v2817_v43 = vadd.f32 %v4709_v30, %v2778_v32  ;;  %v2779_v33 = vadd.f32 %v2714_v3, %v2451_v20  ;;  %v2716_v35 = vpop.f32.mrb[75].mxu0 }
 0x1f7   : > { %v2455_v27 = vpop.f32.mrb[76].mxu1 }
 0x1f8   : > { %v2849_v15 = vmax.f32 %v2817_v43, 0.0  ;;  %v2818_v11 = vadd.f32 %v4709_v30, %v2779_v33  ;;  %v2456_v40 = vadd.f32 %v2455_v27, %v4663_v16  ;;  %v2457_v21 = vpop.f32.mrb[77].mxu1 }
 0x1f9   : > { %v2458_v5 = vpop.f32.mrb[78].mxu1 }
 0x1fa   : > { %v2869_v42 = vmax.f32 %v2845_v14, %v2849_v15  ;;  %v2850_v46 = vmax.f32 %v2818_v11, 0.0  ;;  %v2459_v18 = vadd.f32 %v2458_v5, %v4665_v29  ;;  %v2460_v9 = vpop.f32.mrb[79].mxu1  ;;  %v2847_v29 = vmax.f32 %v2815_v53, 0.0 }
 0x1fb   : > { %v2719_v56 = vpop.f32.mrb[76].mxu0 }
 0x1fc   : > { %2885 = vst.msk [vmem:[#allocation2 + $0x40] sm:$0xff] %vm1844_vm1, %v2869_v42  ;;  %v2870_v47 = vmax.f32 %v2846_v28, %v2850_v46  ;;  %v2780_v7 = vadd.f32 %v2719_v56, %v2456_v40  ;;  %v2721_v38 = vpop.f32.mrb[77].mxu0 }
 0x1fd   : > { %v2722_v4 = vpop.f32.mrb[78].mxu0 }
 0x1fe   : > { %2886 = vst.msk [vmem:[#allocation2 + $0x48] sm:$0xff] %vm1844_vm1, %v2870_v47  ;;  %v2819_v16 = vadd.f32 %v4709_v30, %v2780_v7  ;;  %v2781_v2 = vadd.f32 %v2722_v4, %v2459_v18  ;;  %v2724_v19 = vpop.f32.mrb[79].mxu0 }
 0x1ff   : > { %v2463_v0 = vpop.f32.mrb[80].mxu1 }
 0x200   : > { %v2851_v17 = vmax.f32 %v2819_v16, 0.0  ;;  %v2820_v24 = vadd.f32 %v4709_v30, %v2781_v2  ;;  %v2464_v45 = vadd.f32 %v2463_v0, %v4671_v59  ;;  %v2465_v50 = vpop.f32.mrb[81].mxu1 }
 0x201   : > { %v2466_v55 = vpop.f32.mrb[82].mxu1 }
 0x202   : > { %v2871_v58 = vmax.f32 %v2847_v29, %v2851_v17  ;;  %v2852_v49 = vmax.f32 %v2820_v24, 0.0  ;;  %v2467_v41 = vadd.f32 %v2466_v55, %v4673_v51  ;;  %v2468_v48 = vpop.f32.mrb[83].mxu1 }
 0x203   : > { %v2727_v34 = vpop.f32.mrb[80].mxu0 }
 0x204   : > { %2887 = vst.msk [vmem:[#allocation2 + $0x50] sm:$0xff] %vm1844_vm1, %v2871_v58  ;;  %v2872_v31 = vmax.f32 %v2848_v63, %v2852_v49  ;;  %v2782_v36 = vadd.f32 %v2727_v34, %v2464_v45  ;;  %v2729_v10 = vpop.f32.mrb[81].mxu0 }
 0x205   : > { %v2901_v25 = vld [vmem:[#allocation2 + $0x40] ss:$2 sm:$0xff]  ;;  %v2917_v61 = vld [vmem:[#allocation2 + $0x41] ss:$2 sm:$0xff]  ;;  %v2730_v6 = vpop.f32.mrb[82].mxu0 }
 0x206   : > { %v2928_v1 = vmax.f32 %v2901_v25, %v2917_v61  ;;  %2888 = vst.msk [vmem:[#allocation2 + $0x58] sm:$0xff] %vm1844_vm1, %v2872_v31  ;;  %v2783_v59 = vadd.f32 %v2730_v6, %v2467_v41  ;;  %v2732_v54 = vpop.f32.mrb[83].mxu0  ;;  %v2821_v46 = vadd.f32 %v4709_v30, %v2782_v36 }
 0x207   : > { %v2471_v62 = vpop.f32.mrb[84].mxu1 }
 0x208   : > { %v3298_v20 = vpack.c.bf16 %v2928_v1, %v2928_v1  ;;  %v2472_v51 = vadd.f32 %v2471_v62, %v4679_v13  ;;  %v2473_v26 = vpop.f32.mrb[85].mxu1  ;;  %v2822_v53 = vadd.f32 %v4709_v30, %v2783_v59  ;;  %v2853_v4 = vmax.f32 %v2821_v46, 0.0 }
 0x209   : > { %v2474_v57 = vpop.f32.mrb[86].mxu1 }
 0x20a   : > { %2969 = vst.msk [vmem:[%s4732_s13 + $0x10] sm:$0xf] %vm2964_vm0, %v3298_v20  ;;  %v2475_v39 = vadd.f32 %v2474_v57, %v4681_v8  ;;  %v2476_v32 = vpop.f32.mrb[87].mxu1  ;;  %v2854_v0 = vmax.f32 %v2822_v53, 0.0 }
 0x20b   : > { %v2735_v52 = vpop.f32.mrb[84].mxu0 }
 0x20c   : > { %v2784_v3 = vadd.f32 %v2735_v52, %v2472_v51  ;;  %v2737_v37 = vpop.f32.mrb[85].mxu0 }
 0x20d   : > { %v2903_v43 = vld [vmem:[#allocation2 + $0x50] ss:$2 sm:$0xff]  ;;  %v2919_v33 = vld [vmem:[#allocation2 + $0x51] ss:$2 sm:$0xff]  ;;  %v2738_v35 = vpop.f32.mrb[86].mxu0 }
 0x20e   : > { %v2929_v27 = vmax.f32 %v2903_v43, %v2919_v33  ;;  %v2785_v14 = vadd.f32 %v2738_v35, %v2475_v39  ;;  %v2740_v15 = vpop.f32.mrb[87].mxu0  ;;  %v2823_v55 = vadd.f32 %v4709_v30, %v2784_v3 }
 0x20f   : > { %v2479_v11 = vpop.f32.mrb[88].mxu1 }
 0x210   : > { %v3299_v40 = vpack.c.bf16 %v2929_v27, %v2929_v27  ;;  %v2480_v13 = vadd.f32 %v2479_v11, %v4687_v12  ;;  %v2481_v21 = vpop.f32.mrb[89].mxu1  ;;  %v2824_v48 = vadd.f32 %v4709_v30, %v2785_v14 }
 0x211   : > { %v2482_v5 = vpop.f32.mrb[90].mxu1 }
 0x212   : > { %2970 = vst.msk [vmem:[%s4732_s13 + $0x14] sm:$0xf] %vm2964_vm0, %v3299_v40  ;;  %v2483_v8 = vadd.f32 %v2482_v5, %v4689_v60  ;;  %v2484_v28 = vpop.f32.mrb[91].mxu1  ;;  %v2856_v25 = vmax.f32 %v2824_v48, 0.0 }
 0x213   : > { %v2743_v42 = vpop.f32.mrb[88].mxu0 }
 0x214   : > { %v2786_v18 = vadd.f32 %v2743_v42, %v2480_v13  ;;  %v2745_v9 = vpop.f32.mrb[89].mxu0 }
 0x215   : > { %v2746_v56 = vpop.f32.mrb[90].mxu0 }
 0x216   : > { %v2825_v47 = vadd.f32 %v4709_v30, %v2786_v18  ;;  %v2787_v7 = vadd.f32 %v2746_v56, %v2483_v8  ;;  %v2748_v38 = vpop.f32.mrb[91].mxu0 }
 0x217   : > { %v2487_v12 = vpop.f32.mrb[92].mxu1 }
 0x218   : > { %v2857_v23 = vmax.f32 %v2825_v47, 0.0  ;;  %v2826_v16 = vadd.f32 %v4709_v30, %v2787_v7  ;;  %v2488_v60 = vadd.f32 %v2487_v12, %v4695_v44  ;;  %v2489_v2 = vpop.f32.mrb[93].mxu1 }
 0x219   : > { %v2490_v19 = vpop.f32.mrb[94].mxu1 }
 0x21a   : > { %v2873_v29 = vmax.f32 %v2853_v4, %v2857_v23  ;;  %v2858_v17 = vmax.f32 %v2826_v16, 0.0  ;;  %v2491_v24 = vadd.f32 %v2490_v19, %v4697_v22  ;;  %v2492_v45 = vpop.f32.mrb[95].mxu1  ;;  %v2855_v22 = vmax.f32 %v2823_v55, 0.0 }
 0x21b   : > { %v2751_v50 = vpop.f32.mrb[92].mxu0 }
 0x21c   : > { %2889 = vst.msk [vmem:[#allocation2 + $0x60] sm:$0xff] %vm1844_vm1, %v2873_v29  ;;  %v2874_v63 = vmax.f32 %v2854_v0, %v2858_v17  ;;  %v2788_v58 = vadd.f32 %v2751_v50, %v2488_v60  ;;  %v2753_v49 = vpop.f32.mrb[93].mxu0 }
 0x21d   : > { %v2754_v41 = vpop.f32.mrb[94].mxu0 }
 0x21e   : > { %2890 = vst.msk [vmem:[#allocation2 + $0x68] sm:$0xff] %vm1844_vm1, %v2874_v63  ;;  %v2827_v44 = vadd.f32 %v4709_v30, %v2788_v58  ;;  %v2789_v34 = vadd.f32 %v2754_v41, %v2491_v24  ;;  %v2756_v31 = vpop.f32.mrb[95].mxu0 }
 0x220   : > { %v2859_v36 = vmax.f32 %v2827_v44, 0.0  ;;  %v2828_v10 = vadd.f32 %v4709_v30, %v2789_v34 }
 0x222   : > { %v2875_v61 = vmax.f32 %v2855_v22, %v2859_v36  ;;  %v2860_v6 = vmax.f32 %v2828_v10, 0.0 }
 0x224   : > { %2891 = vst.msk [vmem:[#allocation2 + $0x70] sm:$0xff] %vm1844_vm1, %v2875_v61  ;;  %v2876_v1 = vmax.f32 %v2856_v25, %v2860_v6 }
 0x225   : > { %v2905_v59 = vld [vmem:[#allocation2 + $0x60] ss:$2 sm:$0xff]  ;;  %v2921_v54 = vld [vmem:[#allocation2 + $0x61] ss:$2 sm:$0xff] }
 0x226   : > { %v2930_v62 = vmax.f32 %v2905_v59, %v2921_v54  ;;  %2892 = vst.msk [vmem:[#allocation2 + $0x78] sm:$0xff] %vm1844_vm1, %v2876_v1 }
 0x228   : > { %v3300_v20 = vpack.c.bf16 %v2930_v62, %v2930_v62 }
 0x22a   : > { %2971 = vst.msk [vmem:[%s4732_s13 + $0x18] sm:$0xf] %vm2964_vm0, %v3300_v20 }
 0x22d   : > { %v2907_v51 = vld [vmem:[#allocation2 + $0x70] ss:$2 sm:$0xff]  ;;  %v2923_v26 = vld [vmem:[#allocation2 + $0x71] ss:$2 sm:$0xff] }
 0x22e   : > { %v2931_v57 = vmax.f32 %v2907_v51, %v2923_v26 }
 0x230   : > { %v3301_v39 = vpack.c.bf16 %v2931_v57, %v2931_v57 }
 0x232   : > { %2972 = vst.msk [vmem:[%s4732_s13 + $0x1c] sm:$0xf] %vm2964_vm0, %v3301_v39 }
 0x233 PF: > { %s15_s22 = sadd.s32 1, %s3458_s22   ;;  %s4926_s18 = smov %s3450_s20 }
 0x234   : > { %p12_p2 = scmp.ge.s32.totalorder %s15_s22, 10   ;;  %s4927_s19 = smov %s3454_s21 }
 0x235   : > { %s4928_s20 = smov %s4931_s23  ;;  %s4929_s21 = smov %s4935_s24 }
 0x236   :  { %14 = sbr.rel (!%p12_p2) target bundleno = 3 (0x3), region = 93 }

// kernel: feature_extractor.7
= control target key start
LH: loop header
LB: loop body
LE: loop exit
PB: predicated region body
PF: predicated region fallthrough
CT: control target
= control target key end

     0   :  { %s3586_s18 = smov 0   ;;  %s3588_s19 = smov 0   ;;  %s4591_s0 = inlined_call_operand.vmem [shape: bf16[2,256,128], index: 0, kind: input, shape index: {}, may-alias: {0,1,2}]   ;;  %s4592_s1 = inlined_call_operand.vmem [shape: bf16[2,256,128], index: 1, kind: input, shape index: {}, may-alias: {0,1,2}]   ;;  %s4593_s2 = inlined_call_operand.vmem [shape: bf16[2,256,128], index: 2, kind: input, shape index: {}, may-alias: {0,1,2}]   ;;  %s4594_s3 = inlined_call_operand.vmem [shape: bf16[3,384,128], index: 3, kind: input, shape index: {}]   ;;  %s4595_s4 = inlined_call_operand.vmem [shape: f32[1,128], index: 4, kind: input, shape index: {}]   ;;  %s4596_s5 = inlined_call_operand.vmem [shape: bf16[2,64,128], index: 5, kind: output, shape index: {}]  }
   0x1   :  { %s3590_s20 = smov 0   ;;  %s3592_s21 = smov 0  }
   0x2   :  { %s3594_s22 = smov 0  }
   0x3 LB: > { %s24_s23 = sadd.s32 1, %s3544_s20  ;;  %s27_s24 = sadd.s32 1, %s3548_s21  ;;  %s3552_s22 = sphi %s3594_s22, %s15_s22   ;;  %s3548_s21 = sphi %s3592_s21, %s4685_s21   ;;  %s3544_s20 = sphi %s3590_s20, %s4684_s20   ;;  %s3540_s19 = sphi %s3588_s19, %s4683_s19   ;;  %s3536_s18 = sphi %s3586_s18, %s4682_s18  }
   0x4   : > { %p25_p0 = scmp.ge.s32.totalorder %s24_s23, 2  ;;  %p2526_p1 = scmp.ge.s32.totalorder %s3552_s22, 1 }
   0x5   : > { %p274_p2 = scmp.lt.s32.totalorder %s3552_s22, 5 }
   0x6   : > { %s4687_s23 = smov (%p25_p0, %s24_s23), 0  ;;  %s4689_s24 = smov (!%p25_p0, %s27_s24), %s3548_s21 }
   0x7   : > { %p275_p3 = pnand %p2526_p1, %p274_p2  ;;  %p29_p4 = scmp.ge.s32.totalorder %s4689_s24, 2 }
   0x8   : > { %v3434_v0 = vld [vmem:[%s4594_s3 + $0x100] sm:$0xff] (!%p275_p3)   ;;  %v3437_v3 = vld [vmem:[%s4594_s3 + $0x108] sm:$0xff] (!%p275_p3)   ;;  %s2532_s8 = sshll.u32 (!%p275_p3), %s3536_s18, 4  ;;  %p341_p5 = scmp.lt.s32.totalorder (!%p275_p3), %s3540_s19, 1  ;;  %v3440_v6 = vld [vmem:[%s4594_s3 + $0x110] sm:$0xff] (!%p275_p3)   ;;  %v533_v8 = vlaneseq (!%p275_p3)  ;;  %vm4602_vm0 = vcmask (!%p275_p3), 1046528  }
   0x9   : > { %s4691_s24 = smov (%p29_p4, %s4689_s24), 0  ;;  %278 = sbr.rel (%p275_p3) target bundleno = 431 (0x1af), region = 40 }
   0xa   : > { %v3435_v1 = vld [vmem:[%s4594_s3 + $0x140] sm:$0xff] (!%p275_p3)   ;;  %2960 = vmatprep.subr.bf16.mxu0 (!%p275_p3), %v3434_v0  ;;  %v3438_v4 = vld [vmem:[%s4594_s3 + $0x148] sm:$0xff] (!%p275_p3)   ;;  %p357_p6 = scmp.lt.s32.totalorder (!%p275_p3), %s2532_s8, 31  ;;  %v3441_v7 = vld [vmem:[%s4594_s3 + $0x150] sm:$0xff] (!%p275_p3)   ;;  %v3661_v13 = vshrl.u32 (!%p275_p3), %v533_v8, 7  ;;  %s2527_s10 = sshll.u32 (!%p275_p3), %s3536_s18, 3 }
   0xb   : > { %v3436_v2 = vld [vmem:[%s4594_s3 + $0xc0] sm:$0xff] (!%p275_p3)   ;;  %3200 = vmatprep.subr.bf16.mxu1 (!%p275_p3), %v3435_v1  ;;  %v3439_v5 = vld [vmem:[%s4594_s3 + $0xc8] sm:$0xff] (!%p275_p3)   ;;  %v3442_v9 = vld [vmem:[%s4594_s3 + $0xd0] sm:$0xff] (!%p275_p3)   ;;  %s2528_s14 = sadd.s32 (!%p275_p3), 4294967295, %s2527_s10  ;;  %p395_p9 = scmp.gt.s32.totalorder (!%p275_p3), %s3536_s18, 0  ;;  %vm4603_vm2 = vmmov (!%p275_p3), 1  }
   0xc   : > { %2961 = vmatpush3.bf16.msra.mxu0 (!%p275_p3), %v3436_v2  ;;  %3201 = vmatpush3.bf16.msra.mxu1 (!%p275_p3), %v3435_v1  ;;  %v3443_v10 = vld [vmem:[%s4594_s3 + $0x118] sm:$0xff] (!%p275_p3)   ;;  %v3446_v14 = vld [vmem:[%s4594_s3 + $0x120] sm:$0xff] (!%p275_p3)   ;;  %p338_p7 = scmp.gt.s32.totalorder (!%p275_p3), %s2528_s14, 0  ;;  %v3449_v17 = vld [vmem:[%s4594_s3 + $0x128] sm:$0xff] (!%p275_p3)   ;;  %v537_v18 = vadd.s32 (!%p275_p3), 24, %v3661_v13  ;;  %v3715_v27 = vadd.s32 (!%p275_p3), 16, %v3661_v13 }
   0xd   : > { %2962 = vmatprep.subr.bf16.mxu0 (!%p275_p3), %v3437_v3  ;;  %3202 = vmatprep.subr.bf16.mxu1 (!%p275_p3), %v3438_v4  ;;  %v3444_v11 = vld [vmem:[%s4594_s3 + $0x158] sm:$0xff] (!%p275_p3)   ;;  %v3447_v15 = vld [vmem:[%s4594_s3 + $0x160] sm:$0xff] (!%p275_p3)   ;;  %v3450_v19 = vld [vmem:[%s4594_s3 + $0x168] sm:$0xff] (!%p275_p3)   ;;  %v539_v32 = vadd.s32 (!%p275_p3), 40, %v3661_v13  ;;  %v541_v41 = vadd.s32 (!%p275_p3), 56, %v3661_v13  ;;  %vm4597_vm6 = vcmask (!%p275_p3), 1040384  }
   0xe   : > { %v3445_v12 = vld [vmem:[%s4594_s3 + $0xd8] sm:$0xff] (!%p275_p3)   ;;  %v3448_v16 = vld [vmem:[%s4594_s3 + $0xe0] sm:$0xff] (!%p275_p3)   ;;  %v3451_v20 = vld [vmem:[%s4594_s3 + $0xe8] sm:$0xff] (!%p275_p3)   ;;  %v579_v23 = vand.u32 (!%p275_p3), 15, %v537_v18  ;;  %v572_v39 = vand.u32 (!%p275_p3), 15, %v3715_v27  ;;  %s3864_s7 = sadd.s32 (!%p275_p3), 8, %s2527_s10 }
   0xf   : > { %v3452_v21 = vld [vmem:[%s4594_s3 + $0x130] sm:$0xff] (!%p275_p3)   ;;  %v3455_v25 = vld [vmem:[%s4594_s3 + $0x138] sm:$0xff] (!%p275_p3)   ;;  %v593_v43 = vand.u32 (!%p275_p3), 15, %v539_v32  ;;  %v3461_v45 = vld [vmem:[%s4594_s3 + $0x40] sm:$0xff] (!%p275_p3)   ;;  %v607_v60 = vand.u32 (!%p275_p3), 15, %v541_v41  ;;  %v545_v41 = vadd.s32 (!%p275_p3), 88, %v3661_v13 }
  0x10   : > { %2963 = vmatpush3.bf16.msra.mxu0 %v3439_v5  ;;  %3203 = vmatpush3.bf16.msra.mxu1 %v3438_v4  ;;  %s4693_s19 = smov (!%p341_p5, %s3540_s19), 1  ;;  %s4695_s8 = smov (!%p357_p6, %s2532_s8), 31  ;;  %v3453_v22 = vld [vmem:[%s4594_s3 + $0x170] sm:$0xff]   ;;  %v3456_v26 = vld [vmem:[%s4594_s3 + $0x178] sm:$0xff]   ;;  %vm3732_vm1 = vcmp.ne.s32.totalorder %v579_v23, 15  ;;  %v3462_v51 = vld [vmem:[%s4594_s3 + $0x1c0] sm:$0xff]  }
  0x11   : > { %2964 = vmatprep.subr.bf16.mxu0 %v3440_v6  ;;  %3204 = vmatprep.subr.bf16.mxu1 %v3441_v7  ;;  %s3671_s13 = sshll.u32 %s4693_s19, 5  ;;  %s4697_s14 = smov (!%p338_p7, %s2528_s14), 0  ;;  %v3454_v24 = vld [vmem:[%s4594_s3 + $0xf0] sm:$0xff]   ;;  %v3457_v36 = vld [vmem:[%s4594_s3 + $0xf8] sm:$0xff]   ;;  %vm3767_vm3 = vmpackc.low %vm3732_vm1, %vm4603_vm2  ;;  %vm3772_vm4 = vcmp.ne.s32.totalorder %v593_v43, 15  ;;  %vm3828_vm7 = vcmp.ne.s32.totalorder %v607_v60, 15 }
  0x12   : > { %s360_s17 = sadd.s32 %s3671_s13, %s4695_s8  ;;  %s2529_s6 = sshll.u32 %s4697_s14, 1  ;;  %v3463_v56 = vld [vmem:[%s4594_s3] sm:$0xff]   ;;  %vm3803_vm5 = vmpackc.low %vm3772_vm4, %vm4603_vm2  ;;  %v3465_v62 = vld [vmem:[%s4594_s3 + $0x48] sm:$0xff]   ;;  %vm2944_vm11 = vcmp.ne.s32.totalorder %v572_v39, 0  ;;  %v4631_v5 = vmov 0  ;;  %v553_v49 = vadd.s32 152, %v3661_v13 }
  0x13   : > { %s2534_s29 = sshll.u32 %s360_s17, 2  ;;  %p3692_p8 = scmp.lt.s32.totalorder %s2529_s6, 31  ;;  %v3466_v4 = vld [vmem:[%s4594_s3 + $0x8] sm:$0xff]   ;;  %vm3856_vm8 = vmpackc.low %vm3828_vm7, %vm4603_vm2  ;;  %v3464_v27 = vld [vmem:[%s4594_s3 + $0x180] sm:$0xff]  }
  0x14   : > { %2965 = vmatpush3.bf16.msra.mxu0 %v3442_v9  ;;  %3205 = vmatpush3.bf16.msra.mxu1 %v3441_v7  ;;  %s3702_s14 = scalar_lea.vmem %s4592_s1, %s2534_s29  ;;  %v538_v7 = vadd.s32 32, %v3661_v13  ;;  %p366_p11 = scmp.lt.s32.totalorder %s3864_s7, 15  ;;  %vm3933_vm14 = vmpackc.low %vm4603_vm2, %vm2944_vm11 }
  0x15   : > { %2966 = vmatprep.subr.bf16.mxu0 %v3443_v10  ;;  %3206 = vmatprep.subr.bf16.mxu1 %v3444_v11  ;;  %v3718_v28 = vld [vmem:[%s3702_s14] sm:$0xff]   ;;  %s4699_s6 = smov (!%p3692_p8, %s2529_s6), 31  ;;  %v3725_v29 = vld [vmem:[%s3702_s14 + $0x8] sm:$0xff]   ;;  %v3748_v40 = vld [vmem:[%s3702_s14 + $0x10] sm:$0xff]   ;;  %v543_v10 = vadd.s32 72, %v3661_v13  ;;  %p416_p12 = scmp.lt.s32.totalorder %s3536_s18, 1 }
  0x16   : > { %1393 = vmatprep.mubr.bf16.mxu0 %v3718_v28  ;;  %v514_v30 = vunpack.c.l.bf16 %v3718_v28  ;;  %v515_v31 = vunpack.c.h.bf16 %v3718_v28  ;;  %v516_v33 = vunpack.c.l.bf16 %v3725_v29  ;;  %s396_s29 = scalar_select %p395_p9, 1, 0  ;;  %v517_v35 = vunpack.c.h.bf16 %v3725_v29  ;;  %v3818_v0 = vld [vmem:[%s3702_s14 + $0x18] sm:$0xff]   ;;  %v3835_v8 = vld [vmem:[%s3702_s14 + $0x20] sm:$0xff]  }
  0x17   : > { %s346_s11 = sadd.s32 %s3671_s13, %s4699_s6  ;;  %v518_v47 = vunpack.c.l.bf16 %v3748_v40  ;;  %v519_v55 = vunpack.c.h.bf16 %v3748_v40  ;;  %v520_v6 = vunpack.c.l.bf16 %v3818_v0  ;;  %v521_v9 = vunpack.c.h.bf16 %v3818_v0  ;;  %s4703_s7 = smov (!%p366_p11, %s3864_s7), 15 }
  0x18   : > { %2967 = vmatpush3.bf16.msra.mxu0 %v3445_v12  ;;  %3207 = vmatpush3.bf16.msra.mxu1 %v3444_v11  ;;  %v3742_v37 = vrot.slane %v514_v30, 1  ;;  %v1034_v38 = vrot.slane %v515_v31, 1  ;;  %v1036_v42 = vrot.slane %v516_v33, 1  ;;  %s3753_s12 = scvt.s32.f32 %s396_s29  ;;  %v1038_v44 = vrot.slane %v517_v35, 1  ;;  %s2531_s16 = sshll.u32 %s346_s11, 2  ;;  %v3469_v11 = vld [vmem:[%s4594_s3 + $0x50] sm:$0xff]  }
  0x19   : > { %2968 = vmatprep.subr.bf16.mxu0 %v3446_v14  ;;  %3208 = vmatprep.subr.bf16.mxu1 %v3447_v15  ;;  %v1040_v54 = vrot.slane %v518_v47, 1  ;;  %v3790_v57 = vrot.slane %v514_v30, 7  ;;  %s348_s9 = scalar_lea.vmem %s4591_s0, %s2531_s16  ;;  %v3812_v63 = vrot.slane %v515_v31, 7  ;;  %v1042_v1 = vrot.slane %v519_v55, 1 }
  0x1a   : > { %v1035_v46 = vsel %vm4602_vm0, %v3742_v37, %v1034_v38  ;;  %v1037_v48 = vsel %vm4602_vm0, %v1034_v38, %v1036_v42  ;;  %s400_s17 = sshrl.u32 %s3753_s12, 16  ;;  %p399_p10 = scmp.ne.f32.partialorder %s3753_s12, %s3753_s12  ;;  %v1039_v53 = vsel %vm4602_vm0, %v1036_v42, %v1038_v44  ;;  %v393_v2 = vld [vmem:[%s348_s9] sm:$0xf]  ;;  %v394_v3 = vld [vmem:[%s348_s9 + $0x4] sm:$0xf]  ;;  %v1044_v14 = vrot.slane %v520_v6, 1 }
  0x1b   : > { %v3779_v52 = vpack.c.bf16 %v1037_v48, %v1035_v46  ;;  %s401_s27 = sand.u32 1, %s400_s17  ;;  %v1041_v58 = vsel %vm4602_vm0, %v1038_v44, %v1040_v54  ;;  %v1043_v12 = vsel %vm4602_vm0, %v1040_v54, %v1042_v1  ;;  %v1046_v18 = vrot.slane %v521_v9, 1  ;;  %v3473_v38 = vld [vmem:[%s4594_s3 + $0x58] sm:$0xff]   ;;  %v3894_v46 = vld [vmem:[%s3702_s14 + $0x28] sm:$0xff]   ;;  %v3477_v54 = vld [vmem:[%s4594_s3 + $0x60] sm:$0xff]   ;;  %s2536_s17 = sshll.u32 %s4703_s7, 1 }
  0x1c   : > { %2969 = vmatpush3.bf16.msra.mxu0 %v3448_v16  ;;  %3209 = vmatpush3.bf16.msra.mxu1 %v3447_v15  ;;  %s402_s28 = sadd.s32 32767, %s401_s27  ;;  %v3807_v61 = vpack.c.bf16 %v1041_v58, %v1039_v53  ;;  %v522_v15 = vunpack.c.l.bf16 %v3835_v8  ;;  %v621_v16 = vand.u32 15, %v543_v10  ;;  %v1045_v23 = vsel %vm4602_vm0, %v1042_v1, %v1044_v14  ;;  %v3474_v44 = vld [vmem:[%s4594_s3 + $0x18] sm:$0xff]   ;;  %p371_p13 = scmp.lt.s32.totalorder %s2536_s17, 31  ;;  %v3502_v1 = vld [vmem:[%s4594_s3 + $0xa0] sm:$0xff]  }
  0x1d   : > { %2970 = vmatprep.subr.bf16.mxu0 %v3449_v17  ;;  %3210 = vmatprep.subr.bf16.mxu1 %v3450_v19  ;;  %s403_s11 = sadd.s32 %s402_s28, %s3753_s12  ;;  %v586_v30 = vand.u32 15, %v538_v7  ;;  %v1047_v31 = vsel %vm4602_vm0, %v1044_v14, %v1046_v18  ;;  %v635_v48 = vand.u32 15, %v545_v41  ;;  %v885_v50 = vrot.slane %v516_v33, 7 }
  0x1e   : > { %3216 = vmatprep.mubr.msk.bf16.mxu1 %vm3767_vm3, %v3779_v52  ;;  %s404_s6 = sand.u32 4294901760, %s403_s11  ;;  %vm2955_vm9 = vcmp.ne.s32.totalorder %v621_v16, 15  ;;  %v884_v33 = vsel %vm4597_vm6, %v3790_v57, %v3812_v63  ;;  %v524_v39 = vunpack.c.l.bf16 %v3894_v46  ;;  %v525_v60 = vunpack.c.h.bf16 %v3894_v46  ;;  %v3479_v16 = vld [vmem:[%s4594_s3 + $0x20] sm:$0xff]   ;;  %s4705_s17 = smov (!%p371_p13, %s2536_s17), 31 }
  0x1f   : > { %s4701_s6 = smov (%p399_p10, %s404_s6), 2143289344  ;;  %vm3873_vm10 = vmpackc.low %vm2955_vm9, %vm4603_vm2  ;;  %vm2956_vm12 = vcmp.ne.s32.totalorder %v635_v48, 15  ;;  %vm3924_vm13 = vcmp.ne.s32.totalorder %v586_v30, 0  ;;  %v547_v10 = vadd.s32 104, %v3661_v13  ;;  %v886_v30 = vsel %vm4597_vm6, %v3812_v63, %v885_v50  ;;  %s374_s29 = sadd.s32 %s3671_s13, %s4705_s17 }
  0x20   : > { %2971 = vmatpush3.bf16.msra.mxu0 %v3451_v20  ;;  %3211 = vmatpush3.bf16.msra.mxu1 %v3450_v19  ;;  %s407_s12 = sshrl.u32 %s4701_s6, 16  ;;  %v3471_v19 = vld [vmem:[%s4594_s3 + $0x10] sm:$0xff]   ;;  %v523_v20 = vunpack.c.h.bf16 %v3835_v8  ;;  %vm3954_vm15 = vmpackc.low %vm2956_vm12, %vm4603_vm2  ;;  %v4633_v41 = vmov 0  ;;  %s2538_s13 = sshll.u32 %s374_s29, 2 }
  0x21   : > { %2972 = vmatprep.subr.bf16.mxu0 %v3452_v21  ;;  %3212 = vmatprep.subr.bf16.mxu1 %v3453_v22  ;;  %s408_s26 = sshll.u32 %s407_s12, 16  ;;  %v4632_v5 = vsel %vm3954_vm15, 4294967295, %v4631_v5  ;;  %vm4022_vm7 = vmpackc.low %vm4603_vm2, %vm3924_vm13  ;;  %s376_s27 = scalar_lea.vmem %s4593_s2, %s2538_s13 }
  0x22   : > { %s409_s30 = sor.u32 %s408_s26, %s407_s12  ;;  %v1050_v42 = vrot.slane %v523_v20, 1 }
  0x23   : > { %v410_v17 = vstv %s409_s30  ;;  %s417_s12 = scalar_select %p416_p12, 1, 0 }
  0x24   : > { %2973 = vmatpush3.bf16.msra.mxu0 %v3454_v24  ;;  %3213 = vmatpush3.bf16.msra.mxu1 %v3453_v22  ;;  %v412_v21 = vmul.bf16 %v410_v17, %v393_v2  ;;  %v413_v22 = vmul.bf16 %v410_v17, %v394_v3  ;;  %v1052_v3 = vrot.slane %v524_v39, 1  ;;  %s2539_s30 = sshll.u32 %s3536_s18, 2  ;;  %s2540_s18 = sshll.u32 %s4693_s19, 3 }
  0x25   : > { %2974 = vmatprep.subr.bf16.mxu0 %v3455_v25  ;;  %3214 = vmatprep.subr.bf16.mxu1 %v3456_v26  ;;  %v1048_v25 = vrot.slane %v522_v15, 1  ;;  %s4046_s26 = scvt.s32.f32 %s417_s12  ;;  %p4559_p1 = scmp.lt.s32.totalorder %s2539_s30, 7 }
  0x26   : > { %v3869_v32 = vcombine.low %v412_v21, %v413_v22  ;;  %v1053_v14 = vsel %vm4602_vm0, %v1050_v42, %v1052_v3  ;;  %v649_v21 = vand.u32 15, %v547_v10  ;;  %v3485_v10 = vld [vmem:[%s4594_s3 + $0x1d8] sm:$0xff]  }
  0x27   : > { %v1049_v34 = vsel %vm4602_vm0, %v1046_v18, %v1048_v25  ;;  %v1051_v2 = vsel %vm4602_vm0, %v1048_v25, %v1050_v42  ;;  %v549_v18 = vadd.s32 120, %v3661_v13  ;;  %v3481_v25 = vld [vmem:[%s4594_s3 + $0x68] sm:$0xff]   ;;  %s421_s11 = sshrl.u32 %s4046_s26, 16  ;;  %p420_p0 = scmp.ne.f32.partialorder %s4046_s26, %s4046_s26 }
  0x28   : > { %2975 = vmatpush3.bf16.msra.mxu0 %v3457_v36  ;;  %3215 = vmatpush3.bf16.msra.mxu1 %v3456_v26  ;;  %v3866_v26 = vpack.c.bf16 %v1045_v23, %v1043_v12  ;;  %v4625_v36 = vmov 0  ;;  %v3886_v43 = vpack.c.bf16 %v1049_v34, %v1047_v31  ;;  %v3472_v12 = vld [vmem:[%s4594_s3 + $0x188] sm:$0xff]   ;;  %vm2957_vm1 = vcmp.ne.s32.totalorder %v649_v21, 15  ;;  %s422_s17 = sand.u32 1, %s421_s11  ;;  %s4709_s30 = smov (!%p4559_p1, %s2539_s30), 7 }
  0x29   : > { %3040 = vmatprep.subr.bf16.mxu1 %v3461_v45  ;;  %3120 = vmatprep.subr.bf16.mxu0 %v3462_v51  ;;  %v4626_v36 = vsel %vm3873_vm10, 4294967295, %v4625_v36  ;;  %v513_v45 = vunpack.c.h.bf16 %v3869_v32  ;;  %v3904_v51 = vld [vmem:[%s3702_s14 + $0x30] sm:$0xff]   ;;  %vm3996_vm4 = vmpackc.low %vm2957_vm1, %vm4603_vm2  ;;  %v3482_v42 = vld [vmem:[%s4594_s3 + $0x28] sm:$0xff]   ;;  %v663_v48 = vand.u32 15, %v549_v18  ;;  %v542_v21 = vadd.s32 64, %v3661_v13 }
  0x2a   : > { %v526_v7 = vunpack.c.l.bf16 %v3904_v51  ;;  %v4601_v17 = vunpack.c.h.bf16 %v3904_v51  ;;  %v4634_v41 = vsel %vm3996_vm4, 4294967295, %v4633_v41 }
  0x2b   : > { %3217 = vmatmul.mubr.msk.bf16.vlgmr.msra.gmra.mrb[0].mxu1 %vm3803_vm5, %v3807_v61  ;;  %v3908_v53 = vrot.slane %v513_v45, 7  ;;  %vm4037_vm9 = vcmp.ne.s32.totalorder %v663_v48, 15  ;;  %v4113_v48 = vld [vmem:[%s4594_s3 + $0x80] sm:$0xff]  }
  0x2c   : > { %3041 = vmatpush3.bf16.msra.mxu1 %v3463_v56  ;;  %3220 = vmatprep.mubr.msk.bf16.mxu1 %vm3856_vm8, %v3866_v26  ;;  %v3922_v56 = vrot.slane %v517_v35, 7  ;;  %v3470_v35 = vld [vmem:[%s4594_s3 + $0x1c8] sm:$0xff]   ;;  %v1056_v23 = vrot.slane %v526_v7, 1  ;;  %vm4071_vm12 = vmpackc.low %vm4037_vm9, %vm4603_vm2 }
  0x2d   : > { %3042 = vmatprep.subr.bf16.mxu1 %v3465_v62  ;;  %v882_v62 = vsel %vm4597_vm6, %v3908_v53, %v3790_v57 }
  0x2e   : > { %v3951_v57 = vpack.c.bf16 %v884_v33, %v882_v62  ;;  %v888_v31 = vsel %vm4597_vm6, %v885_v50, %v3922_v56  ;;  %v1058_v50 = vrot.slane %v4601_v17, 1  ;;  %v3484_v62 = vld [vmem:[%s4594_s3 + $0x70] sm:$0xff]  }
  0x2f   : > { %v4011_v33 = vpack.c.bf16 %v888_v31, %v886_v30  ;;  %v3489_v30 = vld [vmem:[%s4594_s3 + $0x38] sm:$0xff]  }
  0x30   : > { %3043 = vmatpush3.bf16.msra.mxu1 %v3466_v4  ;;  %v3944_v4 = vadd.s32 48, %v3661_v13  ;;  %2627 = vmatmul.mubr.msk.bf16.vlgmr.msra.gmra.mrb[0].mxu0 %vm3933_vm14, %v3951_v57 }
  0x31   : > { %3044 = vmatprep.subr.bf16.mxu1 %v3469_v11  ;;  %v1054_v11 = vrot.slane %v525_v60, 1  ;;  %3121 = vmatpush3.bf16.msra.mxu0 %v3464_v27 }
  0x32   : > { %1401 = vmatprep.mubr.bf16.mxu0 %v3725_v29  ;;  %3122 = vmatprep.subr.bf16.mxu0 %v3470_v35  ;;  %v600_v27 = vand.u32 15, %v3944_v4  ;;  %v3511_v35 = vld [vmem:[%s4594_s3 + $0x228] sm:$0xff]  }
  0x33   : > { %3221 = vmatmul.mubr.msk.bf16.gmra.mrb[4].mxu1 %vm3873_vm10, %v3886_v43  ;;  %v1055_v22 = vsel %vm4602_vm0, %v1052_v3, %v1054_v11  ;;  %v1057_v34 = vsel %vm4602_vm0, %v1054_v11, %v1056_v23  ;;  %v3486_v11 = vld [vmem:[%s4594_s3 + $0x30] sm:$0xff]   ;;  %v415_v3 = vld [vmem:[%s376_s27 + $0x4] sm:$0xf] }
  0x34   : > { %3045 = vmatpush3.bf16.msra.mxu1 %v3471_v19  ;;  %v3974_v19 = vpack.c.bf16 %v1053_v14, %v1051_v2  ;;  %v4000_v63 = vpack.c.bf16 %v1057_v34, %v1055_v22  ;;  %v891_v2 = vrot.slane %v519_v55, 7  ;;  %v1059_v55 = vsel %vm4602_vm0, %v1056_v23, %v1058_v50  ;;  %v3487_v22 = vld [vmem:[%s4594_s3 + $0x198] sm:$0xff]  }
  0x35   : > { %3046 = vmatprep.subr.bf16.mxu1 %v3473_v38  ;;  %v3478_v38 = vld [vmem:[%s4594_s3 + $0x1d0] sm:$0xff]   ;;  %3123 = vmatpush3.bf16.msra.mxu0 %v3472_v12  ;;  %vm4062_vm11 = vcmp.ne.s32.totalorder %v600_v27, 0  ;;  %v3491_v27 = vld [vmem:[%s4594_s3 + $0x1e0] sm:$0xff]  }
  0x36   : > { %3224 = vmatprep.mubr.msk.bf16.mxu1 %vm3954_vm15, %v3974_v19  ;;  %3124 = vmatprep.subr.bf16.mxu0 %v3478_v38  ;;  %vm4098_vm13 = vmpackc.low %vm4603_vm2, %vm4062_vm11  ;;  %v893_v38 = vrot.slane %v520_v6, 7  ;;  %v551_v6 = vadd.s32 136, %v3661_v13  ;;  %vm4661_vm15 = vmmov 1  }
  0x38   : > { %3047 = vmatpush3.bf16.msra.mxu1 %v3474_v44  ;;  %v4006_v44 = vld [vmem:[%s3702_s14 + $0x38] sm:$0xff]   ;;  %2631 = vmatmul.mubr.msk.bf16.gmra.mrb[4].mxu0 %vm4022_vm7, %v4011_v33  ;;  %s423_s14 = sadd.s32 32767, %s422_s17 }
  0x39   : > { %3048 = vmatprep.subr.bf16.mxu1 %v3477_v54  ;;  %v889_v54 = vrot.slane %v518_v47, 7  ;;  %v3480_v47 = vld [vmem:[%s4594_s3 + $0x190] sm:$0xff]   ;;  %v4598_v58 = vunpack.c.l.bf16 %v4006_v44  ;;  %1409 = vmatprep.mubr.bf16.mxu0 %v3748_v40  ;;  %s424_s28 = sadd.s32 %s423_s14, %s4046_s26 }
  0x3a   : > { %3125 = vmatpush3.bf16.msra.mxu0 %v3480_v47  ;;  %s425_s29 = sand.u32 4294901760, %s424_s28 }
  0x3b   : > { %3225 = vmatmul.mubr.msk.bf16.gmra.mrb[8].mxu1 %vm3996_vm4, %v4000_v63  ;;  %v4044_v4 = vrot.slane %v4598_v58, 1  ;;  %v890_v12 = vsel %vm4597_vm6, %v3922_v56, %v889_v54  ;;  %v892_v14 = vsel %vm4597_vm6, %v889_v54, %v891_v2  ;;  %v4641_v56 = vmov 0  ;;  %3126 = vmatprep.subr.bf16.mxu0 %v3485_v10  ;;  %s4707_s29 = smov (%p420_p0, %s425_s29), 2143289344  ;;  %v414_v54 = vld [vmem:[%s376_s27] sm:$0xf] }
  0x3c   : > { %3049 = vmatpush3.bf16.msra.mxu1 %v3479_v16  ;;  %v4642_v56 = vsel %vm4071_vm12, 4294967295, %v4641_v56  ;;  %v4090_v31 = vpack.c.bf16 %v892_v14, %v890_v12  ;;  %s428_s26 = sshrl.u32 %s4707_s29, 16  ;;  %v529_v10 = vunpack.c.h.bf16 %v4006_v44  ;;  %s388_s29 = sadd.s32 %s2540_s18, %s4709_s30 }
  0x3d   : > { %3050 = vmatprep.subr.bf16.mxu1 %v3481_v25  ;;  %v1061_v18 = vsel %vm4602_vm0, %v1058_v50, %v4044_v4  ;;  %v3488_v25 = vld [vmem:[%s4594_s3 + $0x78] sm:$0xff]   ;;  %v614_v50 = vand.u32 15, %v542_v21  ;;  %s429_s6 = sshll.u32 %s428_s26, 16  ;;  %v3495_v21 = vld [vmem:[%s4594_s3 + $0x1a8] sm:$0xff]   ;;  %s2541_s10 = sshll.u32 %s388_s29, 2 }
  0x3e   : > { %v4079_v23 = vpack.c.bf16 %v1061_v18, %v1059_v55  ;;  %3127 = vmatpush3.bf16.msra.mxu0 %v3487_v22  ;;  %v3492_v55 = vld [vmem:[%s4594_s3 + $0x1a0] sm:$0xff]   ;;  %s430_s15 = sor.u32 %s429_s6, %s428_s26  ;;  %v897_v18 = vrot.slane %v522_v15, 7  ;;  %v512_v15 = vunpack.c.l.bf16 %v3869_v32  ;;  %v3513_v22 = vld [vmem:[%s4594_s3 + $0x238] sm:$0xff]   ;;  %s390_s19 = scalar_lea.vmem %s4596_s5, %s2541_s10 }
  0x3f   : > { %3128 = vmatprep.subr.bf16.mxu0 %v3491_v27  ;;  %vm2947_vm1 = vcmp.ne.s32.totalorder %v614_v50, 0  ;;  %v431_v14 = vstv %s430_s15  ;;  %v3497_v50 = vld [vmem:[%s4594_s3 + $0x1f0] sm:$0xff]  }
  0x40   : > { %3051 = vmatpush3.bf16.msra.mxu1 %v3482_v42  ;;  %3228 = vmatprep.mubr.msk.bf16.mxu1 %vm4071_vm12, %v4079_v23  ;;  %v895_v42 = vrot.slane %v521_v9, 7  ;;  %v544_v9 = vadd.s32 80, %v3661_v13  ;;  %vm4145_vm9 = vmpackc.low %vm4603_vm2, %vm2947_vm1  ;;  %v3498_v27 = vld [vmem:[%s4594_s3 + $0x1b0] sm:$0xff]  }
  0x41   : > { %3052 = vmatprep.subr.bf16.mxu1 %v3484_v62  ;;  %2635 = vmatmul.mubr.msk.bf16.gmra.mrb[8].mxu0 %vm4098_vm13, %v4090_v31  ;;  %v894_v62 = vsel %vm4597_vm6, %v891_v2, %v893_v38  ;;  %v3494_v2 = vld [vmem:[%s4594_s3 + $0x1e8] sm:$0xff]  }
  0x42   : > { %1417 = vmatprep.mubr.bf16.mxu0 %v3818_v0  ;;  %v896_v47 = vsel %vm4597_vm6, %v893_v38, %v895_v42  ;;  %3129 = vmatpush3.bf16.msra.mxu0 %v3492_v55  ;;  %v628_v16 = vand.u32 15, %v544_v9  ;;  %v899_v38 = vrot.slane %v523_v20, 7  ;;  %v1062_v9 = vrot.slane %v529_v10, 1 }
  0x43   : > { %v4137_v12 = vpack.c.bf16 %v896_v47, %v894_v62  ;;  %3130 = vmatprep.subr.bf16.mxu0 %v3494_v2  ;;  %v3555_v62 = vmov 0   ;;  %v901_v20 = vrot.slane %v524_v39, 7 }
  0x44   : > { %3053 = vmatpush3.bf16.msra.mxu1 %v3486_v11  ;;  %v677_v11 = vand.u32 15, %v551_v6  ;;  %v511_v47 = vunpack.c.h.bf16 %v3555_v62  ;;  %v900_v55 = vsel %vm4597_vm6, %v897_v18, %v899_v38  ;;  %vm4171_vm1 = vcmp.ne.s32.totalorder %v628_v16, 0  ;;  %v3501_v16 = vld [vmem:[%s4594_s3 + $0x1b8] sm:$0xff]  }
  0x45   : > { %3054 = vmatprep.subr.bf16.mxu1 %v3488_v25  ;;  %v433_v25 = vmul.bf16 %v431_v14, %v414_v54  ;;  %v898_v54 = vsel %vm4597_vm6, %v895_v42, %v897_v18  ;;  %v1029_v42 = vrot.slane %v512_v15, 1  ;;  %v4651_v18 = vmov 0  ;;  %vm4200_vm12 = vmpackc.low %vm4603_vm2, %vm4171_vm1 }
  0x46   : > { %3131 = vmatpush3.bf16.msra.mxu0 %v3495_v21  ;;  %vm4163_vm11 = vcmp.ne.s32.totalorder %v677_v11, 15  ;;  %v546_v11 = vadd.s32 96, %v3661_v13  ;;  %v877_v21 = vrot.slane %v512_v15, 7  ;;  %v4192_v58 = vpack.c.bf16 %v900_v55, %v898_v54 }
  0x47   : > { %3132 = vmatprep.subr.bf16.mxu0 %v3497_v50  ;;  %v558_v50 = vand.u32 15, %v3661_v13  ;;  %vm4188_vm6 = vmpackc.low %vm4163_vm11, %vm4603_vm2  ;;  %v876_v15 = vrot.slane %v511_v47, 7  ;;  %v903_v54 = vrot.slane %v525_v60, 7  ;;  %vm4655_vm11 = vcmask 1040384  }
  0x48   : > { %3055 = vmatpush3.bf16.msra.mxu1 %v3489_v30  ;;  %v434_v30 = vmul.bf16 %v431_v14, %v415_v3  ;;  %v3500_v14 = vld [vmem:[%s4594_s3 + $0x1f8] sm:$0xff]   ;;  %v4652_v18 = vsel %vm4188_vm6, 4294967295, %v4651_v18  ;;  %v880_v39 = vsel %vm4655_vm11, %v877_v21, %v3908_v53  ;;  %vm4656_vm1 = vmmov %vm4655_vm11 }
  0x49   : > { %3232 = vmatprep.subr.bf16.mxu1 %v4113_v48  ;;  %2639 = vmatmul.mubr.msk.bf16.gmra.mrb[12].mxu0 %vm4145_vm9, %v4137_v12  ;;  %vm2939_vm11 = vcmp.ne.s32.totalorder %v558_v50, 0 }
  0x4a   : > { %v4155_v6 = vcombine.low %v433_v25, %v434_v30  ;;  %1425 = vmatprep.mubr.bf16.mxu0 %v3835_v8  ;;  %v1063_v25 = vsel %vm4602_vm0, %v4044_v4, %v1062_v9  ;;  %3133 = vmatpush3.bf16.msra.mxu0 %v3498_v27  ;;  %v1030_v4 = vrot.slane %v513_v45, 1  ;;  %v642_v45 = vand.u32 15, %v546_v11  ;;  %vm2713_vm10 = vmpackc.low %vm4661_vm15, %vm2939_vm11 }
  0x4b   : > { %3134 = vmatprep.subr.bf16.mxu0 %v3500_v14  ;;  %v878_v11 = vsel %vm4656_vm1, %v876_v15, %v877_v21 }
  0x4c   : > { %v530_v3 = vunpack.c.l.bf16 %v4155_v6  ;;  %v531_v47 = vunpack.c.h.bf16 %v4155_v6  ;;  %v4217_v2 = vsel %vm4602_vm0, %v1029_v42, %v1030_v4  ;;  %v4221_v14 = vsel %vm4602_vm0, %v1030_v4, %v3742_v37 }
  0x4d   : > { %v2746_v60 = vpack.c.bf16 %v4221_v14, %v4217_v2  ;;  %v911_v42 = vrot.slane %v529_v10, 7  ;;  %v2714_v10 = vpack.c.bf16 %v880_v39, %v878_v11  ;;  %v3493_v11 = vld [vmem:[%s4594_s3 + $0x88] sm:$0xff]  }
  0x4e   : > { %v1064_v30 = vrot.slane %v530_v3, 1  ;;  %3135 = vmatpush3.bf16.msra.mxu0 %v3501_v16  ;;  %v913_v37 = vrot.slane %v530_v3, 7  ;;  %v915_v4 = vrot.slane %v531_v47, 7  ;;  %v1066_v3 = vrot.slane %v531_v47, 1 }
  0x50   : > { %v1065_v27 = vsel %vm4602_vm0, %v1062_v9, %v1064_v30  ;;  %v4214_v9 = vld [vmem:[%s4594_s3 + $0x200] sm:$0xff]   ;;  %vm4657_vm0 = vmmov %vm4656_vm1 }
  0x51   : > { %v4209_v55 = vpack.c.bf16 %v1065_v27, %v1063_v25  ;;  %2643 = vmatmul.mubr.msk.bf16.gmra.mrb[16].mxu0 %vm4200_vm12, %v4192_v58  ;;  %v532_v25 = vunpack.c.l.bf16 %v3555_v62  ;;  %v902_v53 = vsel %vm4657_vm0, %v899_v38, %v901_v20  ;;  %vm4658_vm2 = vmmov %vm4657_vm0  ;;  %v548_v27 = vadd.s32 112, %v3661_v13  ;;  %3264 = vmatprep.subr.bf16.mxu0 %v4214_v9 }
  0x52   : > { %1433 = vmatprep.mubr.bf16.mxu0 %v3894_v46  ;;  %v904_v16 = vsel %vm4658_vm2, %v901_v20, %v903_v54  ;;  %vm4659_vm4 = vmmov %vm4657_vm0  ;;  %v905_v20 = vrot.slane %v526_v7, 7  ;;  %vm4665_vm2 = vcmask 1046528  }
  0x53   : > { %3229 = vmatmul.mubr.msk.bf16.gmra.mrb[12].mxu1 %vm4188_vm6, %v4209_v55  ;;  %vm2949_vm6 = vcmp.ne.s32.totalorder %v642_v45, 0  ;;  %v4241_v21 = vsel %vm4659_vm4, %v911_v42, %v913_v37  ;;  %vm4660_vm1 = vmmov %vm4657_vm0  ;;  %v1068_v50 = vrot.slane %v532_v25, 1  ;;  %v4664_v45 = vunpack.c.h.bf16 %v3904_v51 }
  0x54   : > { %1731 = vmatprep.mubr.bf16.mxu1 %v3869_v32  ;;  %v4244_v62 = vsel %vm4660_vm1, %v913_v37, %v915_v4  ;;  %v4247_v32 = vpack.c.bf16 %v904_v16, %v902_v53  ;;  %vm4252_vm0 = vmpackc.low %vm4661_vm15, %vm2949_vm6  ;;  %v656_v37 = vand.u32 15, %v548_v27  ;;  %v4264_v53 = vsel %vm4665_vm2, %v1064_v30, %v1066_v3  ;;  %v3496_v16 = vld [vmem:[%s4594_s3 + $0x90] sm:$0xff]  }
  0x55   : > { %v2878_v38 = vpack.c.bf16 %v4244_v62, %v4241_v21  ;;  %v907_v39 = vrot.slane %v4664_v45, 7  ;;  %vm4666_vm4 = vmmov %vm4665_vm2  ;;  %v550_v4 = vadd.s32 128, %v3661_v13 }
  0x56   : > { %v4267_v47 = vsel %vm4666_vm4, %v1066_v3, %v1068_v50  ;;  %vm4667_vm6 = vmmov %vm4660_vm1  ;;  %v3499_v3 = vld [vmem:[%s4594_s3 + $0x98] sm:$0xff]  }
  0x57   : > { %v2910_v25 = vpack.c.bf16 %v4267_v47, %v4264_v53  ;;  %v906_v7 = vsel %vm4667_vm6, %v903_v54, %v905_v20  ;;  %vm4668_vm11 = vmmov %vm4660_vm1  ;;  %vm2950_vm1 = vcmp.ne.s32.totalorder %v656_v37, 0  ;;  %v3507_v37 = vld [vmem:[%s4594_s3 + $0x210] sm:$0xff]  }
  0x58   : > { %v908_v30 = vsel %vm4668_vm11, %v905_v20, %v907_v39  ;;  %vm4672_vm2 = vmmov %vm4667_vm6  ;;  %vm4678_vm11 = vnez %v4634_v41 }
  0x59   : > { %2647 = vmatmul.mubr.msk.bf16.gmra.mrb[20].mxu0 %vm4252_vm0, %v4247_v32  ;;  %v4283_v27 = vpack.c.bf16 %v908_v30, %v906_v7  ;;  %vm4673_vm4 = vmmov %vm4672_vm2 }
  0x5a   : > { %1441 = vmatprep.mubr.bf16.mxu0 %v3904_v51 }
  0x5b   : > { %2715 = vmatmul.mubr.msk.bf16.vlgmr.msra.gmra.mrb[16].mxu1 %vm2713_vm10, %v2714_v10  ;;  %vm4286_vm10 = vmpackc.low %vm4661_vm15, %vm2950_vm1  ;;  %v670_v10 = vand.u32 15, %v550_v4  ;;  %vm4679_vm1 = vnez %v4642_v56 }
  0x5c   : > { %3233 = vmatpush3.bf16.msra.mxu1 %v4113_v48  ;;  %1739 = vmatprep.mubr.bf16.mxu1 %v3718_v28  ;;  %v4671_v48 = vunpack.c.l.bf16 %v4006_v44 }
  0x5d   : > { %3234 = vmatprep.subr.bf16.mxu1 %v3493_v11  ;;  %vm2951_vm6 = vcmp.ne.s32.totalorder %v670_v10, 0 }
  0x5e   : > { %v909_v54 = vrot.slane %v4671_v48, 7 }
  0x60   : > { %3235 = vmatpush3.bf16.msra.mxu1 %v3493_v11  ;;  %v910_v50 = vsel %vm4672_vm2, %v907_v39, %v909_v54  ;;  %v912_v20 = vsel %vm4673_vm4, %v909_v54, %v911_v42  ;;  %v3504_v42 = vld [vmem:[%s4594_s3 + $0xa8] sm:$0xff]   ;;  %v3506_v39 = vld [vmem:[%s4594_s3 + $0xb0] sm:$0xff]  }
  0x61   : > { %3236 = vmatprep.subr.bf16.mxu1 %v3496_v16  ;;  %2651 = vmatmul.mubr.msk.bf16.gmra.mrb[24].mxu0 %vm4286_vm10, %v4283_v27  ;;  %v3505_v11 = vld [vmem:[%s4594_s3 + $0x208] sm:$0xff]  }
  0x62   : > { %1449 = vmatprep.mubr.bf16.mxu0 %v4006_v44 }
  0x63   : > { %2719 = vmatmul.mubr.msk.bf16.gmra.mrb[20].mxu1 %vm3933_vm14, %v3951_v57  ;;  %v4308_v57 = vpack.c.bf16 %v912_v20, %v910_v50  ;;  %vm4311_vm14 = vmpackc.low %vm4661_vm15, %vm2951_vm6 }
  0x64   : > { %1747 = vmatprep.mubr.bf16.mxu1 %v3725_v29  ;;  %3237 = vmatpush3.bf16.msra.mxu1 %v3496_v16 }
  0x65   : > { %3238 = vmatprep.subr.bf16.mxu1 %v3499_v3 }
  0x68   : > { %3239 = vmatpush3.bf16.msra.mxu1 %v3499_v3 }
  0x69   : > { %3240 = vmatprep.subr.bf16.mxu1 %v3502_v1  ;;  %2655 = vmatmul.mubr.msk.bf16.gmra.mrb[28].mxu0 %vm4311_vm14, %v4308_v57 }
  0x6a   : > { %2118 = vmatprep.mubr.bf16.mxu0 %v3725_v29  ;;  %v3508_v29 = vld [vmem:[%s4594_s3 + $0xb8] sm:$0xff]  }
  0x6b   : > { %2723 = vmatmul.mubr.msk.bf16.gmra.mrb[24].mxu1 %vm4022_vm7, %v4011_v33 }
  0x6c   : > { %1755 = vmatprep.mubr.bf16.mxu1 %v3748_v40  ;;  %3241 = vmatpush3.bf16.msra.mxu1 %v3502_v1 }
  0x6d   : > { %3242 = vmatprep.subr.bf16.mxu1 %v3504_v42 }
  0x70   : > { %3243 = vmatpush3.bf16.msra.mxu1 %v3504_v42 }
  0x71   : > { %3244 = vmatprep.subr.bf16.mxu1 %v3506_v39  ;;  %2851 = vmatmul.mubr.msk.bf16.vlgmr.msra.gmra.mrb[32].mxu0 %vm4022_vm7, %v4011_v33  ;;  %v3509_v33 = vld [vmem:[%s4594_s3 + $0x218] sm:$0xff]  }
  0x72   : > { %3265 = vmatpush3.bf16.msra.mxu0 %v4214_v9  ;;  %2126 = vmatprep.mubr.bf16.mxu0 %v3748_v40  ;;  %v3510_v40 = vld [vmem:[%s4594_s3 + $0x220] sm:$0xff]  }
  0x73   : > { %2727 = vmatmul.mubr.msk.bf16.gmra.mrb[28].mxu1 %vm4098_vm13, %v4090_v31  ;;  %3266 = vmatprep.subr.bf16.mxu0 %v3505_v11 }
  0x74   : > { %1763 = vmatprep.mubr.bf16.mxu1 %v3818_v0  ;;  %3245 = vmatpush3.bf16.msra.mxu1 %v3506_v39 }
  0x75   : > { %3246 = vmatprep.subr.bf16.mxu1 %v3508_v29 }
  0x76   : > { %3267 = vmatpush3.bf16.msra.mxu0 %v3505_v11 }
  0x77   : > { %3268 = vmatprep.subr.bf16.mxu0 %v3507_v37 }
  0x78   : > { %3247 = vmatpush3.bf16.msra.mxu1 %v3508_v29 }
  0x79   : > { %2855 = vmatmul.mubr.msk.bf16.gmra.mrb[36].mxu0 %vm4098_vm13, %v4090_v31  ;;  %3296 = vmatprep.subr.bf16.mxu1 %v4214_v9  ;;  %v3512_v31 = vld [vmem:[%s4594_s3 + $0x230] sm:$0xff]  }
  0x7a   : > { %2134 = vmatprep.mubr.bf16.mxu0 %v3818_v0  ;;  %3269 = vmatpush3.bf16.msra.mxu0 %v3507_v37  ;;  %v535_v0 = vadd.s32 8, %v3661_v13 }
  0x7b   : > { %2731 = vmatmul.mubr.msk.bf16.gmra.mrb[32].mxu1 %vm4145_vm9, %v4137_v12  ;;  %3270 = vmatprep.subr.bf16.mxu0 %v3509_v33 }
  0x7c   : > { %1771 = vmatprep.mubr.bf16.mxu1 %v3835_v8  ;;  %v565_v34 = vand.u32 15, %v535_v0 }
  0x7e   : > { %3271 = vmatpush3.bf16.msra.mxu0 %v3509_v33  ;;  %vm2940_vm7 = vcmp.ne.s32.totalorder %v565_v34, 15 }
  0x7f   : > { %3272 = vmatprep.subr.bf16.mxu0 %v3510_v40  ;;  %vm2745_vm13 = vmpackc.low %vm2940_vm7, %vm4661_vm15 }
  0x81   : > { %2859 = vmatmul.mubr.msk.bf16.gmra.mrb[40].mxu0 %vm4145_vm9, %v4137_v12 }
  0x82   : > { %2142 = vmatprep.mubr.bf16.mxu0 %v3835_v8  ;;  %3273 = vmatpush3.bf16.msra.mxu0 %v3510_v40  ;;  %v552_v8 = vadd.s32 144, %v3661_v13 }
  0x83   : > { %2735 = vmatmul.mubr.msk.bf16.gmra.mrb[36].mxu1 %vm4200_vm12, %v4192_v58  ;;  %3274 = vmatprep.subr.bf16.mxu0 %v3511_v35 }
  0x84   : > { %1779 = vmatprep.mubr.bf16.mxu1 %v3894_v46 }
  0x86   : > { %3275 = vmatpush3.bf16.msra.mxu0 %v3511_v35 }
  0x87   : > { %3276 = vmatprep.subr.bf16.mxu0 %v3512_v31 }
  0x89   : > { %2863 = vmatmul.mubr.msk.bf16.gmra.mrb[44].mxu0 %vm4200_vm12, %v4192_v58 }
  0x8a   : > { %2150 = vmatprep.mubr.bf16.mxu0 %v3894_v46  ;;  %3277 = vmatpush3.bf16.msra.mxu0 %v3512_v31  ;;  %v684_v46 = vand.u32 15, %v552_v8 }
  0x8b   : > { %2739 = vmatmul.mubr.msk.bf16.gmra.mrb[40].mxu1 %vm4252_vm0, %v4247_v32  ;;  %3278 = vmatprep.subr.bf16.mxu0 %v3513_v22 }
  0x8c   : > { %1787 = vmatprep.mubr.bf16.mxu1 %v3904_v51  ;;  %vm2941_vm12 = vcmp.ne.s32.totalorder %v684_v46, 0 }
  0x8d   : > { %vm2877_vm9 = vmpackc.low %vm4661_vm15, %vm2941_vm12 }
  0x8e   : > { %3279 = vmatpush3.bf16.msra.mxu0 %v3513_v22 }
  0x91   : > { %2867 = vmatmul.mubr.msk.bf16.gmra.mrb[48].mxu0 %vm4252_vm0, %v4247_v32  ;;  %vm4677_vm0 = vnez %v4632_v5 }
  0x92   : > { %2158 = vmatprep.mubr.bf16.mxu0 %v3904_v51 }
  0x93   : > { %2743 = vmatmul.mubr.msk.bf16.gmra.mrb[44].mxu1 %vm4286_vm10, %v4283_v27 }
  0x94   : > { %3248 = vmatprep.mubr.msk.bf16.mxu1 %vm2745_vm13, %v2746_v60 }
  0x99   : > { %2871 = vmatmul.mubr.msk.bf16.gmra.mrb[52].mxu0 %vm4286_vm10, %v4283_v27 }
  0x9a   : > { %2166 = vmatprep.mubr.bf16.mxu0 %v4006_v44 }
  0x9b   : > { %3249 = vmatmul.mubr.msk.bf16.vlgmr.msra.gmra.mrb[0].mxu1 %vm3767_vm3, %v3779_v52  ;;  %vm4676_vm3 = vnez %v4626_v36  ;;  %v691_v52 = vand.u32 15, %v553_v49 }
  0x9c   : > { %3304 = vmatpush3.bf16.msra.mxu1 %v4214_v9  ;;  %3252 = vmatprep.mubr.msk.bf16.mxu1 %vm3803_vm5, %v3807_v61 }
  0x9d   : > { %3297 = vmatprep.subr.bf16.mxu1 %v3505_v11 }
  0xa0   : > { %3305 = vmatpush3.bf16.msra.mxu1 %v3505_v11 }
  0xa1   : > { %3298 = vmatprep.subr.bf16.mxu1 %v3507_v37  ;;  %2875 = vmatmul.mubr.msk.bf16.gmra.mrb[56].mxu0 %vm4311_vm14, %v4308_v57 }
  0xa2   : > { %2174 = vmatprep.mubr.bf16.mxu0 %v4155_v6 }
  0xa3   : > { %3253 = vmatmul.mubr.msk.bf16.gmra.mrb[4].mxu1 %vm3856_vm8, %v3866_v26 }
  0xa4   : > { %3306 = vmatpush3.bf16.msra.mxu1 %v3507_v37  ;;  %3256 = vmatprep.mubr.msk.bf16.mxu1 %vm4676_vm3, %v3886_v43 }
  0xa5   : > { %3299 = vmatprep.subr.bf16.mxu1 %v3509_v33 }
  0xa8   : > { %3307 = vmatpush3.bf16.msra.mxu1 %v3509_v33 }
  0xa9   : > { %3300 = vmatprep.subr.bf16.mxu1 %v3510_v40  ;;  %2879 = vmatmul.mubr.msk.bf16.gmra.mrb[60].mxu0 %vm2877_vm9, %v2878_v38 }
  0xaa   : > { %3280 = vmatprep.mubr.msk.bf16.mxu0 %vm3803_vm5, %v3807_v61  ;;  %vm4680_vm5 = vnez %v4652_v18 }
  0xab   : > { %3257 = vmatmul.mubr.msk.bf16.gmra.mrb[8].mxu1 %vm4677_vm0, %v3974_v19 }
  0xac   : > { %3308 = vmatpush3.bf16.msra.mxu1 %v3510_v40  ;;  %3260 = vmatprep.mubr.msk.bf16.mxu1 %vm4678_vm11, %v4000_v63 }
  0xad   : > { %3301 = vmatprep.subr.bf16.mxu1 %v3511_v35 }
  0xb0   : > { %3309 = vmatpush3.bf16.msra.mxu1 %v3511_v35 }
  0xb1   : > { %3302 = vmatprep.subr.bf16.mxu1 %v3512_v31  ;;  %3281 = vmatmul.mubr.msk.bf16.vlgmr.msra.gmra.mrb[64].mxu0 %vm3856_vm8, %v3866_v26  ;;  %vm2942_vm8 = vcmp.ne.s32.totalorder %v691_v52, 15 }
  0xb2   : > { %3284 = vmatprep.mubr.msk.bf16.mxu0 %vm4676_vm3, %v3886_v43  ;;  %vm2909_vm10 = vmpackc.low %vm2942_vm8, %vm4661_vm15 }
  0xb3   : > { %3261 = vmatmul.mubr.msk.bf16.gmra.mrb[12].mxu1 %vm4679_vm1, %v4079_v23 }
  0xb4   : > { %3310 = vmatpush3.bf16.msra.mxu1 %v3512_v31  ;;  %3288 = vmatprep.mubr.msk.bf16.mxu1 %vm4678_vm11, %v4000_v63 }
  0xb5   : > { %3303 = vmatprep.subr.bf16.mxu1 %v3513_v22 }
  0xb8   : > { %3311 = vmatpush3.bf16.msra.mxu1 %v3513_v22 }
  0xb9   : > { %3285 = vmatmul.mubr.msk.bf16.gmra.mrb[68].mxu0 %vm4677_vm0, %v3974_v19 }
  0xbb   : > { %3289 = vmatmul.mubr.msk.bf16.vlgmr.msra.gmra.mrb[8].mxu1 %vm4679_vm1, %v4079_v23 }
  0xbc   : > { %3292 = vmatprep.mubr.msk.bf16.mxu1 %vm4680_vm5, %v4209_v55 }
  0xc3   : > { %3293 = vmatmul.mubr.msk.bf16.gmra.mrb[12].mxu1 %vm2909_vm10, %v2910_v25 }
 0x103   : > { %v2976_v13 = vpop.f32.mrb[0].mxu0 }
 0x104   : > { %v2977_v59 = vpop.f32.mrb[1].mxu0 }
 0x105   : > { %v2978_v61 = vadd.f32 %v2977_v59, %v2976_v13  ;;  %v2979_v24 = vpop.f32.mrb[2].mxu0 }
 0x106   : > { %v2980_v26 = vpop.f32.mrb[3].mxu0 }
 0x107   : > { %v2981_v36 = vadd.f32 %v2980_v26, %v2979_v24 }
 0x10b   : > { %v2982_v43 = vpop.f32.mrb[4].mxu0 }
 0x10c   : > { %v2983_v51 = vpop.f32.mrb[5].mxu0 }
 0x10d   : > { %v2984_v5 = vadd.f32 %v2983_v51, %v2982_v43  ;;  %v2985_v17 = vpop.f32.mrb[6].mxu0 }
 0x10e   : > { %v2986_v19 = vpop.f32.mrb[7].mxu0 }
 0x10f   : > { %v2987_v41 = vadd.f32 %v2986_v19, %v2985_v17 }
 0x114   : > { %v2988_v63 = vpop.f32.mrb[8].mxu0 }
 0x115   : > { %v2989_v44 = vpop.f32.mrb[9].mxu0 }
 0x116   : > { %v2990_v58 = vadd.f32 %v2989_v44, %v2988_v63  ;;  %v2991_v56 = vpop.f32.mrb[10].mxu0 }
 0x117   : > { %v2992_v23 = vpop.f32.mrb[11].mxu0 }
 0x118   : > { %v2993_v12 = vadd.f32 %v2992_v23, %v2991_v56 }
 0x11c   : > { %v2994_v6 = vpop.f32.mrb[12].mxu0 }
 0x11d   : > { %v2995_v18 = vpop.f32.mrb[13].mxu0 }
 0x11e   : > { %v4460_v55 = vadd.f32 %v2995_v18, %v2994_v6  ;;  %v2997_v9 = vpop.f32.mrb[14].mxu0 }
 0x11f   : > { %v2998_v2 = vpop.f32.mrb[15].mxu0 }
 0x120   : > { %v2999_v14 = vadd.f32 %v2998_v2, %v2997_v9 }
 0x124   : > { %v3000_v60 = vpop.f32.mrb[16].mxu0 }
 0x125   : > { %v3001_v21 = vpop.f32.mrb[17].mxu0 }
 0x126   : > { %v4462_v62 = vadd.f32 %v3001_v21, %v3000_v60  ;;  %v3003_v32 = vpop.f32.mrb[18].mxu0 }
 0x127   : > { %v3004_v38 = vpop.f32.mrb[19].mxu0 }
 0x128   : > { %v4464_v15 = vadd.f32 %v3004_v38, %v3003_v32 }
 0x12c   : > { %v3006_v47 = vpop.f32.mrb[20].mxu0 }
 0x12d   : > { %v3007_v7 = vpop.f32.mrb[21].mxu0 }
 0x12e   : > { %v3056_v53 = vpop.f32.mrb[16].mxu1  ;;  %v4466_v4 = vadd.f32 %v3007_v7, %v3006_v47  ;;  %v3009_v27 = vpop.f32.mrb[22].mxu0 }
 0x12f   : > { %v3057_v25 = vpop.f32.mrb[17].mxu1  ;;  %v3010_v48 = vpop.f32.mrb[23].mxu0 }
 0x130   : > { %v3058_v30 = vadd.f32 %v3057_v25, %v3056_v53  ;;  %v3059_v16 = vpop.f32.mrb[18].mxu1  ;;  %v4468_v10 = vadd.f32 %v3010_v48, %v3009_v27 }
 0x131   : > { %v3060_v28 = vpop.f32.mrb[19].mxu1 }
 0x132   : > { %v3061_v54 = vadd.f32 %v3060_v28, %v3059_v16  ;;  %v4470_v3 = vadd.f32 %v3058_v30, %v2978_v61 }
 0x134   : > { %v4472_v50 = vadd.f32 %v3061_v54, %v2981_v36  ;;  %v3012_v1 = vpop.f32.mrb[24].mxu0 }
 0x135   : > { %v3013_v45 = vpop.f32.mrb[25].mxu0 }
 0x136   : > { %v3062_v20 = vpop.f32.mrb[20].mxu1  ;;  %v4474_v11 = vadd.f32 %v3013_v45, %v3012_v1  ;;  %v3015_v29 = vpop.f32.mrb[26].mxu0 }
 0x137   : > { %v3063_v57 = vpop.f32.mrb[21].mxu1  ;;  %v3016_v33 = vpop.f32.mrb[27].mxu0 }
 0x138   : > { %v3064_v42 = vadd.f32 %v3063_v57, %v3062_v20  ;;  %v3065_v39 = vpop.f32.mrb[22].mxu1  ;;  %v4476_v35 = vadd.f32 %v3016_v33, %v3015_v29 }
 0x139   : > { %v3066_v37 = vpop.f32.mrb[23].mxu1 }
 0x13a   : > { %v3067_v40 = vadd.f32 %v3066_v37, %v3065_v39  ;;  %v4478_v0 = vadd.f32 %v3064_v42, %v2984_v5 }
 0x13c   : > { %v4480_v31 = vadd.f32 %v3067_v40, %v2987_v41  ;;  %v3018_v22 = vpop.f32.mrb[28].mxu0 }
 0x13d   : > { %v3019_v46 = vpop.f32.mrb[29].mxu0 }
 0x13e   : > { %v3068_v34 = vpop.f32.mrb[24].mxu1  ;;  %v4482_v13 = vadd.f32 %v3019_v46, %v3018_v22  ;;  %v3021_v59 = vpop.f32.mrb[30].mxu0 }
 0x13f   : > { %v3069_v8 = vpop.f32.mrb[25].mxu1  ;;  %v3022_v24 = vpop.f32.mrb[31].mxu0 }
 0x140   : > { %v3070_v49 = vadd.f32 %v3069_v8, %v3068_v34  ;;  %v3071_v52 = vpop.f32.mrb[26].mxu1  ;;  %v4484_v36 = vadd.f32 %v3022_v24, %v3021_v59 }
 0x141   : > { %v3072_v61 = vpop.f32.mrb[27].mxu1 }
 0x142   : > { %v3073_v26 = vadd.f32 %v3072_v61, %v3071_v52  ;;  %v4486_v43 = vadd.f32 %v3070_v49, %v2990_v58 }
 0x144   : > { %v4488_v51 = vadd.f32 %v3073_v26, %v2993_v12  ;;  %v3136_v17 = vpop.f32.mrb[32].mxu0 }
 0x145   : > { %v3137_v41 = vpop.f32.mrb[33].mxu0 }
 0x146   : > { %v3074_v5 = vpop.f32.mrb[28].mxu1  ;;  %v4490_v56 = vadd.f32 %v3137_v41, %v3136_v17  ;;  %v3139_v23 = vpop.f32.mrb[34].mxu0 }
 0x147   : > { %v3075_v19 = vpop.f32.mrb[29].mxu1  ;;  %v3140_v18 = vpop.f32.mrb[35].mxu0 }
 0x148   : > { %v3076_v63 = vadd.f32 %v3075_v19, %v3074_v5  ;;  %v3077_v44 = vpop.f32.mrb[30].mxu1  ;;  %v4492_v2 = vadd.f32 %v3140_v18, %v3139_v23 }
 0x149   : > { %v3078_v6 = vpop.f32.mrb[31].mxu1 }
 0x14a   : > { %v3079_v9 = vadd.f32 %v3078_v6, %v3077_v44  ;;  %v4495_v60 = vadd.f32 %v3076_v63, %v4460_v55 }
 0x14c   : > { %v4497_v58 = vadd.f32 %v3079_v9, %v2999_v14  ;;  %v3142_v21 = vpop.f32.mrb[36].mxu0 }
 0x14d   : > { %v3143_v38 = vpop.f32.mrb[37].mxu0 }
 0x14e   : > { %v3080_v12 = vpop.f32.mrb[32].mxu1  ;;  %v4499_v25 = vadd.f32 %v3143_v38, %v3142_v21  ;;  %v3145_v7 = vpop.f32.mrb[38].mxu0 }
 0x14f   : > { %v3081_v32 = vpop.f32.mrb[33].mxu1  ;;  %v3146_v16 = vpop.f32.mrb[39].mxu0 }
 0x150   : > { %v3082_v53 = vadd.f32 %v3081_v32, %v3080_v12  ;;  %v3083_v47 = vpop.f32.mrb[34].mxu1  ;;  %v4502_v48 = vadd.f32 %v3146_v16, %v3145_v7 }
 0x151   : > { %v3084_v30 = vpop.f32.mrb[35].mxu1 }
 0x152   : > { %v3347_v27 = vadd.f32 %v3082_v53, %v4462_v62  ;;  %v3085_v28 = vadd.f32 %v3084_v30, %v3083_v47 }
 0x154   : > { %v3353_v55 = vadd.f32 %v3085_v28, %v4464_v15  ;;  %v3148_v54 = vpop.f32.mrb[40].mxu0 }
 0x155   : > { %v3149_v1 = vpop.f32.mrb[41].mxu0 }
 0x156   : > { %v3086_v14 = vpop.f32.mrb[36].mxu1  ;;  %v4505_v42 = vadd.f32 %v3149_v1, %v3148_v54  ;;  %v3151_v39 = vpop.f32.mrb[42].mxu0 }
 0x157   : > { %v3087_v20 = vpop.f32.mrb[37].mxu1  ;;  %v3152_v37 = vpop.f32.mrb[43].mxu0 }
 0x158   : > { %v3088_v57 = vadd.f32 %v3087_v20, %v3086_v14  ;;  %v3089_v45 = vpop.f32.mrb[38].mxu1  ;;  %v4508_v62 = vadd.f32 %v3152_v37, %v3151_v39 }
 0x159   : > { %v3090_v29 = vpop.f32.mrb[39].mxu1 }
 0x15a   : > { %v3344_v33 = vadd.f32 %v3088_v57, %v4466_v4  ;;  %v3091_v40 = vadd.f32 %v3090_v29, %v3089_v45 }
 0x15c   : > { %v3350_v34 = vadd.f32 %v3091_v40, %v4468_v10  ;;  %v3154_v15 = vpop.f32.mrb[44].mxu0 }
 0x15d   : > { %v3155_v46 = vpop.f32.mrb[45].mxu0 }
 0x15e   : > { %v3092_v22 = vpop.f32.mrb[40].mxu1  ;;  %v3156_v59 = vadd.f32 %v3155_v46, %v3154_v15  ;;  %v3157_v61 = vpop.f32.mrb[46].mxu0 }
 0x15f   : > { %v3093_v8 = vpop.f32.mrb[41].mxu1  ;;  %v3158_v26 = vpop.f32.mrb[47].mxu0 }
 0x160   : > { %v3094_v49 = vadd.f32 %v3093_v8, %v3092_v22  ;;  %v3095_v52 = vpop.f32.mrb[42].mxu1  ;;  %v3159_v19 = vadd.f32 %v3158_v26, %v3157_v61 }
 0x161   : > { %v3096_v24 = vpop.f32.mrb[43].mxu1 }
 0x162   : > { %v3359_v5 = vadd.f32 %v3094_v49, %v4474_v11  ;;  %v3097_v17 = vadd.f32 %v3096_v24, %v3095_v52 }
 0x164   : > { %v3365_v4 = vadd.f32 %v3097_v17, %v4476_v35  ;;  %v3160_v63 = vpop.f32.mrb[48].mxu0 }
 0x165   : > { %v3161_v10 = vpop.f32.mrb[49].mxu0 }
 0x166   : > { %v3098_v41 = vpop.f32.mrb[44].mxu1  ;;  %v3162_v18 = vadd.f32 %v3161_v10, %v3160_v63  ;;  %v3163_v9 = vpop.f32.mrb[50].mxu0 }
 0x167   : > { %v3099_v44 = vpop.f32.mrb[45].mxu1  ;;  %v3164_v21 = vpop.f32.mrb[51].mxu0 }
 0x168   : > { %v3100_v23 = vadd.f32 %v3099_v44, %v3098_v41  ;;  %v3101_v6 = vpop.f32.mrb[46].mxu1  ;;  %v3165_v53 = vadd.f32 %v3164_v21, %v3163_v9  ;;  %v4514_v47 = vadd.f32 %v3347_v27, %v3162_v18 }
 0x169   : > { %v3102_v12 = vpop.f32.mrb[47].mxu1 }
 0x16a   : > { %v3356_v32 = vadd.f32 %v3100_v23, %v4482_v13  ;;  %v3103_v38 = vadd.f32 %v3102_v12, %v3101_v6  ;;  %v4517_v7 = vadd.f32 %v3353_v55, %v3165_v53 }
 0x16c   : > { %v3362_v11 = vadd.f32 %v3103_v38, %v4484_v36  ;;  %v3166_v30 = vpop.f32.mrb[52].mxu0 }
 0x16d   : > { %v3167_v14 = vpop.f32.mrb[53].mxu0 }
 0x16e   : > { %v3250_v35 = vpop.f32.mrb[0].mxu1  ;;  %v3168_v1 = vadd.f32 %v3167_v14, %v3166_v30  ;;  %v3169_v57 = vpop.f32.mrb[54].mxu0 }
 0x16f   : > { %v3313_v16 = vadd.f32 %v4478_v0, %v3250_v35  ;;  %v1830_v28 = vpop.f32.mrb[1].mxu1  ;;  %v3170_v27 = vpop.f32.mrb[55].mxu0 }
 0x170   : > { %v3317_v54 = vadd.f32 %v4470_v3, %v1830_v28  ;;  %v3251_v20 = vpop.f32.mrb[2].mxu1  ;;  %v3171_v55 = vadd.f32 %v3170_v27, %v3169_v57  ;;  %v3345_v29 = vadd.f32 %v3344_v33, %v3168_v1 }
 0x171   : > { %v3321_v13 = vadd.f32 %v4480_v31, %v3251_v20  ;;  %v1833_v45 = vpop.f32.mrb[3].mxu1  ;;  %v3314_v39 = vadd.f32 %v3313_v16, %v4499_v25 }
 0x172   : > { %v3325_v36 = vadd.f32 %v4472_v50, %v1833_v45  ;;  %v3318_v37 = vadd.f32 %v3317_v54, %v4490_v56  ;;  %v3351_v40 = vadd.f32 %v3350_v34, %v3171_v55 }
 0x173   : > { %v3322_v0 = vadd.f32 %v3321_v13, %v4502_v48 }
 0x174   : > { %v3326_v3 = vadd.f32 %v3325_v36, %v4492_v2  ;;  %v3172_v15 = vpop.f32.mrb[56].mxu0 }
 0x175   : > { %v3173_v46 = vpop.f32.mrb[57].mxu0 }
 0x176   : > { %v3254_v22 = vpop.f32.mrb[4].mxu1  ;;  %v3174_v52 = vadd.f32 %v3173_v46, %v3172_v15  ;;  %v3175_v50 = vpop.f32.mrb[58].mxu0 }
 0x177   : > { %v3329_v8 = vadd.f32 %v4495_v60, %v3254_v22  ;;  %v1846_v31 = vpop.f32.mrb[5].mxu1  ;;  %v3176_v56 = vpop.f32.mrb[59].mxu0 }
 0x178   : > { %v3333_v49 = vadd.f32 %v4486_v43, %v1846_v31  ;;  %v3255_v25 = vpop.f32.mrb[6].mxu1  ;;  %v3177_v34 = vadd.f32 %v3176_v56, %v3175_v50  ;;  %v4532_v26 = vadd.f32 %v3359_v5, %v3174_v52 }
 0x179   : > { %v3337_v33 = vadd.f32 %v4497_v58, %v3255_v25  ;;  %v1849_v61 = vpop.f32.mrb[7].mxu1  ;;  %v3330_v24 = vadd.f32 %v3329_v8, %v3156_v59 }
 0x17a   : > { %v3341_v48 = vadd.f32 %v4488_v51, %v1849_v61  ;;  %v3334_v2 = vadd.f32 %v3333_v49, %v4505_v42  ;;  %v4535_v41 = vadd.f32 %v3365_v4, %v3177_v34  ;;  %v4542_v42 = vld [vmem:[%s4595_s4] ss:$0 sm:$0xff] }
 0x17b   : > { %v3338_v60 = vadd.f32 %v3337_v33, %v3159_v19 }
 0x17c   : > { %v3342_v17 = vadd.f32 %v3341_v48, %v4508_v62  ;;  %v3178_v43 = vpop.f32.mrb[60].mxu0 }
 0x17d   : > { %v3179_v63 = vpop.f32.mrb[61].mxu0 }
 0x17e   : > { %v3180_v44 = vadd.f32 %v3179_v63, %v3178_v43  ;;  %v3181_v10 = vpop.f32.mrb[62].mxu0 }
 0x17f   : > { %v3182_v58 = vpop.f32.mrb[63].mxu0 }
 0x180   : > { %v3183_v23 = vadd.f32 %v3182_v58, %v3181_v10  ;;  %v3357_v6 = vadd.f32 %v3356_v32, %v3180_v44 }
 0x182   : > { %v4537_v59 = vadd.f32 %v3362_v11, %v3183_v23 }
 0x184   : > { %v3282_v51 = vpop.f32.mrb[64].mxu0 }
 0x185   : > { %v3315_v5 = vadd.f32 %v3314_v39, %v3282_v51  ;;  %v2217_v19 = vpop.f32.mrb[65].mxu0 }
 0x186   : > { %v3319_v62 = vadd.f32 %v3318_v37, %v2217_v19  ;;  %v3283_v4 = vpop.f32.mrb[66].mxu0 }
 0x187   : > { %v2305_v18 = vadd.f32 %v3315_v5, %v4542_v42  ;;  %v3323_v9 = vadd.f32 %v3322_v0, %v3283_v4  ;;  %v2220_v12 = vpop.f32.mrb[67].mxu0 }
 0x188   : > { %v2303_v21 = vadd.f32 %v3319_v62, %v4542_v42  ;;  %v3327_v38 = vadd.f32 %v3326_v3, %v2220_v12 }
 0x189   : > { %v2321_v32 = vmax.f32 %v2305_v18, 0.0  ;;  %v2306_v53 = vadd.f32 %v3323_v9, %v4542_v42 }
 0x18a   : > { %v2319_v11 = vmax.f32 %v2303_v21, 0.0  ;;  %v2304_v35 = vadd.f32 %v3327_v38, %v4542_v42 }
 0x18b   : > { %v2322_v30 = vmax.f32 %v2306_v53, 0.0 }
 0x18c   : > { %v2335_v28 = vmax.f32 %v2319_v11, %v2321_v32  ;;  %v2320_v14 = vmax.f32 %v2304_v35, 0.0  ;;  %v3286_v54 = vpop.f32.mrb[68].mxu0 }
 0x18d   : > { %v3331_v57 = vadd.f32 %v3330_v24, %v3286_v54  ;;  %v2233_v13 = vpop.f32.mrb[69].mxu0 }
 0x18e   : > { %v3290_v16 = vpop.f32.mrb[8].mxu1  ;;  %2343 = vst [vmem:[#allocation2] sm:$0xff] %v2335_v28  ;;  %v2336_v39 = vmax.f32 %v2320_v14, %v2322_v30  ;;  %v3335_v36 = vadd.f32 %v3334_v2, %v2233_v13  ;;  %v3287_v55 = vpop.f32.mrb[70].mxu0 }
 0x18f   : > { %v3346_v20 = vadd.f32 %v3345_v29, %v3290_v16  ;;  %v2249_v1 = vpop.f32.mrb[9].mxu1  ;;  %v2309_v22 = vadd.f32 %v3331_v57, %v4542_v42  ;;  %v3339_v15 = vadd.f32 %v3338_v60, %v3287_v55  ;;  %v2236_v8 = vpop.f32.mrb[71].mxu0 }
 0x190   : > { %v3349_v45 = vadd.f32 %v4514_v47, %v2249_v1  ;;  %v3291_v27 = vpop.f32.mrb[10].mxu1  ;;  %2344 = vst [vmem:[#allocation2 + $0x8] sm:$0xff] %v2336_v39  ;;  %v2307_v47 = vadd.f32 %v3335_v36, %v4542_v42  ;;  %v3343_v46 = vadd.f32 %v3342_v17, %v2236_v8 }
 0x191   : > { %v2313_v37 = vadd.f32 %v3346_v20, %v4542_v42  ;;  %v3352_v0 = vadd.f32 %v3351_v40, %v3291_v27  ;;  %v2252_v3 = vpop.f32.mrb[11].mxu1  ;;  %v2325_v52 = vmax.f32 %v2309_v22, 0.0  ;;  %v2310_v50 = vadd.f32 %v3339_v15, %v4542_v42 }
 0x192   : > { %v2311_v29 = vadd.f32 %v3349_v45, %v4542_v42  ;;  %v3355_v31 = vadd.f32 %v4517_v7, %v2252_v3  ;;  %v2323_v61 = vmax.f32 %v2307_v47, 0.0  ;;  %v2308_v56 = vadd.f32 %v3343_v46, %v4542_v42 }
 0x193   : > { %v2329_v49 = vmax.f32 %v2313_v37, 0.0  ;;  %v2314_v25 = vadd.f32 %v3352_v0, %v4542_v42  ;;  %v2326_v48 = vmax.f32 %v2310_v50, 0.0 }
 0x194   : > { %v2327_v40 = vmax.f32 %v2311_v29, 0.0  ;;  %v2312_v33 = vadd.f32 %v3355_v31, %v4542_v42  ;;  %v2337_v60 = vmax.f32 %v2323_v61, %v2325_v52  ;;  %v2324_v17 = vmax.f32 %v2308_v56, 0.0 }
 0x195   : > { %v2330_v24 = vmax.f32 %v2314_v25, 0.0 }
 0x196   : > { %v2339_v34 = vmax.f32 %v2327_v40, %v2329_v49  ;;  %v2328_v7 = vmax.f32 %v2312_v33, 0.0  ;;  %v3294_v2 = vpop.f32.mrb[12].mxu1  ;;  %2345 = vst [vmem:[#allocation2 + $0x10] sm:$0xff] %v2337_v60  ;;  %v2338_v23 = vmax.f32 %v2324_v17, %v2326_v48 }
 0x197   : > { %v3358_v43 = vadd.f32 %v3357_v6, %v3294_v2  ;;  %v2265_v63 = vpop.f32.mrb[13].mxu1  ;;  %v2351_v38 = vld [vmem:[#allocation2] ss:$2 sm:$0xff]  ;;  %v2359_v32 = vld [vmem:[#allocation2 + $0x1] ss:$2 sm:$0xff] }
 0x198   : > { %2347 = vst [vmem:[#allocation2 + $0x20] sm:$0xff] %v2339_v34  ;;  %v2340_v44 = vmax.f32 %v2328_v7, %v2330_v24  ;;  %v3361_v10 = vadd.f32 %v4532_v26, %v2265_v63  ;;  %v3295_v58 = vpop.f32.mrb[14].mxu1  ;;  %2346 = vst [vmem:[#allocation2 + $0x18] sm:$0xff] %v2338_v23 }
 0x199   : > { %v2317_v51 = vadd.f32 %v3358_v43, %v4542_v42  ;;  %v3364_v5 = vadd.f32 %v4537_v59, %v3295_v58  ;;  %v2268_v19 = vpop.f32.mrb[15].mxu1 }
 0x19a   : > { %2348 = vst [vmem:[#allocation2 + $0x28] sm:$0xff] %v2340_v44  ;;  %v2315_v62 = vadd.f32 %v3361_v10, %v4542_v42  ;;  %v3367_v6 = vadd.f32 %v4535_v41, %v2268_v19  ;;  %v2366_v41 = vmax.f32 %v2351_v38, %v2359_v32 }
 0x19b   : > { %v2333_v4 = vmax.f32 %v2317_v51, 0.0  ;;  %v2318_v18 = vadd.f32 %v3364_v5, %v4542_v42 }
 0x19c   : > { %v2331_v26 = vmax.f32 %v2315_v62, 0.0  ;;  %v2316_v9 = vadd.f32 %v3367_v6, %v4542_v42 }
 0x19d   : > { %v2334_v12 = vmax.f32 %v2318_v18, 0.0 }
 0x19e   : > { %v2341_v21 = vmax.f32 %v2331_v26, %v2333_v4  ;;  %v2332_v59 = vmax.f32 %v2316_v9, 0.0 }
 0x19f   : > { %v2353_v11 = vld [vmem:[#allocation2 + $0x10] ss:$2 sm:$0xff]  ;;  %v2361_v35 = vld [vmem:[#allocation2 + $0x11] ss:$2 sm:$0xff] }
 0x1a0   : > { %2349 = vst [vmem:[#allocation2 + $0x30] sm:$0xff] %v2341_v21  ;;  %v2342_v53 = vmax.f32 %v2332_v59, %v2334_v12  ;;  %v2367_v30 = vmax.f32 %v2353_v11, %v2361_v35 }
 0x1a1   : > { %v2355_v42 = vld [vmem:[#allocation2 + $0x20] ss:$2 sm:$0xff]  ;;  %v2363_v28 = vld [vmem:[#allocation2 + $0x21] ss:$2 sm:$0xff] }
 0x1a2   : > { %2350 = vst [vmem:[#allocation2 + $0x38] sm:$0xff] %v2342_v53  ;;  %v2932_v16 = vpack.c.bf16 %v2367_v30, %v2366_v41  ;;  %v2368_v20 = vmax.f32 %v2355_v42, %v2363_v28 }
 0x1a4   : > { %2933 = vst [vmem:[%s390_s19] sm:$0xff] %v2932_v16  }
 0x1a9   : > { %v2357_v14 = vld [vmem:[#allocation2 + $0x30] ss:$2 sm:$0xff]  ;;  %v2365_v54 = vld [vmem:[#allocation2 + $0x31] ss:$2 sm:$0xff] }
 0x1aa   : > { %v2369_v1 = vmax.f32 %v2357_v14, %v2365_v54 }
 0x1ac   : > { %v2937_v57 = vpack.c.bf16 %v2369_v1, %v2368_v20 }
 0x1ae   : > { %2943 = vst [vmem:[%s390_s19 + $0x8] sm:$0xff] %v2937_v57  }
 0x1af PF: > { %s15_s22 = sadd.s32 1, %s3552_s22   ;;  %s4682_s18 = smov %s3544_s20 }
 0x1b0   : > { %p12_p2 = scmp.ge.s32.totalorder %s15_s22, 6   ;;  %s4683_s19 = smov %s3548_s21 }
 0x1b1   : > { %s4684_s20 = smov %s4687_s23  ;;  %s4685_s21 = smov %s4691_s24 }
 0x1b2   :  { %14 = sbr.rel (!%p12_p2) target bundleno = 3 (0x3), region = 85 }

</bundles_post_ra>
